<compile_context>
chip_gen: v6e
topology: v6e:2x2x1
jax: 0.10.0
libtpu: 0.0.40
codegen_flags: <defaults>
</compile_context>

<pallas_src>
import jax
import jax.numpy as jnp
from jax.experimental import pallas as pl
from jax.experimental.pallas import tpu as pltpu


# ----------------------------- Pallas conv kernel ---------------------------

def _make_conv_kernel(relu, has_res, has_rmask):
    """Single-shot conv-as-matmul kernel (K fully collapsed, no accumulator).

    refs (in order):
      patches (tm, K_pad)  bf16
      weight  (K_pad, tn)  bf16   (BN scale folded into columns)
      bias    (1, tn)      f32
      [rmask  (1, tn)      f32]   per-column ReLU selector (merged conv+shortcut)
      [res    (tm, tn)     bf16]  residual, added before ReLU
      out     (tm, tn)     bf16
    """

    def kernel(*refs):
        idx = 0
        p_ref = refs[idx]; idx += 1
        w_ref = refs[idx]; idx += 1
        b_ref = refs[idx]; idx += 1
        rmask_ref = None
        if has_rmask:
            rmask_ref = refs[idx]; idx += 1
        res_ref = None
        if has_res:
            res_ref = refs[idx]; idx += 1
        o_ref = refs[idx]

        y = jnp.dot(p_ref[...], w_ref[...], preferred_element_type=jnp.float32)
        y = y + b_ref[...]
        if has_res:
            y = y + res_ref[...].astype(jnp.float32)
        if relu:
            y = jnp.maximum(y, 0.0)
        elif has_rmask:
            y = jnp.where(rmask_ref[...] != 0.0, jnp.maximum(y, 0.0), y)
        o_ref[...] = y.astype(o_ref.dtype)

    return kernel


# ------------------------------ helpers / glue -------------------------------

CPAD = 128   # lane-dense channel padding for all activations


def _round_up(x, m):
    return ((x + m - 1) // m) * m


def _pick_tile(dim, candidates):
    for c in candidates:
        if dim % c == 0:
            return c
    return dim


def matmul_conv(patches, weight, bias, *, rmask=None, residual=None,
                relu=False, out_dtype=jnp.bfloat16):
    """patches (B, M_pad, K_pad) bf16, weight (B, K_pad, C_pad) bf16,
    bias (B, 1, C_pad) f32 -> out (B, M_pad, C_pad) bf16 via Pallas matmul."""
    B, M_pad, K_pad = patches.shape
    C_pad = weight.shape[2]

    tm = _pick_tile(M_pad, (256, 128, 64, 32, 16, 8))
    tn = _pick_tile(C_pad, (256, 128))

    has_rmask = rmask is not None
    has_res = residual is not None

    inputs = [patches, weight, bias]
    in_specs = [
        pl.BlockSpec((None, tm, K_pad), lambda b, i, j: (b, i, 0)),
        pl.BlockSpec((None, K_pad, tn), lambda b, i, j: (b, 0, j)),
        pl.BlockSpec((None, 1, tn), lambda b, i, j: (b, 0, j)),
    ]
    if has_rmask:
        inputs.append(rmask)
        in_specs.append(pl.BlockSpec((1, tn), lambda b, i, j: (0, j)))
    if has_res:
        inputs.append(residual)
        in_specs.append(pl.BlockSpec((None, tm, tn), lambda b, i, j: (b, i, j)))

    out_spec = pl.BlockSpec((None, tm, tn), lambda b, i, j: (b, i, j))

    # VMEM limit from actual tile footprint (double-buffered, 2x margin).
    tile_bytes = (tm * K_pad * 2 + K_pad * tn * 2 + 2 * tn * 4
                  + (1 + int(has_res)) * tm * tn * 2)
    vmem_limit = int(min(48 * 1024 * 1024, max(16 * 1024 * 1024, 4 * tile_bytes)))

    bytes_accessed = B * (M_pad * K_pad * 2 + K_pad * C_pad * 2 + C_pad * 4
                          + (1 + int(has_res)) * M_pad * C_pad * 2)

    return pl.pallas_call(
        _make_conv_kernel(relu, has_res, has_rmask),
        out_shape=jax.ShapeDtypeStruct((B, M_pad, C_pad), out_dtype),
        grid=(B, M_pad // tm, C_pad // tn),
        in_specs=in_specs,
        out_specs=out_spec,
        compiler_params=pltpu.CompilerParams(
            dimension_semantics=("parallel", "parallel", "parallel"),
            vmem_limit_bytes=vmem_limit),
        cost_estimate=pl.CostEstimate(
            flops=2 * B * M_pad * K_pad * C_pad,
            transcendentals=0,
            bytes_accessed=int(bytes_accessed)),
    )(*inputs)


def _extract_patches(x, ksize, stride, pad):
    """x: [Bt, H, W, C] -> patches [Bt, Ho*Wo, ksize*ksize*C] (kh, kw, c order)."""
    Bt, H, W, C = x.shape
    if pad:
        x = jnp.pad(x, ((0, 0), (pad, pad), (pad, pad), (0, 0)))
    Ho = (H + 2 * pad - ksize) // stride + 1
    Wo = (W + 2 * pad - ksize) // stride + 1
    cols = []
    for kh in range(ksize):
        for kw in range(ksize):
            cols.append(x[:, kh:kh + (Ho - 1) * stride + 1:stride,
                             kw:kw + (Wo - 1) * stride + 1:stride, :])
    patches = jnp.concatenate(cols, axis=-1)
    return patches.reshape(Bt, Ho * Wo, ksize * ksize * C), (Ho, Wo)


def conv_apply(x, w_stk, b_stk, *, ksize, stride, pad, relu,
               rmask=None, residual=None):
    """x: (2, N, H, W, C) bf16 -> out (2, M_pad, C_pad) bf16 (+ geometry)."""
    Bb, N, H, W, C = x.shape
    patches, (Ho, Wo) = _extract_patches(x.reshape(Bb * N, H, W, C),
                                         ksize, stride, pad)
    K = patches.shape[-1]
    M = N * Ho * Wo
    patches = patches.reshape(Bb, M, K)
    M_pad = _round_up(M, 8)
    K_pad = w_stk.shape[1]
    patches = jnp.pad(patches, ((0, 0), (0, M_pad - M), (0, K_pad - K)))
    if residual is not None:
        assert residual.shape == (Bb, M_pad, w_stk.shape[2])
    out = matmul_conv(patches, w_stk, b_stk, rmask=rmask,
                      residual=residual, relu=relu)
    return out, (N, Ho, Wo, M)


def maxpool_3x3_s2(x):
    # TODO(synk): fuse into the stem conv epilogue / consumer patch builder.
    return jax.lax.reduce_window(
        x, jnp.array(-jnp.inf, dtype=x.dtype), jax.lax.max,
        window_dimensions=(1, 3, 3, 1),
        window_strides=(1, 2, 2, 1),
        padding=((0, 0), (1, 1), (1, 1), (0, 0)))


def nearest_mask(mask, hw):
    """F.interpolate(mode='nearest') on a bool mask == index selection."""
    _, Hin, Win = mask.shape
    Ho, Wo = hw
    rows = (jnp.arange(Ho) * Hin) // Ho
    cols = (jnp.arange(Wo) * Win) // Wo
    return mask[:, rows, :][:, :, cols]


# ------------------------- model (scaled-down ResNet) ------------------------

STEM_C = 8                    # (64 in ResNet50, scaled down)
LAYER_C = [16, 32, 64, 128]   # (256/512/1024/2048, scaled down)
LAYER_S = [1, 2, 2, 2]
BN_EPS = 1e-5


def _conv_init(key, shape):
    fan_in = shape[0] * shape[1] * shape[2]
    return jax.random.normal(key, shape, jnp.float32) * (2.0 / fan_in) ** 0.5


def _bn_init(key, c):
    kg, kb = jax.random.split(key)
    gamma = 1.0 + 0.1 * jax.random.normal(kg, (c,), jnp.float32)
    beta = 0.1 * jax.random.normal(kb, (c,), jnp.float32)
    mean = jnp.zeros((c,), jnp.float32)
    var = jnp.ones((c,), jnp.float32)
    scale = gamma / jnp.sqrt(var + BN_EPS)
    bias = beta - mean * scale
    return scale, bias


def build_branch_params(key):
    keys = list(jax.random.split(key, 32))
    ki = iter(keys)
    p = {}
    p['conv1_w'] = _conv_init(next(ki), (7, 7, 3, STEM_C))
    p['bn1'] = _bn_init(next(ki), STEM_C)
    cin = STEM_C
    for li, (cout, _s) in enumerate(zip(LAYER_C, LAYER_S), start=1):
        lp = {
            'conv1_w': _conv_init(next(ki), (3, 3, cin, cout)),
            'bn1': _bn_init(next(ki), cout),
            'conv2_w': _conv_init(next(ki), (3, 3, cout, cout)),
            'bn2': _bn_init(next(ki), cout),
            'down_w': _conv_init(next(ki), (1, 1, cin, cout)),
            'bn_down': _bn_init(next(ki), cout),
        }
        p[f'layer{li}'] = lp
        cin = cout
    return p


def _prep_weight(w, scale, bias, cin_eff, cout_pad):
    """HWIO weight + folded BN -> (K_pad, cout_pad) bf16 matrix and f32 bias.

    cin is zero-padded to cin_eff (the padded channel width of the input
    activation) so the weight row layout matches the im2col patch layout.
    """
    kh, kw, cin, cout = w.shape
    wz = jnp.pad(w, ((0, 0), (0, 0), (0, cin_eff - cin), (0, 0)))
    K = kh * kw * cin_eff
    K_pad = _round_up(K, 128)
    w2 = wz.reshape(K, cout) * scale[None, :]
    w2 = jnp.pad(w2, ((0, K_pad - K), (0, cout_pad - cout))).astype(jnp.bfloat16)
    b2 = jnp.pad(bias, (0, cout_pad - cout)).astype(jnp.float32)
    return w2, b2


def prep_params(params):
    """Fold BN, merge conv1+downsample, pad to lane-dense layout, and stack
    the RGB/depth branches along a leading axis (done once, outside jit)."""
    pr, pd = params['rgb'], params['d']
    out = {}

    # stem 7x7 (raw 3-channel input -> CPAD output)
    ws, bs = [], []
    for p in (pr, pd):
        w2, b2 = _prep_weight(p['conv1_w'], p['bn1'][0], p['bn1'][1], 3, CPAD)
        ws.append(w2); bs.append(b2)
    out['stem_w'] = jnp.stack(ws)
    out['stem_b'] = jnp.stack(bs)[:, None, :]

    # layers: merged conv1+downsample (Cout halves each padded to CPAD) + conv2
    for li in range(1, 5):
        cin = STEM_C if li == 1 else LAYER_C[li - 2]
        cout = LAYER_C[li - 1]
        mw, mb, w2s, b2s = [], [], [], []
        for p in (pr, pd):
            lp = p[f'layer{li}']
            w1, b1 = _prep_weight(lp['conv1_w'], lp['bn1'][0], lp['bn1'][1],
                                  CPAD, CPAD)
            # 1x1 downsample embedded as the center tap of a zero 3x3 kernel
            dw3 = jnp.zeros((3, 3, cin, cout), jnp.float32)
            dw3 = dw3.at[1, 1].set(lp['down_w'][0, 0])
            wd, bd = _prep_weight(dw3, lp['bn_down'][0], lp['bn_down'][1],
                                  CPAD, CPAD)
            mw.append(jnp.concatenate([w1, wd], axis=1))   # (K_pad, 2*CPAD)
            mb.append(jnp.concatenate([b1, bd], axis=0))   # (2*CPAD,)
            w2, b2 = _prep_weight(lp['conv2_w'], lp['bn2'][0], lp['bn2'][1],
                                  CPAD, CPAD)
            w2s.append(w2); b2s.append(b2)
        out[f'l{li}_mw'] = jnp.stack(mw)
        out[f'l{li}_mb'] = jnp.stack(mb)[:, None, :]
        out[f'l{li}_w2'] = jnp.stack(w2s)
        out[f'l{li}_b2'] = jnp.stack(b2s)[:, None, :]

    # per-column ReLU mask for the merged call: ReLU on the conv1 half only
    out['rmask'] = jnp.concatenate(
        [jnp.ones((CPAD,), jnp.float32), jnp.zeros((CPAD,), jnp.float32)])[None, :]
    return out


def basic_block(x, merged_w, merged_b, rmask, w2_stk, b2_stk, stride):
    """x: (2, N, H, W, CPAD) bf16 -> block output (2, M_pad, CPAD) bf16.

    merged conv1+downsample (one matmul, per-column ReLU), then conv2 with the
    shortcut residual and ReLU fused into its epilogue.
    """
    m_out, (N, Ho, Wo, M) = conv_apply(
        x, merged_w, merged_b, ksize=3, stride=stride, pad=1,
        relu=False, rmask=rmask)
    out1 = m_out[:, :M, :CPAD].reshape(2, N, Ho, Wo, CPAD)   # relu(bn1(conv1(x)))
    shortcut = m_out[:, :, CPAD:]                            # bn_down(down(x))
    out2, _ = conv_apply(out1, w2_stk, b2_stk, ksize=3, stride=1, pad=1,
                         relu=True, residual=shortcut)
    return out2, (N, Ho, Wo, M)


def backbone_forward(tensors, mask, prm):
    """tensors: [N, 4, H, W] NCHW; mask: [N, H, W] bool.

    RGB = channels 0:3, depth = channel 0 replicated x3 (as in the PyTorch
    forward).  Both branches are stacked along a leading axis and run through
    the same Pallas kernels.
    """
    x_rgb = tensors[:, 0:3, :, :]
    x_d = tensors[:, 0:1, :, :]
    x_d = jnp.concatenate([x_d, x_d, x_d], axis=1)

    x = jnp.stack([jnp.transpose(x_rgb, (0, 2, 3, 1)),
                   jnp.transpose(x_d, (0, 2, 3, 1))]).astype(jnp.bfloat16)

    # stem: conv7x7/s2 + BN + ReLU (Pallas) then maxpool 3x3/s2
    s_out, (N, Ho, Wo, M) = conv_apply(x, prm['stem_w'], prm['stem_b'],
                                       ksize=7, stride=2, pad=3, relu=True)
    y = s_out[:, :M, :].reshape(2 * N, Ho, Wo, CPAD)
    y = maxpool_3x3_s2(y)
    x = y.reshape(2, N, y.shape[1], y.shape[2], CPAD)

    xs = {}
    xs_original = {}
    for li, name in zip((1, 2, 3, 4), ('0', '1', '2', '3')):
        out2, (N, Ho, Wo, M) = basic_block(
            x, prm[f'l{li}_mw'], prm[f'l{li}_mb'], prm['rmask'],
            prm[f'l{li}_w2'], prm[f'l{li}_b2'], LAYER_S[li - 1])
        # next layer consumes the padded bf16 layout directly
        x = out2[:, :M, :].reshape(2, N, Ho, Wo, CPAD)
        # pyramid outputs: slice real channels, f32, NCHW (only here)
        cout = LAYER_C[li - 1]
        lvl = out2[:, :M, :cout].astype(jnp.float32).reshape(2, N, Ho, Wo, cout)
        m = nearest_mask(mask, (Ho, Wo))
        xs_original[name] = (jnp.transpose(lvl[0], (0, 3, 1, 2)), m)
        xs[name] = (jnp.transpose(lvl[0] + lvl[1], (0, 3, 1, 2)), m)

    return xs, xs_original


# --------------------------------- main --------------------------------------

if __name__ == "__main__":
    key = jax.random.PRNGKey(0)
    k_t, k_m, k_rgb, k_d = jax.random.split(key, 4)

    N, H, W = 2, 32, 32
    tensors = jax.random.normal(k_t, (N, 4, H, W), jnp.float32)
    mask = jax.random.uniform(k_m, (N, H, W)) > 0.7

    params = {'rgb': build_branch_params(k_rgb), 'd': build_branch_params(k_d)}
    prepared = prep_params(params)   # BN fold / merge / pad / stack, once

    fwd = jax.jit(backbone_forward)
    out, out1 = fwd(tensors, mask, prepared)
    jax.block_until_ready((out, out1))

    # sanity: 4 pyramid levels in each dict, tensors NCHW + bool masks
    assert set(out.keys()) == {'0', '1', '2', '3'}
    assert set(out1.keys()) == {'0', '1', '2', '3'}
    for name, (x, m) in out.items():
        assert x.shape[0] == N and m.dtype == jnp.bool_
        assert m.shape[-2:] == x.shape[-2:]
        assert jnp.all(jnp.isfinite(x))
    for name, (x, m) in out1.items():
        assert x.shape[0] == N and m.dtype == jnp.bool_
        assert m.shape[-2:] == x.shape[-2:]

    print("KERNEL_OK")
</pallas_src>

<mosaic_0001>
module attributes {stable_mosaic.version = 11 : i64} {
  func.func @kernel(%arg0: i32, %arg1: i32, %arg2: i32, %arg3: memref<1x256x256xbf16, #tpu.memory_space<vmem>>, %arg4: memref<1x256x128xbf16, #tpu.memory_space<vmem>>, %arg5: memref<1x1x128xf32, #tpu.memory_space<vmem>>, %arg6: memref<1x256x128xbf16, #tpu.memory_space<vmem>>) attributes {dimension_semantics = [#tpu.dimension_semantics<parallel>, #tpu.dimension_semantics<parallel>, #tpu.dimension_semantics<parallel>], iteration_bounds = array<i64: 2, 2, 1>, scalar_prefetch = 0 : i64, scratch_operands = 0 : i64, tpu.core_type = #tpu.core_type<tc>, window_params = [{transform_indices = @transform_0, window_bounds = array<i64: 1, 256, 256>}, {transform_indices = @transform_1, window_bounds = array<i64: 1, 256, 128>}, {transform_indices = @transform_2, window_bounds = array<i64: 1, 1, 128>}, {transform_indices = @transform_3, window_bounds = array<i64: 1, 256, 128>}]} {
    %c0 = arith.constant 0 : index
    %c0_0 = arith.constant 0 : index
    %c0_1 = arith.constant 0 : index
    %0 = vector.load %arg3[%c0, %c0_0, %c0_1] : memref<1x256x256xbf16, #tpu.memory_space<vmem>>, vector<1x256x256xbf16>
    %1 = vector.shape_cast %0 : vector<1x256x256xbf16> to vector<256x256xbf16>
    %c0_2 = arith.constant 0 : index
    %c0_3 = arith.constant 0 : index
    %c0_4 = arith.constant 0 : index
    %2 = vector.load %arg4[%c0_2, %c0_3, %c0_4] : memref<1x256x128xbf16, #tpu.memory_space<vmem>>, vector<1x256x128xbf16>
    %3 = vector.shape_cast %2 : vector<1x256x128xbf16> to vector<256x128xbf16>
    %cst = arith.constant dense<0.000000e+00> : vector<256x128xf32>
    %4 = tpu.matmul %1, %3, %cst {dimension_numbers = #tpu.dot_dimension_numbers<[1], [0], [0], [1], [0, 0, 1, 1], [], []>} : vector<256x256xbf16>, vector<256x128xbf16>, vector<256x128xf32> -> vector<256x128xf32>
    %c0_5 = arith.constant 0 : index
    %c0_6 = arith.constant 0 : index
    %c0_7 = arith.constant 0 : index
    %5 = vector.load %arg5[%c0_5, %c0_6, %c0_7] : memref<1x1x128xf32, #tpu.memory_space<vmem>>, vector<1x1x128xf32>
    %6 = vector.shape_cast %5 : vector<1x1x128xf32> to vector<1x128xf32>
    %7 = vector.broadcast %6 : vector<1x128xf32> to vector<256x128xf32>
    %8 = arith.addf %4, %7 : vector<256x128xf32>
    %cst_8 = arith.constant 0.000000e+00 : f32
    %9 = vector.broadcast %cst_8 : f32 to vector<256x128xf32>
    %10 = arith.maximumf %8, %9 : vector<256x128xf32>
    %11 = arith.truncf %10 : vector<256x128xf32> to vector<256x128xbf16>
    %c0_9 = arith.constant 0 : index
    %c0_10 = arith.constant 0 : index
    %c0_11 = arith.constant 0 : index
    %12 = vector.load %arg6[%c0_9, %c0_10, %c0_11] : memref<1x256x128xbf16, #tpu.memory_space<vmem>>, vector<1x256x128xbf16>
    %13 = vector.shape_cast %12 : vector<1x256x128xbf16> to vector<256x128xbf16>
    %14 = vector.shape_cast %11 : vector<256x128xbf16> to vector<1x256x128xbf16>
    tpu.vector_store %arg6[%c0_9, %c0_10, %c0_11], %14 {strides = array<i32>} : memref<1x256x128xbf16, #tpu.memory_space<vmem>>, vector<1x256x128xbf16>,
    return
  }
  func.func @transform_0(%arg0: i32, %arg1: i32, %arg2: i32) -> (i32, i32, i32) {
    %c0_i32 = arith.constant 0 : i32
    %c0_i32_0 = arith.constant 0 : i32
    return %arg0, %arg1, %c0_i32 : i32, i32, i32
  }
  func.func @transform_1(%arg0: i32, %arg1: i32, %arg2: i32) -> (i32, i32, i32) {
    %c0_i32 = arith.constant 0 : i32
    %c0_i32_0 = arith.constant 0 : i32
    return %arg0, %c0_i32, %arg2 : i32, i32, i32
  }
  func.func @transform_2(%arg0: i32, %arg1: i32, %arg2: i32) -> (i32, i32, i32) {
    %c0_i32 = arith.constant 0 : i32
    %c0_i32_0 = arith.constant 0 : i32
    return %arg0, %c0_i32, %arg2 : i32, i32, i32
  }
  func.func @transform_3(%arg0: i32, %arg1: i32, %arg2: i32) -> (i32, i32, i32) {
    %c0_i32 = arith.constant 0 : i32
    return %arg0, %arg1, %arg2 : i32, i32, i32
  }
}

module attributes {stable_mosaic.version = 11 : i64} {
  func.func @kernel(%arg0: i32, %arg1: i32, %arg2: i32, %arg3: memref<1x128x1152xbf16, #tpu.memory_space<vmem>>, %arg4: memref<1x1152x256xbf16, #tpu.memory_space<vmem>>, %arg5: memref<1x1x256xf32, #tpu.memory_space<vmem>>, %arg6: memref<1x256xf32, #tpu.memory_space<vmem>>, %arg7: memref<1x128x256xbf16, #tpu.memory_space<vmem>>) attributes {dimension_semantics = [#tpu.dimension_semantics<parallel>, #tpu.dimension_semantics<parallel>, #tpu.dimension_semantics<parallel>], iteration_bounds = array<i64: 2, 1, 1>, scalar_prefetch = 0 : i64, scratch_operands = 0 : i64, tpu.core_type = #tpu.core_type<tc>, window_params = [{transform_indices = @transform_0, window_bounds = array<i64: 1, 128, 1152>}, {transform_indices = @transform_1, window_bounds = array<i64: 1, 1152, 256>}, {transform_indices = @transform_2, window_bounds = array<i64: 1, 1, 256>}, {transform_indices = @transform_3, window_bounds = array<i64: 1, 256>}, {transform_indices = @transform_4, window_bounds = array<i64: 1, 128, 256>}]} {
    %c0 = arith.constant 0 : index
    %c0_0 = arith.constant 0 : index
    %c0_1 = arith.constant 0 : index
    %0 = vector.load %arg3[%c0, %c0_0, %c0_1] : memref<1x128x1152xbf16, #tpu.memory_space<vmem>>, vector<1x128x1152xbf16>
    %1 = vector.shape_cast %0 : vector<1x128x1152xbf16> to vector<128x1152xbf16>
    %c0_2 = arith.constant 0 : index
    %c0_3 = arith.constant 0 : index
    %c0_4 = arith.constant 0 : index
    %2 = vector.load %arg4[%c0_2, %c0_3, %c0_4] : memref<1x1152x256xbf16, #tpu.memory_space<vmem>>, vector<1x1152x256xbf16>
    %3 = vector.shape_cast %2 : vector<1x1152x256xbf16> to vector<1152x256xbf16>
    %cst = arith.constant dense<0.000000e+00> : vector<128x256xf32>
    %4 = tpu.matmul %1, %3, %cst {dimension_numbers = #tpu.dot_dimension_numbers<[1], [0], [0], [1], [0, 0, 1, 1], [], []>} : vector<128x1152xbf16>, vector<1152x256xbf16>, vector<128x256xf32> -> vector<128x256xf32>
    %c0_5 = arith.constant 0 : index
    %c0_6 = arith.constant 0 : index
    %c0_7 = arith.constant 0 : index
    %5 = vector.load %arg5[%c0_5, %c0_6, %c0_7] : memref<1x1x256xf32, #tpu.memory_space<vmem>>, vector<1x1x256xf32>
    %6 = vector.shape_cast %5 : vector<1x1x256xf32> to vector<1x256xf32>
    %7 = vector.broadcast %6 : vector<1x256xf32> to vector<128x256xf32>
    %8 = arith.addf %4, %7 : vector<128x256xf32>
    %c0_8 = arith.constant 0 : index
    %c0_9 = arith.constant 0 : index
    %9 = vector.load %arg6[%c0_8, %c0_9] : memref<1x256xf32, #tpu.memory_space<vmem>>, vector<1x256xf32>
    %cst_10 = arith.constant 0.000000e+00 : f32
    %10 = vector.broadcast %cst_10 : f32 to vector<1x256xf32>
    %11 = arith.cmpf one, %9, %10 : vector<1x256xf32>
    %cst_11 = arith.constant 0.000000e+00 : f32
    %12 = vector.broadcast %cst_11 : f32 to vector<128x256xf32>
    %13 = arith.maximumf %8, %12 : vector<128x256xf32>
    %14 = vector.shape_cast %11 : vector<1x256xi1> to vector<1x256xi1>
    %15 = vector.broadcast %14 : vector<1x256xi1> to vector<128x256xi1>
    %16 = arith.select %15, %13, %8 : vector<128x256xi1>, vector<128x256xf32>
    %17 = arith.truncf %16 : vector<128x256xf32> to vector<128x256xbf16>
    %c0_12 = arith.constant 0 : index
    %c0_13 = arith.constant 0 : index
    %c0_14 = arith.constant 0 : index
    %18 = vector.load %arg7[%c0_12, %c0_13, %c0_14] : memref<1x128x256xbf16, #tpu.memory_space<vmem>>, vector<1x128x256xbf16>
    %19 = vector.shape_cast %18 : vector<1x128x256xbf16> to vector<128x256xbf16>
    %20 = vector.shape_cast %17 : vector<128x256xbf16> to vector<1x128x256xbf16>
    tpu.vector_store %arg7[%c0_12, %c0_13, %c0_14], %20 {strides = array<i32>} : memref<1x128x256xbf16, #tpu.memory_space<vmem>>, vector<1x128x256xbf16>,
    return
  }
  func.func @transform_0(%arg0: i32, %arg1: i32, %arg2: i32) -> (i32, i32, i32) {
    %c0_i32 = arith.constant 0 : i32
    %c0_i32_0 = arith.constant 0 : i32
    return %arg0, %arg1, %c0_i32 : i32, i32, i32
  }
  func.func @transform_1(%arg0: i32, %arg1: i32, %arg2: i32) -> (i32, i32, i32) {
    %c0_i32 = arith.constant 0 : i32
    %c0_i32_0 = arith.constant 0 : i32
    return %arg0, %c0_i32, %arg2 : i32, i32, i32
  }
  func.func @transform_2(%arg0: i32, %arg1: i32, %arg2: i32) -> (i32, i32, i32) {
    %c0_i32 = arith.constant 0 : i32
    %c0_i32_0 = arith.constant 0 : i32
    return %arg0, %c0_i32, %arg2 : i32, i32, i32
  }
  func.func @transform_3(%arg0: i32, %arg1: i32, %arg2: i32) -> (i32, i32) {
    %c0_i32 = arith.constant 0 : i32
    %c0_i32_0 = arith.constant 0 : i32
    return %c0_i32, %arg2 : i32, i32
  }
  func.func @transform_4(%arg0: i32, %arg1: i32, %arg2: i32) -> (i32, i32, i32) {
    %c0_i32 = arith.constant 0 : i32
    return %arg0, %arg1, %arg2 : i32, i32, i32
  }
}

module attributes {stable_mosaic.version = 11 : i64} {
  func.func @kernel(%arg0: i32, %arg1: i32, %arg2: i32, %arg3: memref<1x128x1152xbf16, #tpu.memory_space<vmem>>, %arg4: memref<1x1152x128xbf16, #tpu.memory_space<vmem>>, %arg5: memref<1x1x128xf32, #tpu.memory_space<vmem>>, %arg6: memref<1x128x128xbf16, #tpu.memory_space<vmem>>, %arg7: memref<1x128x128xbf16, #tpu.memory_space<vmem>>) attributes {dimension_semantics = [#tpu.dimension_semantics<parallel>, #tpu.dimension_semantics<parallel>, #tpu.dimension_semantics<parallel>], iteration_bounds = array<i64: 2, 1, 1>, scalar_prefetch = 0 : i64, scratch_operands = 0 : i64, tpu.core_type = #tpu.core_type<tc>, window_params = [{transform_indices = @transform_0, window_bounds = array<i64: 1, 128, 1152>}, {transform_indices = @transform_1, window_bounds = array<i64: 1, 1152, 128>}, {transform_indices = @transform_2, window_bounds = array<i64: 1, 1, 128>}, {transform_indices = @transform_3, window_bounds = array<i64: 1, 128, 128>}, {transform_indices = @transform_4, window_bounds = array<i64: 1, 128, 128>}]} {
    %c0 = arith.constant 0 : index
    %c0_0 = arith.constant 0 : index
    %c0_1 = arith.constant 0 : index
    %0 = vector.load %arg3[%c0, %c0_0, %c0_1] : memref<1x128x1152xbf16, #tpu.memory_space<vmem>>, vector<1x128x1152xbf16>
    %1 = vector.shape_cast %0 : vector<1x128x1152xbf16> to vector<128x1152xbf16>
    %c0_2 = arith.constant 0 : index
    %c0_3 = arith.constant 0 : index
    %c0_4 = arith.constant 0 : index
    %2 = vector.load %arg4[%c0_2, %c0_3, %c0_4] : memref<1x1152x128xbf16, #tpu.memory_space<vmem>>, vector<1x1152x128xbf16>
    %3 = vector.shape_cast %2 : vector<1x1152x128xbf16> to vector<1152x128xbf16>
    %cst = arith.constant dense<0.000000e+00> : vector<128x128xf32>
    %4 = tpu.matmul %1, %3, %cst {dimension_numbers = #tpu.dot_dimension_numbers<[1], [0], [0], [1], [0, 0, 1, 1], [], []>} : vector<128x1152xbf16>, vector<1152x128xbf16>, vector<128x128xf32> -> vector<128x128xf32>
    %c0_5 = arith.constant 0 : index
    %c0_6 = arith.constant 0 : index
    %c0_7 = arith.constant 0 : index
    %5 = vector.load %arg5[%c0_5, %c0_6, %c0_7] : memref<1x1x128xf32, #tpu.memory_space<vmem>>, vector<1x1x128xf32>
    %6 = vector.shape_cast %5 : vector<1x1x128xf32> to vector<1x128xf32>
    %7 = vector.broadcast %6 : vector<1x128xf32> to vector<128x128xf32>
    %8 = arith.addf %4, %7 : vector<128x128xf32>
    %c0_8 = arith.constant 0 : index
    %c0_9 = arith.constant 0 : index
    %c0_10 = arith.constant 0 : index
    %9 = vector.load %arg6[%c0_8, %c0_9, %c0_10] : memref<1x128x128xbf16, #tpu.memory_space<vmem>>, vector<1x128x128xbf16>
    %10 = vector.shape_cast %9 : vector<1x128x128xbf16> to vector<128x128xbf16>
    %11 = arith.extf %10 : vector<128x128xbf16> to vector<128x128xf32>
    %12 = arith.addf %8, %11 : vector<128x128xf32>
    %cst_11 = arith.constant 0.000000e+00 : f32
    %13 = vector.broadcast %cst_11 : f32 to vector<128x128xf32>
    %14 = arith.maximumf %12, %13 : vector<128x128xf32>
    %15 = arith.truncf %14 : vector<128x128xf32> to vector<128x128xbf16>
    %c0_12 = arith.constant 0 : index
    %c0_13 = arith.constant 0 : index
    %c0_14 = arith.constant 0 : index
    %16 = vector.load %arg7[%c0_12, %c0_13, %c0_14] : memref<1x128x128xbf16, #tpu.memory_space<vmem>>, vector<1x128x128xbf16>
    %17 = vector.shape_cast %16 : vector<1x128x128xbf16> to vector<128x128xbf16>
    %18 = vector.shape_cast %15 : vector<128x128xbf16> to vector<1x128x128xbf16>
    tpu.vector_store %arg7[%c0_12, %c0_13, %c0_14], %18 {strides = array<i32>} : memref<1x128x128xbf16, #tpu.memory_space<vmem>>, vector<1x128x128xbf16>,
    return
  }
  func.func @transform_0(%arg0: i32, %arg1: i32, %arg2: i32) -> (i32, i32, i32) {
    %c0_i32 = arith.constant 0 : i32
    %c0_i32_0 = arith.constant 0 : i32
    return %arg0, %arg1, %c0_i32 : i32, i32, i32
  }
  func.func @transform_1(%arg0: i32, %arg1: i32, %arg2: i32) -> (i32, i32, i32) {
    %c0_i32 = arith.constant 0 : i32
    %c0_i32_0 = arith.constant 0 : i32
    return %arg0, %c0_i32, %arg2 : i32, i32, i32
  }
  func.func @transform_2(%arg0: i32, %arg1: i32, %arg2: i32) -> (i32, i32, i32) {
    %c0_i32 = arith.constant 0 : i32
    %c0_i32_0 = arith.constant 0 : i32
    return %arg0, %c0_i32, %arg2 : i32, i32, i32
  }
  func.func @transform_3(%arg0: i32, %arg1: i32, %arg2: i32) -> (i32, i32, i32) {
    %c0_i32 = arith.constant 0 : i32
    return %arg0, %arg1, %arg2 : i32, i32, i32
  }
  func.func @transform_4(%arg0: i32, %arg1: i32, %arg2: i32) -> (i32, i32, i32) {
    %c0_i32 = arith.constant 0 : i32
    return %arg0, %arg1, %arg2 : i32, i32, i32
  }
}

module attributes {stable_mosaic.version = 11 : i64} {
  func.func @kernel(%arg0: i32, %arg1: i32, %arg2: i32, %arg3: memref<1x32x1152xbf16, #tpu.memory_space<vmem>>, %arg4: memref<1x1152x256xbf16, #tpu.memory_space<vmem>>, %arg5: memref<1x1x256xf32, #tpu.memory_space<vmem>>, %arg6: memref<1x256xf32, #tpu.memory_space<vmem>>, %arg7: memref<1x32x256xbf16, #tpu.memory_space<vmem>>) attributes {dimension_semantics = [#tpu.dimension_semantics<parallel>, #tpu.dimension_semantics<parallel>, #tpu.dimension_semantics<parallel>], iteration_bounds = array<i64: 2, 1, 1>, scalar_prefetch = 0 : i64, scratch_operands = 0 : i64, tpu.core_type = #tpu.core_type<tc>, window_params = [{transform_indices = @transform_0, window_bounds = array<i64: 1, 32, 1152>}, {transform_indices = @transform_1, window_bounds = array<i64: 1, 1152, 256>}, {transform_indices = @transform_2, window_bounds = array<i64: 1, 1, 256>}, {transform_indices = @transform_3, window_bounds = array<i64: 1, 256>}, {transform_indices = @transform_4, window_bounds = array<i64: 1, 32, 256>}]} {
    %c0 = arith.constant 0 : index
    %c0_0 = arith.constant 0 : index
    %c0_1 = arith.constant 0 : index
    %0 = vector.load %arg3[%c0, %c0_0, %c0_1] : memref<1x32x1152xbf16, #tpu.memory_space<vmem>>, vector<1x32x1152xbf16>
    %1 = vector.shape_cast %0 : vector<1x32x1152xbf16> to vector<32x1152xbf16>
    %c0_2 = arith.constant 0 : index
    %c0_3 = arith.constant 0 : index
    %c0_4 = arith.constant 0 : index
    %2 = vector.load %arg4[%c0_2, %c0_3, %c0_4] : memref<1x1152x256xbf16, #tpu.memory_space<vmem>>, vector<1x1152x256xbf16>
    %3 = vector.shape_cast %2 : vector<1x1152x256xbf16> to vector<1152x256xbf16>
    %cst = arith.constant dense<0.000000e+00> : vector<32x256xf32>
    %4 = tpu.matmul %1, %3, %cst {dimension_numbers = #tpu.dot_dimension_numbers<[1], [0], [0], [1], [0, 0, 1, 1], [], []>} : vector<32x1152xbf16>, vector<1152x256xbf16>, vector<32x256xf32> -> vector<32x256xf32>
    %c0_5 = arith.constant 0 : index
    %c0_6 = arith.constant 0 : index
    %c0_7 = arith.constant 0 : index
    %5 = vector.load %arg5[%c0_5, %c0_6, %c0_7] : memref<1x1x256xf32, #tpu.memory_space<vmem>>, vector<1x1x256xf32>
    %6 = vector.shape_cast %5 : vector<1x1x256xf32> to vector<1x256xf32>
    %7 = vector.broadcast %6 : vector<1x256xf32> to vector<32x256xf32>
    %8 = arith.addf %4, %7 : vector<32x256xf32>
    %c0_8 = arith.constant 0 : index
    %c0_9 = arith.constant 0 : index
    %9 = vector.load %arg6[%c0_8, %c0_9] : memref<1x256xf32, #tpu.memory_space<vmem>>, vector<1x256xf32>
    %cst_10 = arith.constant 0.000000e+00 : f32
    %10 = vector.broadcast %cst_10 : f32 to vector<1x256xf32>
    %11 = arith.cmpf one, %9, %10 : vector<1x256xf32>
    %cst_11 = arith.constant 0.000000e+00 : f32
    %12 = vector.broadcast %cst_11 : f32 to vector<32x256xf32>
    %13 = arith.maximumf %8, %12 : vector<32x256xf32>
    %14 = vector.shape_cast %11 : vector<1x256xi1> to vector<1x256xi1>
    %15 = vector.broadcast %14 : vector<1x256xi1> to vector<32x256xi1>
    %16 = arith.select %15, %13, %8 : vector<32x256xi1>, vector<32x256xf32>
    %17 = arith.truncf %16 : vector<32x256xf32> to vector<32x256xbf16>
    %c0_12 = arith.constant 0 : index
    %c0_13 = arith.constant 0 : index
    %c0_14 = arith.constant 0 : index
    %18 = vector.load %arg7[%c0_12, %c0_13, %c0_14] : memref<1x32x256xbf16, #tpu.memory_space<vmem>>, vector<1x32x256xbf16>
    %19 = vector.shape_cast %18 : vector<1x32x256xbf16> to vector<32x256xbf16>
    %20 = vector.shape_cast %17 : vector<32x256xbf16> to vector<1x32x256xbf16>
    tpu.vector_store %arg7[%c0_12, %c0_13, %c0_14], %20 {strides = array<i32>} : memref<1x32x256xbf16, #tpu.memory_space<vmem>>, vector<1x32x256xbf16>,
    return
  }
  func.func @transform_0(%arg0: i32, %arg1: i32, %arg2: i32) -> (i32, i32, i32) {
    %c0_i32 = arith.constant 0 : i32
    %c0_i32_0 = arith.constant 0 : i32
    return %arg0, %arg1, %c0_i32 : i32, i32, i32
  }
  func.func @transform_1(%arg0: i32, %arg1: i32, %arg2: i32) -> (i32, i32, i32) {
    %c0_i32 = arith.constant 0 : i32
    %c0_i32_0 = arith.constant 0 : i32
    return %arg0, %c0_i32, %arg2 : i32, i32, i32
  }
  func.func @transform_2(%arg0: i32, %arg1: i32, %arg2: i32) -> (i32, i32, i32) {
    %c0_i32 = arith.constant 0 : i32
    %c0_i32_0 = arith.constant 0 : i32
    return %arg0, %c0_i32, %arg2 : i32, i32, i32
  }
  func.func @transform_3(%arg0: i32, %arg1: i32, %arg2: i32) -> (i32, i32) {
    %c0_i32 = arith.constant 0 : i32
    %c0_i32_0 = arith.constant 0 : i32
    return %c0_i32, %arg2 : i32, i32
  }
  func.func @transform_4(%arg0: i32, %arg1: i32, %arg2: i32) -> (i32, i32, i32) {
    %c0_i32 = arith.constant 0 : i32
    return %arg0, %arg1, %arg2 : i32, i32, i32
  }
}

module attributes {stable_mosaic.version = 11 : i64} {
  func.func @kernel(%arg0: i32, %arg1: i32, %arg2: i32, %arg3: memref<1x32x1152xbf16, #tpu.memory_space<vmem>>, %arg4: memref<1x1152x128xbf16, #tpu.memory_space<vmem>>, %arg5: memref<1x1x128xf32, #tpu.memory_space<vmem>>, %arg6: memref<1x32x128xbf16, #tpu.memory_space<vmem>>, %arg7: memref<1x32x128xbf16, #tpu.memory_space<vmem>>) attributes {dimension_semantics = [#tpu.dimension_semantics<parallel>, #tpu.dimension_semantics<parallel>, #tpu.dimension_semantics<parallel>], iteration_bounds = array<i64: 2, 1, 1>, scalar_prefetch = 0 : i64, scratch_operands = 0 : i64, tpu.core_type = #tpu.core_type<tc>, window_params = [{transform_indices = @transform_0, window_bounds = array<i64: 1, 32, 1152>}, {transform_indices = @transform_1, window_bounds = array<i64: 1, 1152, 128>}, {transform_indices = @transform_2, window_bounds = array<i64: 1, 1, 128>}, {transform_indices = @transform_3, window_bounds = array<i64: 1, 32, 128>}, {transform_indices = @transform_4, window_bounds = array<i64: 1, 32, 128>}]} {
    %c0 = arith.constant 0 : index
    %c0_0 = arith.constant 0 : index
    %c0_1 = arith.constant 0 : index
    %0 = vector.load %arg3[%c0, %c0_0, %c0_1] : memref<1x32x1152xbf16, #tpu.memory_space<vmem>>, vector<1x32x1152xbf16>
    %1 = vector.shape_cast %0 : vector<1x32x1152xbf16> to vector<32x1152xbf16>
    %c0_2 = arith.constant 0 : index
    %c0_3 = arith.constant 0 : index
    %c0_4 = arith.constant 0 : index
    %2 = vector.load %arg4[%c0_2, %c0_3, %c0_4] : memref<1x1152x128xbf16, #tpu.memory_space<vmem>>, vector<1x1152x128xbf16>
    %3 = vector.shape_cast %2 : vector<1x1152x128xbf16> to vector<1152x128xbf16>
    %cst = arith.constant dense<0.000000e+00> : vector<32x128xf32>
    %4 = tpu.matmul %1, %3, %cst {dimension_numbers = #tpu.dot_dimension_numbers<[1], [0], [0], [1], [0, 0, 1, 1], [], []>} : vector<32x1152xbf16>, vector<1152x128xbf16>, vector<32x128xf32> -> vector<32x128xf32>
    %c0_5 = arith.constant 0 : index
    %c0_6 = arith.constant 0 : index
    %c0_7 = arith.constant 0 : index
    %5 = vector.load %arg5[%c0_5, %c0_6, %c0_7] : memref<1x1x128xf32, #tpu.memory_space<vmem>>, vector<1x1x128xf32>
    %6 = vector.shape_cast %5 : vector<1x1x128xf32> to vector<1x128xf32>
    %7 = vector.broadcast %6 : vector<1x128xf32> to vector<32x128xf32>
    %8 = arith.addf %4, %7 : vector<32x128xf32>
    %c0_8 = arith.constant 0 : index
    %c0_9 = arith.constant 0 : index
    %c0_10 = arith.constant 0 : index
    %9 = vector.load %arg6[%c0_8, %c0_9, %c0_10] : memref<1x32x128xbf16, #tpu.memory_space<vmem>>, vector<1x32x128xbf16>
    %10 = vector.shape_cast %9 : vector<1x32x128xbf16> to vector<32x128xbf16>
    %11 = arith.extf %10 : vector<32x128xbf16> to vector<32x128xf32>
    %12 = arith.addf %8, %11 : vector<32x128xf32>
    %cst_11 = arith.constant 0.000000e+00 : f32
    %13 = vector.broadcast %cst_11 : f32 to vector<32x128xf32>
    %14 = arith.maximumf %12, %13 : vector<32x128xf32>
    %15 = arith.truncf %14 : vector<32x128xf32> to vector<32x128xbf16>
    %c0_12 = arith.constant 0 : index
    %c0_13 = arith.constant 0 : index
    %c0_14 = arith.constant 0 : index
    %16 = vector.load %arg7[%c0_12, %c0_13, %c0_14] : memref<1x32x128xbf16, #tpu.memory_space<vmem>>, vector<1x32x128xbf16>
    %17 = vector.shape_cast %16 : vector<1x32x128xbf16> to vector<32x128xbf16>
    %18 = vector.shape_cast %15 : vector<32x128xbf16> to vector<1x32x128xbf16>
    tpu.vector_store %arg7[%c0_12, %c0_13, %c0_14], %18 {strides = array<i32>} : memref<1x32x128xbf16, #tpu.memory_space<vmem>>, vector<1x32x128xbf16>,
    return
  }
  func.func @transform_0(%arg0: i32, %arg1: i32, %arg2: i32) -> (i32, i32, i32) {
    %c0_i32 = arith.constant 0 : i32
    %c0_i32_0 = arith.constant 0 : i32
    return %arg0, %arg1, %c0_i32 : i32, i32, i32
  }
  func.func @transform_1(%arg0: i32, %arg1: i32, %arg2: i32) -> (i32, i32, i32) {
    %c0_i32 = arith.constant 0 : i32
    %c0_i32_0 = arith.constant 0 : i32
    return %arg0, %c0_i32, %arg2 : i32, i32, i32
  }
  func.func @transform_2(%arg0: i32, %arg1: i32, %arg2: i32) -> (i32, i32, i32) {
    %c0_i32 = arith.constant 0 : i32
    %c0_i32_0 = arith.constant 0 : i32
    return %arg0, %c0_i32, %arg2 : i32, i32, i32
  }
  func.func @transform_3(%arg0: i32, %arg1: i32, %arg2: i32) -> (i32, i32, i32) {
    %c0_i32 = arith.constant 0 : i32
    return %arg0, %arg1, %arg2 : i32, i32, i32
  }
  func.func @transform_4(%arg0: i32, %arg1: i32, %arg2: i32) -> (i32, i32, i32) {
    %c0_i32 = arith.constant 0 : i32
    return %arg0, %arg1, %arg2 : i32, i32, i32
  }
}

module attributes {stable_mosaic.version = 11 : i64} {
  func.func @kernel(%arg0: i32, %arg1: i32, %arg2: i32, %arg3: memref<1x8x1152xbf16, #tpu.memory_space<vmem>>, %arg4: memref<1x1152x256xbf16, #tpu.memory_space<vmem>>, %arg5: memref<1x1x256xf32, #tpu.memory_space<vmem>>, %arg6: memref<1x256xf32, #tpu.memory_space<vmem>>, %arg7: memref<1x8x256xbf16, #tpu.memory_space<vmem>>) attributes {dimension_semantics = [#tpu.dimension_semantics<parallel>, #tpu.dimension_semantics<parallel>, #tpu.dimension_semantics<parallel>], iteration_bounds = array<i64: 2, 1, 1>, scalar_prefetch = 0 : i64, scratch_operands = 0 : i64, tpu.core_type = #tpu.core_type<tc>, window_params = [{transform_indices = @transform_0, window_bounds = array<i64: 1, 8, 1152>}, {transform_indices = @transform_1, window_bounds = array<i64: 1, 1152, 256>}, {transform_indices = @transform_2, window_bounds = array<i64: 1, 1, 256>}, {transform_indices = @transform_3, window_bounds = array<i64: 1, 256>}, {transform_indices = @transform_4, window_bounds = array<i64: 1, 8, 256>}]} {
    %c0 = arith.constant 0 : index
    %c0_0 = arith.constant 0 : index
    %c0_1 = arith.constant 0 : index
    %0 = vector.load %arg3[%c0, %c0_0, %c0_1] : memref<1x8x1152xbf16, #tpu.memory_space<vmem>>, vector<1x8x1152xbf16>
    %1 = vector.shape_cast %0 : vector<1x8x1152xbf16> to vector<8x1152xbf16>
    %c0_2 = arith.constant 0 : index
    %c0_3 = arith.constant 0 : index
    %c0_4 = arith.constant 0 : index
    %2 = vector.load %arg4[%c0_2, %c0_3, %c0_4] : memref<1x1152x256xbf16, #tpu.memory_space<vmem>>, vector<1x1152x256xbf16>
    %3 = vector.shape_cast %2 : vector<1x1152x256xbf16> to vector<1152x256xbf16>
    %cst = arith.constant dense<0.000000e+00> : vector<8x256xf32>
    %4 = tpu.matmul %1, %3, %cst {dimension_numbers = #tpu.dot_dimension_numbers<[1], [0], [0], [1], [0, 0, 1, 1], [], []>} : vector<8x1152xbf16>, vector<1152x256xbf16>, vector<8x256xf32> -> vector<8x256xf32>
    %c0_5 = arith.constant 0 : index
    %c0_6 = arith.constant 0 : index
    %c0_7 = arith.constant 0 : index
    %5 = vector.load %arg5[%c0_5, %c0_6, %c0_7] : memref<1x1x256xf32, #tpu.memory_space<vmem>>, vector<1x1x256xf32>
    %6 = vector.shape_cast %5 : vector<1x1x256xf32> to vector<1x256xf32>
    %7 = vector.broadcast %6 : vector<1x256xf32> to vector<8x256xf32>
    %8 = arith.addf %4, %7 : vector<8x256xf32>
    %c0_8 = arith.constant 0 : index
    %c0_9 = arith.constant 0 : index
    %9 = vector.load %arg6[%c0_8, %c0_9] : memref<1x256xf32, #tpu.memory_space<vmem>>, vector<1x256xf32>
    %cst_10 = arith.constant 0.000000e+00 : f32
    %10 = vector.broadcast %cst_10 : f32 to vector<1x256xf32>
    %11 = arith.cmpf one, %9, %10 : vector<1x256xf32>
    %cst_11 = arith.constant 0.000000e+00 : f32
    %12 = vector.broadcast %cst_11 : f32 to vector<8x256xf32>
    %13 = arith.maximumf %8, %12 : vector<8x256xf32>
    %14 = vector.shape_cast %11 : vector<1x256xi1> to vector<1x256xi1>
    %15 = vector.broadcast %14 : vector<1x256xi1> to vector<8x256xi1>
    %16 = arith.select %15, %13, %8 : vector<8x256xi1>, vector<8x256xf32>
    %17 = arith.truncf %16 : vector<8x256xf32> to vector<8x256xbf16>
    %c0_12 = arith.constant 0 : index
    %c0_13 = arith.constant 0 : index
    %c0_14 = arith.constant 0 : index
    %18 = vector.load %arg7[%c0_12, %c0_13, %c0_14] : memref<1x8x256xbf16, #tpu.memory_space<vmem>>, vector<1x8x256xbf16>
    %19 = vector.shape_cast %18 : vector<1x8x256xbf16> to vector<8x256xbf16>
    %20 = vector.shape_cast %17 : vector<8x256xbf16> to vector<1x8x256xbf16>
    tpu.vector_store %arg7[%c0_12, %c0_13, %c0_14], %20 {strides = array<i32>} : memref<1x8x256xbf16, #tpu.memory_space<vmem>>, vector<1x8x256xbf16>,
    return
  }
  func.func @transform_0(%arg0: i32, %arg1: i32, %arg2: i32) -> (i32, i32, i32) {
    %c0_i32 = arith.constant 0 : i32
    %c0_i32_0 = arith.constant 0 : i32
    return %arg0, %arg1, %c0_i32 : i32, i32, i32
  }
  func.func @transform_1(%arg0: i32, %arg1: i32, %arg2: i32) -> (i32, i32, i32) {
    %c0_i32 = arith.constant 0 : i32
    %c0_i32_0 = arith.constant 0 : i32
    return %arg0, %c0_i32, %arg2 : i32, i32, i32
  }
  func.func @transform_2(%arg0: i32, %arg1: i32, %arg2: i32) -> (i32, i32, i32) {
    %c0_i32 = arith.constant 0 : i32
    %c0_i32_0 = arith.constant 0 : i32
    return %arg0, %c0_i32, %arg2 : i32, i32, i32
  }
  func.func @transform_3(%arg0: i32, %arg1: i32, %arg2: i32) -> (i32, i32) {
    %c0_i32 = arith.constant 0 : i32
    %c0_i32_0 = arith.constant 0 : i32
    return %c0_i32, %arg2 : i32, i32
  }
  func.func @transform_4(%arg0: i32, %arg1: i32, %arg2: i32) -> (i32, i32, i32) {
    %c0_i32 = arith.constant 0 : i32
    return %arg0, %arg1, %arg2 : i32, i32, i32
  }
}

module attributes {stable_mosaic.version = 11 : i64} {
  func.func @kernel(%arg0: i32, %arg1: i32, %arg2: i32, %arg3: memref<1x8x1152xbf16, #tpu.memory_space<vmem>>, %arg4: memref<1x1152x128xbf16, #tpu.memory_space<vmem>>, %arg5: memref<1x1x128xf32, #tpu.memory_space<vmem>>, %arg6: memref<1x8x128xbf16, #tpu.memory_space<vmem>>, %arg7: memref<1x8x128xbf16, #tpu.memory_space<vmem>>) attributes {dimension_semantics = [#tpu.dimension_semantics<parallel>, #tpu.dimension_semantics<parallel>, #tpu.dimension_semantics<parallel>], iteration_bounds = array<i64: 2, 1, 1>, scalar_prefetch = 0 : i64, scratch_operands = 0 : i64, tpu.core_type = #tpu.core_type<tc>, window_params = [{transform_indices = @transform_0, window_bounds = array<i64: 1, 8, 1152>}, {transform_indices = @transform_1, window_bounds = array<i64: 1, 1152, 128>}, {transform_indices = @transform_2, window_bounds = array<i64: 1, 1, 128>}, {transform_indices = @transform_3, window_bounds = array<i64: 1, 8, 128>}, {transform_indices = @transform_4, window_bounds = array<i64: 1, 8, 128>}]} {
    %c0 = arith.constant 0 : index
    %c0_0 = arith.constant 0 : index
    %c0_1 = arith.constant 0 : index
    %0 = vector.load %arg3[%c0, %c0_0, %c0_1] : memref<1x8x1152xbf16, #tpu.memory_space<vmem>>, vector<1x8x1152xbf16>
    %1 = vector.shape_cast %0 : vector<1x8x1152xbf16> to vector<8x1152xbf16>
    %c0_2 = arith.constant 0 : index
    %c0_3 = arith.constant 0 : index
    %c0_4 = arith.constant 0 : index
    %2 = vector.load %arg4[%c0_2, %c0_3, %c0_4] : memref<1x1152x128xbf16, #tpu.memory_space<vmem>>, vector<1x1152x128xbf16>
    %3 = vector.shape_cast %2 : vector<1x1152x128xbf16> to vector<1152x128xbf16>
    %cst = arith.constant dense<0.000000e+00> : vector<8x128xf32>
    %4 = tpu.matmul %1, %3, %cst {dimension_numbers = #tpu.dot_dimension_numbers<[1], [0], [0], [1], [0, 0, 1, 1], [], []>} : vector<8x1152xbf16>, vector<1152x128xbf16>, vector<8x128xf32> -> vector<8x128xf32>
    %c0_5 = arith.constant 0 : index
    %c0_6 = arith.constant 0 : index
    %c0_7 = arith.constant 0 : index
    %5 = vector.load %arg5[%c0_5, %c0_6, %c0_7] : memref<1x1x128xf32, #tpu.memory_space<vmem>>, vector<1x1x128xf32>
    %6 = vector.shape_cast %5 : vector<1x1x128xf32> to vector<1x128xf32>
    %7 = vector.broadcast %6 : vector<1x128xf32> to vector<8x128xf32>
    %8 = arith.addf %4, %7 : vector<8x128xf32>
    %c0_8 = arith.constant 0 : index
    %c0_9 = arith.constant 0 : index
    %c0_10 = arith.constant 0 : index
    %9 = vector.load %arg6[%c0_8, %c0_9, %c0_10] : memref<1x8x128xbf16, #tpu.memory_space<vmem>>, vector<1x8x128xbf16>
    %10 = vector.shape_cast %9 : vector<1x8x128xbf16> to vector<8x128xbf16>
    %11 = arith.extf %10 : vector<8x128xbf16> to vector<8x128xf32>
    %12 = arith.addf %8, %11 : vector<8x128xf32>
    %cst_11 = arith.constant 0.000000e+00 : f32
    %13 = vector.broadcast %cst_11 : f32 to vector<8x128xf32>
    %14 = arith.maximumf %12, %13 : vector<8x128xf32>
    %15 = arith.truncf %14 : vector<8x128xf32> to vector<8x128xbf16>
    %c0_12 = arith.constant 0 : index
    %c0_13 = arith.constant 0 : index
    %c0_14 = arith.constant 0 : index
    %16 = vector.load %arg7[%c0_12, %c0_13, %c0_14] : memref<1x8x128xbf16, #tpu.memory_space<vmem>>, vector<1x8x128xbf16>
    %17 = vector.shape_cast %16 : vector<1x8x128xbf16> to vector<8x128xbf16>
    %18 = vector.shape_cast %15 : vector<8x128xbf16> to vector<1x8x128xbf16>
    tpu.vector_store %arg7[%c0_12, %c0_13, %c0_14], %18 {strides = array<i32>} : memref<1x8x128xbf16, #tpu.memory_space<vmem>>, vector<1x8x128xbf16>,
    return
  }
  func.func @transform_0(%arg0: i32, %arg1: i32, %arg2: i32) -> (i32, i32, i32) {
    %c0_i32 = arith.constant 0 : i32
    %c0_i32_0 = arith.constant 0 : i32
    return %arg0, %arg1, %c0_i32 : i32, i32, i32
  }
  func.func @transform_1(%arg0: i32, %arg1: i32, %arg2: i32) -> (i32, i32, i32) {
    %c0_i32 = arith.constant 0 : i32
    %c0_i32_0 = arith.constant 0 : i32
    return %arg0, %c0_i32, %arg2 : i32, i32, i32
  }
  func.func @transform_2(%arg0: i32, %arg1: i32, %arg2: i32) -> (i32, i32, i32) {
    %c0_i32 = arith.constant 0 : i32
    %c0_i32_0 = arith.constant 0 : i32
    return %arg0, %c0_i32, %arg2 : i32, i32, i32
  }
  func.func @transform_3(%arg0: i32, %arg1: i32, %arg2: i32) -> (i32, i32, i32) {
    %c0_i32 = arith.constant 0 : i32
    return %arg0, %arg1, %arg2 : i32, i32, i32
  }
  func.func @transform_4(%arg0: i32, %arg1: i32, %arg2: i32) -> (i32, i32, i32) {
    %c0_i32 = arith.constant 0 : i32
    return %arg0, %arg1, %arg2 : i32, i32, i32
  }
}

</mosaic_0001>

<bundles_post_ra>
// kernel: backbone_forward.9
= control target key start
LH: loop header
LB: loop body
LE: loop exit
PB: predicated region body
PF: predicated region fallthrough
CT: control target
= control target key end

     0   :  { %s1618_s12 = smov 0   ;;  %s1620_s13 = smov 0   ;;  %s1788_s0 = inlined_call_operand.vmem [shape: bf16[2,512,256], index: 0, kind: input, shape index: {}]   ;;  %s1789_s1 = inlined_call_operand.vmem [shape: bf16[2,256,128], index: 1, kind: input, shape index: {}]   ;;  %s1790_s2 = inlined_call_operand.vmem [shape: f32[2,1,128], index: 2, kind: input, shape index: {}]   ;;  %s1791_s3 = inlined_call_operand.vmem [shape: bf16[2,512,128], index: 3, kind: output, shape index: {}]  }
   0x1   :  { %s1622_s14 = smov 0   ;;  %s1624_s15 = smov 0  }
   0x2   :  { %s1626_s16 = smov 0  }
   0x3 LB: > { %s28_s17 = sadd.s32 1, %s1588_s14  ;;  %s32_s18 = sadd.s32 1, %s1592_s15  ;;  %s1596_s16 = sphi %s1626_s16, %s13_s16   ;;  %s1592_s15 = sphi %s1624_s15, %s1795_s15   ;;  %s1588_s14 = sphi %s1622_s14, %s1794_s14   ;;  %s1584_s13 = sphi %s1620_s13, %s1793_s13   ;;  %s1580_s12 = sphi %s1618_s12, %s1792_s12  }
   0x4   : > { %p30_p0 = scmp.ge.s32.totalorder %s28_s17, 2  ;;  %p1105_p1 = scmp.ge.s32.totalorder %s1596_s16, 1 }
   0x5   : > { %p196_p2 = scmp.lt.s32.totalorder %s1596_s16, 5 }
   0x6   : > { %s1797_s17 = smov (%p30_p0, %s28_s17), 0  ;;  %s1799_s18 = smov (!%p30_p0, %s32_s18), %s1592_s15 }
   0x7   : > { %p197_p3 = pnand %p1105_p1, %p196_p2  ;;  %p34_p4 = scmp.ge.s32.totalorder %s1799_s18, 2 }
   0x8   : > { %p247_p5 = scmp.lt.s32.totalorder (!%p197_p3), %s1584_s13, 1  ;;  %s1106_s19 = sshll.u32 (!%p197_p3), %s1580_s12, 5 }
   0x9   : > { %s1801_s18 = smov (%p34_p4, %s1799_s18), 0  ;;  %200 = sbr.rel (%p197_p3) target bundleno = 314 (0x13a), region = 32 }
   0xa   : > { %p249_p6 = scmp.lt.s32.totalorder (!%p197_p3), %s1106_s19, 63 }
   0xe   : > { %s1803_s13 = smov (!%p247_p5, %s1584_s13), 1  ;;  %s1805_s19 = smov (!%p249_p6, %s1106_s19), 63 }
   0xf   : > { %s1108_s20 = sshll.u32 %s1803_s13, 7  ;;  %s1107_s24 = sshll.u32 %s1805_s19, 1 }
  0x10   : > { %s1654_s23 = scalar_lea.vmem %s1789_s1, %s1108_s20  ;;  %s253_s25 = sadd.s32 %s1108_s20, %s1107_s24 }
  0x11   : > { %v1494_v0 = vld [vmem:[%s1654_s23 + $0x78] sm:$0xff]   ;;  %v1496_v2 = vld [vmem:[%s1654_s23 + $0x70] sm:$0xff]   ;;  %v1498_v4 = vld [vmem:[%s1654_s23 + $0x68] sm:$0xff]   ;;  %s1109_s26 = sshll.u32 %s253_s25, 2  ;;  %s270_s5 = scalar_lea.vmem %s1790_s2, %s1803_s13 }
  0x12   : > { %v1495_v1 = vld [vmem:[%s1654_s23 + $0x38] sm:$0xff]   ;;  %1326 = vmatprep.subr.bf16.mxu0 %v1494_v0  ;;  %1438 = vmatprep.subr.bf16.mxu1 %v1494_v0  ;;  %v1497_v3 = vld [vmem:[%s1654_s23 + $0x30] sm:$0xff]   ;;  %v1499_v5 = vld [vmem:[%s1654_s23 + $0x28] sm:$0xff]   ;;  %s1671_s29 = scalar_lea.vmem %s1788_s0, %s1109_s26  ;;  %s1113_s6 = sshll.u32 %s1803_s13, 6 }
  0x13   : > { %1327 = vmatpush3.bf16.msra.mxu0 %v1495_v1  ;;  %1446 = vmatpush3.bf16.msra.mxu1 %v1495_v1  ;;  %v1500_v6 = vld [vmem:[%s1654_s23 + $0x60] sm:$0xff]   ;;  %v1502_v8 = vld [vmem:[%s1654_s23 + $0x58] sm:$0xff]   ;;  %v1504_v10 = vld [vmem:[%s1654_s23 + $0x50] sm:$0xff]   ;;  %s280_s7 = sadd.s32 %s1113_s6, %s1805_s19 }
  0x14   : > { %1328 = vmatprep.subr.bf16.mxu0 %v1496_v2  ;;  %1439 = vmatprep.subr.bf16.mxu1 %v1496_v2  ;;  %v1501_v7 = vld [vmem:[%s1654_s23 + $0x20] sm:$0xff]   ;;  %v1503_v9 = vld [vmem:[%s1654_s23 + $0x18] sm:$0xff]   ;;  %v1505_v13 = vld [vmem:[%s1654_s23 + $0x10] sm:$0xff]   ;;  %s1114_s8 = sshll.u32 %s280_s7, 2 }
  0x15   : > { %v1512_v11 = vld [vmem:[%s1671_s29 + $0x4] ss:$8 sps:$4 sm:$0xff]   ;;  %v1510_v18 = vld [vmem:[%s1671_s29] ss:$8 sps:$4 sm:$0xff]   ;;  %v1516_v20 = vld [vmem:[%s1671_s29 + $0x14] ss:$8 sps:$4 sm:$0xff]   ;;  %s1727_s11 = scalar_lea.vmem %s1791_s3, %s1114_s8 }
  0x16   : > { %v1515_v12 = vld [vmem:[%s1671_s29 + $0x84] ss:$8 sps:$4 sm:$0xff]   ;;  %644 = vmatprep.mubr.bf16.mxu0 %v1512_v11  ;;  %v1513_v19 = vld [vmem:[%s1671_s29 + $0x80] ss:$8 sps:$4 sm:$0xff]   ;;  %v1518_v21 = vld [vmem:[%s1671_s29 + $0x94] ss:$8 sps:$4 sm:$0xff]  }
  0x17   : > { %1329 = vmatpush3.bf16.msra.mxu0 %v1497_v3  ;;  %1447 = vmatpush3.bf16.msra.mxu1 %v1497_v3  ;;  %v1506_v14 = vld [vmem:[%s1654_s23 + $0x48] sm:$0xff]   ;;  %v1508_v16 = vld [vmem:[%s1654_s23 + $0x40] sm:$0xff]   ;;  %v1520_v22 = vld [vmem:[%s1671_s29 + $0x10] ss:$8 sps:$4 sm:$0xff]  }
  0x18   : > { %1330 = vmatprep.subr.bf16.mxu0 %v1498_v4  ;;  %1440 = vmatprep.subr.bf16.mxu1 %v1498_v4  ;;  %v1507_v15 = vld [vmem:[%s1654_s23 + $0x8] sm:$0xff]   ;;  %v1509_v17 = vld [vmem:[%s1654_s23] sm:$0xff]   ;;  %v1521_v23 = vld [vmem:[%s1671_s29 + $0x90] ss:$8 sps:$4 sm:$0xff]  }
  0x19   : > { %708 = vmatprep.mubr.bf16.mxu1 %v1515_v12  ;;  %v1522_v24 = vld [vmem:[%s1671_s29 + $0x24] ss:$8 sps:$4 sm:$0xff]   ;;  %v1526_v26 = vld [vmem:[%s1671_s29 + $0x20] ss:$8 sps:$4 sm:$0xff]   ;;  %v1528_v28 = vld [vmem:[%s1671_s29 + $0x34] ss:$8 sps:$4 sm:$0xff]  }
  0x1a   : > { %v1524_v25 = vld [vmem:[%s1671_s29 + $0xa4] ss:$8 sps:$4 sm:$0xff]   ;;  %v1527_v27 = vld [vmem:[%s1671_s29 + $0xa0] ss:$8 sps:$4 sm:$0xff]   ;;  %v1530_v29 = vld [vmem:[%s1671_s29 + $0xb4] ss:$8 sps:$4 sm:$0xff]  }
  0x1b   : > { %1331 = vmatpush3.bf16.msra.mxu0 %v1499_v5  ;;  %1448 = vmatpush3.bf16.msra.mxu1 %v1499_v5  ;;  %v1532_v30 = vld [vmem:[%s1671_s29 + $0x30] ss:$8 sps:$4 sm:$0xff]   ;;  %v1534_v32 = vld [vmem:[%s1671_s29 + $0x44] ss:$8 sps:$4 sm:$0xff]   ;;  %v1538_v34 = vld [vmem:[%s1671_s29 + $0x40] ss:$8 sps:$4 sm:$0xff]  }
  0x1c   : > { %1332 = vmatprep.subr.bf16.mxu0 %v1500_v6  ;;  %1441 = vmatprep.subr.bf16.mxu1 %v1500_v6  ;;  %v1533_v31 = vld [vmem:[%s1671_s29 + $0xb0] ss:$8 sps:$4 sm:$0xff]   ;;  %v1536_v33 = vld [vmem:[%s1671_s29 + $0xc4] ss:$8 sps:$4 sm:$0xff]   ;;  %v1539_v35 = vld [vmem:[%s1671_s29 + $0xc0] ss:$8 sps:$4 sm:$0xff]  }
  0x1d   : > { %v1540_v36 = vld [vmem:[%s1671_s29 + $0x54] ss:$8 sps:$4 sm:$0xff]   ;;  %v1544_v38 = vld [vmem:[%s1671_s29 + $0x50] ss:$8 sps:$4 sm:$0xff]   ;;  %v1546_v40 = vld [vmem:[%s1671_s29 + $0x64] ss:$8 sps:$4 sm:$0xff]  }
  0x1e   : > { %v1542_v37 = vld [vmem:[%s1671_s29 + $0xd4] ss:$8 sps:$4 sm:$0xff]   ;;  %v1545_v39 = vld [vmem:[%s1671_s29 + $0xd0] ss:$8 sps:$4 sm:$0xff]   ;;  %v1548_v41 = vld [vmem:[%s1671_s29 + $0xe4] ss:$8 sps:$4 sm:$0xff]  }
  0x1f   : > { %1333 = vmatpush3.bf16.msra.mxu0 %v1501_v7  ;;  %1449 = vmatpush3.bf16.msra.mxu1 %v1501_v7  ;;  %v1550_v42 = vld [vmem:[%s1671_s29 + $0x60] ss:$8 sps:$4 sm:$0xff]   ;;  %v1552_v44 = vld [vmem:[%s1671_s29 + $0x74] ss:$8 sps:$4 sm:$0xff]   ;;  %v1556_v46 = vld [vmem:[%s1671_s29 + $0x70] ss:$8 sps:$4 sm:$0xff]  }
  0x20   : > { %1334 = vmatprep.subr.bf16.mxu0 %v1502_v8  ;;  %1442 = vmatprep.subr.bf16.mxu1 %v1502_v8  ;;  %v1551_v43 = vld [vmem:[%s1671_s29 + $0xe0] ss:$8 sps:$4 sm:$0xff]   ;;  %v1554_v45 = vld [vmem:[%s1671_s29 + $0xf4] ss:$8 sps:$4 sm:$0xff]   ;;  %v1557_v47 = vld [vmem:[%s1671_s29 + $0xf0] ss:$8 sps:$4 sm:$0xff]  }
  0x21   : > { %v1716_v52 = vld [vmem:[%s270_s5] ss:$0 sm:$0xff] }
  0x23   : > { %1335 = vmatpush3.bf16.msra.mxu0 %v1503_v9  ;;  %1450 = vmatpush3.bf16.msra.mxu1 %v1503_v9 }
  0x24   : > { %1336 = vmatprep.subr.bf16.mxu0 %v1504_v10  ;;  %1443 = vmatprep.subr.bf16.mxu1 %v1504_v10 }
  0x27   : > { %1337 = vmatpush3.bf16.msra.mxu0 %v1505_v13  ;;  %1451 = vmatpush3.bf16.msra.mxu1 %v1505_v13 }
  0x28   : > { %1338 = vmatprep.subr.bf16.mxu0 %v1506_v14  ;;  %1444 = vmatprep.subr.bf16.mxu1 %v1506_v14 }
  0x2b   : > { %1339 = vmatpush3.bf16.msra.mxu0 %v1507_v15  ;;  %1452 = vmatpush3.bf16.msra.mxu1 %v1507_v15 }
  0x2c   : > { %1340 = vmatprep.subr.bf16.mxu0 %v1508_v16  ;;  %1445 = vmatprep.subr.bf16.mxu1 %v1508_v16 }
  0x2f   : > { %1341 = vmatpush3.bf16.msra.mxu0 %v1509_v17  ;;  %1453 = vmatpush3.bf16.msra.mxu1 %v1509_v17 }
  0x32   : > { %645 = vmatmul.mubr.bf16.vlgmr.msra.gmra.mxu0 %v1510_v18  ;;  %709 = vmatmul.mubr.bf16.vlgmr.msra.gmra.mxu1 %v1513_v19 }
  0x33   : > { %652 = vmatprep.mubr.bf16.mxu0 %v1516_v20  ;;  %716 = vmatprep.mubr.bf16.mxu1 %v1518_v21 }
  0x3a   : > { %653 = vmatmul.mubr.bf16.gmra.mxu0 %v1520_v22  ;;  %717 = vmatmul.mubr.bf16.gmra.mxu1 %v1521_v23 }
  0x3b   : > { %660 = vmatprep.mubr.bf16.mxu0 %v1522_v24  ;;  %724 = vmatprep.mubr.bf16.mxu1 %v1524_v25 }
  0x42   : > { %661 = vmatmul.mubr.bf16.gmra.mxu0 %v1526_v26  ;;  %725 = vmatmul.mubr.bf16.gmra.mxu1 %v1527_v27 }
  0x43   : > { %668 = vmatprep.mubr.bf16.mxu0 %v1528_v28  ;;  %732 = vmatprep.mubr.bf16.mxu1 %v1530_v29 }
  0x4a   : > { %669 = vmatmul.mubr.bf16.gmra.mxu0 %v1532_v30  ;;  %733 = vmatmul.mubr.bf16.gmra.mxu1 %v1533_v31 }
  0x4b   : > { %676 = vmatprep.mubr.bf16.mxu0 %v1534_v32  ;;  %740 = vmatprep.mubr.bf16.mxu1 %v1536_v33 }
  0x52   : > { %677 = vmatmul.mubr.bf16.gmra.mxu0 %v1538_v34  ;;  %741 = vmatmul.mubr.bf16.gmra.mxu1 %v1539_v35 }
  0x53   : > { %684 = vmatprep.mubr.bf16.mxu0 %v1540_v36  ;;  %748 = vmatprep.mubr.bf16.mxu1 %v1542_v37 }
  0x5a   : > { %685 = vmatmul.mubr.bf16.gmra.mxu0 %v1544_v38  ;;  %749 = vmatmul.mubr.bf16.gmra.mxu1 %v1545_v39 }
  0x5b   : > { %692 = vmatprep.mubr.bf16.mxu0 %v1546_v40  ;;  %756 = vmatprep.mubr.bf16.mxu1 %v1548_v41 }
  0x62   : > { %693 = vmatmul.mubr.bf16.gmra.mxu0 %v1550_v42  ;;  %757 = vmatmul.mubr.bf16.gmra.mxu1 %v1551_v43 }
  0x63   : > { %700 = vmatprep.mubr.bf16.mxu0 %v1552_v44  ;;  %764 = vmatprep.mubr.bf16.mxu1 %v1554_v45 }
  0x6a   : > { %701 = vmatmul.mubr.bf16.gmra.mxu0 %v1556_v46  ;;  %765 = vmatmul.mubr.bf16.gmra.mxu1 %v1557_v47 }
  0xf2   : > { %v1342_v48 = vpop.f32.mrf.mxu0  ;;  %v1390_v49 = vpop.f32.mrf.mxu1 }
  0xf4   : > { %v1343_v50 = vpop.f32.mrf.mxu0  ;;  %v1391_v51 = vpop.f32.mrf.mxu1 }
  0xf5   : > { %v1344_v53 = vadd.f32 %v1343_v50, %v1342_v48  ;;  %v1392_v54 = vadd.f32 %v1391_v51, %v1390_v49 }
  0xf6   : > { %v1345_v55 = vpop.f32.mrf.mxu0  ;;  %v1393_v56 = vpop.f32.mrf.mxu1 }
  0xf7   : > { %v647_v57 = vadd.f32 %v1344_v53, %v1716_v52  ;;  %v711_v58 = vadd.f32 %v1392_v54, %v1716_v52 }
  0xf8   : > { %v1346_v59 = vpop.f32.mrf.mxu0  ;;  %v1394_v60 = vpop.f32.mrf.mxu1 }
  0xf9   : > { %v1347_v61 = vadd.f32 %v1346_v59, %v1345_v55  ;;  %v1395_v62 = vadd.f32 %v1394_v60, %v1393_v56  ;;  %v773_v3 = vmax.f32 %v647_v57, 0.0  ;;  %v789_v4 = vmax.f32 %v711_v58, 0.0 }
  0xfa   : > { %v1348_v63 = vpop.f32.mrf.mxu0  ;;  %v1396_v0 = vpop.f32.mrf.mxu1 }
  0xfb   : > { %v650_v1 = vadd.f32 %v1347_v61, %v1716_v52  ;;  %v714_v2 = vadd.f32 %v1395_v62, %v1716_v52 }
  0xfc   : > { %v1349_v5 = vpop.f32.mrf.mxu0  ;;  %v1397_v6 = vpop.f32.mrf.mxu1 }
  0xfd   : > { %v774_v7 = vmax.f32 %v650_v1, 0.0  ;;  %v790_v8 = vmax.f32 %v714_v2, 0.0  ;;  %v1350_v9 = vadd.f32 %v1349_v5, %v1348_v63  ;;  %v1398_v10 = vadd.f32 %v1397_v6, %v1396_v0 }
  0xfe   : > { %v1351_v11 = vpop.f32.mrf.mxu0  ;;  %v1399_v12 = vpop.f32.mrf.mxu1 }
  0xff   : > { %v1234_v13 = vpack.c.bf16 %v774_v7, %v773_v3  ;;  %v1274_v14 = vpack.c.bf16 %v790_v8, %v789_v4  ;;  %v655_v15 = vadd.f32 %v1350_v9, %v1716_v52  ;;  %v719_v16 = vadd.f32 %v1398_v10, %v1716_v52 }
 0x100   : > { %v1352_v17 = vpop.f32.mrf.mxu0  ;;  %v1400_v18 = vpop.f32.mrf.mxu1 }
 0x101   : > { %1235 = vst [vmem:[%s1727_s11] sm:$0xff] %v1234_v13   ;;  %1318 = vst [vmem:[%s1727_s11 + $0x40] sm:$0xff] %v1274_v14   ;;  %v1353_v19 = vadd.f32 %v1352_v17, %v1351_v11  ;;  %v1401_v20 = vadd.f32 %v1400_v18, %v1399_v12  ;;  %v775_v25 = vmax.f32 %v655_v15, 0.0  ;;  %v791_v26 = vmax.f32 %v719_v16, 0.0 }
 0x102   : > { %v1354_v21 = vpop.f32.mrf.mxu0  ;;  %v1402_v22 = vpop.f32.mrf.mxu1 }
 0x103   : > { %v658_v23 = vadd.f32 %v1353_v19, %v1716_v52  ;;  %v722_v24 = vadd.f32 %v1401_v20, %v1716_v52 }
 0x104   : > { %v1355_v27 = vpop.f32.mrf.mxu0  ;;  %v1403_v28 = vpop.f32.mrf.mxu1 }
 0x105   : > { %v776_v29 = vmax.f32 %v658_v23, 0.0  ;;  %v792_v30 = vmax.f32 %v722_v24, 0.0  ;;  %v1356_v31 = vadd.f32 %v1355_v27, %v1354_v21  ;;  %v1404_v32 = vadd.f32 %v1403_v28, %v1402_v22 }
 0x106   : > { %v1357_v33 = vpop.f32.mrf.mxu0  ;;  %v1405_v34 = vpop.f32.mrf.mxu1 }
 0x107   : > { %v1239_v35 = vpack.c.bf16 %v776_v29, %v775_v25  ;;  %v1279_v36 = vpack.c.bf16 %v792_v30, %v791_v26  ;;  %v663_v37 = vadd.f32 %v1356_v31, %v1716_v52  ;;  %v727_v38 = vadd.f32 %v1404_v32, %v1716_v52 }
 0x108   : > { %v1358_v39 = vpop.f32.mrf.mxu0  ;;  %v1406_v40 = vpop.f32.mrf.mxu1 }
 0x109   : > { %1311 = vst [vmem:[%s1727_s11 + $0x8] sm:$0xff] %v1239_v35   ;;  %1319 = vst [vmem:[%s1727_s11 + $0x48] sm:$0xff] %v1279_v36   ;;  %v1359_v41 = vadd.f32 %v1358_v39, %v1357_v33  ;;  %v1407_v42 = vadd.f32 %v1406_v40, %v1405_v34  ;;  %v777_v47 = vmax.f32 %v663_v37, 0.0  ;;  %v793_v48 = vmax.f32 %v727_v38, 0.0 }
 0x10a   : > { %v1360_v43 = vpop.f32.mrf.mxu0  ;;  %v1408_v44 = vpop.f32.mrf.mxu1 }
 0x10b   : > { %v666_v45 = vadd.f32 %v1359_v41, %v1716_v52  ;;  %v730_v46 = vadd.f32 %v1407_v42, %v1716_v52 }
 0x10c   : > { %v1361_v49 = vpop.f32.mrf.mxu0  ;;  %v1409_v50 = vpop.f32.mrf.mxu1 }
 0x10d   : > { %v778_v51 = vmax.f32 %v666_v45, 0.0  ;;  %v794_v53 = vmax.f32 %v730_v46, 0.0  ;;  %v1362_v54 = vadd.f32 %v1361_v49, %v1360_v43  ;;  %v1410_v55 = vadd.f32 %v1409_v50, %v1408_v44 }
 0x10e   : > { %v1363_v56 = vpop.f32.mrf.mxu0  ;;  %v1411_v57 = vpop.f32.mrf.mxu1 }
 0x10f   : > { %v1244_v58 = vpack.c.bf16 %v778_v51, %v777_v47  ;;  %v1284_v59 = vpack.c.bf16 %v794_v53, %v793_v48  ;;  %v671_v60 = vadd.f32 %v1362_v54, %v1716_v52  ;;  %v735_v61 = vadd.f32 %v1410_v55, %v1716_v52 }
 0x110   : > { %v1364_v62 = vpop.f32.mrf.mxu0  ;;  %v1412_v63 = vpop.f32.mrf.mxu1 }
 0x111   : > { %1312 = vst [vmem:[%s1727_s11 + $0x10] sm:$0xff] %v1244_v58   ;;  %1320 = vst [vmem:[%s1727_s11 + $0x50] sm:$0xff] %v1284_v59   ;;  %v1365_v0 = vadd.f32 %v1364_v62, %v1363_v56  ;;  %v1413_v1 = vadd.f32 %v1412_v63, %v1411_v57  ;;  %v779_v6 = vmax.f32 %v671_v60, 0.0  ;;  %v795_v7 = vmax.f32 %v735_v61, 0.0 }
 0x112   : > { %v1366_v2 = vpop.f32.mrf.mxu0  ;;  %v1414_v3 = vpop.f32.mrf.mxu1 }
 0x113   : > { %v674_v4 = vadd.f32 %v1365_v0, %v1716_v52  ;;  %v738_v5 = vadd.f32 %v1413_v1, %v1716_v52 }
 0x114   : > { %v1367_v8 = vpop.f32.mrf.mxu0  ;;  %v1415_v9 = vpop.f32.mrf.mxu1 }
 0x115   : > { %v780_v10 = vmax.f32 %v674_v4, 0.0  ;;  %v796_v11 = vmax.f32 %v738_v5, 0.0  ;;  %v1368_v12 = vadd.f32 %v1367_v8, %v1366_v2  ;;  %v1416_v13 = vadd.f32 %v1415_v9, %v1414_v3 }
 0x116   : > { %v1369_v14 = vpop.f32.mrf.mxu0  ;;  %v1417_v15 = vpop.f32.mrf.mxu1 }
 0x117   : > { %v1249_v16 = vpack.c.bf16 %v780_v10, %v779_v6  ;;  %v1289_v17 = vpack.c.bf16 %v796_v11, %v795_v7  ;;  %v679_v18 = vadd.f32 %v1368_v12, %v1716_v52  ;;  %v743_v19 = vadd.f32 %v1416_v13, %v1716_v52 }
 0x118   : > { %v1370_v20 = vpop.f32.mrf.mxu0  ;;  %v1418_v21 = vpop.f32.mrf.mxu1 }
 0x119   : > { %1313 = vst [vmem:[%s1727_s11 + $0x18] sm:$0xff] %v1249_v16   ;;  %1321 = vst [vmem:[%s1727_s11 + $0x58] sm:$0xff] %v1289_v17   ;;  %v1371_v22 = vadd.f32 %v1370_v20, %v1369_v14  ;;  %v1419_v23 = vadd.f32 %v1418_v21, %v1417_v15  ;;  %v781_v28 = vmax.f32 %v679_v18, 0.0  ;;  %v797_v29 = vmax.f32 %v743_v19, 0.0 }
 0x11a   : > { %v1372_v24 = vpop.f32.mrf.mxu0  ;;  %v1420_v25 = vpop.f32.mrf.mxu1 }
 0x11b   : > { %v682_v26 = vadd.f32 %v1371_v22, %v1716_v52  ;;  %v746_v27 = vadd.f32 %v1419_v23, %v1716_v52 }
 0x11c   : > { %v1373_v30 = vpop.f32.mrf.mxu0  ;;  %v1421_v31 = vpop.f32.mrf.mxu1 }
 0x11d   : > { %v782_v32 = vmax.f32 %v682_v26, 0.0  ;;  %v798_v33 = vmax.f32 %v746_v27, 0.0  ;;  %v1374_v34 = vadd.f32 %v1373_v30, %v1372_v24  ;;  %v1422_v35 = vadd.f32 %v1421_v31, %v1420_v25 }
 0x11e   : > { %v1375_v36 = vpop.f32.mrf.mxu0  ;;  %v1423_v37 = vpop.f32.mrf.mxu1 }
 0x11f   : > { %v1254_v38 = vpack.c.bf16 %v782_v32, %v781_v28  ;;  %v1294_v39 = vpack.c.bf16 %v798_v33, %v797_v29  ;;  %v687_v40 = vadd.f32 %v1374_v34, %v1716_v52  ;;  %v751_v41 = vadd.f32 %v1422_v35, %v1716_v52 }
 0x120   : > { %v1376_v42 = vpop.f32.mrf.mxu0  ;;  %v1424_v43 = vpop.f32.mrf.mxu1 }
 0x121   : > { %1314 = vst [vmem:[%s1727_s11 + $0x20] sm:$0xff] %v1254_v38   ;;  %1322 = vst [vmem:[%s1727_s11 + $0x60] sm:$0xff] %v1294_v39   ;;  %v1377_v44 = vadd.f32 %v1376_v42, %v1375_v36  ;;  %v1425_v45 = vadd.f32 %v1424_v43, %v1423_v37  ;;  %v783_v50 = vmax.f32 %v687_v40, 0.0  ;;  %v799_v51 = vmax.f32 %v751_v41, 0.0 }
 0x122   : > { %v1378_v46 = vpop.f32.mrf.mxu0  ;;  %v1426_v47 = vpop.f32.mrf.mxu1 }
 0x123   : > { %v690_v48 = vadd.f32 %v1377_v44, %v1716_v52  ;;  %v754_v49 = vadd.f32 %v1425_v45, %v1716_v52 }
 0x124   : > { %v1379_v53 = vpop.f32.mrf.mxu0  ;;  %v1427_v54 = vpop.f32.mrf.mxu1 }
 0x125   : > { %v784_v55 = vmax.f32 %v690_v48, 0.0  ;;  %v800_v56 = vmax.f32 %v754_v49, 0.0  ;;  %v1380_v57 = vadd.f32 %v1379_v53, %v1378_v46  ;;  %v1428_v58 = vadd.f32 %v1427_v54, %v1426_v47 }
 0x126   : > { %v1381_v59 = vpop.f32.mrf.mxu0  ;;  %v1429_v60 = vpop.f32.mrf.mxu1 }
 0x127   : > { %v1259_v61 = vpack.c.bf16 %v784_v55, %v783_v50  ;;  %v1299_v62 = vpack.c.bf16 %v800_v56, %v799_v51  ;;  %v695_v63 = vadd.f32 %v1380_v57, %v1716_v52  ;;  %v759_v0 = vadd.f32 %v1428_v58, %v1716_v52 }
 0x128   : > { %v1382_v1 = vpop.f32.mrf.mxu0  ;;  %v1430_v2 = vpop.f32.mrf.mxu1 }
 0x129   : > { %1315 = vst [vmem:[%s1727_s11 + $0x28] sm:$0xff] %v1259_v61   ;;  %1323 = vst [vmem:[%s1727_s11 + $0x68] sm:$0xff] %v1299_v62   ;;  %v1383_v3 = vadd.f32 %v1382_v1, %v1381_v59  ;;  %v1431_v4 = vadd.f32 %v1430_v2, %v1429_v60  ;;  %v785_v9 = vmax.f32 %v695_v63, 0.0  ;;  %v801_v10 = vmax.f32 %v759_v0, 0.0 }
 0x12a   : > { %v1384_v5 = vpop.f32.mrf.mxu0  ;;  %v1432_v6 = vpop.f32.mrf.mxu1 }
 0x12b   : > { %v698_v7 = vadd.f32 %v1383_v3, %v1716_v52  ;;  %v762_v8 = vadd.f32 %v1431_v4, %v1716_v52 }
 0x12c   : > { %v1385_v11 = vpop.f32.mrf.mxu0  ;;  %v1433_v12 = vpop.f32.mrf.mxu1 }
 0x12d   : > { %v786_v13 = vmax.f32 %v698_v7, 0.0  ;;  %v802_v14 = vmax.f32 %v762_v8, 0.0  ;;  %v1386_v15 = vadd.f32 %v1385_v11, %v1384_v5  ;;  %v1434_v16 = vadd.f32 %v1433_v12, %v1432_v6 }
 0x12e   : > { %v1387_v17 = vpop.f32.mrf.mxu0  ;;  %v1435_v18 = vpop.f32.mrf.mxu1 }
 0x12f   : > { %v1264_v19 = vpack.c.bf16 %v786_v13, %v785_v9  ;;  %v1304_v20 = vpack.c.bf16 %v802_v14, %v801_v10  ;;  %v703_v23 = vadd.f32 %v1386_v15, %v1716_v52  ;;  %v767_v24 = vadd.f32 %v1434_v16, %v1716_v52 }
 0x130   : > { %v1388_v21 = vpop.f32.mrf.mxu0  ;;  %v1436_v22 = vpop.f32.mrf.mxu1 }
 0x131   : > { %1316 = vst [vmem:[%s1727_s11 + $0x30] sm:$0xff] %v1264_v19   ;;  %1324 = vst [vmem:[%s1727_s11 + $0x70] sm:$0xff] %v1304_v20   ;;  %v1389_v25 = vadd.f32 %v1388_v21, %v1387_v17  ;;  %v1437_v26 = vadd.f32 %v1436_v22, %v1435_v18  ;;  %v787_v29 = vmax.f32 %v703_v23, 0.0  ;;  %v803_v30 = vmax.f32 %v767_v24, 0.0 }
 0x133   : > { %v706_v27 = vadd.f32 %v1389_v25, %v1716_v52  ;;  %v770_v28 = vadd.f32 %v1437_v26, %v1716_v52 }
 0x135   : > { %v788_v31 = vmax.f32 %v706_v27, 0.0  ;;  %v804_v32 = vmax.f32 %v770_v28, 0.0 }
 0x137   : > { %v1269_v33 = vpack.c.bf16 %v788_v31, %v787_v29  ;;  %v1309_v34 = vpack.c.bf16 %v804_v32, %v803_v30 }
 0x139   : > { %1317 = vst [vmem:[%s1727_s11 + $0x38] sm:$0xff] %v1269_v33   ;;  %1325 = vst [vmem:[%s1727_s11 + $0x78] sm:$0xff] %v1309_v34  }
 0x13a PF: > { %s13_s16 = sadd.s32 1, %s1596_s16   ;;  %s1792_s12 = smov %s1588_s14 }
 0x13b   : > { %p10_p7 = scmp.ge.s32.totalorder %s13_s16, 6   ;;  %s1793_s13 = smov %s1592_s15 }
 0x13c   : > { %s1794_s14 = smov %s1797_s17  ;;  %s1795_s15 = smov %s1801_s18 }
 0x13d   :  { %12 = sbr.rel (!%p10_p7) target bundleno = 3 (0x3), region = 68 }

// kernel: backbone_forward.10
= control target key start
LH: loop header
LB: loop body
LE: loop exit
PB: predicated region body
PF: predicated region fallthrough
CT: control target
= control target key end

     0   :  { %s3259_s15 = smov 0   ;;  %s3261_s16 = smov 0   ;;  %s3918_s0 = inlined_call_operand.vmem [shape: bf16[2,128,1152], index: 0, kind: input, shape index: {}]   ;;  %s3919_s1 = inlined_call_operand.vmem [shape: bf16[2,1152,256], index: 1, kind: input, shape index: {}]   ;;  %s3920_s2 = inlined_call_operand.vmem [shape: f32[2,1,256], index: 2, kind: input, shape index: {}]   ;;  %s3921_s3 = inlined_call_operand.vmem [shape: f32[1,256], index: 3, kind: input, shape index: {}]   ;;  %s3922_s4 = inlined_call_operand.vmem [shape: bf16[2,128,256], index: 4, kind: output, shape index: {}]  }
   0x1   :  { %s3263_s17 = smov 0  }
   0x2 LB: > { %s33_s18 = sadd.s32 1, %s3227_s16  ;;  %p2589_p0 = scmp.ge.s32.totalorder %s3231_s17, 1  ;;  %s3231_s17 = sphi %s3263_s17, %s14_s17   ;;  %s3227_s16 = sphi %s3261_s16, %s3972_s16   ;;  %s3223_s15 = sphi %s3259_s15, %s3971_s15  }
   0x3   : > { %p35_p1 = scmp.ge.s32.totalorder %s33_s18, 2  ;;  %p236_p2 = scmp.lt.s32.totalorder %s3231_s17, 3 }
   0x5   : > { %s3974_s18 = smov (%p35_p1, %s33_s18), 0  ;;  %p237_p3 = pnand %p2589_p0, %p236_p2 }
   0x7   : > { %240 = sbr.rel (%p237_p3) target bundleno = 443 (0x1bb), region = 36 }
   0xc   : > { %p298_p4 = scmp.lt.s32.totalorder %s3223_s15, 1 }
   0xe   : > { %s3976_s15 = smov (!%p298_p4, %s3223_s15), 1 }
   0xf   : > { %s2863_s19 = smul.u32 1152, %s3976_s15  ;;  %s2592_s27 = sshll.u32 %s3976_s15, 1 }
  0x10   : > { %s2862_s23 = smul.u32 576, %s3976_s15  ;;  %s325_s30 = scalar_lea.vmem %s3920_s2, %s2592_s27 }
  0x11   : > { %s3283_s22 = scalar_lea.vmem %s3919_s1, %s2863_s19  ;;  %s2829_s7 = sshll.u32 %s3976_s15, 7 }
  0x12   : > { %v2889_v0 = vld [vmem:[%s3283_s22 + $0x74] ss:$8 sps:$4 sm:$0xff]   ;;  %v2893_v2 = vld [vmem:[%s3283_s22 + $0x70] ss:$8 sps:$4 sm:$0xff]   ;;  %v2895_v4 = vld [vmem:[%s3283_s22 + $0x64] ss:$8 sps:$4 sm:$0xff]   ;;  %s3334_s26 = scalar_lea.vmem %s3918_s0, %s2862_s23  ;;  %s3792_s10 = scalar_lea.vmem %s3922_s4, %s2829_s7 }
  0x13   : > { %v2891_v1 = vld [vmem:[%s3283_s22 + $0x174] ss:$8 sps:$4 sm:$0xff]   ;;  %1673 = vmatprep.subr.bf16.mxu0 %v2889_v0  ;;  %v2894_v3 = vld [vmem:[%s3283_s22 + $0x170] ss:$8 sps:$4 sm:$0xff]   ;;  %v2897_v5 = vld [vmem:[%s3283_s22 + $0x164] ss:$8 sps:$4 sm:$0xff]  }
  0x14   : > { %1786 = vmatprep.subr.bf16.mxu1 %v2891_v1  ;;  %1674 = vmatpush1.bf16.msra.mxu0 %v2893_v2  ;;  %v2899_v6 = vld [vmem:[%s3283_s22 + $0x60] ss:$8 sps:$4 sm:$0xff]   ;;  %v2901_v8 = vld [vmem:[%s3283_s22 + $0x54] ss:$8 sps:$4 sm:$0xff]   ;;  %v2905_v10 = vld [vmem:[%s3283_s22 + $0x50] ss:$8 sps:$4 sm:$0xff]  }
  0x15   : > { %1787 = vmatpush1.bf16.msra.mxu1 %v2894_v3  ;;  %1675 = vmatprep.subr.bf16.mxu0 %v2895_v4  ;;  %v2900_v7 = vld [vmem:[%s3283_s22 + $0x160] ss:$8 sps:$4 sm:$0xff]   ;;  %v2903_v9 = vld [vmem:[%s3283_s22 + $0x154] ss:$8 sps:$4 sm:$0xff]   ;;  %v2906_v11 = vld [vmem:[%s3283_s22 + $0x150] ss:$8 sps:$4 sm:$0xff]  }
  0x16   : > { %1788 = vmatprep.subr.bf16.mxu1 %v2897_v5  ;;  %v2907_v12 = vld [vmem:[%s3283_s22 + $0x44] ss:$8 sps:$4 sm:$0xff]   ;;  %v2911_v14 = vld [vmem:[%s3283_s22 + $0x40] ss:$8 sps:$4 sm:$0xff]   ;;  %v2913_v16 = vld [vmem:[%s3283_s22 + $0x34] ss:$8 sps:$4 sm:$0xff]  }
  0x17   : > { %v2909_v13 = vld [vmem:[%s3283_s22 + $0x144] ss:$8 sps:$4 sm:$0xff]   ;;  %v2912_v15 = vld [vmem:[%s3283_s22 + $0x140] ss:$8 sps:$4 sm:$0xff]   ;;  %v2915_v17 = vld [vmem:[%s3283_s22 + $0x134] ss:$8 sps:$4 sm:$0xff]  }
  0x18   : > { %1676 = vmatpush1.bf16.msra.mxu0 %v2899_v6  ;;  %v2917_v18 = vld [vmem:[%s3283_s22 + $0x30] ss:$8 sps:$4 sm:$0xff]   ;;  %v2919_v20 = vld [vmem:[%s3283_s22 + $0x24] ss:$8 sps:$4 sm:$0xff]   ;;  %v2923_v22 = vld [vmem:[%s3283_s22 + $0x20] ss:$8 sps:$4 sm:$0xff]  }
  0x19   : > { %1789 = vmatpush1.bf16.msra.mxu1 %v2900_v7  ;;  %1677 = vmatprep.subr.bf16.mxu0 %v2901_v8  ;;  %v2918_v19 = vld [vmem:[%s3283_s22 + $0x130] ss:$8 sps:$4 sm:$0xff]   ;;  %v2921_v21 = vld [vmem:[%s3283_s22 + $0x124] ss:$8 sps:$4 sm:$0xff]   ;;  %v2924_v23 = vld [vmem:[%s3283_s22 + $0x120] ss:$8 sps:$4 sm:$0xff]  }
  0x1a   : > { %1790 = vmatprep.subr.bf16.mxu1 %v2903_v9  ;;  %v2925_v24 = vld [vmem:[%s3283_s22 + $0x14] ss:$8 sps:$4 sm:$0xff]   ;;  %v2929_v26 = vld [vmem:[%s3283_s22 + $0x10] ss:$8 sps:$4 sm:$0xff]   ;;  %v2931_v28 = vld [vmem:[%s3283_s22 + $0x4] ss:$8 sps:$4 sm:$0xff]  }
  0x1b   : > { %v2927_v25 = vld [vmem:[%s3283_s22 + $0x114] ss:$8 sps:$4 sm:$0xff]   ;;  %v2930_v27 = vld [vmem:[%s3283_s22 + $0x110] ss:$8 sps:$4 sm:$0xff]   ;;  %v2933_v29 = vld [vmem:[%s3283_s22 + $0x104] ss:$8 sps:$4 sm:$0xff]  }
  0x1c   : > { %1678 = vmatpush1.bf16.msra.mxu0 %v2905_v10  ;;  %v2935_v30 = vld [vmem:[%s3283_s22] ss:$8 sps:$4 sm:$0xff]   ;;  %v2937_v32 = vld [vmem:[%s3283_s22 + $0xf4] ss:$8 sps:$4 sm:$0xff]   ;;  %v2941_v34 = vld [vmem:[%s3283_s22 + $0xf0] ss:$8 sps:$4 sm:$0xff]  }
  0x1d   : > { %1791 = vmatpush1.bf16.msra.mxu1 %v2906_v11  ;;  %1679 = vmatprep.subr.bf16.mxu0 %v2907_v12  ;;  %v2936_v31 = vld [vmem:[%s3283_s22 + $0x100] ss:$8 sps:$4 sm:$0xff]   ;;  %v2939_v33 = vld [vmem:[%s3283_s22 + $0x1f4] ss:$8 sps:$4 sm:$0xff]   ;;  %v2942_v35 = vld [vmem:[%s3283_s22 + $0x1f0] ss:$8 sps:$4 sm:$0xff]  }
  0x1e   : > { %1792 = vmatprep.subr.bf16.mxu1 %v2909_v13  ;;  %v2943_v36 = vld [vmem:[%s3283_s22 + $0xe4] ss:$8 sps:$4 sm:$0xff]   ;;  %v2947_v38 = vld [vmem:[%s3283_s22 + $0xe0] ss:$8 sps:$4 sm:$0xff]   ;;  %v2949_v40 = vld [vmem:[%s3283_s22 + $0xd4] ss:$8 sps:$4 sm:$0xff]  }
  0x1f   : > { %v2945_v37 = vld [vmem:[%s3283_s22 + $0x1e4] ss:$8 sps:$4 sm:$0xff]   ;;  %v2948_v39 = vld [vmem:[%s3283_s22 + $0x1e0] ss:$8 sps:$4 sm:$0xff]   ;;  %v2951_v41 = vld [vmem:[%s3283_s22 + $0x1d4] ss:$8 sps:$4 sm:$0xff]  }
  0x20   : > { %1680 = vmatpush1.bf16.msra.mxu0 %v2911_v14  ;;  %v2953_v42 = vld [vmem:[%s3283_s22 + $0xd0] ss:$8 sps:$4 sm:$0xff]   ;;  %v2955_v44 = vld [vmem:[%s3283_s22 + $0xc4] ss:$8 sps:$4 sm:$0xff]   ;;  %v2959_v46 = vld [vmem:[%s3283_s22 + $0xc0] ss:$8 sps:$4 sm:$0xff]  }
  0x21   : > { %1793 = vmatpush1.bf16.msra.mxu1 %v2912_v15  ;;  %1681 = vmatprep.subr.bf16.mxu0 %v2913_v16  ;;  %v2954_v43 = vld [vmem:[%s3283_s22 + $0x1d0] ss:$8 sps:$4 sm:$0xff]   ;;  %v2957_v45 = vld [vmem:[%s3283_s22 + $0x1c4] ss:$8 sps:$4 sm:$0xff]   ;;  %v2960_v47 = vld [vmem:[%s3283_s22 + $0x1c0] ss:$8 sps:$4 sm:$0xff]  }
  0x22   : > { %1794 = vmatprep.subr.bf16.mxu1 %v2915_v17  ;;  %v2961_v48 = vld [vmem:[%s3283_s22 + $0xb4] ss:$8 sps:$4 sm:$0xff]   ;;  %v2987_v49 = vld [vmem:[%s3334_s26 + $0x4] ss:$36 sps:$4 sm:$0xff]   ;;  %v2990_v51 = vld [vmem:[%s3334_s26 + $0xc] ss:$36 sps:$4 sm:$0xff]  }
  0x23   : > { %v2963_v50 = vld [vmem:[%s3283_s22 + $0x1b4] ss:$8 sps:$4 sm:$0xff]   ;;  %1705 = vmatprep.mubr.bf16.mxu0 %v2987_v49  ;;  %v2965_v52 = vld [vmem:[%s3283_s22 + $0xb0] ss:$8 sps:$4 sm:$0xff]   ;;  %1818 = vmatprep.mubr.bf16.mxu1 %v2990_v51  ;;  %v2967_v54 = vld [vmem:[%s3283_s22 + $0xa4] ss:$8 sps:$4 sm:$0xff]  }
  0x24   : > { %1682 = vmatpush1.bf16.msra.mxu0 %v2917_v18  ;;  %v2966_v53 = vld [vmem:[%s3283_s22 + $0x1b0] ss:$8 sps:$4 sm:$0xff]   ;;  %v2969_v55 = vld [vmem:[%s3283_s22 + $0x1a4] ss:$8 sps:$4 sm:$0xff]   ;;  %v2971_v56 = vld [vmem:[%s3283_s22 + $0xa0] ss:$8 sps:$4 sm:$0xff]  }
  0x25   : > { %1795 = vmatpush1.bf16.msra.mxu1 %v2918_v19  ;;  %1683 = vmatprep.subr.bf16.mxu0 %v2919_v20  ;;  %v2972_v57 = vld [vmem:[%s3283_s22 + $0x1a0] ss:$8 sps:$4 sm:$0xff]   ;;  %v2973_v58 = vld [vmem:[%s3283_s22 + $0x94] ss:$8 sps:$4 sm:$0xff]   ;;  %v2977_v60 = vld [vmem:[%s3283_s22 + $0x90] ss:$8 sps:$4 sm:$0xff]  }
  0x26   : > { %1796 = vmatprep.subr.bf16.mxu1 %v2921_v21  ;;  %v2975_v59 = vld [vmem:[%s3283_s22 + $0x194] ss:$8 sps:$4 sm:$0xff]   ;;  %v2978_v61 = vld [vmem:[%s3283_s22 + $0x190] ss:$8 sps:$4 sm:$0xff]   ;;  %v2979_v62 = vld [vmem:[%s3283_s22 + $0x84] ss:$8 sps:$4 sm:$0xff]  }
  0x27   : > { %v2981_v63 = vld [vmem:[%s3283_s22 + $0x184] ss:$8 sps:$4 sm:$0xff]   ;;  %v2983_v0 = vld [vmem:[%s3283_s22 + $0x80] ss:$8 sps:$4 sm:$0xff]   ;;  %v2993_v2 = vld [vmem:[%s3283_s22 + $0x274] ss:$8 sps:$4 sm:$0xff]  }
  0x28   : > { %1684 = vmatpush1.bf16.msra.mxu0 %v2923_v22  ;;  %v2984_v1 = vld [vmem:[%s3283_s22 + $0x180] ss:$8 sps:$4 sm:$0xff]   ;;  %v2996_v3 = vld [vmem:[%s3283_s22 + $0x374] ss:$8 sps:$4 sm:$0xff]   ;;  %v2991_v6 = vld [vmem:[%s3283_s22 + $0x270] ss:$8 sps:$4 sm:$0xff]  }
  0x29   : > { %1797 = vmatpush1.bf16.msra.mxu1 %v2924_v23  ;;  %1685 = vmatprep.subr.bf16.mxu0 %v2925_v24  ;;  %v2985_v4 = vld [vmem:[%s3334_s26] ss:$36 sps:$4 sm:$0xff]   ;;  %v2988_v5 = vld [vmem:[%s3334_s26 + $0x8] ss:$36 sps:$4 sm:$0xff]   ;;  %v2994_v7 = vld [vmem:[%s3283_s22 + $0x370] ss:$8 sps:$4 sm:$0xff]  }
  0x2a   : > { %1798 = vmatprep.subr.bf16.mxu1 %v2927_v25  ;;  %v2999_v8 = vld [vmem:[%s3283_s22 + $0x264] ss:$8 sps:$4 sm:$0xff]   ;;  %v3005_v11 = vld [vmem:[%s3334_s26 + $0x54] ss:$36 sps:$4 sm:$0xff]   ;;  %v2997_v12 = vld [vmem:[%s3283_s22 + $0x260] ss:$8 sps:$4 sm:$0xff]  }
  0x2b   : > { %v3002_v9 = vld [vmem:[%s3283_s22 + $0x364] ss:$8 sps:$4 sm:$0xff]   ;;  %v3000_v13 = vld [vmem:[%s3283_s22 + $0x360] ss:$8 sps:$4 sm:$0xff]   ;;  %v3011_v14 = vld [vmem:[%s3283_s22 + $0x254] ss:$8 sps:$4 sm:$0xff]  }
  0x2c   : > { %1686 = vmatpush1.bf16.msra.mxu0 %v2929_v26  ;;  %v3003_v10 = vld [vmem:[%s3334_s26 + $0x4c] ss:$36 sps:$4 sm:$0xff]   ;;  %v3014_v15 = vld [vmem:[%s3283_s22 + $0x354] ss:$8 sps:$4 sm:$0xff]   ;;  %v3015_v24 = vld [vmem:[%s3283_s22 + $0x240] ss:$8 sps:$4 sm:$0xff]  }
  0x2d   : > { %1799 = vmatpush1.bf16.msra.mxu1 %v2930_v27  ;;  %1687 = vmatprep.subr.bf16.mxu0 %v2931_v28  ;;  %v3007_v16 = vld [vmem:[%s3334_s26 + $0x48] ss:$36 sps:$4 sm:$0xff]   ;;  %v3008_v17 = vld [vmem:[%s3334_s26 + $0x50] ss:$36 sps:$4 sm:$0xff]   ;;  %v3023_v23 = vld [vmem:[%s3334_s26 + $0x9c] ss:$36 sps:$4 sm:$0xff]  }
  0x2e   : > { %1800 = vmatprep.subr.bf16.mxu1 %v2933_v29  ;;  %v3009_v18 = vld [vmem:[%s3283_s22 + $0x250] ss:$8 sps:$4 sm:$0xff]   ;;  %v3017_v20 = vld [vmem:[%s3283_s22 + $0x244] ss:$8 sps:$4 sm:$0xff]   ;;  %v3018_v25 = vld [vmem:[%s3283_s22 + $0x340] ss:$8 sps:$4 sm:$0xff]  }
  0x2f   : > { %v3012_v19 = vld [vmem:[%s3283_s22 + $0x350] ss:$8 sps:$4 sm:$0xff]   ;;  %v3020_v21 = vld [vmem:[%s3283_s22 + $0x344] ss:$8 sps:$4 sm:$0xff]   ;;  %v3029_v26 = vld [vmem:[%s3283_s22 + $0x234] ss:$8 sps:$4 sm:$0xff]  }
  0x30   : > { %1688 = vmatpush1.bf16.msra.mxu0 %v2935_v30  ;;  %v3021_v22 = vld [vmem:[%s3334_s26 + $0x94] ss:$36 sps:$4 sm:$0xff]   ;;  %v3054_v49 = vld [vmem:[%s3283_s22 + $0x300] ss:$8 sps:$4 sm:$0xff]  }
  0x31   : > { %1801 = vmatpush1.bf16.msra.mxu1 %v2936_v31  ;;  %1689 = vmatprep.subr.bf16.mxu0 %v2937_v32  ;;  %v3032_v27 = vld [vmem:[%s3283_s22 + $0x334] ss:$8 sps:$4 sm:$0xff]   ;;  %v3027_v30 = vld [vmem:[%s3283_s22 + $0x230] ss:$8 sps:$4 sm:$0xff]   ;;  %v3035_v32 = vld [vmem:[%s3283_s22 + $0x224] ss:$8 sps:$4 sm:$0xff]  }
  0x32   : > { %1802 = vmatprep.subr.bf16.mxu1 %v2939_v33  ;;  %v3025_v28 = vld [vmem:[%s3334_s26 + $0x90] ss:$36 sps:$4 sm:$0xff]   ;;  %v3026_v29 = vld [vmem:[%s3334_s26 + $0x98] ss:$36 sps:$4 sm:$0xff]   ;;  %v3038_v33 = vld [vmem:[%s3283_s22 + $0x324] ss:$8 sps:$4 sm:$0xff]  }
  0x33   : > { %v3030_v31 = vld [vmem:[%s3283_s22 + $0x330] ss:$8 sps:$4 sm:$0xff]   ;;  %v3068_v51 = vld [vmem:[%s3283_s22 + $0x3f4] ss:$8 sps:$4 sm:$0xff]  }
  0x34   : > { %1690 = vmatpush2.bf16.msra.mxu0 %v2941_v34  ;;  %v3039_v34 = vld [vmem:[%s3334_s26 + $0xdc] ss:$36 sps:$4 sm:$0xff]  }
  0x35   : > { %1803 = vmatpush2.bf16.msra.mxu1 %v2942_v35  ;;  %1691 = vmatprep.subr.bf16.mxu0 %v2943_v36  ;;  %v3041_v35 = vld [vmem:[%s3334_s26 + $0xe4] ss:$36 sps:$4 sm:$0xff]  }
  0x36   : > { %1804 = vmatprep.subr.bf16.mxu1 %v2945_v37  ;;  %v3033_v36 = vld [vmem:[%s3283_s22 + $0x220] ss:$8 sps:$4 sm:$0xff]  }
  0x37   : > { %v3036_v37 = vld [vmem:[%s3283_s22 + $0x320] ss:$8 sps:$4 sm:$0xff]  }
  0x38   : > { %1692 = vmatpush2.bf16.msra.mxu0 %v2947_v38  ;;  %v3047_v38 = vld [vmem:[%s3283_s22 + $0x214] ss:$8 sps:$4 sm:$0xff]  }
  0x39   : > { %1805 = vmatpush2.bf16.msra.mxu1 %v2948_v39  ;;  %1693 = vmatprep.subr.bf16.mxu0 %v2949_v40  ;;  %v3050_v39 = vld [vmem:[%s3283_s22 + $0x314] ss:$8 sps:$4 sm:$0xff]  }
  0x3a   : > { %1806 = vmatprep.subr.bf16.mxu1 %v2951_v41  ;;  %v3043_v40 = vld [vmem:[%s3334_s26 + $0xd8] ss:$36 sps:$4 sm:$0xff]   ;;  %v3044_v41 = vld [vmem:[%s3334_s26 + $0xe0] ss:$36 sps:$4 sm:$0xff]  }
  0x3c   : > { %1694 = vmatpush2.bf16.msra.mxu0 %v2953_v42  ;;  %v3045_v42 = vld [vmem:[%s3283_s22 + $0x210] ss:$8 sps:$4 sm:$0xff]  }
  0x3d   : > { %1807 = vmatpush2.bf16.msra.mxu1 %v2954_v43  ;;  %1695 = vmatprep.subr.bf16.mxu0 %v2955_v44  ;;  %v3048_v43 = vld [vmem:[%s3283_s22 + $0x310] ss:$8 sps:$4 sm:$0xff]   ;;  %v3053_v44 = vld [vmem:[%s3283_s22 + $0x204] ss:$8 sps:$4 sm:$0xff]  }
  0x3e   : > { %1808 = vmatprep.subr.bf16.mxu1 %v2957_v45  ;;  %v3056_v45 = vld [vmem:[%s3283_s22 + $0x304] ss:$8 sps:$4 sm:$0xff]  }
  0x40   : > { %1696 = vmatpush2.bf16.msra.mxu0 %v2959_v46  ;;  %v3057_v46 = vld [vmem:[%s3334_s26 + $0x124] ss:$36 sps:$4 sm:$0xff]  }
  0x41   : > { %1809 = vmatpush2.bf16.msra.mxu1 %v2960_v47  ;;  %1697 = vmatprep.subr.bf16.mxu0 %v2961_v48  ;;  %v3059_v47 = vld [vmem:[%s3334_s26 + $0x12c] ss:$36 sps:$4 sm:$0xff]   ;;  %v3051_v48 = vld [vmem:[%s3283_s22 + $0x200] ss:$8 sps:$4 sm:$0xff]  }
  0x42   : > { %1810 = vmatprep.subr.bf16.mxu1 %v2963_v50  ;;  %v3065_v50 = vld [vmem:[%s3283_s22 + $0x2f4] ss:$8 sps:$4 sm:$0xff]  }
  0x44   : > { %1698 = vmatpush2.bf16.msra.mxu0 %v2965_v52  ;;  %v3061_v52 = vld [vmem:[%s3334_s26 + $0x120] ss:$36 sps:$4 sm:$0xff]  }
  0x45   : > { %1811 = vmatpush2.bf16.msra.mxu1 %v2966_v53  ;;  %1699 = vmatprep.subr.bf16.mxu0 %v2967_v54  ;;  %v3062_v53 = vld [vmem:[%s3334_s26 + $0x128] ss:$36 sps:$4 sm:$0xff]   ;;  %v3063_v54 = vld [vmem:[%s3283_s22 + $0x2f0] ss:$8 sps:$4 sm:$0xff]  }
  0x46   : > { %1812 = vmatprep.subr.bf16.mxu1 %v2969_v55  ;;  %v3066_v55 = vld [vmem:[%s3283_s22 + $0x3f0] ss:$8 sps:$4 sm:$0xff]  }
  0x48   : > { %1700 = vmatpush2.bf16.msra.mxu0 %v2971_v56  ;;  %v3071_v56 = vld [vmem:[%s3283_s22 + $0x2e4] ss:$8 sps:$4 sm:$0xff]  }
  0x49   : > { %1813 = vmatpush2.bf16.msra.mxu1 %v2972_v57  ;;  %1701 = vmatprep.subr.bf16.mxu0 %v2973_v58  ;;  %v3074_v57 = vld [vmem:[%s3283_s22 + $0x3e4] ss:$8 sps:$4 sm:$0xff]  }
  0x4a   : > { %1814 = vmatprep.subr.bf16.mxu1 %v2975_v59  ;;  %v3075_v58 = vld [vmem:[%s3334_s26 + $0x16c] ss:$36 sps:$4 sm:$0xff]   ;;  %v3077_v59 = vld [vmem:[%s3334_s26 + $0x174] ss:$36 sps:$4 sm:$0xff]  }
  0x4c   : > { %1702 = vmatpush2.bf16.msra.mxu0 %v2977_v60  ;;  %v3069_v60 = vld [vmem:[%s3283_s22 + $0x2e0] ss:$8 sps:$4 sm:$0xff]  }
  0x4d   : > { %1815 = vmatpush2.bf16.msra.mxu1 %v2978_v61  ;;  %1703 = vmatprep.subr.bf16.mxu0 %v2979_v62  ;;  %v3072_v61 = vld [vmem:[%s3283_s22 + $0x3e0] ss:$8 sps:$4 sm:$0xff]   ;;  %v3083_v62 = vld [vmem:[%s3283_s22 + $0x2d4] ss:$8 sps:$4 sm:$0xff]  }
  0x4e   : > { %1816 = vmatprep.subr.bf16.mxu1 %v2981_v63  ;;  %v3086_v63 = vld [vmem:[%s3283_s22 + $0x3d4] ss:$8 sps:$4 sm:$0xff]  }
  0x50   : > { %1704 = vmatpush2.bf16.msra.mxu0 %v2983_v0  ;;  %v3079_v0 = vld [vmem:[%s3334_s26 + $0x168] ss:$36 sps:$4 sm:$0xff]  }
  0x51   : > { %1817 = vmatpush2.bf16.msra.mxu1 %v2984_v1  ;;  %1899 = vmatprep.subr.bf16.mxu0 %v2993_v2  ;;  %v3080_v1 = vld [vmem:[%s3334_s26 + $0x170] ss:$36 sps:$4 sm:$0xff]  }
  0x52   : > { %2012 = vmatprep.subr.bf16.mxu1 %v2996_v3  ;;  %v3081_v2 = vld [vmem:[%s3283_s22 + $0x2d0] ss:$8 sps:$4 sm:$0xff]  }
  0x53   : > { %1706 = vmatmul.mubr.bf16.vlgmr.msra.gmra.mxu0 %v2985_v4  ;;  %v3084_v3 = vld [vmem:[%s3283_s22 + $0x3d0] ss:$8 sps:$4 sm:$0xff]   ;;  %v3089_v4 = vld [vmem:[%s3283_s22 + $0x2c4] ss:$8 sps:$4 sm:$0xff]  }
  0x54   : > { %1819 = vmatmul.mubr.bf16.vlgmr.msra.gmra.mxu1 %v2988_v5  ;;  %1900 = vmatpush1.bf16.msra.mxu0 %v2991_v6  ;;  %v3092_v5 = vld [vmem:[%s3283_s22 + $0x3c4] ss:$8 sps:$4 sm:$0xff]   ;;  %v3093_v6 = vld [vmem:[%s3334_s26 + $0x1b4] ss:$36 sps:$4 sm:$0xff]  }
  0x55   : > { %2013 = vmatpush1.bf16.msra.mxu1 %v2994_v7  ;;  %1901 = vmatprep.subr.bf16.mxu0 %v2999_v8  ;;  %v3095_v7 = vld [vmem:[%s3334_s26 + $0x1bc] ss:$36 sps:$4 sm:$0xff]  }
  0x56   : > { %2014 = vmatprep.subr.bf16.mxu1 %v3002_v9  ;;  %1715 = vmatprep.mubr.bf16.mxu0 %v3003_v10  ;;  %v3087_v8 = vld [vmem:[%s3283_s22 + $0x2c0] ss:$8 sps:$4 sm:$0xff]   ;;  %v3101_v10 = vld [vmem:[%s3283_s22 + $0x2b4] ss:$8 sps:$4 sm:$0xff]  }
  0x57   : > { %1828 = vmatprep.mubr.bf16.mxu1 %v3005_v11  ;;  %v3090_v9 = vld [vmem:[%s3283_s22 + $0x3c0] ss:$8 sps:$4 sm:$0xff]   ;;  %v3104_v11 = vld [vmem:[%s3283_s22 + $0x3b4] ss:$8 sps:$4 sm:$0xff]  }
  0x58   : > { %1902 = vmatpush1.bf16.msra.mxu0 %v2997_v12  ;;  %v3097_v12 = vld [vmem:[%s3334_s26 + $0x1b0] ss:$36 sps:$4 sm:$0xff]  }
  0x59   : > { %2015 = vmatpush1.bf16.msra.mxu1 %v3000_v13  ;;  %1903 = vmatprep.subr.bf16.mxu0 %v3011_v14  ;;  %v3098_v13 = vld [vmem:[%s3334_s26 + $0x1b8] ss:$36 sps:$4 sm:$0xff]  }
  0x5a   : > { %2016 = vmatprep.subr.bf16.mxu1 %v3014_v15  ;;  %v3099_v14 = vld [vmem:[%s3283_s22 + $0x2b0] ss:$8 sps:$4 sm:$0xff]  }
  0x5b   : > { %1716 = vmatmul.mubr.bf16.gmra.mxu0 %v3007_v16  ;;  %v3102_v15 = vld [vmem:[%s3283_s22 + $0x3b0] ss:$8 sps:$4 sm:$0xff]   ;;  %v3107_v16 = vld [vmem:[%s3283_s22 + $0x2a4] ss:$8 sps:$4 sm:$0xff]  }
  0x5c   : > { %1829 = vmatmul.mubr.bf16.gmra.mxu1 %v3008_v17  ;;  %1904 = vmatpush1.bf16.msra.mxu0 %v3009_v18  ;;  %v3110_v17 = vld [vmem:[%s3283_s22 + $0x3a4] ss:$8 sps:$4 sm:$0xff]   ;;  %v3111_v18 = vld [vmem:[%s3334_s26 + $0x1fc] ss:$36 sps:$4 sm:$0xff]  }
  0x5d   : > { %2017 = vmatpush1.bf16.msra.mxu1 %v3012_v19  ;;  %1905 = vmatprep.subr.bf16.mxu0 %v3017_v20  ;;  %v3113_v19 = vld [vmem:[%s3334_s26 + $0x204] ss:$36 sps:$4 sm:$0xff]  }
  0x5e   : > { %2018 = vmatprep.subr.bf16.mxu1 %v3020_v21  ;;  %1725 = vmatprep.mubr.bf16.mxu0 %v3021_v22  ;;  %v3105_v20 = vld [vmem:[%s3283_s22 + $0x2a0] ss:$8 sps:$4 sm:$0xff]   ;;  %v3119_v22 = vld [vmem:[%s3283_s22 + $0x294] ss:$8 sps:$4 sm:$0xff]  }
  0x5f   : > { %1838 = vmatprep.mubr.bf16.mxu1 %v3023_v23  ;;  %v3108_v21 = vld [vmem:[%s3283_s22 + $0x3a0] ss:$8 sps:$4 sm:$0xff]   ;;  %v3122_v23 = vld [vmem:[%s3283_s22 + $0x394] ss:$8 sps:$4 sm:$0xff]  }
  0x60   : > { %1906 = vmatpush1.bf16.msra.mxu0 %v3015_v24  ;;  %v3115_v24 = vld [vmem:[%s3334_s26 + $0x1f8] ss:$36 sps:$4 sm:$0xff]  }
  0x61   : > { %2019 = vmatpush1.bf16.msra.mxu1 %v3018_v25  ;;  %1907 = vmatprep.subr.bf16.mxu0 %v3029_v26  ;;  %v3116_v25 = vld [vmem:[%s3334_s26 + $0x200] ss:$36 sps:$4 sm:$0xff]   ;;  %v3117_v26 = vld [vmem:[%s3283_s22 + $0x290] ss:$8 sps:$4 sm:$0xff]  }
  0x62   : > { %2020 = vmatprep.subr.bf16.mxu1 %v3032_v27  ;;  %v3120_v27 = vld [vmem:[%s3283_s22 + $0x390] ss:$8 sps:$4 sm:$0xff]  }
  0x63   : > { %1726 = vmatmul.mubr.bf16.gmra.mxu0 %v3025_v28  ;;  %v3125_v28 = vld [vmem:[%s3283_s22 + $0x284] ss:$8 sps:$4 sm:$0xff]  }
  0x64   : > { %1839 = vmatmul.mubr.bf16.gmra.mxu1 %v3026_v29  ;;  %1908 = vmatpush1.bf16.msra.mxu0 %v3027_v30  ;;  %v3128_v29 = vld [vmem:[%s3283_s22 + $0x384] ss:$8 sps:$4 sm:$0xff]   ;;  %v3131_v30 = vld [vmem:[%s3334_s26 + $0x14] ss:$36 sps:$4 sm:$0xff]  }
  0x65   : > { %2021 = vmatpush1.bf16.msra.mxu1 %v3030_v31  ;;  %1909 = vmatprep.subr.bf16.mxu0 %v3035_v32  ;;  %v3134_v31 = vld [vmem:[%s3334_s26 + $0x1c] ss:$36 sps:$4 sm:$0xff]  }
  0x66   : > { %2022 = vmatprep.subr.bf16.mxu1 %v3038_v33  ;;  %1735 = vmatprep.mubr.bf16.mxu0 %v3039_v34  ;;  %v3123_v32 = vld [vmem:[%s3283_s22 + $0x280] ss:$8 sps:$4 sm:$0xff]   ;;  %v3137_v34 = vld [vmem:[%s3283_s22 + $0x474] ss:$8 sps:$4 sm:$0xff]  }
  0x67   : > { %1848 = vmatprep.mubr.bf16.mxu1 %v3041_v35  ;;  %v3126_v33 = vld [vmem:[%s3283_s22 + $0x380] ss:$8 sps:$4 sm:$0xff]   ;;  %v3129_v35 = vld [vmem:[%s3334_s26 + $0x10] ss:$36 sps:$4 sm:$0xff]  }
  0x68   : > { %1910 = vmatpush1.bf16.msra.mxu0 %v3033_v36  ;;  %v3132_v36 = vld [vmem:[%s3334_s26 + $0x18] ss:$36 sps:$4 sm:$0xff]  }
  0x69   : > { %2023 = vmatpush1.bf16.msra.mxu1 %v3036_v37  ;;  %1911 = vmatprep.subr.bf16.mxu0 %v3047_v38  ;;  %v3135_v37 = vld [vmem:[%s3283_s22 + $0x470] ss:$8 sps:$4 sm:$0xff]   ;;  %v3138_v38 = vld [vmem:[%s3334_s26 + $0x5c] ss:$36 sps:$4 sm:$0xff]  }
  0x6a   : > { %2024 = vmatprep.subr.bf16.mxu1 %v3050_v39  ;;  %v3140_v39 = vld [vmem:[%s3334_s26 + $0x64] ss:$36 sps:$4 sm:$0xff]  }
  0x6b   : > { %1736 = vmatmul.mubr.bf16.gmra.mxu0 %v3043_v40  ;;  %v3146_v40 = vld [vmem:[%s3283_s22 + $0x464] ss:$8 sps:$4 sm:$0xff]  }
  0x6c   : > { %1849 = vmatmul.mubr.bf16.gmra.mxu1 %v3044_v41  ;;  %1912 = vmatpush1.bf16.msra.mxu0 %v3045_v42  ;;  %v3144_v41 = vld [vmem:[%s3283_s22 + $0x460] ss:$8 sps:$4 sm:$0xff]   ;;  %v3155_v42 = vld [vmem:[%s3283_s22 + $0x454] ss:$8 sps:$4 sm:$0xff]  }
  0x6d   : > { %2025 = vmatpush1.bf16.msra.mxu1 %v3048_v43  ;;  %1913 = vmatprep.subr.bf16.mxu0 %v3053_v44  ;;  %v3142_v43 = vld [vmem:[%s3334_s26 + $0x58] ss:$36 sps:$4 sm:$0xff]   ;;  %v3143_v44 = vld [vmem:[%s3334_s26 + $0x60] ss:$36 sps:$4 sm:$0xff]  }
  0x6e   : > { %2026 = vmatprep.subr.bf16.mxu1 %v3056_v45  ;;  %1745 = vmatprep.mubr.bf16.mxu0 %v3057_v46  ;;  %v3147_v45 = vld [vmem:[%s3334_s26 + $0xa4] ss:$36 sps:$4 sm:$0xff]   ;;  %v3149_v46 = vld [vmem:[%s3334_s26 + $0xac] ss:$36 sps:$4 sm:$0xff]  }
  0x6f   : > { %1858 = vmatprep.mubr.bf16.mxu1 %v3059_v47  ;;  %v3153_v47 = vld [vmem:[%s3283_s22 + $0x450] ss:$8 sps:$4 sm:$0xff]  }
  0x70   : > { %1914 = vmatpush1.bf16.msra.mxu0 %v3051_v48  ;;  %v3164_v48 = vld [vmem:[%s3283_s22 + $0x444] ss:$8 sps:$4 sm:$0xff]  }
  0x71   : > { %2027 = vmatpush1.bf16.msra.mxu1 %v3054_v49  ;;  %1915 = vmatprep.subr.bf16.mxu0 %v3065_v50  ;;  %v3151_v49 = vld [vmem:[%s3334_s26 + $0xa0] ss:$36 sps:$4 sm:$0xff]  }
  0x72   : > { %2028 = vmatprep.subr.bf16.mxu1 %v3068_v51  ;;  %v3162_v50 = vld [vmem:[%s3283_s22 + $0x440] ss:$8 sps:$4 sm:$0xff]   ;;  %v3173_v51 = vld [vmem:[%s3283_s22 + $0x434] ss:$8 sps:$4 sm:$0xff]  }
  0x73   : > { %1746 = vmatmul.mubr.bf16.gmra.mxu0 %v3061_v52  ;;  %v3152_v52 = vld [vmem:[%s3334_s26 + $0xa8] ss:$36 sps:$4 sm:$0xff]  }
  0x74   : > { %1859 = vmatmul.mubr.bf16.gmra.mxu1 %v3062_v53  ;;  %1916 = vmatpush2.bf16.msra.mxu0 %v3063_v54  ;;  %v3156_v53 = vld [vmem:[%s3334_s26 + $0xec] ss:$36 sps:$4 sm:$0xff]   ;;  %v3158_v54 = vld [vmem:[%s3334_s26 + $0xf4] ss:$36 sps:$4 sm:$0xff]  }
  0x75   : > { %2029 = vmatpush2.bf16.msra.mxu1 %v3066_v55  ;;  %1917 = vmatprep.subr.bf16.mxu0 %v3071_v56  ;;  %v3171_v55 = vld [vmem:[%s3283_s22 + $0x430] ss:$8 sps:$4 sm:$0xff]   ;;  %v3182_v56 = vld [vmem:[%s3283_s22 + $0x424] ss:$8 sps:$4 sm:$0xff]  }
  0x76   : > { %2030 = vmatprep.subr.bf16.mxu1 %v3074_v57  ;;  %1755 = vmatprep.mubr.bf16.mxu0 %v3075_v58  ;;  %v3180_v57 = vld [vmem:[%s3283_s22 + $0x420] ss:$8 sps:$4 sm:$0xff]   ;;  %v3191_v58 = vld [vmem:[%s3283_s22 + $0x414] ss:$8 sps:$4 sm:$0xff]  }
  0x77   : > { %1868 = vmatprep.mubr.bf16.mxu1 %v3077_v59  ;;  %v3160_v59 = vld [vmem:[%s3334_s26 + $0xe8] ss:$36 sps:$4 sm:$0xff]  }
  0x78   : > { %1918 = vmatpush2.bf16.msra.mxu0 %v3069_v60  ;;  %v3161_v60 = vld [vmem:[%s3334_s26 + $0xf0] ss:$36 sps:$4 sm:$0xff]  }
  0x79   : > { %2031 = vmatpush2.bf16.msra.mxu1 %v3072_v61  ;;  %1919 = vmatprep.subr.bf16.mxu0 %v3083_v62  ;;  %v3165_v61 = vld [vmem:[%s3334_s26 + $0x134] ss:$36 sps:$4 sm:$0xff]   ;;  %v3167_v62 = vld [vmem:[%s3334_s26 + $0x13c] ss:$36 sps:$4 sm:$0xff]  }
  0x7a   : > { %2032 = vmatprep.subr.bf16.mxu1 %v3086_v63  ;;  %v3189_v63 = vld [vmem:[%s3283_s22 + $0x410] ss:$8 sps:$4 sm:$0xff]  }
  0x7b   : > { %1756 = vmatmul.mubr.bf16.gmra.mxu0 %v3079_v0  ;;  %v3200_v0 = vld [vmem:[%s3283_s22 + $0x404] ss:$8 sps:$4 sm:$0xff]  }
  0x7c   : > { %1869 = vmatmul.mubr.bf16.gmra.mxu1 %v3080_v1  ;;  %1920 = vmatpush2.bf16.msra.mxu0 %v3081_v2  ;;  %v3198_v1 = vld [vmem:[%s3283_s22 + $0x400] ss:$8 sps:$4 sm:$0xff]   ;;  %v3169_v2 = vld [vmem:[%s3334_s26 + $0x130] ss:$36 sps:$4 sm:$0xff]  }
  0x7d   : > { %2033 = vmatpush2.bf16.msra.mxu1 %v3084_v3  ;;  %1921 = vmatprep.subr.bf16.mxu0 %v3089_v4  ;;  %v3170_v3 = vld [vmem:[%s3334_s26 + $0x138] ss:$36 sps:$4 sm:$0xff]  }
  0x7e   : > { %2034 = vmatprep.subr.bf16.mxu1 %v3092_v5  ;;  %1765 = vmatprep.mubr.bf16.mxu0 %v3093_v6  ;;  %v3174_v4 = vld [vmem:[%s3334_s26 + $0x17c] ss:$36 sps:$4 sm:$0xff]   ;;  %v3176_v5 = vld [vmem:[%s3334_s26 + $0x184] ss:$36 sps:$4 sm:$0xff]  }
  0x7f   : > { %1878 = vmatprep.mubr.bf16.mxu1 %v3095_v7  ;;  %v3178_v6 = vld [vmem:[%s3334_s26 + $0x178] ss:$36 sps:$4 sm:$0xff]   ;;  %v3179_v7 = vld [vmem:[%s3334_s26 + $0x180] ss:$36 sps:$4 sm:$0xff]  }
  0x80   : > { %1922 = vmatpush2.bf16.msra.mxu0 %v3087_v8  ;;  %v3183_v8 = vld [vmem:[%s3334_s26 + $0x1c4] ss:$36 sps:$4 sm:$0xff]  }
  0x81   : > { %2035 = vmatpush2.bf16.msra.mxu1 %v3090_v9  ;;  %1923 = vmatprep.subr.bf16.mxu0 %v3101_v10  ;;  %v3185_v9 = vld [vmem:[%s3334_s26 + $0x1cc] ss:$36 sps:$4 sm:$0xff]   ;;  %v3187_v10 = vld [vmem:[%s3334_s26 + $0x1c0] ss:$36 sps:$4 sm:$0xff]  }
  0x82   : > { %2036 = vmatprep.subr.bf16.mxu1 %v3104_v11  ;;  %v3188_v11 = vld [vmem:[%s3334_s26 + $0x1c8] ss:$36 sps:$4 sm:$0xff]  }
  0x83   : > { %1766 = vmatmul.mubr.bf16.gmra.mxu0 %v3097_v12  ;;  %v3192_v12 = vld [vmem:[%s3334_s26 + $0x20c] ss:$36 sps:$4 sm:$0xff]  }
  0x84   : > { %1879 = vmatmul.mubr.bf16.gmra.mxu1 %v3098_v13  ;;  %1924 = vmatpush2.bf16.msra.mxu0 %v3099_v14  ;;  %v3194_v13 = vld [vmem:[%s3334_s26 + $0x214] ss:$36 sps:$4 sm:$0xff]   ;;  %v3196_v14 = vld [vmem:[%s3334_s26 + $0x208] ss:$36 sps:$4 sm:$0xff]  }
  0x85   : > { %2037 = vmatpush2.bf16.msra.mxu1 %v3102_v15  ;;  %1925 = vmatprep.subr.bf16.mxu0 %v3107_v16  ;;  %v3197_v15 = vld [vmem:[%s3334_s26 + $0x210] ss:$36 sps:$4 sm:$0xff]   ;;  %v3925_v16 = vmov 0  }
  0x86   : > { %2038 = vmatprep.subr.bf16.mxu1 %v3110_v17  ;;  %1775 = vmatprep.mubr.bf16.mxu0 %v3111_v18  ;;  %v3201_v17 = vld [vmem:[%s3334_s26 + $0x20] ss:$36 sps:$4 sm:$0xff]  }
  0x87   : > { %1888 = vmatprep.mubr.bf16.mxu1 %v3113_v19  ;;  %v3202_v18 = vld [vmem:[%s3334_s26 + $0x140] ss:$36 sps:$4 sm:$0xff]   ;;  %v3203_v19 = vld [vmem:[%s3334_s26 + $0x68] ss:$36 sps:$4 sm:$0xff]  }
  0x88   : > { %1926 = vmatpush2.bf16.msra.mxu0 %v3105_v20  ;;  %v3204_v20 = vld [vmem:[%s3334_s26 + $0x188] ss:$36 sps:$4 sm:$0xff]  }
  0x89   : > { %2039 = vmatpush2.bf16.msra.mxu1 %v3108_v21  ;;  %1927 = vmatprep.subr.bf16.mxu0 %v3119_v22  ;;  %v3205_v21 = vld [vmem:[%s3334_s26 + $0xb0] ss:$36 sps:$4 sm:$0xff]  }
  0x8a   : > { %2040 = vmatprep.subr.bf16.mxu1 %v3122_v23  ;;  %v3206_v22 = vld [vmem:[%s3334_s26 + $0x1d0] ss:$36 sps:$4 sm:$0xff]   ;;  %v3207_v23 = vld [vmem:[%s3334_s26 + $0xf8] ss:$36 sps:$4 sm:$0xff]  }
  0x8b   : > { %1776 = vmatmul.mubr.bf16.gmra.mxu0 %v3115_v24  ;;  %v3208_v24 = vld [vmem:[%s3334_s26 + $0x218] ss:$36 sps:$4 sm:$0xff]  }
  0x8c   : > { %1889 = vmatmul.mubr.bf16.gmra.mxu1 %v3116_v25  ;;  %1928 = vmatpush2.bf16.msra.mxu0 %v3117_v26  ;;  %v575_v25 = vlaneseq }
  0x8d   : > { %2041 = vmatpush2.bf16.msra.mxu1 %v3120_v27  ;;  %1929 = vmatprep.subr.bf16.mxu0 %v3125_v28  ;;  %v573_v28 = vld [vmem:[%s325_s30] sm:$0x3] }
  0x8e   : > { %2042 = vmatprep.subr.bf16.mxu1 %v3128_v29  ;;  %1931 = vmatprep.mubr.bf16.mxu0 %v3131_v30  ;;  %v3516_v26 = vshrl.u32 %v575_v25, 7 }
  0x8f   : > { %2044 = vmatprep.mubr.bf16.mxu1 %v3134_v31 }
  0x90   : > { %1930 = vmatpush2.bf16.msra.mxu0 %v3123_v32  ;;  %v3924_v27 = vsub.s32 0, %v3516_v26  ;;  %v3923_v29 = vsub.s32 1, %v3516_v26 }
  0x91   : > { %2043 = vmatpush2.bf16.msra.mxu1 %v3126_v33  ;;  %2125 = vmatprep.subr.bf16.mxu0 %v3137_v34 }
  0x92   : > { %2846 = vmatprep.subr.bf16.mxu1 %v3137_v34  ;;  %v3525_v30 = vrot.slane %v573_v28, %v3924_v27  ;;  %v3529_v31 = vrot.slane %v573_v28, %v3923_v29 }
  0x93   : > { %1932 = vmatmul.mubr.bf16.vlgmr.msra.gmra.mxu0 %v3129_v35 }
  0x94   : > { %2045 = vmatmul.mubr.bf16.vlgmr.msra.gmra.mxu1 %v3132_v36  ;;  %2126 = vmatpush1.bf16.msra.mxu0 %v3135_v37 }
  0x95   : > { %2854 = vmatpush1.bf16.msra.mxu1 %v3135_v37  ;;  %1941 = vmatprep.mubr.bf16.mxu0 %v3138_v38 }
  0x96   : > { %2054 = vmatprep.mubr.bf16.mxu1 %v3140_v39  ;;  %2127 = vmatprep.subr.bf16.mxu0 %v3146_v40 }
  0x97   : > { %2847 = vmatprep.subr.bf16.mxu1 %v3146_v40 }
  0x98   : > { %2128 = vmatpush1.bf16.msra.mxu0 %v3144_v41 }
  0x99   : > { %2855 = vmatpush1.bf16.msra.mxu1 %v3144_v41  ;;  %2129 = vmatprep.subr.bf16.mxu0 %v3155_v42 }
  0x9a   : > { %2848 = vmatprep.subr.bf16.mxu1 %v3155_v42 }
  0x9b   : > { %1942 = vmatmul.mubr.bf16.gmra.mxu0 %v3142_v43 }
  0x9c   : > { %2055 = vmatmul.mubr.bf16.gmra.mxu1 %v3143_v44  ;;  %1951 = vmatprep.mubr.bf16.mxu0 %v3147_v45 }
  0x9d   : > { %2064 = vmatprep.mubr.bf16.mxu1 %v3149_v46  ;;  %2130 = vmatpush1.bf16.msra.mxu0 %v3153_v47 }
  0x9e   : > { %2856 = vmatpush1.bf16.msra.mxu1 %v3153_v47  ;;  %2131 = vmatprep.subr.bf16.mxu0 %v3164_v48 }
  0x9f   : > { %2849 = vmatprep.subr.bf16.mxu1 %v3164_v48 }
  0xa1   : > { %2132 = vmatpush1.bf16.msra.mxu0 %v3162_v50 }
  0xa2   : > { %2857 = vmatpush1.bf16.msra.mxu1 %v3162_v50  ;;  %2133 = vmatprep.subr.bf16.mxu0 %v3173_v51 }
  0xa3   : > { %2850 = vmatprep.subr.bf16.mxu1 %v3173_v51  ;;  %1952 = vmatmul.mubr.bf16.gmra.mxu0 %v3151_v49 }
  0xa4   : > { %2065 = vmatmul.mubr.bf16.gmra.mxu1 %v3152_v52  ;;  %1961 = vmatprep.mubr.bf16.mxu0 %v3156_v53 }
  0xa5   : > { %2074 = vmatprep.mubr.bf16.mxu1 %v3158_v54  ;;  %2134 = vmatpush1.bf16.msra.mxu0 %v3171_v55 }
  0xa6   : > { %2858 = vmatpush1.bf16.msra.mxu1 %v3171_v55  ;;  %2135 = vmatprep.subr.bf16.mxu0 %v3182_v56 }
  0xa7   : > { %2851 = vmatprep.subr.bf16.mxu1 %v3182_v56 }
  0xa9   : > { %2136 = vmatpush1.bf16.msra.mxu0 %v3180_v57 }
  0xaa   : > { %2859 = vmatpush1.bf16.msra.mxu1 %v3180_v57  ;;  %2137 = vmatprep.subr.bf16.mxu0 %v3191_v58 }
  0xab   : > { %2852 = vmatprep.subr.bf16.mxu1 %v3191_v58  ;;  %1962 = vmatmul.mubr.bf16.gmra.mxu0 %v3160_v59 }
  0xac   : > { %2075 = vmatmul.mubr.bf16.gmra.mxu1 %v3161_v60  ;;  %1971 = vmatprep.mubr.bf16.mxu0 %v3165_v61 }
  0xad   : > { %2084 = vmatprep.mubr.bf16.mxu1 %v3167_v62  ;;  %2138 = vmatpush1.bf16.msra.mxu0 %v3189_v63 }
  0xae   : > { %2860 = vmatpush1.bf16.msra.mxu1 %v3189_v63  ;;  %2139 = vmatprep.subr.bf16.mxu0 %v3200_v0 }
  0xaf   : > { %2853 = vmatprep.subr.bf16.mxu1 %v3200_v0 }
  0xb1   : > { %2140 = vmatpush1.bf16.msra.mxu0 %v3198_v1 }
  0xb2   : > { %2861 = vmatpush1.bf16.msra.mxu1 %v3198_v1 }
  0xb3   : > { %1972 = vmatmul.mubr.bf16.gmra.mxu0 %v3169_v2 }
  0xb4   : > { %2085 = vmatmul.mubr.bf16.gmra.mxu1 %v3170_v3  ;;  %1981 = vmatprep.mubr.bf16.mxu0 %v3174_v4 }
  0xb5   : > { %2094 = vmatprep.mubr.bf16.mxu1 %v3176_v5 }
  0xbb   : > { %1982 = vmatmul.mubr.bf16.gmra.mxu0 %v3178_v6 }
  0xbc   : > { %2095 = vmatmul.mubr.bf16.gmra.mxu1 %v3179_v7  ;;  %1991 = vmatprep.mubr.bf16.mxu0 %v3183_v8 }
  0xbd   : > { %2104 = vmatprep.mubr.bf16.mxu1 %v3185_v9 }
  0xc3   : > { %1992 = vmatmul.mubr.bf16.gmra.mxu0 %v3187_v10 }
  0xc4   : > { %2105 = vmatmul.mubr.bf16.gmra.mxu1 %v3188_v11  ;;  %2001 = vmatprep.mubr.bf16.mxu0 %v3192_v12 }
  0xc5   : > { %2114 = vmatprep.mubr.bf16.mxu1 %v3194_v13 }
  0xcb   : > { %2002 = vmatmul.mubr.bf16.gmra.mxu0 %v3196_v14 }
  0xcc   : > { %2115 = vmatmul.mubr.bf16.gmra.mxu1 %v3197_v15  ;;  %2157 = vmatprep.mubr.bf16.mxu0 %v3925_v16 }
  0xcd   : > { %2197 = vmatprep.mubr.bf16.mxu1 %v3925_v16 }
  0xd3   : > { %2158 = vmatmul.mubr.bf16.vlgmr.msra.gmra.mxu0 %v3201_v17 }
  0xd4   : > { %2198 = vmatmul.mubr.bf16.vlgmr.msra.gmra.mxu1 %v3202_v18  ;;  %2167 = vmatprep.mubr.bf16.mxu0 %v3925_v16 }
  0xd5   : > { %2207 = vmatprep.mubr.bf16.mxu1 %v3925_v16 }
  0xdb   : > { %2168 = vmatmul.mubr.bf16.gmra.mxu0 %v3203_v19 }
  0xdc   : > { %2208 = vmatmul.mubr.bf16.gmra.mxu1 %v3204_v20  ;;  %2177 = vmatprep.mubr.bf16.mxu0 %v3925_v16 }
  0xdd   : > { %2217 = vmatprep.mubr.bf16.mxu1 %v3925_v16 }
  0xe3   : > { %2178 = vmatmul.mubr.bf16.gmra.mxu0 %v3205_v21 }
  0xe4   : > { %2218 = vmatmul.mubr.bf16.gmra.mxu1 %v3206_v22  ;;  %2187 = vmatprep.mubr.bf16.mxu0 %v3925_v16 }
  0xe5   : > { %2227 = vmatprep.mubr.bf16.mxu1 %v3925_v16 }
  0xeb   : > { %2188 = vmatmul.mubr.bf16.gmra.mxu0 %v3207_v23 }
  0xec   : > { %2228 = vmatmul.mubr.bf16.gmra.mxu1 %v3208_v24 }
 0x113   : > { %v1707_v32 = vpop.f32.mrf.mxu0 }
 0x114   : > { %v1820_v33 = vpop.f32.mrf.mxu1  ;;  %v1708_v34 = vadd.f32 %v1707_v32, %v3525_v30 }
 0x115   : > { %v1709_v35 = vpop.f32.mrf.mxu0 }
 0x116   : > { %v1822_v36 = vpop.f32.mrf.mxu1  ;;  %v3532_v37 = vadd.f32 %v1820_v33, %v1708_v34  ;;  %v1710_v38 = vadd.f32 %v1709_v35, %v3529_v31 }
 0x117   : > { %v1711_v39 = vpop.f32.mrf.mxu0 }
 0x118   : > { %v1824_v40 = vpop.f32.mrf.mxu1  ;;  %v3535_v41 = vadd.f32 %v1822_v36, %v1710_v38  ;;  %v1712_v42 = vadd.f32 %v1711_v39, %v3525_v30 }
 0x119   : > { %v1713_v43 = vpop.f32.mrf.mxu0 }
 0x11a   : > { %v1826_v44 = vpop.f32.mrf.mxu1  ;;  %v3538_v45 = vadd.f32 %v1824_v40, %v1712_v42  ;;  %v1714_v46 = vadd.f32 %v1713_v43, %v3529_v31 }
 0x11b   : > { %v1717_v47 = vpop.f32.mrf.mxu0 }
 0x11c   : > { %v1830_v48 = vpop.f32.mrf.mxu1  ;;  %v3541_v49 = vadd.f32 %v1826_v44, %v1714_v46  ;;  %v1718_v50 = vadd.f32 %v1717_v47, %v3525_v30 }
 0x11d   : > { %v1719_v51 = vpop.f32.mrf.mxu0 }
 0x11e   : > { %v1832_v52 = vpop.f32.mrf.mxu1  ;;  %v3544_v53 = vadd.f32 %v1830_v48, %v1718_v50  ;;  %v1720_v54 = vadd.f32 %v1719_v51, %v3529_v31 }
 0x11f   : > { %v1721_v55 = vpop.f32.mrf.mxu0 }
 0x120   : > { %v1834_v56 = vpop.f32.mrf.mxu1  ;;  %v3547_v57 = vadd.f32 %v1832_v52, %v1720_v54  ;;  %v1722_v58 = vadd.f32 %v1721_v55, %v3525_v30 }
 0x121   : > { %v1723_v59 = vpop.f32.mrf.mxu0 }
 0x122   : > { %v1836_v60 = vpop.f32.mrf.mxu1  ;;  %v3550_v61 = vadd.f32 %v1834_v56, %v1722_v58  ;;  %v1724_v62 = vadd.f32 %v1723_v59, %v3529_v31 }
 0x123   : > { %v1727_v63 = vpop.f32.mrf.mxu0 }
 0x124   : > { %v1840_v0 = vpop.f32.mrf.mxu1  ;;  %v3553_v1 = vadd.f32 %v1836_v60, %v1724_v62  ;;  %v1728_v2 = vadd.f32 %v1727_v63, %v3525_v30 }
 0x125   : > { %v1729_v3 = vpop.f32.mrf.mxu0 }
 0x126   : > { %v1842_v4 = vpop.f32.mrf.mxu1  ;;  %v3556_v5 = vadd.f32 %v1840_v0, %v1728_v2  ;;  %v1730_v6 = vadd.f32 %v1729_v3, %v3529_v31 }
 0x127   : > { %v1731_v7 = vpop.f32.mrf.mxu0 }
 0x128   : > { %v1844_v8 = vpop.f32.mrf.mxu1  ;;  %v3559_v9 = vadd.f32 %v1842_v4, %v1730_v6  ;;  %v1732_v10 = vadd.f32 %v1731_v7, %v3525_v30 }
 0x129   : > { %v1733_v11 = vpop.f32.mrf.mxu0 }
 0x12a   : > { %v1846_v12 = vpop.f32.mrf.mxu1  ;;  %v3562_v13 = vadd.f32 %v1844_v8, %v1732_v10  ;;  %v1734_v14 = vadd.f32 %v1733_v11, %v3529_v31 }
 0x12b   : > { %v1737_v15 = vpop.f32.mrf.mxu0 }
 0x12c   : > { %v1850_v17 = vpop.f32.mrf.mxu1  ;;  %v3565_v18 = vadd.f32 %v1846_v12, %v1734_v14  ;;  %v1738_v19 = vadd.f32 %v1737_v15, %v3525_v30 }
 0x12d   : > { %v1739_v20 = vpop.f32.mrf.mxu0 }
 0x12e   : > { %v1852_v21 = vpop.f32.mrf.mxu1  ;;  %v3568_v22 = vadd.f32 %v1850_v17, %v1738_v19  ;;  %v1740_v23 = vadd.f32 %v1739_v20, %v3529_v31 }
 0x12f   : > { %v1741_v24 = vpop.f32.mrf.mxu0 }
 0x130   : > { %v1854_v25 = vpop.f32.mrf.mxu1  ;;  %v3571_v28 = vadd.f32 %v1852_v21, %v1740_v23  ;;  %v1742_v32 = vadd.f32 %v1741_v24, %v3525_v30 }
 0x131   : > { %v1743_v33 = vpop.f32.mrf.mxu0 }
 0x132   : > { %v1856_v34 = vpop.f32.mrf.mxu1  ;;  %v3574_v35 = vadd.f32 %v1854_v25, %v1742_v32  ;;  %v1744_v36 = vadd.f32 %v1743_v33, %v3529_v31 }
 0x133   : > { %v1747_v38 = vpop.f32.mrf.mxu0 }
 0x134   : > { %v1860_v39 = vpop.f32.mrf.mxu1  ;;  %v3577_v40 = vadd.f32 %v1856_v34, %v1744_v36  ;;  %v1748_v42 = vadd.f32 %v1747_v38, %v3525_v30 }
 0x135   : > { %v1749_v43 = vpop.f32.mrf.mxu0 }
 0x136   : > { %v1862_v44 = vpop.f32.mrf.mxu1  ;;  %v3580_v46 = vadd.f32 %v1860_v39, %v1748_v42  ;;  %v1750_v47 = vadd.f32 %v1749_v43, %v3529_v31 }
 0x137   : > { %v1751_v48 = vpop.f32.mrf.mxu0 }
 0x138   : > { %v1864_v50 = vpop.f32.mrf.mxu1  ;;  %v3583_v51 = vadd.f32 %v1862_v44, %v1750_v47  ;;  %v1752_v52 = vadd.f32 %v1751_v48, %v3525_v30 }
 0x139   : > { %v1753_v54 = vpop.f32.mrf.mxu0 }
 0x13a   : > { %v1866_v55 = vpop.f32.mrf.mxu1  ;;  %v3586_v56 = vadd.f32 %v1864_v50, %v1752_v52  ;;  %v1754_v58 = vadd.f32 %v1753_v54, %v3529_v31 }
 0x13b   : > { %v1757_v59 = vpop.f32.mrf.mxu0 }
 0x13c   : > { %v1870_v60 = vpop.f32.mrf.mxu1  ;;  %v3589_v62 = vadd.f32 %v1866_v55, %v1754_v58  ;;  %v1758_v63 = vadd.f32 %v1757_v59, %v3525_v30 }
 0x13d   : > { %v1759_v0 = vpop.f32.mrf.mxu0 }
 0x13e   : > { %v1872_v2 = vpop.f32.mrf.mxu1  ;;  %v3592_v3 = vadd.f32 %v1870_v60, %v1758_v63  ;;  %v1760_v4 = vadd.f32 %v1759_v0, %v3529_v31 }
 0x13f   : > { %v1761_v6 = vpop.f32.mrf.mxu0 }
 0x140   : > { %v1874_v7 = vpop.f32.mrf.mxu1  ;;  %v3595_v8 = vadd.f32 %v1872_v2, %v1760_v4  ;;  %v1762_v10 = vadd.f32 %v1761_v6, %v3525_v30 }
 0x141   : > { %v1763_v11 = vpop.f32.mrf.mxu0 }
 0x142   : > { %v1876_v12 = vpop.f32.mrf.mxu1  ;;  %v3598_v14 = vadd.f32 %v1874_v7, %v1762_v10  ;;  %v1764_v15 = vadd.f32 %v1763_v11, %v3529_v31 }
 0x143   : > { %v1767_v17 = vpop.f32.mrf.mxu0 }
 0x144   : > { %v1880_v19 = vpop.f32.mrf.mxu1  ;;  %v3601_v20 = vadd.f32 %v1876_v12, %v1764_v15  ;;  %v1768_v21 = vadd.f32 %v1767_v17, %v3525_v30 }
 0x145   : > { %v1769_v23 = vpop.f32.mrf.mxu0 }
 0x146   : > { %v1882_v24 = vpop.f32.mrf.mxu1  ;;  %v3604_v25 = vadd.f32 %v1880_v19, %v1768_v21  ;;  %v1770_v32 = vadd.f32 %v1769_v23, %v3529_v31 }
 0x147   : > { %v1771_v33 = vpop.f32.mrf.mxu0 }
 0x148   : > { %v1884_v34 = vpop.f32.mrf.mxu1  ;;  %v3607_v36 = vadd.f32 %v1882_v24, %v1770_v32  ;;  %v1772_v38 = vadd.f32 %v1771_v33, %v3525_v30 }
 0x149   : > { %v1773_v39 = vpop.f32.mrf.mxu0 }
 0x14a   : > { %3926 = vst [vmem:[#allocation2_spill] sm:$0xff] %v3607_v36  ;;  %v1886_v42 = vpop.f32.mrf.mxu1  ;;  %v3610_v43 = vadd.f32 %v1884_v34, %v1772_v38  ;;  %v1774_v44 = vadd.f32 %v1773_v39, %v3529_v31  ;;  %v3948_v36 = vsub.s32 1, %v3516_v26 }
 0x14b   : > { %v1777_v47 = vpop.f32.mrf.mxu0 }
 0x14c   : > { %3927 = vst [vmem:[#allocation3_spill] sm:$0xff] %v3610_v43  ;;  %v1890_v48 = vpop.f32.mrf.mxu1  ;;  %v3613_v50 = vadd.f32 %v1886_v42, %v1774_v44  ;;  %v1778_v52 = vadd.f32 %v1777_v47, %v3525_v30 }
 0x14d   : > { %v1779_v54 = vpop.f32.mrf.mxu0 }
 0x14e   : > { %3928 = vst [vmem:[#allocation4_spill] sm:$0xff] %v3613_v50  ;;  %v1892_v55 = vpop.f32.mrf.mxu1  ;;  %v3616_v58 = vadd.f32 %v1890_v48, %v1778_v52  ;;  %v1780_v59 = vadd.f32 %v1779_v54, %v3529_v31  ;;  %v3947_v50 = vsub.s32 0, %v3516_v26 }
 0x14f   : > { %v1781_v60 = vpop.f32.mrf.mxu0 }
 0x150   : > { %3929 = vst [vmem:[#allocation5_spill] sm:$0xff] %v3616_v58  ;;  %v1894_v63 = vpop.f32.mrf.mxu1  ;;  %v3619_v0 = vadd.f32 %v1892_v55, %v1780_v59  ;;  %v1782_v2 = vadd.f32 %v1781_v60, %v3525_v30 }
 0x151   : > { %v1783_v4 = vpop.f32.mrf.mxu0 }
 0x152   : > { %3930 = vst [vmem:[#allocation6_spill] sm:$0xff] %v3619_v0  ;;  %v1896_v6 = vpop.f32.mrf.mxu1  ;;  %v3622_v7 = vadd.f32 %v1894_v63, %v1782_v2  ;;  %v1784_v10 = vadd.f32 %v1783_v4, %v3529_v31 }
 0x153   : > { %v1933_v11 = vpop.f32.mrf.mxu0 }
 0x154   : > { %3931 = vst [vmem:[#allocation7_spill] sm:$0xff] %v3622_v7  ;;  %v2046_v12 = vpop.f32.mrf.mxu1  ;;  %v3625_v15 = vadd.f32 %v1896_v6, %v1784_v10  ;;  %v1934_v17 = vadd.f32 %v1933_v11, %v3532_v37 }
 0x155   : > { %v3628_v19 = vpop.f32.mrf.mxu0 }
 0x156   : > { %3932 = vst [vmem:[#allocation8_spill] sm:$0xff] %v3625_v15  ;;  %v3630_v21 = vpop.f32.mrf.mxu1  ;;  %v3632_v23 = vadd.f32 %v2046_v12, %v1934_v17 }
 0x157   : > { %v1937_v24 = vpop.f32.mrf.mxu0 }
 0x158   : > { %v2050_v30 = vpop.f32.mrf.mxu1  ;;  %v1938_v32 = vadd.f32 %v1937_v24, %v3538_v45 }
 0x159   : > { %v3635_v33 = vpop.f32.mrf.mxu0 }
 0x15a   : > { %v3637_v34 = vpop.f32.mrf.mxu1  ;;  %v3639_v31 = vadd.f32 %v2050_v30, %v1938_v32 }
 0x15b   : > { %v1943_v38 = vpop.f32.mrf.mxu0 }
 0x15c   : > { %3933 = vst [vmem:[#allocation9_spill] sm:$0xff] %v3639_v31  ;;  %v2056_v39 = vpop.f32.mrf.mxu1  ;;  %v1944_v37 = vadd.f32 %v1943_v38, %v3544_v53 }
 0x15d   : > { %v3642_v42 = vpop.f32.mrf.mxu0 }
 0x15e   : > { %v3644_v44 = vpop.f32.mrf.mxu1  ;;  %v3646_v47 = vadd.f32 %v2056_v39, %v1944_v37 }
 0x15f   : > { %v1947_v48 = vpop.f32.mrf.mxu0 }
 0x160   : > { %3934 = vst [vmem:[#allocation10_spill] sm:$0xff] %v3646_v47  ;;  %v2060_v52 = vpop.f32.mrf.mxu1  ;;  %v1948_v45 = vadd.f32 %v1947_v48, %v3550_v61 }
 0x161   : > { %v3649_v54 = vpop.f32.mrf.mxu0 }
 0x162   : > { %v3651_v55 = vpop.f32.mrf.mxu1  ;;  %v3653_v59 = vadd.f32 %v2060_v52, %v1948_v45  ;;  %v1950_v26 = vadd.f32 %v3649_v54, %v3553_v1 }
 0x163   : > { %v1953_v60 = vpop.f32.mrf.mxu0 }
 0x164   : > { %3935 = vst [vmem:[#allocation11_spill] sm:$0xff] %v3653_v59  ;;  %v2066_v63 = vpop.f32.mrf.mxu1  ;;  %v1954_v53 = vadd.f32 %v1953_v60, %v3556_v5  ;;  %v3945_v59 = vmov 0  }
 0x165   : > { %v1955_v2 = vpop.f32.mrf.mxu0 }
 0x166   : > { %v3656_v4 = vpop.f32.mrf.mxu1  ;;  %v3658_v6 = vadd.f32 %v2066_v63, %v1954_v53 }
 0x167   : > { %v1957_v10 = vpop.f32.mrf.mxu0 }
 0x168   : > { %3936 = vst [vmem:[#allocation12_spill] sm:$0xff] %v3658_v6  ;;  %v2070_v11 = vpop.f32.mrf.mxu1  ;;  %v1958_v12 = vadd.f32 %v1957_v10, %v3562_v13 }
 0x169   : > { %v1959_v61 = vpop.f32.mrf.mxu0 }
 0x16a   : > { %v3661_v17 = vpop.f32.mrf.mxu1  ;;  %v3663_v24 = vadd.f32 %v2070_v11, %v1958_v12 }
 0x16b   : > { %v1963_v30 = vpop.f32.mrf.mxu0 }
 0x16c   : > { %3937 = vst [vmem:[#allocation13_spill] sm:$0xff] %v3663_v24  ;;  %v2076_v32 = vpop.f32.mrf.mxu1  ;;  %v1964_v38 = vadd.f32 %v1963_v30, %v3568_v22 }
 0x16d   : > { %v1965_v39 = vpop.f32.mrf.mxu0 }
 0x16e   : > { %v3666_v5 = vpop.f32.mrf.mxu1  ;;  %v3668_v37 = vadd.f32 %v2076_v32, %v1964_v38 }
 0x16f   : > { %v1967_v48 = vpop.f32.mrf.mxu0 }
 0x170   : > { %3938 = vst [vmem:[#allocation14_spill] sm:$0xff] %v3668_v37  ;;  %v2080_v52 = vpop.f32.mrf.mxu1  ;;  %v1968_v45 = vadd.f32 %v1967_v48, %v3574_v35 }
 0x171   : > { %v3671_v60 = vpop.f32.mrf.mxu0 }
 0x172   : > { %v3673_v13 = vpop.f32.mrf.mxu1  ;;  %v3675_v63 = vadd.f32 %v2080_v52, %v1968_v45 }
 0x173   : > { %3939 = vst [vmem:[#allocation15_spill] sm:$0xff] %v3673_v13  ;;  %v1973_v53 = vpop.f32.mrf.mxu0 }
 0x174   : > { %3940 = vst [vmem:[#allocation16_spill] sm:$0xff] %v3675_v63  ;;  %v2086_v10 = vpop.f32.mrf.mxu1  ;;  %v2238_v63 = vld [vmem:[%s3921_s3] sm:$0x3] }
 0x175   : > { %v1975_v11 = vpop.f32.mrf.mxu0  ;;  %vm2239_vm0 = vcmp.ne.f32.partialorder %v2238_v63, 0.0 }
 0x176   : > { %v3677_v12 = vpop.f32.mrf.mxu1  ;;  %v2272_v58 = vsel %vm2239_vm0, 1, %v3945_v59  ;;  %v1940_v59 = vadd.f32 %v3635_v33, %v3541_v49 }
 0x177   : > { %v1977_v22 = vpop.f32.mrf.mxu0  ;;  %v3703_v43 = vrot.slane %v2272_v58, %v3947_v50 }
 0x178   : > { %v3679_v30 = vpop.f32.mrf.mxu1  ;;  %v2053_v1 = vadd.f32 %v3637_v34, %v1940_v59 }
 0x179   : > { %v1979_v32 = vpop.f32.mrf.mxu0  ;;  %vm2281_vm1 = vcmp.eq.s32.totalorder %v3703_v43, 1 }
 0x17a   : > { %v3681_v38 = vpop.f32.mrf.mxu1  ;;  %v1980_v33 = vadd.f32 %v1979_v32, %v3589_v62 }
 0x17b   : > { %v1983_v29 = vpop.f32.mrf.mxu0 }
 0x17c   : > { %v2096_v27 = vpop.f32.mrf.mxu1 }
 0x17d   : > { %v1985_v35 = vpop.f32.mrf.mxu0 }
 0x17e   : > { %v2098_v48 = vpop.f32.mrf.mxu1 }
 0x17f   : > { %v1987_v16 = vpop.f32.mrf.mxu0 }
 0x180   : > { %v3683_v37 = vpop.f32.mrf.mxu1 }
 0x181   : > { %v1989_v52 = vpop.f32.mrf.mxu0 }
 0x182   : > { %v3685_v45 = vpop.f32.mrf.mxu1 }
 0x183   : > { %v1993_v13 = vpop.f32.mrf.mxu0 }
 0x184   : > { %v3690_v24 = vpop.f32.mrf.mxu1 }
 0x185   : > { %3941 = vst [vmem:[#allocation17_spill] sm:$0xff] %v3690_v24  ;;  %v1995_v6 = vpop.f32.mrf.mxu0  ;;  %v3707_v24 = vrot.slane %v2272_v58, %v3948_v36  ;;  %v1956_v36 = vadd.f32 %v1955_v2, %v3559_v9  ;;  %v1960_v58 = vadd.f32 %v1959_v61, %v3565_v18  ;;  %v1976_v18 = vadd.f32 %v1975_v11, %v3583_v51  ;;  %v3951_v11 = vld [vmem:[#allocation2_spill] sm:$0xff] }
 0x186   : > { %v3692_v15 = vpop.f32.mrf.mxu1 }
 0x187   : > { %3942 = vst [vmem:[#allocation18_spill] sm:$0xff] %v3692_v15  ;;  %v3694_v7 = vpop.f32.mrf.mxu0  ;;  %vm2282_vm2 = vcmp.eq.s32.totalorder %v3707_v24, 1  ;;  %v3756_v51 = vadd.f32 %v3661_v17, %v1960_v58 }
 0x188   : > { %3943 = vst [vmem:[#allocation19_spill] sm:$0xff] %v3694_v7  ;;  %v3696_v0 = vpop.f32.mrf.mxu1 }
 0x189   : > { %3944 = vst [vmem:[#allocation20_spill] sm:$0xff] %v3696_v0  ;;  %v1999_v47 = vpop.f32.mrf.mxu0  ;;  %v1936_v0 = vadd.f32 %v3628_v19, %v3535_v41  ;;  %v1966_v41 = vadd.f32 %v1965_v39, %v3571_v28  ;;  %v1986_v28 = vadd.f32 %v1985_v35, %v3595_v8  ;;  %v1994_v8 = vadd.f32 %v1993_v13, %v3604_v25  ;;  %v3954_v35 = vld [vmem:[#allocation4_spill] sm:$0xff] }
 0x18a   : > { %v3699_v31 = vpop.f32.mrf.mxu1 }
 0x18b   : > { %3946 = vst [vmem:[#allocation21_spill] sm:$0xff] %v3699_v31  ;;  %v3709_v63 = vpop.f32.mrf.mxu0  ;;  %v1946_v31 = vadd.f32 %v3642_v42, %v3547_v57  ;;  %v2049_v19 = vadd.f32 %v3630_v21, %v1936_v0  ;;  %v1984_v42 = vadd.f32 %v1983_v29, %v3592_v3  ;;  %v3750_v0 = vadd.f32 %v3651_v55, %v1950_v26  ;;  %v3955_v26 = vld [vmem:[#allocation9_spill] sm:$0xff] }
 0x18c   : > { %v3711_v15 = vpop.f32.mrf.mxu1  ;;  %v3753_v21 = vadd.f32 %v3656_v4, %v1956_v36  ;;  %v3759_v62 = vadd.f32 %v3666_v5, %v1966_v41  ;;  %v1988_v29 = vadd.f32 %v1987_v16, %v3598_v14  ;;  %v1990_v3 = vadd.f32 %v1989_v52, %v3601_v20 }
 0x18d   : > { %3949 = vst [vmem:[#allocation22_spill] sm:$0xff] %v3711_v15  ;;  %v3719_v7 = vpop.f32.mrf.mxu0  ;;  %v1974_v15 = vadd.f32 %v1973_v53, %v3580_v46  ;;  %v3738_v9 = vadd.f32 %v3644_v44, %v1946_v31  ;;  %v1978_v46 = vadd.f32 %v1977_v22, %v3586_v56  ;;  %v3766_v44 = vadd.f32 %v3671_v60, %v3577_v40 }
 0x18e   : > { %v3721_v50 = vpop.f32.mrf.mxu1  ;;  %v2089_v55 = vadd.f32 %v3677_v12, %v1976_v18  ;;  %v2093_v16 = vadd.f32 %v3681_v38, %v1980_v33  ;;  %v2097_v14 = vadd.f32 %v2096_v27, %v1984_v42  ;;  %v2099_v20 = vadd.f32 %v2098_v48, %v1986_v28 }
 0x18f   : > { %v3731_v49 = vpop.f32.mrf.mxu0  ;;  %v2087_v56 = vadd.f32 %v2086_v10, %v1974_v15  ;;  %v2091_v61 = vadd.f32 %v3679_v30, %v1978_v46  ;;  %v2101_v40 = vadd.f32 %v3683_v37, %v1988_v29  ;;  %v3774_v60 = vadd.f32 %v3685_v45, %v1990_v3  ;;  %v3952_v30 = vld [vmem:[#allocation3_spill] sm:$0xff] }
 0x190   : > { %v3733_v57 = vpop.f32.mrf.mxu1  ;;  %v1996_v12 = vadd.f32 %v1995_v6, %v3951_v11  ;;  %v3953_v32 = vld [vmem:[#allocation19_spill] sm:$0xff]  ;;  %v2000_v48 = vadd.f32 %v1999_v47, %v3954_v35 }
 0x191   : > { %v3745_v54 = vpop.f32.mrf.mxu0  ;;  %v1998_v38 = vadd.f32 %v3953_v32, %v3952_v30  ;;  %v3959_v32 = vld [vmem:[#allocation20_spill] sm:$0xff] }
 0x192   : > { %v3747_v2 = vpop.f32.mrf.mxu1 }
 0x193   : > { %v2159_v34 = vpop.f32.mrf.mxu0  ;;  %v2111_v35 = vadd.f32 %v3959_v32, %v1998_v38 }
 0x194   : > { %v2199_v31 = vpop.f32.mrf.mxu1  ;;  %v2160_v4 = vadd.f32 %v2159_v34, %v3632_v23  ;;  %v3950_v23 = vld [vmem:[#allocation17_spill] sm:$0xff] }
 0x195   : > { %v2200_v15 = vadd.f32 %v2199_v31, %v2087_v56  ;;  %v2161_v17 = vpop.f32.mrf.mxu0  ;;  %v3777_v10 = vadd.f32 %v3950_v23, %v1994_v8  ;;  %v3956_v31 = vld [vmem:[#allocation10_spill] sm:$0xff] }
 0x196   : > { %v2201_v25 = vpop.f32.mrf.mxu1  ;;  %v2240_v39 = vmax.f32 %v2160_v4, 0.0  ;;  %v2162_v13 = vadd.f32 %v2161_v17, %v2049_v19  ;;  %v3958_v17 = vld [vmem:[#allocation5_spill] sm:$0xff] }
 0x197   : > { %v2256_v5 = vmax.f32 %v2200_v15, 0.0  ;;  %v2202_v53 = vadd.f32 %v2201_v25, %v2089_v55  ;;  %v2163_v22 = vpop.f32.mrf.mxu0  ;;  %v2004_v25 = vadd.f32 %v3709_v63, %v3958_v17 }
 0x198   : > { %v2203_v27 = vpop.f32.mrf.mxu1  ;;  %v2241_v52 = vmax.f32 %v2162_v13, 0.0  ;;  %v2283_v37 = vsel %vm2281_vm1, %v2240_v39, %v2160_v4  ;;  %v2164_v36 = vadd.f32 %v2163_v22, %v3955_v26 }
 0x199   : > { %v2257_v59 = vmax.f32 %v2202_v53, 0.0  ;;  %v2299_v45 = vsel %vm2281_vm1, %v2256_v5, %v2200_v15  ;;  %v2204_v58 = vadd.f32 %v2203_v27, %v2091_v61  ;;  %v2165_v6 = vpop.f32.mrf.mxu0  ;;  %v3957_v15 = vld [vmem:[#allocation18_spill] sm:$0xff] }
 0x19a   : > { %v2205_v41 = vpop.f32.mrf.mxu1  ;;  %v2284_v47 = vsel %vm2282_vm2, %v2241_v52, %v2162_v13  ;;  %v2166_v18 = vadd.f32 %v2165_v6, %v2053_v1  ;;  %v2242_v28 = vmax.f32 %v2164_v36, 0.0  ;;  %v2109_v61 = vadd.f32 %v3957_v15, %v1996_v12  ;;  %v3960_v52 = vld [vmem:[#allocation21_spill] sm:$0xff]  ;;  %v3963_v6 = vld [vmem:[#allocation6_spill] sm:$0xff] }
 0x19b   : > { %v2300_v19 = vsel %vm2282_vm2, %v2257_v59, %v2202_v53  ;;  %v2206_v46 = vadd.f32 %v2205_v41, %v2093_v16  ;;  %v2830_v33 = vpack.c.bf16 %v2284_v47, %v2283_v37  ;;  %v2258_v56 = vmax.f32 %v2204_v58, 0.0  ;;  %v2169_v29 = vpop.f32.mrf.mxu0  ;;  %v3961_v37 = vld [vmem:[#allocation11_spill] sm:$0xff] }
 0x19c   : > { %v2838_v42 = vpack.c.bf16 %v2300_v19, %v2299_v45  ;;  %v2209_v3 = vpop.f32.mrf.mxu1  ;;  %v2243_v8 = vmax.f32 %v2166_v18, 0.0  ;;  %v2170_v55 = vadd.f32 %v2169_v29, %v3956_v31  ;;  %v2285_v1 = vsel %vm2281_vm1, %v2242_v28, %v2164_v36  ;;  %v3962_v36 = vld [vmem:[#allocation22_spill] sm:$0xff]  ;;  %v3964_v29 = vld [vmem:[#allocation7_spill] sm:$0xff] }
 0x19d   : > { %v2259_v34 = vmax.f32 %v2206_v46, 0.0  ;;  %v2210_v4 = vadd.f32 %v2209_v3, %v2097_v14  ;;  %2411 = vst [vmem:[%s3792_s10] sm:$0xff] %v2830_v33  ;;  %v2301_v16 = vsel %vm2281_vm1, %v2258_v56, %v2204_v58  ;;  %v2171_v39 = vpop.f32.mrf.mxu0  ;;  %v2113_v59 = vadd.f32 %v3960_v52, %v2000_v48 }
 0x19e   : > { %2419 = vst [vmem:[%s3792_s10 + $0x40] sm:$0xff] %v2838_v42  ;;  %v2211_v5 = vpop.f32.mrf.mxu1  ;;  %v2286_v13 = vsel %vm2282_vm2, %v2243_v8, %v2166_v18  ;;  %v2244_v53 = vmax.f32 %v2170_v55, 0.0  ;;  %v2172_v12 = vadd.f32 %v2171_v39, %v3738_v9  ;;  %v3817_v58 = vadd.f32 %v3962_v36, %v2004_v25 }
 0x19f   : > { %v2302_v14 = vsel %vm2282_vm2, %v2259_v34, %v2206_v46  ;;  %v2260_v63 = vmax.f32 %v2210_v4, 0.0  ;;  %v2831_v23 = vpack.c.bf16 %v2286_v13, %v2285_v1  ;;  %v2212_v22 = vadd.f32 %v2211_v5, %v2099_v20  ;;  %v2173_v27 = vpop.f32.mrf.mxu0 }
 0x1a0   : > { %v2839_v11 = vpack.c.bf16 %v2302_v14, %v2301_v16  ;;  %v2213_v30 = vpop.f32.mrf.mxu1  ;;  %v2174_v45 = vadd.f32 %v2173_v27, %v3961_v37  ;;  %v3821_v41 = vadd.f32 %v3719_v7, %v3963_v6  ;;  %v2245_v9 = vmax.f32 %v2172_v12, 0.0  ;;  %v3967_v27 = vld [vmem:[#allocation13_spill] sm:$0xff] }
 0x1a1   : > { %v2214_v26 = vadd.f32 %v2213_v30, %v2101_v40  ;;  %2412 = vst [vmem:[%s3792_s10 + $0x8] sm:$0xff] %v2831_v23  ;;  %v2261_v20 = vmax.f32 %v2212_v22, 0.0  ;;  %v2175_v47 = vpop.f32.mrf.mxu0  ;;  %v2287_v40 = vsel %vm2281_vm1, %v2244_v53, %v2170_v55  ;;  %v2303_v7 = vsel %vm2281_vm1, %v2260_v63, %v2210_v4  ;;  %v3966_v4 = vld [vmem:[#allocation12_spill] sm:$0xff] }
 0x1a2   : > { %2420 = vst [vmem:[%s3792_s10 + $0x48] sm:$0xff] %v2839_v11  ;;  %v2215_v19 = vpop.f32.mrf.mxu1  ;;  %v2246_v18 = vmax.f32 %v2174_v45, 0.0  ;;  %v2176_v48 = vadd.f32 %v2175_v47, %v3750_v0  ;;  %v2288_v33 = vsel %vm2282_vm2, %v2245_v9, %v2172_v12  ;;  %v2008_v0 = vadd.f32 %v3731_v49, %v3964_v29 }
 0x1a3   : > { %v2262_v38 = vmax.f32 %v2214_v26, 0.0  ;;  %v2216_v46 = vadd.f32 %v2215_v19, %v3774_v60  ;;  %v2304_v42 = vsel %vm2282_vm2, %v2261_v20, %v2212_v22  ;;  %v2179_v28 = vpop.f32.mrf.mxu0  ;;  %v3965_v60 = vld [vmem:[#allocation8_spill] sm:$0xff]  ;;  %v2832_v8 = vpack.c.bf16 %v2288_v33, %v2287_v40 }
 0x1a4   : > { %v2219_v56 = vpop.f32.mrf.mxu1  ;;  %v3839_v3 = vadd.f32 %v3745_v54, %v3965_v60  ;;  %v2840_v34 = vpack.c.bf16 %v2304_v42, %v2303_v7  ;;  %v2247_v31 = vmax.f32 %v2176_v48, 0.0  ;;  %v2180_v15 = vadd.f32 %v2179_v28, %v3966_v4 }
 0x1a5   : > { %v2263_v55 = vmax.f32 %v2216_v46, 0.0  ;;  %v2220_v17 = vadd.f32 %v2219_v56, %v3777_v10  ;;  %v2181_v25 = vpop.f32.mrf.mxu0  ;;  %2413 = vst [vmem:[%s3792_s10 + $0x10] sm:$0xff] %v2832_v8  ;;  %v2289_v16 = vsel %vm2281_vm1, %v2246_v18, %v2174_v45  ;;  %v2305_v49 = vsel %vm2281_vm1, %v2262_v38, %v2214_v26 }
 0x1a6   : > { %v2221_v1 = vpop.f32.mrf.mxu1  ;;  %2421 = vst [vmem:[%s3792_s10 + $0x50] sm:$0xff] %v2840_v34  ;;  %v2182_v54 = vadd.f32 %v2181_v25, %v3753_v21  ;;  %v2290_v5 = vsel %vm2282_vm2, %v2247_v31, %v2176_v48  ;;  %v2248_v13 = vmax.f32 %v2180_v15, 0.0  ;;  %v2119_v33 = vadd.f32 %v3721_v50, %v3821_v41 }
 0x1a7   : > { %v2222_v39 = vadd.f32 %v2221_v1, %v2109_v61  ;;  %v2306_v10 = vsel %vm2282_vm2, %v2263_v55, %v2216_v46  ;;  %v2264_v14 = vmax.f32 %v2220_v17, 0.0  ;;  %v2183_v53 = vpop.f32.mrf.mxu0  ;;  %v2833_v23 = vpack.c.bf16 %v2290_v5, %v2289_v16  ;;  %v3968_v46 = vld [vmem:[#allocation14_spill] sm:$0xff]  ;;  %v3969_v55 = vld [vmem:[#allocation15_spill] sm:$0xff] }
 0x1a8   : > { %v2223_v63 = vpop.f32.mrf.mxu1  ;;  %v2841_v11 = vpack.c.bf16 %v2306_v10, %v2305_v49  ;;  %v2249_v12 = vmax.f32 %v2182_v54, 0.0  ;;  %v2291_v21 = vsel %vm2281_vm1, %v2248_v13, %v2180_v15  ;;  %v2184_v30 = vadd.f32 %v2183_v53, %v3967_v27 }
 0x1a9   : > { %v2265_v22 = vmax.f32 %v2222_v39, 0.0  ;;  %v2307_v61 = vsel %vm2281_vm1, %v2264_v14, %v2220_v17  ;;  %v2224_v32 = vadd.f32 %v2223_v63, %v2111_v35  ;;  %v2185_v52 = vpop.f32.mrf.mxu0  ;;  %2414 = vst [vmem:[%s3792_s10 + $0x18] sm:$0xff] %v2833_v23  ;;  %v2121_v42 = vadd.f32 %v3733_v57, %v2008_v0  ;;  %v3970_v17 = vld [vmem:[#allocation16_spill] sm:$0xff] }
 0x1aa   : > { %v2225_v37 = vpop.f32.mrf.mxu1  ;;  %2422 = vst [vmem:[%s3792_s10 + $0x58] sm:$0xff] %v2841_v11  ;;  %v2292_v45 = vsel %vm2282_vm2, %v2249_v12, %v2182_v54  ;;  %v2186_v36 = vadd.f32 %v2185_v52, %v3756_v51  ;;  %v2250_v47 = vmax.f32 %v2184_v30, 0.0  ;;  %v2083_v4 = vadd.f32 %v3969_v55, %v3766_v44 }
 0x1ab   : > { %v2308_v26 = vsel %vm2282_vm2, %v2265_v22, %v2222_v39  ;;  %v2226_v6 = vadd.f32 %v2225_v37, %v2113_v59  ;;  %v2834_v9 = vpack.c.bf16 %v2292_v45, %v2291_v21  ;;  %v2266_v19 = vmax.f32 %v2224_v32, 0.0  ;;  %v2189_v35 = vpop.f32.mrf.mxu0 }
 0x1ac   : > { %v2842_v20 = vpack.c.bf16 %v2308_v26, %v2307_v61  ;;  %v2229_v18 = vpop.f32.mrf.mxu1  ;;  %v2251_v38 = vmax.f32 %v2186_v36, 0.0  ;;  %v2190_v40 = vadd.f32 %v2189_v35, %v3968_v46  ;;  %v2293_v51 = vsel %vm2281_vm1, %v2250_v47, %v2184_v30 }
 0x1ad   : > { %v2267_v48 = vmax.f32 %v2226_v6, 0.0  ;;  %v2230_v7 = vadd.f32 %v2229_v18, %v3817_v58  ;;  %2415 = vst [vmem:[%s3792_s10 + $0x20] sm:$0xff] %v2834_v9  ;;  %v2309_v59 = vsel %vm2281_vm1, %v2266_v19, %v2224_v32  ;;  %v2191_v28 = vpop.f32.mrf.mxu0  ;;  %v2123_v15 = vadd.f32 %v3747_v2, %v3839_v3 }
 0x1ae   : > { %2423 = vst [vmem:[%s3792_s10 + $0x60] sm:$0xff] %v2842_v20  ;;  %v2231_v56 = vpop.f32.mrf.mxu1  ;;  %v2294_v58 = vsel %vm2282_vm2, %v2251_v38, %v2186_v36  ;;  %v2252_v41 = vmax.f32 %v2190_v40, 0.0  ;;  %v2192_v60 = vadd.f32 %v2191_v28, %v3759_v62 }
 0x1af   : > { %v2310_v50 = vsel %vm2282_vm2, %v2267_v48, %v2226_v6  ;;  %v2268_v57 = vmax.f32 %v2230_v7, 0.0  ;;  %v2835_v29 = vpack.c.bf16 %v2294_v58, %v2293_v51  ;;  %v2232_v8 = vadd.f32 %v2231_v56, %v2119_v33  ;;  %v2193_v34 = vpop.f32.mrf.mxu0 }
 0x1b0   : > { %v2843_v0 = vpack.c.bf16 %v2310_v50, %v2309_v59  ;;  %v2233_v31 = vpop.f32.mrf.mxu1  ;;  %v2194_v25 = vadd.f32 %v2193_v34, %v3970_v17  ;;  %v2253_v16 = vmax.f32 %v2192_v60, 0.0  ;;  %v2295_v39 = vsel %vm2281_vm1, %v2252_v41, %v2190_v40 }
 0x1b1   : > { %v2234_v1 = vadd.f32 %v2233_v31, %v2121_v42  ;;  %2416 = vst [vmem:[%s3792_s10 + $0x28] sm:$0xff] %v2835_v29  ;;  %v2269_v49 = vmax.f32 %v2232_v8, 0.0  ;;  %v2195_v54 = vpop.f32.mrf.mxu0  ;;  %v2311_v44 = vsel %vm2281_vm1, %v2268_v57, %v2230_v7 }
 0x1b2   : > { %2424 = vst [vmem:[%s3792_s10 + $0x68] sm:$0xff] %v2843_v0  ;;  %v2235_v62 = vpop.f32.mrf.mxu1  ;;  %v2196_v5 = vadd.f32 %v2195_v54, %v2083_v4  ;;  %v2296_v2 = vsel %vm2282_vm2, %v2253_v16, %v2192_v60  ;;  %v2254_v13 = vmax.f32 %v2194_v25, 0.0 }
 0x1b3   : > { %v2236_v10 = vadd.f32 %v2235_v62, %v2123_v15  ;;  %v2312_v3 = vsel %vm2282_vm2, %v2269_v49, %v2232_v8  ;;  %v2270_v14 = vmax.f32 %v2234_v1, 0.0  ;;  %v2836_v53 = vpack.c.bf16 %v2296_v2, %v2295_v39 }
 0x1b4   : > { %v2844_v63 = vpack.c.bf16 %v2312_v3, %v2311_v44  ;;  %v2255_v23 = vmax.f32 %v2196_v5, 0.0  ;;  %v2297_v12 = vsel %vm2281_vm1, %v2254_v13, %v2194_v25 }
 0x1b5   : > { %v2271_v11 = vmax.f32 %v2236_v10, 0.0  ;;  %2417 = vst [vmem:[%s3792_s10 + $0x30] sm:$0xff] %v2836_v53  ;;  %v2313_v22 = vsel %vm2281_vm1, %v2270_v14, %v2234_v1 }
 0x1b6   : > { %2425 = vst [vmem:[%s3792_s10 + $0x70] sm:$0xff] %v2844_v63  ;;  %v2298_v21 = vsel %vm2282_vm2, %v2255_v23, %v2196_v5 }
 0x1b7   : > { %v2314_v61 = vsel %vm2282_vm2, %v2271_v11, %v2236_v10  ;;  %v2837_v27 = vpack.c.bf16 %v2298_v21, %v2297_v12 }
 0x1b8   : > { %v2845_v30 = vpack.c.bf16 %v2314_v61, %v2313_v22 }
 0x1b9   : > { %2418 = vst [vmem:[%s3792_s10 + $0x38] sm:$0xff] %v2837_v27 }
 0x1ba   : > { %2426 = vst [vmem:[%s3792_s10 + $0x78] sm:$0xff] %v2845_v30 }
 0x1bb PF: > { %s14_s17 = sadd.s32 1, %s3231_s17   ;;  %s3971_s15 = smov %s3227_s16 }
 0x1bc   : > { %p11_p5 = scmp.ge.s32.totalorder %s14_s17, 4   ;;  %s3972_s16 = smov %s3974_s18 }
 0x1be   :  { %13 = sbr.rel (!%p11_p5) target bundleno = 2 (0x2), region = 75 }

// kernel: backbone_forward.11
= control target key start
LH: loop header
LB: loop body
LE: loop exit
PB: predicated region body
PF: predicated region fallthrough
CT: control target
= control target key end

     0   :  { %s3021_s15 = smov 0   ;;  %s3023_s16 = smov 0   ;;  %s3484_s0 = inlined_call_operand.vmem [shape: bf16[2,128,1152], index: 0, kind: input, shape index: {}]   ;;  %s3485_s1 = inlined_call_operand.vmem [shape: bf16[2,1152,128], index: 1, kind: input, shape index: {}]   ;;  %s3486_s2 = inlined_call_operand.vmem [shape: f32[2,1,128], index: 2, kind: input, shape index: {}]   ;;  %s3487_s3 = inlined_call_operand.vmem [shape: bf16[2,128,128], index: 3, kind: input, shape index: {}]   ;;  %s3488_s4 = inlined_call_operand.vmem [shape: bf16[2,128,128], index: 4, kind: output, shape index: {}]  }
   0x1   :  { %s3025_s17 = smov 0  }
   0x2 LB: > { %s33_s18 = sadd.s32 1, %s2990_s16  ;;  %p2177_p0 = scmp.ge.s32.totalorder %s2994_s17, 1  ;;  %s2994_s17 = sphi %s3025_s17, %s14_s17   ;;  %s2990_s16 = sphi %s3023_s16, %s3545_s16   ;;  %s2986_s15 = sphi %s3021_s15, %s3544_s15  }
   0x3   : > { %p35_p1 = scmp.ge.s32.totalorder %s33_s18, 2  ;;  %p243_p2 = scmp.lt.s32.totalorder %s2994_s17, 3 }
   0x5   : > { %s3547_s18 = smov (%p35_p1, %s33_s18), 0  ;;  %p244_p3 = pnand %p2177_p0, %p243_p2 }
   0x7   : > { %247 = sbr.rel (%p244_p3) target bundleno = 397 (0x18d), region = 36 }
   0xc   : > { %p308_p4 = scmp.lt.s32.totalorder %s2986_s15, 1 }
   0xe   : > { %s3549_s15 = smov (!%p308_p4, %s2986_s15), 1 }
   0xf   : > { %s2771_s19 = smul.u32 576, %s3549_s15  ;;  %s331_s28 = scalar_lea.vmem %s3486_s2, %s3549_s15 }
  0x10   : > { %s2347_s29 = sshll.u32 %s3549_s15, 6 }
  0x11   : > { %s3047_s22 = scalar_lea.vmem %s3485_s1, %s2771_s19  ;;  %s3084_s25 = scalar_lea.vmem %s3484_s0, %s2771_s19 }
  0x12   : > { %v2796_v0 = vld [vmem:[%s3047_s22 + $0x78] sm:$0xff]   ;;  %v2800_v4 = vld [vmem:[%s3047_s22 + $0x70] sm:$0xff]   ;;  %v2804_v8 = vld [vmem:[%s3047_s22 + $0x68] sm:$0xff]   ;;  %s343_s6 = scalar_lea.vmem %s3487_s3, %s2347_s29  ;;  %s3444_s9 = scalar_lea.vmem %s3488_s4, %s2347_s29 }
  0x13   : > { %v2797_v1 = vld [vmem:[%s3047_s22 + $0xf8] sm:$0xff]   ;;  %2451 = vmatprep.subr.bf16.mxu0 %v2796_v0  ;;  %v2801_v5 = vld [vmem:[%s3047_s22 + $0xf0] sm:$0xff]   ;;  %v2805_v9 = vld [vmem:[%s3047_s22 + $0xe8] sm:$0xff]  }
  0x14   : > { %v2798_v2 = vld [vmem:[%s3047_s22 + $0x38] sm:$0xff]   ;;  %2515 = vmatprep.subr.bf16.mxu1 %v2797_v1  ;;  %v2802_v6 = vld [vmem:[%s3047_s22 + $0x30] sm:$0xff]   ;;  %v2806_v10 = vld [vmem:[%s3047_s22 + $0x28] sm:$0xff]  }
  0x15   : > { %v2799_v3 = vld [vmem:[%s3047_s22 + $0xb8] sm:$0xff]   ;;  %2452 = vmatpush3.bf16.msra.mxu0 %v2798_v2  ;;  %v2803_v7 = vld [vmem:[%s3047_s22 + $0xb0] sm:$0xff]   ;;  %v2807_v11 = vld [vmem:[%s3047_s22 + $0xa8] sm:$0xff]  }
  0x16   : > { %2516 = vmatpush3.bf16.msra.mxu1 %v2799_v3  ;;  %2453 = vmatprep.subr.bf16.mxu0 %v2800_v4  ;;  %v2808_v12 = vld [vmem:[%s3047_s22 + $0x60] sm:$0xff]   ;;  %v2812_v16 = vld [vmem:[%s3047_s22 + $0x58] sm:$0xff]   ;;  %v2816_v20 = vld [vmem:[%s3047_s22 + $0x50] sm:$0xff]  }
  0x17   : > { %2517 = vmatprep.subr.bf16.mxu1 %v2801_v5  ;;  %v2809_v13 = vld [vmem:[%s3047_s22 + $0xe0] sm:$0xff]   ;;  %v2813_v17 = vld [vmem:[%s3047_s22 + $0xd8] sm:$0xff]   ;;  %v2817_v21 = vld [vmem:[%s3047_s22 + $0xd0] sm:$0xff]  }
  0x18   : > { %v2810_v14 = vld [vmem:[%s3047_s22 + $0x20] sm:$0xff]   ;;  %v2814_v18 = vld [vmem:[%s3047_s22 + $0x18] sm:$0xff]   ;;  %v2818_v22 = vld [vmem:[%s3047_s22 + $0x10] sm:$0xff]  }
  0x19   : > { %2454 = vmatpush3.bf16.msra.mxu0 %v2802_v6  ;;  %v2811_v15 = vld [vmem:[%s3047_s22 + $0xa0] sm:$0xff]   ;;  %v2815_v19 = vld [vmem:[%s3047_s22 + $0x98] sm:$0xff]   ;;  %v2819_v23 = vld [vmem:[%s3047_s22 + $0x90] sm:$0xff]  }
  0x1a   : > { %2518 = vmatpush3.bf16.msra.mxu1 %v2803_v7  ;;  %2455 = vmatprep.subr.bf16.mxu0 %v2804_v8  ;;  %v2820_v24 = vld [vmem:[%s3047_s22 + $0x48] sm:$0xff]   ;;  %v2824_v28 = vld [vmem:[%s3047_s22 + $0x40] sm:$0xff]   ;;  %v2834_v36 = vld [vmem:[%s3047_s22 + $0x178] sm:$0xff]  }
  0x1b   : > { %2519 = vmatprep.subr.bf16.mxu1 %v2805_v9  ;;  %v2821_v25 = vld [vmem:[%s3047_s22 + $0xc8] sm:$0xff]   ;;  %v2825_v29 = vld [vmem:[%s3047_s22 + $0xc0] sm:$0xff]   ;;  %v2835_v37 = vld [vmem:[%s3047_s22 + $0x1f8] sm:$0xff]  }
  0x1c   : > { %v2822_v26 = vld [vmem:[%s3047_s22 + $0x8] sm:$0xff]   ;;  %v2826_v30 = vld [vmem:[%s3047_s22] sm:$0xff]   ;;  %v2836_v38 = vld [vmem:[%s3047_s22 + $0x138] sm:$0xff]  }
  0x1d   : > { %2456 = vmatpush3.bf16.msra.mxu0 %v2806_v10  ;;  %v2823_v27 = vld [vmem:[%s3047_s22 + $0x88] sm:$0xff]   ;;  %v2827_v31 = vld [vmem:[%s3047_s22 + $0x80] sm:$0xff]   ;;  %v2837_v39 = vld [vmem:[%s3047_s22 + $0x1b8] sm:$0xff]  }
  0x1e   : > { %2520 = vmatpush3.bf16.msra.mxu1 %v2807_v11  ;;  %2457 = vmatprep.subr.bf16.mxu0 %v2808_v12  ;;  %v2828_v32 = vld [vmem:[%s3084_s25] ss:$36 sps:$4 sm:$0xff]   ;;  %v2831_v34 = vld [vmem:[%s3084_s25 + $0x8] ss:$36 sps:$4 sm:$0xff]   ;;  %v2840_v41 = vld [vmem:[%s3084_s25 + $0x54] ss:$36 sps:$4 sm:$0xff]  }
  0x1f   : > { %2521 = vmatprep.subr.bf16.mxu1 %v2809_v13  ;;  %v2830_v33 = vld [vmem:[%s3084_s25 + $0x4] ss:$36 sps:$4 sm:$0xff]   ;;  %v2833_v35 = vld [vmem:[%s3084_s25 + $0xc] ss:$36 sps:$4 sm:$0xff]   ;;  %v2848_v48 = vld [vmem:[%s3084_s25 + $0x94] ss:$36 sps:$4 sm:$0xff]  }
  0x20   : > { %1422 = vmatprep.mubr.bf16.mxu0 %v2830_v33  ;;  %1519 = vmatprep.mubr.bf16.mxu1 %v2833_v35  ;;  %v2838_v40 = vld [vmem:[%s3084_s25 + $0x4c] ss:$36 sps:$4 sm:$0xff]   ;;  %v2850_v49 = vld [vmem:[%s3084_s25 + $0x9c] ss:$36 sps:$4 sm:$0xff]   ;;  %v2860_v57 = vld [vmem:[%s3084_s25 + $0xe4] ss:$36 sps:$4 sm:$0xff]  }
  0x21   : > { %2458 = vmatpush3.bf16.msra.mxu0 %v2810_v14  ;;  %v2842_v42 = vld [vmem:[%s3084_s25 + $0x48] ss:$36 sps:$4 sm:$0xff]   ;;  %v2843_v43 = vld [vmem:[%s3084_s25 + $0x50] ss:$36 sps:$4 sm:$0xff]   ;;  %v2853_v51 = vld [vmem:[%s3084_s25 + $0x98] ss:$36 sps:$4 sm:$0xff]  }
  0x22   : > { %2522 = vmatpush3.bf16.msra.mxu1 %v2811_v15  ;;  %2459 = vmatprep.subr.bf16.mxu0 %v2812_v16  ;;  %v2844_v44 = vld [vmem:[%s3047_s22 + $0x170] sm:$0xff]   ;;  %v2854_v52 = vld [vmem:[%s3047_s22 + $0x168] sm:$0xff]   ;;  %v2858_v56 = vld [vmem:[%s3084_s25 + $0xdc] ss:$36 sps:$4 sm:$0xff]  }
  0x23   : > { %2523 = vmatprep.subr.bf16.mxu1 %v2813_v17  ;;  %v2845_v45 = vld [vmem:[%s3047_s22 + $0x1f0] sm:$0xff]   ;;  %v2855_v53 = vld [vmem:[%s3047_s22 + $0x1e8] sm:$0xff]   ;;  %v2862_v58 = vld [vmem:[%s3084_s25 + $0xd8] ss:$36 sps:$4 sm:$0xff]  }
  0x24   : > { %v2846_v46 = vld [vmem:[%s3047_s22 + $0x130] sm:$0xff]   ;;  %v2856_v54 = vld [vmem:[%s3047_s22 + $0x128] sm:$0xff]   ;;  %v2863_v59 = vld [vmem:[%s3084_s25 + $0xe0] ss:$36 sps:$4 sm:$0xff]  }
  0x25   : > { %2460 = vmatpush3.bf16.msra.mxu0 %v2814_v18  ;;  %v2847_v47 = vld [vmem:[%s3047_s22 + $0x1b0] sm:$0xff]   ;;  %v2857_v55 = vld [vmem:[%s3047_s22 + $0x1a8] sm:$0xff]   ;;  %v2864_v60 = vld [vmem:[%s3047_s22 + $0x160] sm:$0xff]  }
  0x26   : > { %2524 = vmatpush3.bf16.msra.mxu1 %v2815_v19  ;;  %2461 = vmatprep.subr.bf16.mxu0 %v2816_v20  ;;  %v2852_v50 = vld [vmem:[%s3084_s25 + $0x90] ss:$36 sps:$4 sm:$0xff]   ;;  %v2865_v61 = vld [vmem:[%s3047_s22 + $0x1e0] sm:$0xff]   ;;  %v2874_v3 = vld [vmem:[%s3047_s22 + $0x158] sm:$0xff]  }
  0x27   : > { %2525 = vmatprep.subr.bf16.mxu1 %v2817_v21  ;;  %v2866_v62 = vld [vmem:[%s3047_s22 + $0x120] sm:$0xff]   ;;  %v2870_v1 = vld [vmem:[%s3084_s25 + $0x12c] ss:$36 sps:$4 sm:$0xff]   ;;  %v2875_v5 = vld [vmem:[%s3047_s22 + $0x1d8] sm:$0xff]  }
  0x28   : > { %v2867_v63 = vld [vmem:[%s3047_s22 + $0x1a0] sm:$0xff]   ;;  %v2873_v4 = vld [vmem:[%s3084_s25 + $0x128] ss:$36 sps:$4 sm:$0xff]   ;;  %v2876_v6 = vld [vmem:[%s3047_s22 + $0x118] sm:$0xff]  }
  0x29   : > { %2462 = vmatpush3.bf16.msra.mxu0 %v2818_v22  ;;  %v2868_v0 = vld [vmem:[%s3084_s25 + $0x124] ss:$36 sps:$4 sm:$0xff]   ;;  %v2877_v7 = vld [vmem:[%s3047_s22 + $0x198] sm:$0xff]   ;;  %v2878_v8 = vld [vmem:[%s3084_s25 + $0x16c] ss:$36 sps:$4 sm:$0xff]  }
  0x2a   : > { %2526 = vmatpush3.bf16.msra.mxu1 %v2819_v23  ;;  %2463 = vmatprep.subr.bf16.mxu0 %v2820_v24  ;;  %v2872_v2 = vld [vmem:[%s3084_s25 + $0x120] ss:$36 sps:$4 sm:$0xff]   ;;  %v2880_v9 = vld [vmem:[%s3084_s25 + $0x174] ss:$36 sps:$4 sm:$0xff]   ;;  %v2882_v12 = vld [vmem:[%s3084_s25 + $0x168] ss:$36 sps:$4 sm:$0xff]  }
  0x2b   : > { %2527 = vmatprep.subr.bf16.mxu1 %v2821_v25  ;;  %v2884_v10 = vld [vmem:[%s3047_s22 + $0x150] sm:$0xff]   ;;  %v2890_v17 = vld [vmem:[%s3084_s25 + $0x1bc] ss:$36 sps:$4 sm:$0xff]   ;;  %v2894_v18 = vld [vmem:[%s3047_s22 + $0x148] sm:$0xff]  }
  0x2c   : > { %v2885_v11 = vld [vmem:[%s3047_s22 + $0x1d0] sm:$0xff]   ;;  %v2895_v19 = vld [vmem:[%s3047_s22 + $0x1c8] sm:$0xff]   ;;  %v2893_v23 = vld [vmem:[%s3084_s25 + $0x1b8] ss:$36 sps:$4 sm:$0xff]  }
  0x2d   : > { %2464 = vmatpush3.bf16.msra.mxu0 %v2822_v26  ;;  %v2886_v13 = vld [vmem:[%s3047_s22 + $0x110] sm:$0xff]   ;;  %v2896_v20 = vld [vmem:[%s3047_s22 + $0x108] sm:$0xff]   ;;  %v2898_v24 = vld [vmem:[%s3084_s25 + $0x1fc] ss:$36 sps:$4 sm:$0xff]  }
  0x2e   : > { %2528 = vmatpush3.bf16.msra.mxu1 %v2823_v27  ;;  %2465 = vmatprep.subr.bf16.mxu0 %v2824_v28  ;;  %v2887_v14 = vld [vmem:[%s3047_s22 + $0x190] sm:$0xff]   ;;  %v2897_v21 = vld [vmem:[%s3047_s22 + $0x188] sm:$0xff]   ;;  %v2904_v26 = vld [vmem:[%s3047_s22 + $0x140] sm:$0xff]  }
  0x2f   : > { %2529 = vmatprep.subr.bf16.mxu1 %v2825_v29  ;;  %v2883_v15 = vld [vmem:[%s3084_s25 + $0x170] ss:$36 sps:$4 sm:$0xff]   ;;  %v2900_v25 = vld [vmem:[%s3084_s25 + $0x204] ss:$36 sps:$4 sm:$0xff]  }
  0x30   : > { %v2888_v16 = vld [vmem:[%s3084_s25 + $0x1b4] ss:$36 sps:$4 sm:$0xff]   ;;  %v2905_v27 = vld [vmem:[%s3047_s22 + $0x1c0] sm:$0xff]  }
  0x31   : > { %2466 = vmatpush3.bf16.msra.mxu0 %v2826_v30  ;;  %v2892_v22 = vld [vmem:[%s3084_s25 + $0x1b0] ss:$36 sps:$4 sm:$0xff]   ;;  %v2906_v28 = vld [vmem:[%s3047_s22 + $0x100] sm:$0xff]   ;;  %v2902_v30 = vld [vmem:[%s3084_s25 + $0x1f8] ss:$36 sps:$4 sm:$0xff]  }
  0x32   : > { %2530 = vmatpush3.bf16.msra.mxu1 %v2827_v31  ;;  %2579 = vmatprep.subr.bf16.mxu0 %v2834_v36  ;;  %v2907_v29 = vld [vmem:[%s3047_s22 + $0x180] sm:$0xff]   ;;  %v2910_v33 = vld [vmem:[%s3084_s25 + $0x14] ss:$36 sps:$4 sm:$0xff]  }
  0x33   : > { %2643 = vmatprep.subr.bf16.mxu1 %v2835_v37  ;;  %v2903_v31 = vld [vmem:[%s3084_s25 + $0x200] ss:$36 sps:$4 sm:$0xff]   ;;  %v2908_v35 = vld [vmem:[%s3084_s25 + $0x10] ss:$36 sps:$4 sm:$0xff]   ;;  %v2911_v36 = vld [vmem:[%s3084_s25 + $0x18] ss:$36 sps:$4 sm:$0xff]  }
  0x34   : > { %1423 = vmatmul.mubr.bf16.vlgmr.msra.gmra.mxu0 %v2828_v32  ;;  %v2914_v32 = vld [vmem:[%s3047_s22 + $0x238] sm:$0xff]  }
  0x35   : > { %1520 = vmatmul.mubr.bf16.vlgmr.msra.gmra.mxu1 %v2831_v34  ;;  %2580 = vmatpush3.bf16.msra.mxu0 %v2836_v38  ;;  %v2913_v34 = vld [vmem:[%s3084_s25 + $0x1c] ss:$36 sps:$4 sm:$0xff]   ;;  %v2917_v38 = vld [vmem:[%s3084_s25 + $0x64] ss:$36 sps:$4 sm:$0xff]  }
  0x36   : > { %2644 = vmatpush3.bf16.msra.mxu1 %v2837_v39  ;;  %1430 = vmatprep.mubr.bf16.mxu0 %v2838_v40  ;;  %v2915_v37 = vld [vmem:[%s3084_s25 + $0x5c] ss:$36 sps:$4 sm:$0xff]   ;;  %v2921_v39 = vld [vmem:[%s3047_s22 + $0x230] sm:$0xff]   ;;  %v2928_v40 = vld [vmem:[%s3047_s22 + $0x228] sm:$0xff]  }
  0x37   : > { %1527 = vmatprep.mubr.bf16.mxu1 %v2840_v41  ;;  %2581 = vmatprep.subr.bf16.mxu0 %v2844_v44  ;;  %v2919_v41 = vld [vmem:[%s3084_s25 + $0x58] ss:$36 sps:$4 sm:$0xff]   ;;  %v2924_v44 = vld [vmem:[%s3084_s25 + $0xac] ss:$36 sps:$4 sm:$0xff]  }
  0x38   : > { %2645 = vmatprep.subr.bf16.mxu1 %v2845_v45  ;;  %v2935_v45 = vld [vmem:[%s3047_s22 + $0x220] sm:$0xff]  }
  0x39   : > { %2582 = vmatpush3.bf16.msra.mxu0 %v2846_v46  ;;  %v2942_v46 = vld [vmem:[%s3047_s22 + $0x218] sm:$0xff]  }
  0x3a   : > { %2646 = vmatpush3.bf16.msra.mxu1 %v2847_v47  ;;  %2583 = vmatprep.subr.bf16.mxu0 %v2854_v52  ;;  %v2926_v47 = vld [vmem:[%s3084_s25 + $0xa0] ss:$36 sps:$4 sm:$0xff]   ;;  %v2933_v52 = vld [vmem:[%s3084_s25 + $0xe8] ss:$36 sps:$4 sm:$0xff]  }
  0x3b   : > { %2647 = vmatprep.subr.bf16.mxu1 %v2855_v53  ;;  %v2956_v53 = vld [vmem:[%s3047_s22 + $0x208] sm:$0xff]  }
  0x3c   : > { %1431 = vmatmul.mubr.bf16.gmra.mxu0 %v2842_v42  ;;  %v2920_v42 = vld [vmem:[%s3084_s25 + $0x60] ss:$36 sps:$4 sm:$0xff]  }
  0x3d   : > { %1528 = vmatmul.mubr.bf16.gmra.mxu1 %v2843_v43  ;;  %1438 = vmatprep.mubr.bf16.mxu0 %v2848_v48  ;;  %v2922_v43 = vld [vmem:[%s3084_s25 + $0xa4] ss:$36 sps:$4 sm:$0xff]  }
  0x3e   : > { %1535 = vmatprep.mubr.bf16.mxu1 %v2850_v49  ;;  %2584 = vmatpush3.bf16.msra.mxu0 %v2856_v54  ;;  %v2927_v48 = vld [vmem:[%s3084_s25 + $0xa8] ss:$36 sps:$4 sm:$0xff]   ;;  %v2934_v54 = vld [vmem:[%s3084_s25 + $0xf0] ss:$36 sps:$4 sm:$0xff]  }
  0x3f   : > { %2648 = vmatpush3.bf16.msra.mxu1 %v2857_v55  ;;  %2585 = vmatprep.subr.bf16.mxu0 %v2864_v60  ;;  %v2929_v49 = vld [vmem:[%s3084_s25 + $0xec] ss:$36 sps:$4 sm:$0xff]   ;;  %v2936_v55 = vld [vmem:[%s3084_s25 + $0x134] ss:$36 sps:$4 sm:$0xff]   ;;  %v2943_v60 = vld [vmem:[%s3084_s25 + $0x17c] ss:$36 sps:$4 sm:$0xff]  }
  0x40   : > { %2649 = vmatprep.subr.bf16.mxu1 %v2865_v61  ;;  %v2945_v61 = vld [vmem:[%s3084_s25 + $0x184] ss:$36 sps:$4 sm:$0xff]  }
  0x42   : > { %2586 = vmatpush3.bf16.msra.mxu0 %v2866_v62  ;;  %v2947_v62 = vld [vmem:[%s3084_s25 + $0x178] ss:$36 sps:$4 sm:$0xff]  }
  0x43   : > { %2650 = vmatpush3.bf16.msra.mxu1 %v2867_v63  ;;  %2587 = vmatprep.subr.bf16.mxu0 %v2874_v3  ;;  %v2948_v63 = vld [vmem:[%s3084_s25 + $0x180] ss:$36 sps:$4 sm:$0xff]   ;;  %v2955_v3 = vld [vmem:[%s3084_s25 + $0x1c8] ss:$36 sps:$4 sm:$0xff]  }
  0x44   : > { %1439 = vmatmul.mubr.bf16.gmra.mxu0 %v2852_v50  ;;  %2651 = vmatprep.subr.bf16.mxu1 %v2875_v5  ;;  %v2931_v50 = vld [vmem:[%s3084_s25 + $0xf4] ss:$36 sps:$4 sm:$0xff]  }
  0x45   : > { %1536 = vmatmul.mubr.bf16.gmra.mxu1 %v2853_v51  ;;  %1446 = vmatprep.mubr.bf16.mxu0 %v2858_v56  ;;  %v2949_v51 = vld [vmem:[%s3047_s22 + $0x210] sm:$0xff]   ;;  %v2938_v56 = vld [vmem:[%s3084_s25 + $0x13c] ss:$36 sps:$4 sm:$0xff]  }
  0x46   : > { %1543 = vmatprep.mubr.bf16.mxu1 %v2860_v57  ;;  %2588 = vmatpush3.bf16.msra.mxu0 %v2876_v6  ;;  %v2963_v57 = vld [vmem:[%s3047_s22 + $0x200] sm:$0xff]   ;;  %v2959_v5 = vld [vmem:[%s3084_s25 + $0x214] ss:$36 sps:$4 sm:$0xff]   ;;  %v2961_v6 = vld [vmem:[%s3084_s25 + $0x208] ss:$36 sps:$4 sm:$0xff]  }
  0x47   : > { %2652 = vmatpush3.bf16.msra.mxu1 %v2877_v7  ;;  %2589 = vmatprep.subr.bf16.mxu0 %v2884_v10  ;;  %v2962_v7 = vld [vmem:[%s3084_s25 + $0x210] ss:$36 sps:$4 sm:$0xff]   ;;  %v2966_v10 = vld [vmem:[%s3084_s25 + $0x68] ss:$36 sps:$4 sm:$0xff]  }
  0x48   : > { %2653 = vmatprep.subr.bf16.mxu1 %v2885_v11  ;;  %v2967_v11 = vld [vmem:[%s3084_s25 + $0x188] ss:$36 sps:$4 sm:$0xff]  }
  0x4a   : > { %2590 = vmatpush3.bf16.msra.mxu0 %v2886_v13  ;;  %v2969_v13 = vld [vmem:[%s3084_s25 + $0x1d0] ss:$36 sps:$4 sm:$0xff]  }
  0x4b   : > { %2654 = vmatpush3.bf16.msra.mxu1 %v2887_v14  ;;  %2591 = vmatprep.subr.bf16.mxu0 %v2894_v18  ;;  %v2970_v14 = vld [vmem:[%s3084_s25 + $0xf8] ss:$36 sps:$4 sm:$0xff]   ;;  %v3204_v18 = vld [vmem:[%s331_s28] ss:$0 sm:$0xff] }
  0x4c   : > { %1447 = vmatmul.mubr.bf16.gmra.mxu0 %v2862_v58  ;;  %2655 = vmatprep.subr.bf16.mxu1 %v2895_v19  ;;  %v2940_v58 = vld [vmem:[%s3084_s25 + $0x130] ss:$36 sps:$4 sm:$0xff]  }
  0x4d   : > { %1544 = vmatmul.mubr.bf16.gmra.mxu1 %v2863_v59  ;;  %1454 = vmatprep.mubr.bf16.mxu0 %v2868_v0  ;;  %v2941_v59 = vld [vmem:[%s3084_s25 + $0x138] ss:$36 sps:$4 sm:$0xff]   ;;  %v2950_v0 = vld [vmem:[%s3084_s25 + $0x1c4] ss:$36 sps:$4 sm:$0xff]  }
  0x4e   : > { %1551 = vmatprep.mubr.bf16.mxu1 %v2870_v1  ;;  %2592 = vmatpush3.bf16.msra.mxu0 %v2896_v20  ;;  %v2952_v1 = vld [vmem:[%s3084_s25 + $0x1cc] ss:$36 sps:$4 sm:$0xff]  }
  0x4f   : > { %2656 = vmatpush3.bf16.msra.mxu1 %v2897_v21  ;;  %2593 = vmatprep.subr.bf16.mxu0 %v2904_v26 }
  0x50   : > { %2657 = vmatprep.subr.bf16.mxu1 %v2905_v27 }
  0x52   : > { %2594 = vmatpush3.bf16.msra.mxu0 %v2906_v28 }
  0x53   : > { %2658 = vmatpush3.bf16.msra.mxu1 %v2907_v29  ;;  %2723 = vmatprep.subr.bf16.mxu0 %v2914_v32 }
  0x54   : > { %1455 = vmatmul.mubr.bf16.gmra.mxu0 %v2872_v2  ;;  %2755 = vmatprep.subr.bf16.mxu1 %v2914_v32  ;;  %v2954_v2 = vld [vmem:[%s3084_s25 + $0x1c0] ss:$36 sps:$4 sm:$0xff]  }
  0x55   : > { %1552 = vmatmul.mubr.bf16.gmra.mxu1 %v2873_v4  ;;  %1462 = vmatprep.mubr.bf16.mxu0 %v2878_v8  ;;  %v2957_v4 = vld [vmem:[%s3084_s25 + $0x20c] ss:$36 sps:$4 sm:$0xff]   ;;  %v2964_v8 = vld [vmem:[%s3084_s25 + $0x20] ss:$36 sps:$4 sm:$0xff]  }
  0x56   : > { %1559 = vmatprep.mubr.bf16.mxu1 %v2880_v9  ;;  %v2965_v9 = vld [vmem:[%s3084_s25 + $0x140] ss:$36 sps:$4 sm:$0xff]  }
  0x5c   : > { %1463 = vmatmul.mubr.bf16.gmra.mxu0 %v2882_v12  ;;  %v2968_v12 = vld [vmem:[%s3084_s25 + $0xb0] ss:$36 sps:$4 sm:$0xff]  }
  0x5d   : > { %1560 = vmatmul.mubr.bf16.gmra.mxu1 %v2883_v15  ;;  %1470 = vmatprep.mubr.bf16.mxu0 %v2888_v16  ;;  %v2971_v15 = vld [vmem:[%s3084_s25 + $0x218] ss:$36 sps:$4 sm:$0xff]  }
  0x5e   : > { %1567 = vmatprep.mubr.bf16.mxu1 %v2890_v17 }
  0x64   : > { %1471 = vmatmul.mubr.bf16.gmra.mxu0 %v2892_v22 }
  0x65   : > { %1568 = vmatmul.mubr.bf16.gmra.mxu1 %v2893_v23  ;;  %1478 = vmatprep.mubr.bf16.mxu0 %v2898_v24 }
  0x66   : > { %1575 = vmatprep.mubr.bf16.mxu1 %v2900_v25 }
  0x6c   : > { %1479 = vmatmul.mubr.bf16.gmra.mxu0 %v2902_v30 }
  0x6d   : > { %1576 = vmatmul.mubr.bf16.gmra.mxu1 %v2903_v31  ;;  %1616 = vmatprep.mubr.bf16.mxu0 %v2910_v33 }
  0x6e   : > { %1713 = vmatprep.mubr.bf16.mxu1 %v2913_v34 }
  0x74   : > { %1617 = vmatmul.mubr.bf16.vlgmr.msra.gmra.mxu0 %v2908_v35 }
  0x75   : > { %1714 = vmatmul.mubr.bf16.vlgmr.msra.gmra.mxu1 %v2911_v36  ;;  %2724 = vmatpush3.bf16.msra.mxu0 %v2914_v32 }
  0x76   : > { %2763 = vmatpush3.bf16.msra.mxu1 %v2914_v32  ;;  %1624 = vmatprep.mubr.bf16.mxu0 %v2915_v37 }
  0x77   : > { %1721 = vmatprep.mubr.bf16.mxu1 %v2917_v38  ;;  %2725 = vmatprep.subr.bf16.mxu0 %v2921_v39 }
  0x78   : > { %2756 = vmatprep.subr.bf16.mxu1 %v2921_v39 }
  0x79   : > { %2726 = vmatpush3.bf16.msra.mxu0 %v2921_v39 }
  0x7a   : > { %2764 = vmatpush3.bf16.msra.mxu1 %v2921_v39  ;;  %2727 = vmatprep.subr.bf16.mxu0 %v2928_v40 }
  0x7b   : > { %2757 = vmatprep.subr.bf16.mxu1 %v2928_v40 }
  0x7c   : > { %1625 = vmatmul.mubr.bf16.gmra.mxu0 %v2919_v41 }
  0x7d   : > { %1722 = vmatmul.mubr.bf16.gmra.mxu1 %v2920_v42  ;;  %1632 = vmatprep.mubr.bf16.mxu0 %v2922_v43 }
  0x7e   : > { %1729 = vmatprep.mubr.bf16.mxu1 %v2924_v44  ;;  %2728 = vmatpush3.bf16.msra.mxu0 %v2928_v40 }
  0x7f   : > { %2765 = vmatpush3.bf16.msra.mxu1 %v2928_v40  ;;  %2729 = vmatprep.subr.bf16.mxu0 %v2935_v45 }
  0x80   : > { %2758 = vmatprep.subr.bf16.mxu1 %v2935_v45 }
  0x82   : > { %2730 = vmatpush3.bf16.msra.mxu0 %v2935_v45 }
  0x83   : > { %2766 = vmatpush3.bf16.msra.mxu1 %v2935_v45  ;;  %2731 = vmatprep.subr.bf16.mxu0 %v2942_v46 }
  0x84   : > { %1633 = vmatmul.mubr.bf16.gmra.mxu0 %v2926_v47  ;;  %2759 = vmatprep.subr.bf16.mxu1 %v2942_v46 }
  0x85   : > { %1730 = vmatmul.mubr.bf16.gmra.mxu1 %v2927_v48  ;;  %1640 = vmatprep.mubr.bf16.mxu0 %v2929_v49 }
  0x86   : > { %1737 = vmatprep.mubr.bf16.mxu1 %v2931_v50  ;;  %2732 = vmatpush3.bf16.msra.mxu0 %v2942_v46 }
  0x87   : > { %2767 = vmatpush3.bf16.msra.mxu1 %v2942_v46  ;;  %2733 = vmatprep.subr.bf16.mxu0 %v2949_v51 }
  0x88   : > { %2760 = vmatprep.subr.bf16.mxu1 %v2949_v51 }
  0x8a   : > { %2734 = vmatpush3.bf16.msra.mxu0 %v2949_v51 }
  0x8b   : > { %2768 = vmatpush3.bf16.msra.mxu1 %v2949_v51  ;;  %2735 = vmatprep.subr.bf16.mxu0 %v2956_v53 }
  0x8c   : > { %1641 = vmatmul.mubr.bf16.gmra.mxu0 %v2933_v52  ;;  %2761 = vmatprep.subr.bf16.mxu1 %v2956_v53 }
  0x8d   : > { %1738 = vmatmul.mubr.bf16.gmra.mxu1 %v2934_v54  ;;  %1648 = vmatprep.mubr.bf16.mxu0 %v2936_v55 }
  0x8e   : > { %1745 = vmatprep.mubr.bf16.mxu1 %v2938_v56  ;;  %2736 = vmatpush3.bf16.msra.mxu0 %v2956_v53 }
  0x8f   : > { %2769 = vmatpush3.bf16.msra.mxu1 %v2956_v53  ;;  %2737 = vmatprep.subr.bf16.mxu0 %v2963_v57 }
  0x90   : > { %2762 = vmatprep.subr.bf16.mxu1 %v2963_v57 }
  0x92   : > { %2738 = vmatpush3.bf16.msra.mxu0 %v2963_v57 }
  0x93   : > { %2770 = vmatpush3.bf16.msra.mxu1 %v2963_v57 }
  0x94   : > { %1649 = vmatmul.mubr.bf16.gmra.mxu0 %v2940_v58 }
  0x95   : > { %1746 = vmatmul.mubr.bf16.gmra.mxu1 %v2941_v59  ;;  %1656 = vmatprep.mubr.bf16.mxu0 %v2943_v60 }
  0x96   : > { %1753 = vmatprep.mubr.bf16.mxu1 %v2945_v61 }
  0x9c   : > { %1657 = vmatmul.mubr.bf16.gmra.mxu0 %v2947_v62 }
  0x9d   : > { %1754 = vmatmul.mubr.bf16.gmra.mxu1 %v2948_v63  ;;  %1664 = vmatprep.mubr.bf16.mxu0 %v2950_v0 }
  0x9e   : > { %1761 = vmatprep.mubr.bf16.mxu1 %v2952_v1 }
  0xa4   : > { %1665 = vmatmul.mubr.bf16.gmra.mxu0 %v2954_v2 }
  0xa5   : > { %1762 = vmatmul.mubr.bf16.gmra.mxu1 %v2955_v3  ;;  %1672 = vmatprep.mubr.bf16.mxu0 %v2957_v4 }
  0xa6   : > { %1769 = vmatprep.mubr.bf16.mxu1 %v2959_v5 }
  0xac   : > { %1673 = vmatmul.mubr.bf16.gmra.mxu0 %v2961_v6 }
  0xad   : > { %1770 = vmatmul.mubr.bf16.gmra.mxu1 %v2962_v7  ;;  %2739 = vmatprep.mubr.bf16.mxu0 %v2964_v8 }
  0xae   : > { %2747 = vmatprep.mubr.bf16.mxu1 %v2965_v9 }
  0xb4   : > { %2740 = vmatmul.mubr.bf16.vlgmr.msra.gmra.mxu0 %v2966_v10 }
  0xb5   : > { %2748 = vmatmul.mubr.bf16.vlgmr.msra.gmra.mxu1 %v2967_v11  ;;  %2743 = vmatprep.mubr.bf16.mxu0 %v2968_v12 }
  0xb6   : > { %2751 = vmatprep.mubr.bf16.mxu1 %v2969_v13 }
  0xbc   : > { %2744 = vmatmul.mubr.bf16.gmra.mxu0 %v2970_v14 }
  0xbd   : > { %2752 = vmatmul.mubr.bf16.gmra.mxu1 %v2971_v15 }
  0xf4   : > { %v2467_v16 = vpop.f32.mrf.mxu0 }
  0xf5   : > { %v2531_v17 = vpop.f32.mrf.mxu1 }
  0xf6   : > { %v2468_v19 = vpop.f32.mrf.mxu0 }
  0xf7   : > { %v2469_v20 = vadd.f32 %v2468_v19, %v2467_v16  ;;  %v2532_v21 = vpop.f32.mrf.mxu1 }
  0xf8   : > { %v2533_v22 = vadd.f32 %v2532_v21, %v2531_v17  ;;  %v2470_v23 = vpop.f32.mrf.mxu0 }
  0xf9   : > { %v1425_v24 = vadd.f32 %v2469_v20, %v3204_v18  ;;  %v2534_v25 = vpop.f32.mrf.mxu1 }
  0xfa   : > { %v2471_v26 = vpop.f32.mrf.mxu0 }
  0xfb   : > { %v3207_v27 = vadd.f32 %v2533_v22, %v1425_v24  ;;  %v2472_v28 = vadd.f32 %v2471_v26, %v2470_v23  ;;  %v2535_v29 = vpop.f32.mrf.mxu1 }
  0xfc   : > { %v2536_v30 = vadd.f32 %v2535_v29, %v2534_v25  ;;  %v2473_v31 = vpop.f32.mrf.mxu0 }
  0xfd   : > { %v1428_v32 = vadd.f32 %v2472_v28, %v3204_v18  ;;  %v2537_v33 = vpop.f32.mrf.mxu1 }
  0xfe   : > { %v2474_v34 = vpop.f32.mrf.mxu0 }
  0xff   : > { %v3210_v35 = vadd.f32 %v2536_v30, %v1428_v32  ;;  %v2475_v36 = vadd.f32 %v2474_v34, %v2473_v31  ;;  %v2538_v37 = vpop.f32.mrf.mxu1 }
 0x100   : > { %v2539_v38 = vadd.f32 %v2538_v37, %v2537_v33  ;;  %v2476_v39 = vpop.f32.mrf.mxu0 }
 0x101   : > { %v1433_v40 = vadd.f32 %v2475_v36, %v3204_v18  ;;  %v2540_v41 = vpop.f32.mrf.mxu1 }
 0x102   : > { %v2477_v42 = vpop.f32.mrf.mxu0 }
 0x103   : > { %v3213_v43 = vadd.f32 %v2539_v38, %v1433_v40  ;;  %v2478_v44 = vadd.f32 %v2477_v42, %v2476_v39  ;;  %v2541_v45 = vpop.f32.mrf.mxu1 }
 0x104   : > { %v2542_v46 = vadd.f32 %v2541_v45, %v2540_v41  ;;  %v2479_v47 = vpop.f32.mrf.mxu0 }
 0x105   : > { %v1436_v48 = vadd.f32 %v2478_v44, %v3204_v18  ;;  %v2543_v49 = vpop.f32.mrf.mxu1 }
 0x106   : > { %v2480_v50 = vpop.f32.mrf.mxu0 }
 0x107   : > { %v3216_v51 = vadd.f32 %v2542_v46, %v1436_v48  ;;  %v2481_v52 = vadd.f32 %v2480_v50, %v2479_v47  ;;  %v2544_v53 = vpop.f32.mrf.mxu1 }
 0x108   : > { %v2545_v54 = vadd.f32 %v2544_v53, %v2543_v49  ;;  %v2482_v55 = vpop.f32.mrf.mxu0 }
 0x109   : > { %v1441_v56 = vadd.f32 %v2481_v52, %v3204_v18  ;;  %v2546_v57 = vpop.f32.mrf.mxu1 }
 0x10a   : > { %v2483_v58 = vpop.f32.mrf.mxu0 }
 0x10b   : > { %v3219_v59 = vadd.f32 %v2545_v54, %v1441_v56  ;;  %v2484_v60 = vadd.f32 %v2483_v58, %v2482_v55  ;;  %v2547_v61 = vpop.f32.mrf.mxu1 }
 0x10c   : > { %v2548_v62 = vadd.f32 %v2547_v61, %v2546_v57  ;;  %v2485_v63 = vpop.f32.mrf.mxu0 }
 0x10d   : > { %v1444_v0 = vadd.f32 %v2484_v60, %v3204_v18  ;;  %v2549_v1 = vpop.f32.mrf.mxu1 }
 0x10e   : > { %v2486_v2 = vpop.f32.mrf.mxu0 }
 0x10f   : > { %v3222_v3 = vadd.f32 %v2548_v62, %v1444_v0  ;;  %v2487_v4 = vadd.f32 %v2486_v2, %v2485_v63  ;;  %v2550_v5 = vpop.f32.mrf.mxu1 }
 0x110   : > { %v2551_v6 = vadd.f32 %v2550_v5, %v2549_v1  ;;  %v2488_v7 = vpop.f32.mrf.mxu0 }
 0x111   : > { %v1449_v8 = vadd.f32 %v2487_v4, %v3204_v18  ;;  %v2552_v9 = vpop.f32.mrf.mxu1 }
 0x112   : > { %v2489_v10 = vpop.f32.mrf.mxu0 }
 0x113   : > { %v3225_v11 = vadd.f32 %v2551_v6, %v1449_v8  ;;  %v2490_v12 = vadd.f32 %v2489_v10, %v2488_v7  ;;  %v2553_v13 = vpop.f32.mrf.mxu1 }
 0x114   : > { %v2554_v14 = vadd.f32 %v2553_v13, %v2552_v9  ;;  %v2491_v15 = vpop.f32.mrf.mxu0 }
 0x115   : > { %v1452_v16 = vadd.f32 %v2490_v12, %v3204_v18  ;;  %v2555_v17 = vpop.f32.mrf.mxu1 }
 0x116   : > { %v2492_v19 = vpop.f32.mrf.mxu0 }
 0x117   : > { %v3228_v20 = vadd.f32 %v2554_v14, %v1452_v16  ;;  %v2493_v21 = vadd.f32 %v2492_v19, %v2491_v15  ;;  %v2556_v22 = vpop.f32.mrf.mxu1 }
 0x118   : > { %v2557_v23 = vadd.f32 %v2556_v22, %v2555_v17  ;;  %v2494_v24 = vpop.f32.mrf.mxu0 }
 0x119   : > { %v1457_v25 = vadd.f32 %v2493_v21, %v3204_v18  ;;  %v2558_v26 = vpop.f32.mrf.mxu1 }
 0x11a   : > { %v2495_v28 = vpop.f32.mrf.mxu0 }
 0x11b   : > { %v3231_v29 = vadd.f32 %v2557_v23, %v1457_v25  ;;  %v2496_v30 = vadd.f32 %v2495_v28, %v2494_v24  ;;  %v2559_v31 = vpop.f32.mrf.mxu1 }
 0x11c   : > { %v2560_v32 = vadd.f32 %v2559_v31, %v2558_v26  ;;  %v2497_v33 = vpop.f32.mrf.mxu0 }
 0x11d   : > { %v1460_v34 = vadd.f32 %v2496_v30, %v3204_v18  ;;  %v2561_v36 = vpop.f32.mrf.mxu1 }
 0x11e   : > { %v2498_v37 = vpop.f32.mrf.mxu0 }
 0x11f   : > { %v3234_v38 = vadd.f32 %v2560_v32, %v1460_v34  ;;  %v2499_v39 = vadd.f32 %v2498_v37, %v2497_v33  ;;  %v2562_v40 = vpop.f32.mrf.mxu1 }
 0x120   : > { %v2563_v41 = vadd.f32 %v2562_v40, %v2561_v36  ;;  %v2500_v42 = vpop.f32.mrf.mxu0 }
 0x121   : > { %3493 = vst [vmem:[#allocation2_spill] sm:$0xff] %v3234_v38  ;;  %v1465_v44 = vadd.f32 %v2499_v39, %v3204_v18  ;;  %v2564_v45 = vpop.f32.mrf.mxu1 }
 0x122   : > { %v2501_v46 = vpop.f32.mrf.mxu0 }
 0x123   : > { %v3237_v47 = vadd.f32 %v2563_v41, %v1465_v44  ;;  %v2502_v48 = vadd.f32 %v2501_v46, %v2500_v42  ;;  %v2565_v49 = vpop.f32.mrf.mxu1 }
 0x124   : > { %v2566_v50 = vadd.f32 %v2565_v49, %v2564_v45  ;;  %v2503_v52 = vpop.f32.mrf.mxu0 }
 0x125   : > { %v1468_v53 = vadd.f32 %v2502_v48, %v3204_v18  ;;  %v2567_v54 = vpop.f32.mrf.mxu1 }
 0x126   : > { %v2504_v55 = vpop.f32.mrf.mxu0 }
 0x127   : > { %v3240_v56 = vadd.f32 %v2566_v50, %v1468_v53  ;;  %v2505_v57 = vadd.f32 %v2504_v55, %v2503_v52  ;;  %v2568_v58 = vpop.f32.mrf.mxu1 }
 0x128   : > { %v2569_v60 = vadd.f32 %v2568_v58, %v2567_v54  ;;  %v2506_v61 = vpop.f32.mrf.mxu0 }
 0x129   : > { %3494 = vst [vmem:[#allocation3_spill] sm:$0xff] %v3240_v56  ;;  %v1473_v62 = vadd.f32 %v2505_v57, %v3204_v18  ;;  %v2570_v63 = vpop.f32.mrf.mxu1 }
 0x12a   : > { %v2507_v0 = vpop.f32.mrf.mxu0 }
 0x12b   : > { %v3243_v1 = vadd.f32 %v2569_v60, %v1473_v62  ;;  %v2508_v2 = vadd.f32 %v2507_v0, %v2506_v61  ;;  %v2571_v4 = vpop.f32.mrf.mxu1 }
 0x12c   : > { %v2572_v5 = vadd.f32 %v2571_v4, %v2570_v63  ;;  %v2509_v6 = vpop.f32.mrf.mxu0 }
 0x12d   : > { %3495 = vst [vmem:[#allocation4_spill] sm:$0xff] %v3243_v1  ;;  %v1476_v7 = vadd.f32 %v2508_v2, %v3204_v18  ;;  %v2573_v8 = vpop.f32.mrf.mxu1 }
 0x12e   : > { %v2510_v9 = vpop.f32.mrf.mxu0 }
 0x12f   : > { %v3246_v10 = vadd.f32 %v2572_v5, %v1476_v7  ;;  %v2511_v12 = vadd.f32 %v2510_v9, %v2509_v6  ;;  %v2574_v13 = vpop.f32.mrf.mxu1 }
 0x130   : > { %v2575_v14 = vadd.f32 %v2574_v13, %v2573_v8  ;;  %v2512_v15 = vpop.f32.mrf.mxu0 }
 0x131   : > { %3496 = vst [vmem:[#allocation5_spill] sm:$0xff] %v3246_v10  ;;  %v1481_v16 = vadd.f32 %v2511_v12, %v3204_v18  ;;  %v2576_v17 = vpop.f32.mrf.mxu1 }
 0x132   : > { %v2513_v19 = vpop.f32.mrf.mxu0 }
 0x133   : > { %v3249_v21 = vadd.f32 %v2575_v14, %v1481_v16  ;;  %v2514_v22 = vadd.f32 %v2513_v19, %v2512_v15  ;;  %v2577_v23 = vpop.f32.mrf.mxu1 }
 0x134   : > { %v2578_v24 = vadd.f32 %v2577_v23, %v2576_v17  ;;  %v2595_v25 = vpop.f32.mrf.mxu0 }
 0x135   : > { %3497 = vst [vmem:[#allocation6_spill] sm:$0xff] %v3249_v21  ;;  %v1484_v26 = vadd.f32 %v2514_v22, %v3204_v18  ;;  %v2659_v28 = vpop.f32.mrf.mxu1 }
 0x136   : > { %v2596_v30 = vpop.f32.mrf.mxu0 }
 0x137   : > { %v3252_v31 = vadd.f32 %v2578_v24, %v1484_v26  ;;  %v2597_v32 = vadd.f32 %v2596_v30, %v2595_v25  ;;  %v2660_v33 = vpop.f32.mrf.mxu1 }
 0x138   : > { %v2598_v34 = vpop.f32.mrf.mxu0  ;;  %v2661_v37 = vadd.f32 %v2660_v33, %v2659_v28  ;;  %v3323_v33 = vld [vmem:[%s343_s6 + $0x8] sm:$0xff]  }
 0x139   : > { %3498 = vst [vmem:[#allocation7_spill] sm:$0xff] %v3252_v31  ;;  %v1619_v36 = vadd.f32 %v2597_v32, %v3207_v27  ;;  %v3255_v39 = vpop.f32.mrf.mxu1  ;;  %v3331_v31 = vld [vmem:[%s343_s6 + $0x20] sm:$0xff]  }
 0x13a   : > { %v2599_v40 = vpop.f32.mrf.mxu0 }
 0x13b   : > { %v3257_v41 = vpop.f32.mrf.mxu1  ;;  %v3259_v42 = vadd.f32 %v2661_v37, %v1619_v36  ;;  %v3325_v36 = vld [vmem:[%s343_s6 + $0x28] sm:$0xff]   ;;  %v3327_v37 = vld [vmem:[%s343_s6] sm:$0xff]  }
 0x13c   : > { %v3261_v44 = vpop.f32.mrf.mxu0  ;;  %3508 = vst [vmem:[#allocation17_spill] sm:$0xff] %v3325_v36  ;;  %3509 = vst [vmem:[#allocation18_spill] sm:$0xff] %v3327_v37 }
 0x13d   : > { %3499 = vst [vmem:[#allocation8_spill] sm:$0xff] %v3259_v42  ;;  %v3263_v18 = vpop.f32.mrf.mxu1  ;;  %v2600_v42 = vadd.f32 %v2599_v40, %v2598_v34 }
 0x13e   : > { %v2602_v45 = vpop.f32.mrf.mxu0 }
 0x13f   : > { %v3265_v46 = vpop.f32.mrf.mxu1 }
 0x140   : > { %v2604_v48 = vpop.f32.mrf.mxu0 }
 0x141   : > { %v3267_v49 = vpop.f32.mrf.mxu1 }
 0x142   : > { %v2605_v50 = vpop.f32.mrf.mxu0 }
 0x143   : > { %v3269_v27 = vpop.f32.mrf.mxu1 }
 0x144   : > { %v2607_v52 = vpop.f32.mrf.mxu0 }
 0x145   : > { %v3271_v53 = vpop.f32.mrf.mxu1 }
 0x146   : > { %v2608_v54 = vpop.f32.mrf.mxu0 }
 0x147   : > { %v3273_v55 = vpop.f32.mrf.mxu1  ;;  %v2609_v38 = vadd.f32 %v2608_v54, %v2607_v52 }
 0x148   : > { %v3275_v57 = vpop.f32.mrf.mxu0 }
 0x149   : > { %v3277_v58 = vpop.f32.mrf.mxu1  ;;  %v1635_v36 = vadd.f32 %v2609_v38, %v3219_v59 }
 0x14a   : > { %v3279_v60 = vpop.f32.mrf.mxu0 }
 0x14b   : > { %v3281_v61 = vpop.f32.mrf.mxu1 }
 0x14c   : > { %v2613_v62 = vpop.f32.mrf.mxu0 }
 0x14d   : > { %v3283_v63 = vpop.f32.mrf.mxu1 }
 0x14e   : > { %v2614_v0 = vpop.f32.mrf.mxu0 }
 0x14f   : > { %v3285_v2 = vpop.f32.mrf.mxu1 }
 0x150   : > { %v3287_v4 = vpop.f32.mrf.mxu0 }
 0x151   : > { %v3289_v5 = vpop.f32.mrf.mxu1 }
 0x152   : > { %3500 = vst [vmem:[#allocation9_spill] sm:$0xff] %v3289_v5  ;;  %v3291_v6 = vpop.f32.mrf.mxu0  ;;  %v3340_v5 = vld [vmem:[%s343_s6 + $0x38] sm:$0xff]  }
 0x153   : > { %v3293_v7 = vpop.f32.mrf.mxu1  ;;  %v2618_v59 = vadd.f32 %v3291_v6, %v3287_v4  ;;  %v3399_v6 = vadd.f32 %v3281_v61, %v3277_v58 }
 0x154   : > { %3501 = vst [vmem:[#allocation10_spill] sm:$0xff] %v3293_v7  ;;  %v2619_v8 = vpop.f32.mrf.mxu0  ;;  %v3338_v7 = vld [vmem:[%s343_s6 + $0x18] sm:$0xff]  }
 0x155   : > { %v3295_v9 = vpop.f32.mrf.mxu1  ;;  %v2379_v34 = vunpack.c.l.bf16 %v3338_v7 }
 0x156   : > { %3502 = vst [vmem:[#allocation11_spill] sm:$0xff] %v3295_v9  ;;  %v2620_v12 = vpop.f32.mrf.mxu0  ;;  %v2615_v9 = vadd.f32 %v2614_v0, %v2613_v62 }
 0x157   : > { %v3297_v13 = vpop.f32.mrf.mxu1 }
 0x158   : > { %3503 = vst [vmem:[#allocation12_spill] sm:$0xff] %v3297_v13  ;;  %v3299_v14 = vpop.f32.mrf.mxu0 }
 0x159   : > { %v3301_v15 = vpop.f32.mrf.mxu1 }
 0x15a   : > { %3504 = vst [vmem:[#allocation13_spill] sm:$0xff] %v3301_v15  ;;  %v3303_v16 = vpop.f32.mrf.mxu0  ;;  %v2606_v15 = vadd.f32 %v2605_v50, %v2604_v48  ;;  %v2664_v50 = vadd.f32 %v3257_v41, %v3255_v39  ;;  %v2667_v48 = vadd.f32 %v3265_v46, %v3263_v18  ;;  %v2612_v39 = vadd.f32 %v3279_v60, %v3275_v57 }
 0x15b   : > { %v3305_v17 = vpop.f32.mrf.mxu1  ;;  %v1643_v41 = vadd.f32 %v2615_v9, %v3225_v11  ;;  %v2624_v38 = vadd.f32 %v3303_v16, %v3299_v14  ;;  %v2679_v46 = vadd.f32 %v3285_v2, %v3283_v63  ;;  %v1646_v2 = vadd.f32 %v2618_v59, %v3228_v20  ;;  %v3515_v14 = vld [vmem:[#allocation2_spill] sm:$0xff] }
 0x15c   : > { %3505 = vst [vmem:[#allocation14_spill] sm:$0xff] %v3305_v17  ;;  %v2625_v19 = vpop.f32.mrf.mxu0  ;;  %v3350_v17 = vld [vmem:[%s343_s6 + $0x30] sm:$0xff]   ;;  %v1630_v0 = vadd.f32 %v2606_v15, %v3216_v51  ;;  %v2673_v51 = vadd.f32 %v3273_v55, %v3271_v53  ;;  %v3395_v4 = vadd.f32 %v2612_v39, %v3222_v3  ;;  %v3516_v3 = vld [vmem:[#allocation3_spill] sm:$0xff] }
 0x15d   : > { %v3307_v22 = vpop.f32.mrf.mxu1  ;;  %v2392_v54 = vunpack.c.h.bf16 %v3350_v17  ;;  %v1654_v15 = vadd.f32 %v2624_v38, %v3515_v14 }
 0x15e   : > { %v2626_v23 = vpop.f32.mrf.mxu0 }
 0x15f   : > { %v3310_v24 = vpop.f32.mrf.mxu1  ;;  %v3514_v9 = vld [vmem:[#allocation12_spill] sm:$0xff] }
 0x160   : > { %v3312_v25 = vpop.f32.mrf.mxu0 }
 0x161   : > { %v3314_v26 = vpop.f32.mrf.mxu1 }
 0x162   : > { %3506 = vst [vmem:[#allocation15_spill] sm:$0xff] %v3314_v26  ;;  %v2629_v28 = vpop.f32.mrf.mxu0 }
 0x163   : > { %v3321_v30 = vpop.f32.mrf.mxu1 }
 0x164   : > { %3507 = vst [vmem:[#allocation16_spill] sm:$0xff] %v3321_v30  ;;  %v2631_v32 = vpop.f32.mrf.mxu0  ;;  %v2603_v30 = vadd.f32 %v2602_v45, %v3261_v44  ;;  %v2380_v45 = vunpack.c.h.bf16 %v3338_v7  ;;  %v2621_v44 = vadd.f32 %v2620_v12, %v2619_v8  ;;  %v3392_v8 = vadd.f32 %v2673_v51, %v1635_v36 }
 0x165   : > { %v3329_v10 = vpop.f32.mrf.mxu1 }
 0x166   : > { %3510 = vst [vmem:[#allocation19_spill] sm:$0xff] %v3329_v10  ;;  %v2632_v21 = vpop.f32.mrf.mxu0  ;;  %v1622_v10 = vadd.f32 %v2600_v42, %v3210_v35  ;;  %v2627_v35 = vadd.f32 %v2626_v23, %v2625_v19  ;;  %v1627_v62 = vadd.f32 %v2603_v30, %v3213_v43  ;;  %v2670_v43 = vadd.f32 %v3269_v27, %v3267_v49  ;;  %v3517_v30 = vld [vmem:[#allocation4_spill] sm:$0xff] }
 0x167   : > { %v3333_v26 = vpop.f32.mrf.mxu1  ;;  %v2633_v57 = vadd.f32 %v2632_v21, %v2631_v32  ;;  %v1651_v49 = vadd.f32 %v2621_v44, %v3231_v29  ;;  %v1740_v21 = vadd.f32 %v2679_v46, %v1643_v41  ;;  %v3513_v29 = vld [vmem:[#allocation11_spill] sm:$0xff]  ;;  %v3518_v44 = vld [vmem:[#allocation9_spill] sm:$0xff] }
 0x168   : > { %3511 = vst [vmem:[#allocation20_spill] sm:$0xff] %v3333_v26  ;;  %v3342_v1 = vpop.f32.mrf.mxu0  ;;  %v3348_v26 = vld [vmem:[%s343_s6 + $0x10] sm:$0xff]   ;;  %v3377_v23 = vadd.f32 %v2664_v50, %v1622_v10  ;;  %v1659_v11 = vadd.f32 %v2627_v35, %v3237_v47  ;;  %v2630_v10 = vadd.f32 %v2629_v28, %v3312_v25  ;;  %v1724_v53 = vadd.f32 %v2667_v48, %v1627_v62  ;;  %v3520_v48 = vld [vmem:[#allocation13_spill] sm:$0xff]  ;;  %v3521_v50 = vld [vmem:[#allocation14_spill] sm:$0xff] }
 0x169   : > { %3512 = vst [vmem:[#allocation21_spill] sm:$0xff] %v3342_v1  ;;  %v3353_v13 = vpop.f32.mrf.mxu1  ;;  %v2384_v1 = vunpack.c.h.bf16 %v3331_v31  ;;  %v2376_v52 = vunpack.c.h.bf16 %v3348_v26  ;;  %v1727_v55 = vadd.f32 %v2670_v43, %v1630_v0  ;;  %v2691_v47 = vadd.f32 %v3310_v24, %v3307_v22  ;;  %v3519_v22 = vld [vmem:[#allocation10_spill] sm:$0xff]  ;;  %v3522_v39 = vld [vmem:[#allocation15_spill] sm:$0xff] }
 0x16a   : > { %v2635_v56 = vpop.f32.mrf.mxu0  ;;  %v2685_v12 = vadd.f32 %v3514_v9, %v3513_v29  ;;  %v1662_v28 = vadd.f32 %v2630_v10, %v3516_v3  ;;  %v1667_v32 = vadd.f32 %v2633_v57, %v3517_v30  ;;  %v2682_v24 = vadd.f32 %v3519_v22, %v3518_v44 }
 0x16b   : > { %v3359_v37 = vpop.f32.mrf.mxu1  ;;  %v1756_v36 = vadd.f32 %v2691_v47, %v1659_v11  ;;  %v2688_v20 = vadd.f32 %v3521_v50, %v3520_v48  ;;  %v3523_v41 = vld [vmem:[#allocation16_spill] sm:$0xff]  ;;  %v3527_v11 = vld [vmem:[#allocation6_spill] sm:$0xff]  ;;  %v3531_v48 = vld [vmem:[#allocation5_spill] sm:$0xff] }
 0x16c   : > { %v2637_v42 = vpop.f32.mrf.mxu0  ;;  %v1748_v0 = vadd.f32 %v2685_v12, %v1651_v49  ;;  %v1743_v9 = vadd.f32 %v2682_v24, %v1646_v2 }
 0x16d   : > { %v2701_v40 = vpop.f32.mrf.mxu1  ;;  %v1751_v29 = vadd.f32 %v2688_v20, %v1654_v15  ;;  %v3532_v15 = vld [vmem:[#allocation17_spill] sm:$0xff] }
 0x16e   : > { %v2638_v19 = vpop.f32.mrf.mxu0  ;;  %v3533_v2 = vunpack.c.l.bf16 %v3532_v15 }
 0x16f   : > { %v2702_v18 = vpop.f32.mrf.mxu1  ;;  %v2639_v16 = vadd.f32 %v2638_v19, %v2637_v42  ;;  %v2694_v42 = vadd.f32 %v3523_v41, %v3522_v39  ;;  %v3524_v19 = vld [vmem:[#allocation19_spill] sm:$0xff]  ;;  %v3525_v43 = vld [vmem:[#allocation20_spill] sm:$0xff]  ;;  %v3536_v39 = vunpack.c.h.bf16 %v3323_v33 }
 0x170   : > { %v2640_v60 = vpop.f32.mrf.mxu0  ;;  %v2697_v51 = vadd.f32 %v3525_v43, %v3524_v19  ;;  %v3526_v59 = vld [vmem:[#allocation21_spill] sm:$0xff]  ;;  %v2703_v44 = vadd.f32 %v2702_v18, %v2701_v40 }
 0x171   : > { %v2704_v27 = vpop.f32.mrf.mxu1  ;;  %v2636_v38 = vadd.f32 %v2635_v56, %v3526_v59  ;;  %v1675_v57 = vadd.f32 %v2639_v16, %v3527_v11  ;;  %v1759_v3 = vadd.f32 %v2694_v42, %v1662_v28  ;;  %v3530_v56 = vunpack.c.l.bf16 %v3323_v33 }
 0x172   : > { %v2641_v63 = vpop.f32.mrf.mxu0  ;;  %v1764_v30 = vadd.f32 %v2697_v51, %v1667_v32 }
 0x173   : > { %v2705_v25 = vpop.f32.mrf.mxu1  ;;  %v2642_v58 = vadd.f32 %v2641_v63, %v2640_v60  ;;  %v3528_v60 = vld [vmem:[#allocation8_spill] sm:$0xff]  ;;  %v1670_v50 = vadd.f32 %v2636_v38, %v3531_v48  ;;  %v1772_v18 = vadd.f32 %v2703_v44, %v1675_v57 }
 0x174   : > { %v2741_v61 = vpop.f32.mrf.mxu0 }
 0x175   : > { %v1821_v35 = vadd.f32 %v2741_v61, %v1724_v53  ;;  %v2749_v62 = vpop.f32.mrf.mxu1  ;;  %v3529_v53 = vld [vmem:[#allocation7_spill] sm:$0xff]  ;;  %v2700_v61 = vadd.f32 %v3359_v37, %v3353_v13 }
 0x176   : > { %v1853_v46 = vadd.f32 %v2749_v62, %v1756_v36  ;;  %v1812_v10 = vpop.f32.mrf.mxu0  ;;  %v1678_v14 = vadd.f32 %v2642_v58, %v3529_v53  ;;  %v2706_v62 = vadd.f32 %v2705_v25, %v2704_v27  ;;  %v3538_v27 = vunpack.c.h.bf16 %v3532_v15 }
 0x177   : > { %v1813_v47 = vadd.f32 %v1812_v10, %v3528_v60  ;;  %v1844_v63 = vpop.f32.mrf.mxu1  ;;  %v1909_v36 = vadd.f32 %v3530_v56, %v1821_v35 }
 0x178   : > { %v1845_v49 = vadd.f32 %v1844_v63, %v1748_v0  ;;  %v2742_v12 = vpop.f32.mrf.mxu0  ;;  %v1917_v24 = vadd.f32 %v3533_v2, %v1853_v46  ;;  %v3534_v0 = vld [vmem:[#allocation18_spill] sm:$0xff]  ;;  %v1775_v19 = vadd.f32 %v2706_v62, %v1678_v14  ;;  %v3541_v2 = vunpack.c.l.bf16 %v3348_v26 }
 0x179   : > { %v1824_v22 = vadd.f32 %v2742_v12, %v1727_v55  ;;  %v2750_v16 = vpop.f32.mrf.mxu1  ;;  %v3535_v28 = vunpack.c.l.bf16 %v3534_v0  ;;  %v3537_v55 = vunpack.c.l.bf16 %v3331_v31  ;;  %v1925_v43 = vmax.f32 %v1909_v36, 0.0 }
 0x17a   : > { %v1856_v58 = vadd.f32 %v2750_v16, %v1759_v3  ;;  %v1815_v20 = vpop.f32.mrf.mxu0  ;;  %v3539_v59 = vunpack.c.h.bf16 %v3534_v0  ;;  %v1933_v10 = vmax.f32 %v1917_v24, 0.0  ;;  %v3540_v16 = vunpack.c.l.bf16 %v3340_v5 }
 0x17b   : > { %v1907_v32 = vadd.f32 %v3535_v28, %v1813_v47  ;;  %v1910_v13 = vadd.f32 %v3536_v39, %v1824_v22  ;;  %v1816_v37 = vadd.f32 %v1815_v20, %v3377_v23  ;;  %v1847_v40 = vpop.f32.mrf.mxu1  ;;  %v1915_v35 = vadd.f32 %v3537_v55, %v1845_v49 }
 0x17c   : > { %v1918_v25 = vadd.f32 %v3538_v27, %v1856_v58  ;;  %v1848_v41 = vadd.f32 %v1847_v40, %v1751_v29  ;;  %v2745_v42 = vpop.f32.mrf.mxu0  ;;  %v1735_v22 = vadd.f32 %v3399_v6, %v3395_v4  ;;  %v3542_v4 = vunpack.c.l.bf16 %v3350_v17 }
 0x17d   : > { %v1926_v51 = vmax.f32 %v1910_v13, 0.0  ;;  %v1908_v33 = vadd.f32 %v3539_v59, %v1816_v37  ;;  %v1837_v38 = vadd.f32 %v2745_v42, %v1740_v21  ;;  %v2753_v46 = vpop.f32.mrf.mxu1  ;;  %v1923_v47 = vmax.f32 %v1907_v32, 0.0 }
 0x17e   : > { %v1934_v23 = vmax.f32 %v1918_v25, 0.0  ;;  %v1916_v11 = vadd.f32 %v2384_v1, %v1848_v41  ;;  %v1869_v57 = vadd.f32 %v2753_v46, %v1772_v18  ;;  %v1828_v60 = vpop.f32.mrf.mxu0  ;;  %v1931_v14 = vmax.f32 %v1915_v35, 0.0 }
 0x17f   : > { %v2405_v63 = vpack.c.bf16 %v1926_v51, %v1925_v43  ;;  %v1924_v29 = vmax.f32 %v1908_v33, 0.0  ;;  %v1829_v21 = vadd.f32 %v1828_v60, %v3392_v8  ;;  %v1860_v53 = vpop.f32.mrf.mxu1  ;;  %v1913_v1 = vadd.f32 %v2379_v34, %v1837_v38 }
 0x180   : > { %v2425_v49 = vpack.c.bf16 %v1934_v23, %v1933_v10  ;;  %v1932_v12 = vmax.f32 %v1916_v11, 0.0  ;;  %v1861_v3 = vadd.f32 %v1860_v53, %v1764_v30  ;;  %v2746_v44 = vpop.f32.mrf.mxu0  ;;  %v1921_v48 = vadd.f32 %v3540_v16, %v1869_v57 }
 0x181   : > { %2444 = vst [vmem:[%s3444_s9 + $0x8] sm:$0xff] %v2405_v63   ;;  %v2400_v56 = vpack.c.bf16 %v1924_v29, %v1923_v47  ;;  %v1840_v31 = vadd.f32 %v2746_v44, %v1743_v9  ;;  %v2754_v36 = vpop.f32.mrf.mxu1  ;;  %v1767_v30 = vadd.f32 %v2700_v61, %v1670_v50  ;;  %v1911_v24 = vadd.f32 %v3541_v2, %v1829_v21 }
 0x182   : > { %2448 = vst [vmem:[%s3444_s9 + $0x28] sm:$0xff] %v2425_v49   ;;  %v2420_v8 = vpack.c.bf16 %v1932_v12, %v1931_v14  ;;  %v1872_v62 = vadd.f32 %v2754_v36, %v1775_v19  ;;  %v1831_v15 = vpop.f32.mrf.mxu0  ;;  %v1919_v6 = vadd.f32 %v3542_v4, %v1861_v3  ;;  %v3543_v20 = vunpack.c.h.bf16 %v3340_v5 }
 0x183   : > { %2401 = vst [vmem:[%s3444_s9] sm:$0xff] %v2400_v56   ;;  %v1914_v34 = vadd.f32 %v2380_v45, %v1840_v31  ;;  %v1832_v9 = vadd.f32 %v1831_v15, %v1735_v22  ;;  %v1863_v58 = vpop.f32.mrf.mxu1  ;;  %v1929_v61 = vmax.f32 %v1913_v1, 0.0  ;;  %v1937_v45 = vmax.f32 %v1921_v48, 0.0 }
 0x184   : > { %2447 = vst [vmem:[%s3444_s9 + $0x20] sm:$0xff] %v2420_v8   ;;  %v1922_v0 = vadd.f32 %v3543_v20, %v1872_v62  ;;  %v1864_v28 = vadd.f32 %v1863_v58, %v1767_v30  ;;  %v1927_v13 = vmax.f32 %v1911_v24, 0.0  ;;  %v1935_v18 = vmax.f32 %v1919_v6, 0.0 }
 0x185   : > { %v1930_v50 = vmax.f32 %v1914_v34, 0.0  ;;  %v1912_v7 = vadd.f32 %v2376_v52, %v1832_v9 }
 0x186   : > { %v1938_v32 = vmax.f32 %v1922_v0, 0.0  ;;  %v1920_v39 = vadd.f32 %v2392_v54, %v1864_v28 }
 0x187   : > { %v2415_v37 = vpack.c.bf16 %v1930_v50, %v1929_v61  ;;  %v1928_v40 = vmax.f32 %v1912_v7, 0.0 }
 0x188   : > { %v2435_v5 = vpack.c.bf16 %v1938_v32, %v1937_v45  ;;  %v1936_v55 = vmax.f32 %v1920_v39, 0.0 }
 0x189   : > { %2446 = vst [vmem:[%s3444_s9 + $0x18] sm:$0xff] %v2415_v37   ;;  %v2410_v35 = vpack.c.bf16 %v1928_v40, %v1927_v13 }
 0x18a   : > { %2450 = vst [vmem:[%s3444_s9 + $0x38] sm:$0xff] %v2435_v5   ;;  %v2430_v27 = vpack.c.bf16 %v1936_v55, %v1935_v18 }
 0x18b   : > { %2445 = vst [vmem:[%s3444_s9 + $0x10] sm:$0xff] %v2410_v35  }
 0x18c   : > { %2449 = vst [vmem:[%s3444_s9 + $0x30] sm:$0xff] %v2430_v27  }
 0x18d PF: > { %s14_s17 = sadd.s32 1, %s2994_s17   ;;  %s3544_s15 = smov %s2990_s16 }
 0x18e   : > { %p11_p5 = scmp.ge.s32.totalorder %s14_s17, 4   ;;  %s3545_s16 = smov %s3547_s18 }
 0x190   :  { %13 = sbr.rel (!%p11_p5) target bundleno = 2 (0x2), region = 75 }

// kernel: backbone_forward.12
= control target key start
LH: loop header
LB: loop body
LE: loop exit
PB: predicated region body
PF: predicated region fallthrough
CT: control target
= control target key end

     0   :  { %s2335_s15 = smov 0   ;;  %s2337_s16 = smov 0   ;;  %s2560_s0 = inlined_call_operand.vmem [shape: bf16[2,32,1152], index: 0, kind: input, shape index: {}]   ;;  %s2561_s1 = inlined_call_operand.vmem [shape: bf16[2,1152,256], index: 1, kind: input, shape index: {}]   ;;  %s2562_s2 = inlined_call_operand.vmem [shape: f32[2,1,256], index: 2, kind: input, shape index: {}]   ;;  %s2563_s3 = inlined_call_operand.vmem [shape: f32[1,256], index: 3, kind: input, shape index: {}]   ;;  %s2564_s4 = inlined_call_operand.vmem [shape: bf16[2,32,256], index: 4, kind: output, shape index: {}]  }
   0x1   :  { %s2339_s17 = smov 0  }
   0x2 LB: > { %s33_s18 = sadd.s32 1, %s2303_s16  ;;  %p1821_p0 = scmp.ge.s32.totalorder %s2307_s17, 1  ;;  %s2307_s17 = sphi %s2339_s17, %s14_s17   ;;  %s2303_s16 = sphi %s2337_s16, %s2566_s16   ;;  %s2299_s15 = sphi %s2335_s15, %s2565_s15  }
   0x3   : > { %p35_p1 = scmp.ge.s32.totalorder %s33_s18, 2  ;;  %p236_p2 = scmp.lt.s32.totalorder %s2307_s17, 3 }
   0x5   : > { %s2568_s18 = smov (%p35_p1, %s33_s18), 0  ;;  %p237_p3 = pnand %p1821_p0, %p236_p2 }
   0x6   : > { %p298_p4 = scmp.lt.s32.totalorder (!%p237_p3), %s2299_s15, 1 }
   0x7   : > { %240 = sbr.rel (%p237_p3) target bundleno = 385 (0x181), region = 36 }
   0xc   : > { %s2570_s15 = smov (!%p298_p4, %s2299_s15), 1 }
   0xd   : > { %s2017_s19 = smul.u32 1152, %s2570_s15  ;;  %s1824_s27 = sshll.u32 %s2570_s15, 1 }
   0xe   : > { %s2016_s23 = smul.u32 144, %s2570_s15  ;;  %s325_s30 = scalar_lea.vmem %s2562_s2, %s1824_s27 }
   0xf   : > { %s2359_s22 = scalar_lea.vmem %s2561_s1, %s2017_s19  ;;  %s1995_s7 = sshll.u32 %s2570_s15, 5 }
  0x10   : > { %v2043_v0 = vld [vmem:[%s2359_s22 + $0x74] ss:$8 sps:$4 sm:$0xff]   ;;  %v2047_v2 = vld [vmem:[%s2359_s22 + $0x70] ss:$8 sps:$4 sm:$0xff]   ;;  %v2049_v4 = vld [vmem:[%s2359_s22 + $0x64] ss:$8 sps:$4 sm:$0xff]   ;;  %s2410_s26 = scalar_lea.vmem %s2560_s0, %s2016_s23  ;;  %s345_s10 = scalar_lea.vmem %s2564_s4, %s1995_s7 }
  0x11   : > { %v2045_v1 = vld [vmem:[%s2359_s22 + $0x174] ss:$8 sps:$4 sm:$0xff]   ;;  %1337 = vmatprep.subr.bf16.mxu0 %v2043_v0  ;;  %v2048_v3 = vld [vmem:[%s2359_s22 + $0x170] ss:$8 sps:$4 sm:$0xff]   ;;  %v2051_v5 = vld [vmem:[%s2359_s22 + $0x164] ss:$8 sps:$4 sm:$0xff]  }
  0x12   : > { %1390 = vmatprep.subr.bf16.mxu1 %v2045_v1  ;;  %1338 = vmatpush1.bf16.msra.mxu0 %v2047_v2  ;;  %v2053_v6 = vld [vmem:[%s2359_s22 + $0x60] ss:$8 sps:$4 sm:$0xff]   ;;  %v2055_v8 = vld [vmem:[%s2359_s22 + $0x54] ss:$8 sps:$4 sm:$0xff]   ;;  %v2059_v10 = vld [vmem:[%s2359_s22 + $0x50] ss:$8 sps:$4 sm:$0xff]  }
  0x13   : > { %1391 = vmatpush1.bf16.msra.mxu1 %v2048_v3  ;;  %1339 = vmatprep.subr.bf16.mxu0 %v2049_v4  ;;  %v2054_v7 = vld [vmem:[%s2359_s22 + $0x160] ss:$8 sps:$4 sm:$0xff]   ;;  %v2057_v9 = vld [vmem:[%s2359_s22 + $0x154] ss:$8 sps:$4 sm:$0xff]   ;;  %v2060_v11 = vld [vmem:[%s2359_s22 + $0x150] ss:$8 sps:$4 sm:$0xff]  }
  0x14   : > { %1392 = vmatprep.subr.bf16.mxu1 %v2051_v5  ;;  %v2061_v12 = vld [vmem:[%s2359_s22 + $0x44] ss:$8 sps:$4 sm:$0xff]   ;;  %v2065_v14 = vld [vmem:[%s2359_s22 + $0x40] ss:$8 sps:$4 sm:$0xff]   ;;  %v2067_v16 = vld [vmem:[%s2359_s22 + $0x34] ss:$8 sps:$4 sm:$0xff]  }
  0x15   : > { %v2063_v13 = vld [vmem:[%s2359_s22 + $0x144] ss:$8 sps:$4 sm:$0xff]   ;;  %v2066_v15 = vld [vmem:[%s2359_s22 + $0x140] ss:$8 sps:$4 sm:$0xff]   ;;  %v2069_v17 = vld [vmem:[%s2359_s22 + $0x134] ss:$8 sps:$4 sm:$0xff]  }
  0x16   : > { %1340 = vmatpush1.bf16.msra.mxu0 %v2053_v6  ;;  %v2071_v18 = vld [vmem:[%s2359_s22 + $0x30] ss:$8 sps:$4 sm:$0xff]   ;;  %v2073_v20 = vld [vmem:[%s2359_s22 + $0x24] ss:$8 sps:$4 sm:$0xff]   ;;  %v2077_v22 = vld [vmem:[%s2359_s22 + $0x20] ss:$8 sps:$4 sm:$0xff]  }
  0x17   : > { %1393 = vmatpush1.bf16.msra.mxu1 %v2054_v7  ;;  %1341 = vmatprep.subr.bf16.mxu0 %v2055_v8  ;;  %v2072_v19 = vld [vmem:[%s2359_s22 + $0x130] ss:$8 sps:$4 sm:$0xff]   ;;  %v2075_v21 = vld [vmem:[%s2359_s22 + $0x124] ss:$8 sps:$4 sm:$0xff]   ;;  %v2078_v23 = vld [vmem:[%s2359_s22 + $0x120] ss:$8 sps:$4 sm:$0xff]  }
  0x18   : > { %1394 = vmatprep.subr.bf16.mxu1 %v2057_v9  ;;  %v2079_v24 = vld [vmem:[%s2359_s22 + $0x14] ss:$8 sps:$4 sm:$0xff]   ;;  %v2083_v26 = vld [vmem:[%s2359_s22 + $0x10] ss:$8 sps:$4 sm:$0xff]   ;;  %v2085_v28 = vld [vmem:[%s2359_s22 + $0x4] ss:$8 sps:$4 sm:$0xff]  }
  0x19   : > { %v2081_v25 = vld [vmem:[%s2359_s22 + $0x114] ss:$8 sps:$4 sm:$0xff]   ;;  %v2084_v27 = vld [vmem:[%s2359_s22 + $0x110] ss:$8 sps:$4 sm:$0xff]   ;;  %v2087_v29 = vld [vmem:[%s2359_s22 + $0x104] ss:$8 sps:$4 sm:$0xff]  }
  0x1a   : > { %1342 = vmatpush1.bf16.msra.mxu0 %v2059_v10  ;;  %v2089_v30 = vld [vmem:[%s2359_s22] ss:$8 sps:$4 sm:$0xff]   ;;  %v2091_v32 = vld [vmem:[%s2359_s22 + $0xf4] ss:$8 sps:$4 sm:$0xff]   ;;  %v2095_v34 = vld [vmem:[%s2359_s22 + $0xf0] ss:$8 sps:$4 sm:$0xff]  }
  0x1b   : > { %1395 = vmatpush1.bf16.msra.mxu1 %v2060_v11  ;;  %1343 = vmatprep.subr.bf16.mxu0 %v2061_v12  ;;  %v2090_v31 = vld [vmem:[%s2359_s22 + $0x100] ss:$8 sps:$4 sm:$0xff]   ;;  %v2093_v33 = vld [vmem:[%s2359_s22 + $0x1f4] ss:$8 sps:$4 sm:$0xff]   ;;  %v2096_v35 = vld [vmem:[%s2359_s22 + $0x1f0] ss:$8 sps:$4 sm:$0xff]  }
  0x1c   : > { %1396 = vmatprep.subr.bf16.mxu1 %v2063_v13  ;;  %v2097_v36 = vld [vmem:[%s2359_s22 + $0xe4] ss:$8 sps:$4 sm:$0xff]   ;;  %v2101_v38 = vld [vmem:[%s2359_s22 + $0xe0] ss:$8 sps:$4 sm:$0xff]   ;;  %v2103_v40 = vld [vmem:[%s2359_s22 + $0xd4] ss:$8 sps:$4 sm:$0xff]  }
  0x1d   : > { %v2099_v37 = vld [vmem:[%s2359_s22 + $0x1e4] ss:$8 sps:$4 sm:$0xff]   ;;  %v2102_v39 = vld [vmem:[%s2359_s22 + $0x1e0] ss:$8 sps:$4 sm:$0xff]   ;;  %v2105_v41 = vld [vmem:[%s2359_s22 + $0x1d4] ss:$8 sps:$4 sm:$0xff]  }
  0x1e   : > { %1344 = vmatpush1.bf16.msra.mxu0 %v2065_v14  ;;  %v2107_v42 = vld [vmem:[%s2359_s22 + $0xd0] ss:$8 sps:$4 sm:$0xff]   ;;  %v2109_v44 = vld [vmem:[%s2359_s22 + $0xc4] ss:$8 sps:$4 sm:$0xff]   ;;  %v2113_v46 = vld [vmem:[%s2359_s22 + $0xc0] ss:$8 sps:$4 sm:$0xff]  }
  0x1f   : > { %1397 = vmatpush1.bf16.msra.mxu1 %v2066_v15  ;;  %1345 = vmatprep.subr.bf16.mxu0 %v2067_v16  ;;  %v2108_v43 = vld [vmem:[%s2359_s22 + $0x1d0] ss:$8 sps:$4 sm:$0xff]   ;;  %v2111_v45 = vld [vmem:[%s2359_s22 + $0x1c4] ss:$8 sps:$4 sm:$0xff]   ;;  %v2114_v47 = vld [vmem:[%s2359_s22 + $0x1c0] ss:$8 sps:$4 sm:$0xff]  }
  0x20   : > { %1398 = vmatprep.subr.bf16.mxu1 %v2069_v17  ;;  %v2115_v48 = vld [vmem:[%s2359_s22 + $0xb4] ss:$8 sps:$4 sm:$0xff]   ;;  %v2141_v49 = vld [vmem:[%s2410_s26 + $0x4] ss:$36 sps:$4 sm:$0xff]   ;;  %v2144_v51 = vld [vmem:[%s2410_s26 + $0xc] ss:$36 sps:$4 sm:$0xff]  }
  0x21   : > { %v2117_v50 = vld [vmem:[%s2359_s22 + $0x1b4] ss:$8 sps:$4 sm:$0xff]   ;;  %1369 = vmatprep.mubr.bf16.mxu0 %v2141_v49  ;;  %v2119_v52 = vld [vmem:[%s2359_s22 + $0xb0] ss:$8 sps:$4 sm:$0xff]   ;;  %1422 = vmatprep.mubr.bf16.mxu1 %v2144_v51  ;;  %v2121_v54 = vld [vmem:[%s2359_s22 + $0xa4] ss:$8 sps:$4 sm:$0xff]  }
  0x22   : > { %1346 = vmatpush1.bf16.msra.mxu0 %v2071_v18  ;;  %v2120_v53 = vld [vmem:[%s2359_s22 + $0x1b0] ss:$8 sps:$4 sm:$0xff]   ;;  %v2123_v55 = vld [vmem:[%s2359_s22 + $0x1a4] ss:$8 sps:$4 sm:$0xff]   ;;  %v2125_v56 = vld [vmem:[%s2359_s22 + $0xa0] ss:$8 sps:$4 sm:$0xff]  }
  0x23   : > { %1399 = vmatpush1.bf16.msra.mxu1 %v2072_v19  ;;  %1347 = vmatprep.subr.bf16.mxu0 %v2073_v20  ;;  %v2126_v57 = vld [vmem:[%s2359_s22 + $0x1a0] ss:$8 sps:$4 sm:$0xff]   ;;  %v2127_v58 = vld [vmem:[%s2359_s22 + $0x94] ss:$8 sps:$4 sm:$0xff]   ;;  %v2131_v60 = vld [vmem:[%s2359_s22 + $0x90] ss:$8 sps:$4 sm:$0xff]  }
  0x24   : > { %1400 = vmatprep.subr.bf16.mxu1 %v2075_v21  ;;  %v2129_v59 = vld [vmem:[%s2359_s22 + $0x194] ss:$8 sps:$4 sm:$0xff]   ;;  %v2132_v61 = vld [vmem:[%s2359_s22 + $0x190] ss:$8 sps:$4 sm:$0xff]   ;;  %v2133_v62 = vld [vmem:[%s2359_s22 + $0x84] ss:$8 sps:$4 sm:$0xff]  }
  0x25   : > { %v2135_v63 = vld [vmem:[%s2359_s22 + $0x184] ss:$8 sps:$4 sm:$0xff]   ;;  %v2137_v0 = vld [vmem:[%s2359_s22 + $0x80] ss:$8 sps:$4 sm:$0xff]   ;;  %v2147_v2 = vld [vmem:[%s2359_s22 + $0x274] ss:$8 sps:$4 sm:$0xff]  }
  0x26   : > { %1348 = vmatpush1.bf16.msra.mxu0 %v2077_v22  ;;  %v2138_v1 = vld [vmem:[%s2359_s22 + $0x180] ss:$8 sps:$4 sm:$0xff]   ;;  %v2150_v3 = vld [vmem:[%s2359_s22 + $0x374] ss:$8 sps:$4 sm:$0xff]   ;;  %v2145_v6 = vld [vmem:[%s2359_s22 + $0x270] ss:$8 sps:$4 sm:$0xff]  }
  0x27   : > { %1401 = vmatpush1.bf16.msra.mxu1 %v2078_v23  ;;  %1349 = vmatprep.subr.bf16.mxu0 %v2079_v24  ;;  %v2139_v4 = vld [vmem:[%s2410_s26] ss:$36 sps:$4 sm:$0xff]   ;;  %v2142_v5 = vld [vmem:[%s2410_s26 + $0x8] ss:$36 sps:$4 sm:$0xff]   ;;  %v2148_v7 = vld [vmem:[%s2359_s22 + $0x370] ss:$8 sps:$4 sm:$0xff]  }
  0x28   : > { %1402 = vmatprep.subr.bf16.mxu1 %v2081_v25  ;;  %v2153_v8 = vld [vmem:[%s2359_s22 + $0x264] ss:$8 sps:$4 sm:$0xff]   ;;  %v2151_v10 = vld [vmem:[%s2359_s22 + $0x260] ss:$8 sps:$4 sm:$0xff]   ;;  %v2159_v12 = vld [vmem:[%s2359_s22 + $0x254] ss:$8 sps:$4 sm:$0xff]  }
  0x29   : > { %v2156_v9 = vld [vmem:[%s2359_s22 + $0x364] ss:$8 sps:$4 sm:$0xff]   ;;  %v2154_v11 = vld [vmem:[%s2359_s22 + $0x360] ss:$8 sps:$4 sm:$0xff]   ;;  %v2162_v13 = vld [vmem:[%s2359_s22 + $0x354] ss:$8 sps:$4 sm:$0xff]  }
  0x2a   : > { %1350 = vmatpush1.bf16.msra.mxu0 %v2083_v26  ;;  %v2157_v14 = vld [vmem:[%s2359_s22 + $0x250] ss:$8 sps:$4 sm:$0xff]   ;;  %v2165_v16 = vld [vmem:[%s2359_s22 + $0x244] ss:$8 sps:$4 sm:$0xff]   ;;  %v2163_v18 = vld [vmem:[%s2359_s22 + $0x240] ss:$8 sps:$4 sm:$0xff]  }
  0x2b   : > { %1403 = vmatpush1.bf16.msra.mxu1 %v2084_v27  ;;  %1351 = vmatprep.subr.bf16.mxu0 %v2085_v28  ;;  %v2160_v15 = vld [vmem:[%s2359_s22 + $0x350] ss:$8 sps:$4 sm:$0xff]   ;;  %v2168_v17 = vld [vmem:[%s2359_s22 + $0x344] ss:$8 sps:$4 sm:$0xff]   ;;  %v2166_v19 = vld [vmem:[%s2359_s22 + $0x340] ss:$8 sps:$4 sm:$0xff]  }
  0x2c   : > { %1404 = vmatprep.subr.bf16.mxu1 %v2087_v29  ;;  %v2171_v20 = vld [vmem:[%s2359_s22 + $0x234] ss:$8 sps:$4 sm:$0xff]   ;;  %v2217_v22 = vld [vmem:[%s2410_s26 + $0x4c] ss:$36 sps:$4 sm:$0xff]   ;;  %v2175_v28 = vld [vmem:[%s2359_s22 + $0x220] ss:$8 sps:$4 sm:$0xff]  }
  0x2d   : > { %v2174_v21 = vld [vmem:[%s2359_s22 + $0x334] ss:$8 sps:$4 sm:$0xff]   ;;  %v2169_v23 = vld [vmem:[%s2359_s22 + $0x230] ss:$8 sps:$4 sm:$0xff]   ;;  %v2177_v25 = vld [vmem:[%s2359_s22 + $0x224] ss:$8 sps:$4 sm:$0xff]  }
  0x2e   : > { %1352 = vmatpush1.bf16.msra.mxu0 %v2089_v30  ;;  %v2172_v24 = vld [vmem:[%s2359_s22 + $0x330] ss:$8 sps:$4 sm:$0xff]   ;;  %v2180_v26 = vld [vmem:[%s2359_s22 + $0x324] ss:$8 sps:$4 sm:$0xff]   ;;  %v2178_v30 = vld [vmem:[%s2359_s22 + $0x320] ss:$8 sps:$4 sm:$0xff]  }
  0x2f   : > { %1405 = vmatpush1.bf16.msra.mxu1 %v2090_v31  ;;  %1353 = vmatprep.subr.bf16.mxu0 %v2091_v32  ;;  %v2225_v27 = vld [vmem:[%s2410_s26 + $0x48] ss:$36 sps:$4 sm:$0xff]   ;;  %v2226_v29 = vld [vmem:[%s2410_s26 + $0x54] ss:$36 sps:$4 sm:$0xff]  }
  0x30   : > { %1406 = vmatprep.subr.bf16.mxu1 %v2093_v33  ;;  %v2228_v31 = vld [vmem:[%s2410_s26 + $0x50] ss:$36 sps:$4 sm:$0xff]   ;;  %v2202_v49 = vld [vmem:[%s2359_s22 + $0x3e0] ss:$8 sps:$4 sm:$0xff]  }
  0x31   : > { %v2183_v32 = vld [vmem:[%s2359_s22 + $0x214] ss:$8 sps:$4 sm:$0xff]  }
  0x32   : > { %1354 = vmatpush2.bf16.msra.mxu0 %v2095_v34  ;;  %v2186_v33 = vld [vmem:[%s2359_s22 + $0x314] ss:$8 sps:$4 sm:$0xff]   ;;  %v2181_v34 = vld [vmem:[%s2359_s22 + $0x210] ss:$8 sps:$4 sm:$0xff]  }
  0x33   : > { %1407 = vmatpush2.bf16.msra.mxu1 %v2096_v35  ;;  %1355 = vmatprep.subr.bf16.mxu0 %v2097_v36  ;;  %v2184_v35 = vld [vmem:[%s2359_s22 + $0x310] ss:$8 sps:$4 sm:$0xff]   ;;  %v2189_v36 = vld [vmem:[%s2359_s22 + $0x204] ss:$8 sps:$4 sm:$0xff]   ;;  %v2210_v51 = vld [vmem:[%s2359_s22 + $0x3d4] ss:$8 sps:$4 sm:$0xff]  }
  0x34   : > { %1408 = vmatprep.subr.bf16.mxu1 %v2099_v37  ;;  %v2192_v37 = vld [vmem:[%s2359_s22 + $0x304] ss:$8 sps:$4 sm:$0xff]  }
  0x36   : > { %1356 = vmatpush2.bf16.msra.mxu0 %v2101_v38  ;;  %v2187_v38 = vld [vmem:[%s2359_s22 + $0x200] ss:$8 sps:$4 sm:$0xff]  }
  0x37   : > { %1409 = vmatpush2.bf16.msra.mxu1 %v2102_v39  ;;  %1357 = vmatprep.subr.bf16.mxu0 %v2103_v40  ;;  %v2190_v39 = vld [vmem:[%s2359_s22 + $0x300] ss:$8 sps:$4 sm:$0xff]   ;;  %v2195_v40 = vld [vmem:[%s2359_s22 + $0x2f4] ss:$8 sps:$4 sm:$0xff]  }
  0x38   : > { %1410 = vmatprep.subr.bf16.mxu1 %v2105_v41  ;;  %v2249_v41 = vld [vmem:[%s2410_s26 + $0x14] ss:$36 sps:$4 sm:$0xff]  }
  0x3a   : > { %1358 = vmatpush2.bf16.msra.mxu0 %v2107_v42  ;;  %v2198_v42 = vld [vmem:[%s2359_s22 + $0x3f4] ss:$8 sps:$4 sm:$0xff]  }
  0x3b   : > { %1411 = vmatpush2.bf16.msra.mxu1 %v2108_v43  ;;  %1359 = vmatprep.subr.bf16.mxu0 %v2109_v44  ;;  %v2252_v43 = vld [vmem:[%s2410_s26 + $0x1c] ss:$36 sps:$4 sm:$0xff]   ;;  %v2193_v44 = vld [vmem:[%s2359_s22 + $0x2f0] ss:$8 sps:$4 sm:$0xff]  }
  0x3c   : > { %1412 = vmatprep.subr.bf16.mxu1 %v2111_v45  ;;  %v2196_v45 = vld [vmem:[%s2359_s22 + $0x3f0] ss:$8 sps:$4 sm:$0xff]  }
  0x3e   : > { %1360 = vmatpush2.bf16.msra.mxu0 %v2113_v46  ;;  %v2201_v46 = vld [vmem:[%s2359_s22 + $0x2e4] ss:$8 sps:$4 sm:$0xff]  }
  0x3f   : > { %1413 = vmatpush2.bf16.msra.mxu1 %v2114_v47  ;;  %1361 = vmatprep.subr.bf16.mxu0 %v2115_v48  ;;  %v2204_v47 = vld [vmem:[%s2359_s22 + $0x3e4] ss:$8 sps:$4 sm:$0xff]   ;;  %v2199_v48 = vld [vmem:[%s2359_s22 + $0x2e0] ss:$8 sps:$4 sm:$0xff]  }
  0x40   : > { %1414 = vmatprep.subr.bf16.mxu1 %v2117_v50  ;;  %v2207_v50 = vld [vmem:[%s2359_s22 + $0x2d4] ss:$8 sps:$4 sm:$0xff]  }
  0x42   : > { %1362 = vmatpush2.bf16.msra.mxu0 %v2119_v52  ;;  %v2205_v52 = vld [vmem:[%s2359_s22 + $0x2d0] ss:$8 sps:$4 sm:$0xff]  }
  0x43   : > { %1415 = vmatpush2.bf16.msra.mxu1 %v2120_v53  ;;  %1363 = vmatprep.subr.bf16.mxu0 %v2121_v54  ;;  %v2208_v53 = vld [vmem:[%s2359_s22 + $0x3d0] ss:$8 sps:$4 sm:$0xff]   ;;  %v2213_v54 = vld [vmem:[%s2359_s22 + $0x2c4] ss:$8 sps:$4 sm:$0xff]  }
  0x44   : > { %1416 = vmatprep.subr.bf16.mxu1 %v2123_v55  ;;  %v2216_v55 = vld [vmem:[%s2359_s22 + $0x3c4] ss:$8 sps:$4 sm:$0xff]  }
  0x46   : > { %1364 = vmatpush2.bf16.msra.mxu0 %v2125_v56  ;;  %v2211_v56 = vld [vmem:[%s2359_s22 + $0x2c0] ss:$8 sps:$4 sm:$0xff]  }
  0x47   : > { %1417 = vmatpush2.bf16.msra.mxu1 %v2126_v57  ;;  %1365 = vmatprep.subr.bf16.mxu0 %v2127_v58  ;;  %v2214_v57 = vld [vmem:[%s2359_s22 + $0x3c0] ss:$8 sps:$4 sm:$0xff]   ;;  %v2221_v58 = vld [vmem:[%s2359_s22 + $0x2b4] ss:$8 sps:$4 sm:$0xff]  }
  0x48   : > { %1418 = vmatprep.subr.bf16.mxu1 %v2129_v59  ;;  %v2224_v59 = vld [vmem:[%s2359_s22 + $0x3b4] ss:$8 sps:$4 sm:$0xff]  }
  0x4a   : > { %1366 = vmatpush2.bf16.msra.mxu0 %v2131_v60  ;;  %v2219_v60 = vld [vmem:[%s2359_s22 + $0x2b0] ss:$8 sps:$4 sm:$0xff]  }
  0x4b   : > { %1419 = vmatpush2.bf16.msra.mxu1 %v2132_v61  ;;  %1367 = vmatprep.subr.bf16.mxu0 %v2133_v62  ;;  %v2222_v61 = vld [vmem:[%s2359_s22 + $0x3b0] ss:$8 sps:$4 sm:$0xff]   ;;  %v2231_v62 = vld [vmem:[%s2359_s22 + $0x2a4] ss:$8 sps:$4 sm:$0xff]  }
  0x4c   : > { %1420 = vmatprep.subr.bf16.mxu1 %v2135_v63  ;;  %v2234_v63 = vld [vmem:[%s2359_s22 + $0x3a4] ss:$8 sps:$4 sm:$0xff]  }
  0x4e   : > { %1368 = vmatpush2.bf16.msra.mxu0 %v2137_v0  ;;  %v2229_v0 = vld [vmem:[%s2359_s22 + $0x2a0] ss:$8 sps:$4 sm:$0xff]  }
  0x4f   : > { %1421 = vmatpush2.bf16.msra.mxu1 %v2138_v1  ;;  %1443 = vmatprep.subr.bf16.mxu0 %v2147_v2  ;;  %v2232_v1 = vld [vmem:[%s2359_s22 + $0x3a0] ss:$8 sps:$4 sm:$0xff]   ;;  %v2237_v2 = vld [vmem:[%s2359_s22 + $0x294] ss:$8 sps:$4 sm:$0xff]  }
  0x50   : > { %1496 = vmatprep.subr.bf16.mxu1 %v2150_v3  ;;  %v2240_v3 = vld [vmem:[%s2359_s22 + $0x394] ss:$8 sps:$4 sm:$0xff]  }
  0x51   : > { %1370 = vmatmul.mubr.bf16.vlgmr.msra.gmra.mxu0 %v2139_v4  ;;  %v2235_v4 = vld [vmem:[%s2359_s22 + $0x290] ss:$8 sps:$4 sm:$0xff]  }
  0x52   : > { %1423 = vmatmul.mubr.bf16.vlgmr.msra.gmra.mxu1 %v2142_v5  ;;  %1444 = vmatpush1.bf16.msra.mxu0 %v2145_v6  ;;  %v2238_v5 = vld [vmem:[%s2359_s22 + $0x390] ss:$8 sps:$4 sm:$0xff]   ;;  %v2243_v6 = vld [vmem:[%s2359_s22 + $0x284] ss:$8 sps:$4 sm:$0xff]  }
  0x53   : > { %1497 = vmatpush1.bf16.msra.mxu1 %v2148_v7  ;;  %1445 = vmatprep.subr.bf16.mxu0 %v2153_v8  ;;  %v2246_v7 = vld [vmem:[%s2359_s22 + $0x384] ss:$8 sps:$4 sm:$0xff]   ;;  %v2241_v8 = vld [vmem:[%s2359_s22 + $0x280] ss:$8 sps:$4 sm:$0xff]  }
  0x54   : > { %1498 = vmatprep.subr.bf16.mxu1 %v2156_v9  ;;  %1379 = vmatprep.mubr.bf16.mxu0 %v2217_v22  ;;  %v2244_v9 = vld [vmem:[%s2359_s22 + $0x380] ss:$8 sps:$4 sm:$0xff]   ;;  %v2270_v22 = vld [vmem:[%s2359_s22 + $0x444] ss:$8 sps:$4 sm:$0xff]  }
  0x55   : > { %1432 = vmatprep.mubr.bf16.mxu1 %v2226_v29  ;;  %v2279_v29 = vld [vmem:[%s2359_s22 + $0x414] ss:$8 sps:$4 sm:$0xff]  }
  0x56   : > { %1446 = vmatpush1.bf16.msra.mxu0 %v2151_v10  ;;  %v2255_v10 = vld [vmem:[%s2359_s22 + $0x474] ss:$8 sps:$4 sm:$0xff]  }
  0x57   : > { %1499 = vmatpush1.bf16.msra.mxu1 %v2154_v11  ;;  %1447 = vmatprep.subr.bf16.mxu0 %v2159_v12  ;;  %v2247_v11 = vld [vmem:[%s2410_s26 + $0x10] ss:$36 sps:$4 sm:$0xff]   ;;  %v2250_v12 = vld [vmem:[%s2410_s26 + $0x18] ss:$36 sps:$4 sm:$0xff]  }
  0x58   : > { %1500 = vmatprep.subr.bf16.mxu1 %v2162_v13  ;;  %v2253_v13 = vld [vmem:[%s2359_s22 + $0x470] ss:$8 sps:$4 sm:$0xff]  }
  0x59   : > { %1380 = vmatmul.mubr.bf16.gmra.mxu0 %v2225_v27  ;;  %v2276_v27 = vld [vmem:[%s2359_s22 + $0x424] ss:$8 sps:$4 sm:$0xff]  }
  0x5a   : > { %1448 = vmatpush1.bf16.msra.mxu0 %v2157_v14  ;;  %1433 = vmatmul.mubr.bf16.gmra.mxu1 %v2228_v31  ;;  %v2258_v14 = vld [vmem:[%s2359_s22 + $0x464] ss:$8 sps:$4 sm:$0xff]  }
  0x5b   : > { %1501 = vmatpush1.bf16.msra.mxu1 %v2160_v15  ;;  %1449 = vmatprep.subr.bf16.mxu0 %v2165_v16  ;;  %v2259_v15 = vld [vmem:[%s2410_s26 + $0x5c] ss:$36 sps:$4 sm:$0xff]   ;;  %v2265_v16 = vld [vmem:[%s2410_s26 + $0x64] ss:$36 sps:$4 sm:$0xff]  }
  0x5c   : > { %1502 = vmatprep.subr.bf16.mxu1 %v2168_v17  ;;  %1475 = vmatprep.mubr.bf16.mxu0 %v2249_v41  ;;  %v2256_v17 = vld [vmem:[%s2359_s22 + $0x460] ss:$8 sps:$4 sm:$0xff]   ;;  %v2282_v31 = vld [vmem:[%s2359_s22 + $0x404] ss:$8 sps:$4 sm:$0xff]  }
  0x5d   : > { %1528 = vmatprep.mubr.bf16.mxu1 %v2252_v43 }
  0x5e   : > { %1450 = vmatpush1.bf16.msra.mxu0 %v2163_v18  ;;  %v2264_v18 = vld [vmem:[%s2359_s22 + $0x454] ss:$8 sps:$4 sm:$0xff]  }
  0x5f   : > { %1503 = vmatpush1.bf16.msra.mxu1 %v2166_v19  ;;  %1451 = vmatprep.subr.bf16.mxu0 %v2171_v20  ;;  %v2261_v19 = vld [vmem:[%s2410_s26 + $0x58] ss:$36 sps:$4 sm:$0xff]   ;;  %v2267_v20 = vld [vmem:[%s2410_s26 + $0x60] ss:$36 sps:$4 sm:$0xff]  }
  0x60   : > { %1504 = vmatprep.subr.bf16.mxu1 %v2174_v21  ;;  %v2262_v21 = vld [vmem:[%s2359_s22 + $0x450] ss:$8 sps:$4 sm:$0xff]  }
  0x62   : > { %1452 = vmatpush1.bf16.msra.mxu0 %v2169_v23  ;;  %v2268_v23 = vld [vmem:[%s2359_s22 + $0x440] ss:$8 sps:$4 sm:$0xff]  }
  0x63   : > { %1505 = vmatpush1.bf16.msra.mxu1 %v2172_v24  ;;  %1453 = vmatprep.subr.bf16.mxu0 %v2177_v25  ;;  %v2273_v24 = vld [vmem:[%s2359_s22 + $0x434] ss:$8 sps:$4 sm:$0xff]   ;;  %v2309_v25 = vmov 0  }
  0x64   : > { %1506 = vmatprep.subr.bf16.mxu1 %v2180_v26  ;;  %v2271_v26 = vld [vmem:[%s2359_s22 + $0x430] ss:$8 sps:$4 sm:$0xff]  }
  0x66   : > { %1454 = vmatpush1.bf16.msra.mxu0 %v2175_v28  ;;  %v2274_v28 = vld [vmem:[%s2359_s22 + $0x420] ss:$8 sps:$4 sm:$0xff]  }
  0x67   : > { %1507 = vmatpush1.bf16.msra.mxu1 %v2178_v30  ;;  %1455 = vmatprep.subr.bf16.mxu0 %v2183_v32  ;;  %v2277_v30 = vld [vmem:[%s2359_s22 + $0x410] ss:$8 sps:$4 sm:$0xff]   ;;  %v2280_v32 = vld [vmem:[%s2359_s22 + $0x400] ss:$8 sps:$4 sm:$0xff]  }
  0x68   : > { %1508 = vmatprep.subr.bf16.mxu1 %v2186_v33  ;;  %v2283_v33 = vld [vmem:[%s2410_s26 + $0x20] ss:$36 sps:$4 sm:$0xff]  }
  0x6a   : > { %1456 = vmatpush1.bf16.msra.mxu0 %v2181_v34  ;;  %v2284_v34 = vld [vmem:[%s2410_s26 + $0x68] ss:$36 sps:$4 sm:$0xff]  }
  0x6b   : > { %1509 = vmatpush1.bf16.msra.mxu1 %v2184_v35  ;;  %1457 = vmatprep.subr.bf16.mxu0 %v2189_v36 }
  0x6c   : > { %1510 = vmatprep.subr.bf16.mxu1 %v2192_v37 }
  0x6e   : > { %1458 = vmatpush1.bf16.msra.mxu0 %v2187_v38 }
  0x6f   : > { %1511 = vmatpush1.bf16.msra.mxu1 %v2190_v39  ;;  %1459 = vmatprep.subr.bf16.mxu0 %v2195_v40 }
  0x70   : > { %1512 = vmatprep.subr.bf16.mxu1 %v2198_v42 }
  0x72   : > { %1460 = vmatpush2.bf16.msra.mxu0 %v2193_v44 }
  0x73   : > { %1513 = vmatpush2.bf16.msra.mxu1 %v2196_v45  ;;  %1461 = vmatprep.subr.bf16.mxu0 %v2201_v46 }
  0x74   : > { %1514 = vmatprep.subr.bf16.mxu1 %v2204_v47 }
  0x76   : > { %1462 = vmatpush2.bf16.msra.mxu0 %v2199_v48 }
  0x77   : > { %1515 = vmatpush2.bf16.msra.mxu1 %v2202_v49  ;;  %1463 = vmatprep.subr.bf16.mxu0 %v2207_v50 }
  0x78   : > { %1516 = vmatprep.subr.bf16.mxu1 %v2210_v51 }
  0x7a   : > { %1464 = vmatpush2.bf16.msra.mxu0 %v2205_v52 }
  0x7b   : > { %1517 = vmatpush2.bf16.msra.mxu1 %v2208_v53  ;;  %1465 = vmatprep.subr.bf16.mxu0 %v2213_v54  ;;  %v515_v53 = vlaneseq }
  0x7c   : > { %1518 = vmatprep.subr.bf16.mxu1 %v2216_v55 }
  0x7e   : > { %1466 = vmatpush2.bf16.msra.mxu0 %v2211_v56  ;;  %v516_v56 = vshrl.u32 %v515_v53, 7 }
  0x7f   : > { %1519 = vmatpush2.bf16.msra.mxu1 %v2214_v57  ;;  %1467 = vmatprep.subr.bf16.mxu0 %v2221_v58 }
  0x80   : > { %1520 = vmatprep.subr.bf16.mxu1 %v2224_v59  ;;  %v517_v59 = vsub.s32 0, %v516_v56 }
  0x82   : > { %1468 = vmatpush2.bf16.msra.mxu0 %v2219_v60  ;;  %v521_v60 = vsub.s32 1, %v516_v56 }
  0x83   : > { %1521 = vmatpush2.bf16.msra.mxu1 %v2222_v61  ;;  %1469 = vmatprep.subr.bf16.mxu0 %v2231_v62  ;;  %v513_v61 = vld [vmem:[%s325_s30] sm:$0x3] }
  0x84   : > { %1522 = vmatprep.subr.bf16.mxu1 %v2234_v63 }
  0x86   : > { %1470 = vmatpush2.bf16.msra.mxu0 %v2229_v0  ;;  %v518_v0 = vrot.slane %v513_v61, %v517_v59 }
  0x87   : > { %1523 = vmatpush2.bf16.msra.mxu1 %v2232_v1  ;;  %1471 = vmatprep.subr.bf16.mxu0 %v2237_v2  ;;  %v522_v1 = vrot.slane %v513_v61, %v521_v60 }
  0x88   : > { %1524 = vmatprep.subr.bf16.mxu1 %v2240_v3 }
  0x8a   : > { %1472 = vmatpush2.bf16.msra.mxu0 %v2235_v4  ;;  %v1602_v4 = vld [vmem:[%s2563_s3] sm:$0x3] }
  0x8b   : > { %1525 = vmatpush2.bf16.msra.mxu1 %v2238_v5  ;;  %1473 = vmatprep.subr.bf16.mxu0 %v2243_v6  ;;  %vm1603_vm0 = vcmp.ne.f32.partialorder %v1602_v4, 0.0 }
  0x8c   : > { %1526 = vmatprep.subr.bf16.mxu1 %v2246_v7 }
  0x8e   : > { %1474 = vmatpush2.bf16.msra.mxu0 %v2241_v8 }
  0x8f   : > { %1527 = vmatpush2.bf16.msra.mxu1 %v2244_v9  ;;  %1549 = vmatprep.subr.bf16.mxu0 %v2255_v10 }
  0x90   : > { %2000 = vmatprep.subr.bf16.mxu1 %v2255_v10 }
  0x91   : > { %1476 = vmatmul.mubr.bf16.vlgmr.msra.gmra.mxu0 %v2247_v11  ;;  %v1612_v11 = vsel %vm1603_vm0, 1, %v2309_v25 }
  0x92   : > { %1529 = vmatmul.mubr.bf16.vlgmr.msra.gmra.mxu1 %v2250_v12  ;;  %1550 = vmatpush1.bf16.msra.mxu0 %v2253_v13 }
  0x93   : > { %2008 = vmatpush1.bf16.msra.mxu1 %v2253_v13  ;;  %1551 = vmatprep.subr.bf16.mxu0 %v2258_v14 }
  0x94   : > { %2001 = vmatprep.subr.bf16.mxu1 %v2258_v14  ;;  %1485 = vmatprep.mubr.bf16.mxu0 %v2259_v15 }
  0x95   : > { %1538 = vmatprep.mubr.bf16.mxu1 %v2265_v16 }
  0x96   : > { %1552 = vmatpush1.bf16.msra.mxu0 %v2256_v17 }
  0x97   : > { %2009 = vmatpush1.bf16.msra.mxu1 %v2256_v17  ;;  %1553 = vmatprep.subr.bf16.mxu0 %v2264_v18 }
  0x98   : > { %2002 = vmatprep.subr.bf16.mxu1 %v2264_v18 }
  0x99   : > { %1486 = vmatmul.mubr.bf16.gmra.mxu0 %v2261_v19 }
  0x9a   : > { %1539 = vmatmul.mubr.bf16.gmra.mxu1 %v2267_v20  ;;  %1554 = vmatpush1.bf16.msra.mxu0 %v2262_v21 }
  0x9b   : > { %2010 = vmatpush1.bf16.msra.mxu1 %v2262_v21  ;;  %1555 = vmatprep.subr.bf16.mxu0 %v2270_v22 }
  0x9c   : > { %2003 = vmatprep.subr.bf16.mxu1 %v2270_v22  ;;  %1581 = vmatprep.mubr.bf16.mxu0 %v2309_v25 }
  0x9d   : > { %1591 = vmatprep.mubr.bf16.mxu1 %v2309_v25 }
  0x9e   : > { %1556 = vmatpush1.bf16.msra.mxu0 %v2268_v23 }
  0x9f   : > { %2011 = vmatpush1.bf16.msra.mxu1 %v2268_v23  ;;  %1557 = vmatprep.subr.bf16.mxu0 %v2273_v24 }
  0xa0   : > { %2004 = vmatprep.subr.bf16.mxu1 %v2273_v24 }
  0xa2   : > { %1558 = vmatpush1.bf16.msra.mxu0 %v2271_v26 }
  0xa3   : > { %2012 = vmatpush1.bf16.msra.mxu1 %v2271_v26  ;;  %1559 = vmatprep.subr.bf16.mxu0 %v2276_v27 }
  0xa4   : > { %2005 = vmatprep.subr.bf16.mxu1 %v2276_v27  ;;  %v1616_v27 = vrot.slane %v1612_v11, %v517_v59 }
  0xa6   : > { %1560 = vmatpush1.bf16.msra.mxu0 %v2274_v28  ;;  %vm1621_vm1 = vcmp.eq.s32.totalorder %v1616_v27, 1 }
  0xa7   : > { %2013 = vmatpush1.bf16.msra.mxu1 %v2274_v28  ;;  %1561 = vmatprep.subr.bf16.mxu0 %v2279_v29 }
  0xa8   : > { %2006 = vmatprep.subr.bf16.mxu1 %v2279_v29 }
  0xaa   : > { %1562 = vmatpush1.bf16.msra.mxu0 %v2277_v30 }
  0xab   : > { %2014 = vmatpush1.bf16.msra.mxu1 %v2277_v30  ;;  %1563 = vmatprep.subr.bf16.mxu0 %v2282_v31 }
  0xac   : > { %2007 = vmatprep.subr.bf16.mxu1 %v2282_v31 }
  0xae   : > { %1564 = vmatpush1.bf16.msra.mxu0 %v2280_v32 }
  0xaf   : > { %2015 = vmatpush1.bf16.msra.mxu1 %v2280_v32  ;;  %v1620_v32 = vrot.slane %v1612_v11, %v521_v60 }
  0xb1   : > { %1582 = vmatmul.mubr.bf16.vlgmr.msra.gmra.mxu0 %v2283_v33  ;;  %vm1622_vm2 = vcmp.eq.s32.totalorder %v1620_v32, 1 }
  0xb2   : > { %1592 = vmatmul.mubr.bf16.vlgmr.msra.gmra.mxu1 %v2284_v34 }
 0x111   : > { %v1371_v35 = vpop.f32.mrf.mxu0 }
 0x112   : > { %v1424_v36 = vpop.f32.mrf.mxu1  ;;  %v1372_v5 = vadd.f32 %v1371_v35, %v518_v0 }
 0x113   : > { %v1373_v37 = vpop.f32.mrf.mxu0 }
 0x114   : > { %v1426_v38 = vpop.f32.mrf.mxu1  ;;  %v1374_v7 = vadd.f32 %v1373_v37, %v522_v1  ;;  %v1425_v12 = vadd.f32 %v1424_v36, %v1372_v5 }
 0x115   : > { %v1375_v39 = vpop.f32.mrf.mxu0 }
 0x116   : > { %v1428_v40 = vpop.f32.mrf.mxu1  ;;  %v1427_v14 = vadd.f32 %v1426_v38, %v1374_v7  ;;  %v1376_v15 = vadd.f32 %v1375_v39, %v518_v0 }
 0x117   : > { %v1377_v41 = vpop.f32.mrf.mxu0 }
 0x118   : > { %v1430_v42 = vpop.f32.mrf.mxu1  ;;  %v1378_v16 = vadd.f32 %v1377_v41, %v522_v1  ;;  %v1429_v28 = vadd.f32 %v1428_v40, %v1376_v15 }
 0x119   : > { %v1381_v43 = vpop.f32.mrf.mxu0 }
 0x11a   : > { %v1434_v44 = vpop.f32.mrf.mxu1  ;;  %v1382_v6 = vadd.f32 %v1381_v43, %v518_v0  ;;  %v1431_v29 = vadd.f32 %v1430_v42, %v1378_v16 }
 0x11b   : > { %v1383_v45 = vpop.f32.mrf.mxu0 }
 0x11c   : > { %v1436_v46 = vpop.f32.mrf.mxu1  ;;  %v1384_v10 = vadd.f32 %v1383_v45, %v522_v1  ;;  %v1435_v13 = vadd.f32 %v1434_v44, %v1382_v6 }
 0x11d   : > { %v1385_v47 = vpop.f32.mrf.mxu0 }
 0x11e   : > { %v1438_v48 = vpop.f32.mrf.mxu1  ;;  %v1386_v17 = vadd.f32 %v1385_v47, %v518_v0  ;;  %v1437_v20 = vadd.f32 %v1436_v46, %v1384_v10 }
 0x11f   : > { %v1387_v49 = vpop.f32.mrf.mxu0 }
 0x120   : > { %v1440_v50 = vpop.f32.mrf.mxu1  ;;  %v1388_v21 = vadd.f32 %v1387_v49, %v522_v1  ;;  %v1439_v30 = vadd.f32 %v1438_v48, %v1386_v17 }
 0x122   : > { %v1441_v33 = vadd.f32 %v1440_v50, %v1388_v21 }
 0x151   : > { %v1477_v51 = vpop.f32.mrf.mxu0 }
 0x152   : > { %v1530_v52 = vpop.f32.mrf.mxu1  ;;  %v1478_v22 = vadd.f32 %v1477_v51, %v1425_v12 }
 0x153   : > { %v1479_v54 = vpop.f32.mrf.mxu0 }
 0x154   : > { %v1532_v55 = vpop.f32.mrf.mxu1  ;;  %v1480_v24 = vadd.f32 %v1479_v54, %v1427_v14  ;;  %v1531_v34 = vadd.f32 %v1530_v52, %v1478_v22 }
 0x155   : > { %v1481_v57 = vpop.f32.mrf.mxu0 }
 0x156   : > { %v1534_v58 = vpop.f32.mrf.mxu1  ;;  %v1533_v36 = vadd.f32 %v1532_v55, %v1480_v24  ;;  %v1482_v37 = vadd.f32 %v1481_v57, %v1429_v28 }
 0x157   : > { %v1483_v62 = vpop.f32.mrf.mxu0 }
 0x158   : > { %v1536_v63 = vpop.f32.mrf.mxu1  ;;  %v1484_v38 = vadd.f32 %v1483_v62, %v1431_v29  ;;  %v1535_v52 = vadd.f32 %v1534_v58, %v1482_v37 }
 0x159   : > { %v1487_v2 = vpop.f32.mrf.mxu0 }
 0x15a   : > { %v1540_v3 = vpop.f32.mrf.mxu1  ;;  %v1488_v23 = vadd.f32 %v1487_v2, %v1435_v13  ;;  %v1537_v56 = vadd.f32 %v1536_v63, %v1484_v38 }
 0x15b   : > { %v1489_v8 = vpop.f32.mrf.mxu0 }
 0x15c   : > { %v1542_v9 = vpop.f32.mrf.mxu1  ;;  %v1490_v26 = vadd.f32 %v1489_v8, %v1437_v20  ;;  %v1541_v35 = vadd.f32 %v1540_v3, %v1488_v23 }
 0x15d   : > { %v1491_v18 = vpop.f32.mrf.mxu0 }
 0x15e   : > { %v1544_v19 = vpop.f32.mrf.mxu1  ;;  %v1492_v39 = vadd.f32 %v1491_v18, %v1439_v30  ;;  %v1543_v44 = vadd.f32 %v1542_v9, %v1490_v26 }
 0x15f   : > { %v1493_v31 = vpop.f32.mrf.mxu0 }
 0x160   : > { %v1546_v25 = vpop.f32.mrf.mxu1  ;;  %v1494_v45 = vadd.f32 %v1493_v31, %v1441_v33  ;;  %v1545_v53 = vadd.f32 %v1544_v19, %v1492_v39 }
 0x162   : > { %v1547_v57 = vadd.f32 %v1546_v25, %v1494_v45 }
 0x171   : > { %v1583_v41 = vpop.f32.mrf.mxu0 }
 0x172   : > { %v1593_v43 = vpop.f32.mrf.mxu1  ;;  %v1584_v46 = vadd.f32 %v1583_v41, %v1531_v34 }
 0x173   : > { %v1594_v47 = vadd.f32 %v1593_v43, %v1541_v35  ;;  %v1585_v40 = vpop.f32.mrf.mxu0 }
 0x174   : > { %v1595_v42 = vpop.f32.mrf.mxu1  ;;  %v1604_v48 = vmax.f32 %v1584_v46, 0.0  ;;  %v1586_v51 = vadd.f32 %v1585_v40, %v1533_v36 }
 0x175   : > { %v1608_v49 = vmax.f32 %v1594_v47, 0.0  ;;  %v1596_v50 = vadd.f32 %v1595_v42, %v1543_v44  ;;  %v1587_v54 = vpop.f32.mrf.mxu0 }
 0x176   : > { %v1597_v55 = vpop.f32.mrf.mxu1  ;;  %v1605_v59 = vmax.f32 %v1586_v51, 0.0  ;;  %v1623_v61 = vsel %vm1621_vm1, %v1604_v48, %v1584_v46  ;;  %v1588_v0 = vadd.f32 %v1587_v54, %v1535_v52 }
 0x177   : > { %v1609_v60 = vmax.f32 %v1596_v50, 0.0  ;;  %v1627_v62 = vsel %vm1621_vm1, %v1608_v49, %v1594_v47  ;;  %v1598_v1 = vadd.f32 %v1597_v55, %v1545_v53  ;;  %v1589_v2 = vpop.f32.mrf.mxu0 }
 0x178   : > { %v1599_v3 = vpop.f32.mrf.mxu1  ;;  %v1624_v58 = vsel %vm1622_vm2, %v1605_v59, %v1586_v51  ;;  %v1590_v63 = vadd.f32 %v1589_v2, %v1537_v56  ;;  %v1606_v8 = vmax.f32 %v1588_v0, 0.0 }
 0x179   : > { %v1628_v4 = vsel %vm1622_vm2, %v1609_v60, %v1596_v50  ;;  %v1600_v5 = vadd.f32 %v1599_v3, %v1547_v57  ;;  %v1996_v6 = vpack.c.bf16 %v1624_v58, %v1623_v61  ;;  %v1610_v9 = vmax.f32 %v1598_v1, 0.0 }
 0x17a   : > { %v1998_v7 = vpack.c.bf16 %v1628_v4, %v1627_v62  ;;  %v1607_v10 = vmax.f32 %v1590_v63, 0.0  ;;  %v1625_v12 = vsel %vm1621_vm1, %v1606_v8, %v1588_v0 }
 0x17b   : > { %v1611_v11 = vmax.f32 %v1600_v5, 0.0  ;;  %1655 = vst [vmem:[%s345_s10] sm:$0xff] %v1996_v6  ;;  %v1629_v13 = vsel %vm1621_vm1, %v1610_v9, %v1598_v1 }
 0x17c   : > { %1657 = vst [vmem:[%s345_s10 + $0x10] sm:$0xff] %v1998_v7  ;;  %v1626_v14 = vsel %vm1622_vm2, %v1607_v10, %v1590_v63 }
 0x17d   : > { %v1630_v15 = vsel %vm1622_vm2, %v1611_v11, %v1600_v5  ;;  %v1997_v16 = vpack.c.bf16 %v1626_v14, %v1625_v12 }
 0x17e   : > { %v1999_v17 = vpack.c.bf16 %v1630_v15, %v1629_v13 }
 0x17f   : > { %1656 = vst [vmem:[%s345_s10 + $0x8] sm:$0xff] %v1997_v16 }
 0x180   : > { %1658 = vst [vmem:[%s345_s10 + $0x18] sm:$0xff] %v1999_v17 }
 0x181 PF: > { %s14_s17 = sadd.s32 1, %s2307_s17   ;;  %s2565_s15 = smov %s2303_s16 }
 0x182   : > { %p11_p5 = scmp.ge.s32.totalorder %s14_s17, 4   ;;  %s2566_s16 = smov %s2568_s18 }
 0x184   :  { %13 = sbr.rel (!%p11_p5) target bundleno = 2 (0x2), region = 75 }

// kernel: backbone_forward.13
= control target key start
LH: loop header
LB: loop body
LE: loop exit
PB: predicated region body
PF: predicated region fallthrough
CT: control target
= control target key end

     0   :  { %s1938_s15 = smov 0   ;;  %s1940_s16 = smov 0   ;;  %s2084_s0 = inlined_call_operand.vmem [shape: bf16[2,32,1152], index: 0, kind: input, shape index: {}]   ;;  %s2085_s1 = inlined_call_operand.vmem [shape: bf16[2,1152,128], index: 1, kind: input, shape index: {}]   ;;  %s2086_s2 = inlined_call_operand.vmem [shape: f32[2,1,128], index: 2, kind: input, shape index: {}]   ;;  %s2087_s3 = inlined_call_operand.vmem [shape: bf16[2,32,128], index: 3, kind: input, shape index: {}]   ;;  %s2088_s4 = inlined_call_operand.vmem [shape: bf16[2,32,128], index: 4, kind: output, shape index: {}]  }
   0x1   :  { %s1942_s17 = smov 0  }
   0x2 LB: > { %s33_s18 = sadd.s32 1, %s1907_s16  ;;  %p1493_p0 = scmp.ge.s32.totalorder %s1911_s17, 1  ;;  %s1911_s17 = sphi %s1942_s17, %s14_s17   ;;  %s1907_s16 = sphi %s1940_s16, %s2090_s16   ;;  %s1903_s15 = sphi %s1938_s15, %s2089_s15  }
   0x3   : > { %p35_p1 = scmp.ge.s32.totalorder %s33_s18, 2  ;;  %p243_p2 = scmp.lt.s32.totalorder %s1911_s17, 3 }
   0x5   : > { %s2092_s18 = smov (%p35_p1, %s33_s18), 0  ;;  %p244_p3 = pnand %p1493_p0, %p243_p2 }
   0x6   : > { %p308_p4 = scmp.lt.s32.totalorder (!%p244_p3), %s1903_s15, 1 }
   0x7   : > { %247 = sbr.rel (%p244_p3) target bundleno = 321 (0x141), region = 36 }
   0xc   : > { %s2094_s15 = smov (!%p308_p4, %s1903_s15), 1 }
   0xd   : > { %s1766_s19 = smul.u32 576, %s2094_s15  ;;  %s331_s29 = scalar_lea.vmem %s2086_s2, %s2094_s15 }
   0xe   : > { %s1765_s23 = smul.u32 144, %s2094_s15  ;;  %s1597_s30 = sshll.u32 %s2094_s15, 4 }
   0xf   : > { %s1962_s22 = scalar_lea.vmem %s2085_s1, %s1766_s19  ;;  %s343_s7 = scalar_lea.vmem %s2087_s3, %s1597_s30 }
  0x10   : > { %v1791_v0 = vld [vmem:[%s1962_s22 + $0x78] sm:$0xff]   ;;  %v1795_v4 = vld [vmem:[%s1962_s22 + $0x70] sm:$0xff]   ;;  %v1799_v8 = vld [vmem:[%s1962_s22 + $0x68] sm:$0xff]   ;;  %s1997_s26 = scalar_lea.vmem %s2084_s0, %s1765_s23  ;;  %s356_s10 = scalar_lea.vmem %s2088_s4, %s1597_s30 }
  0x11   : > { %v1792_v1 = vld [vmem:[%s1962_s22 + $0x38] sm:$0xff]   ;;  %1623 = vmatprep.subr.bf16.mxu0 %v1791_v0  ;;  %v1796_v5 = vld [vmem:[%s1962_s22 + $0x30] sm:$0xff]   ;;  %v1800_v9 = vld [vmem:[%s1962_s22 + $0x28] sm:$0xff]  }
  0x12   : > { %v1793_v2 = vld [vmem:[%s1962_s22 + $0xf8] sm:$0xff]   ;;  %1624 = vmatpush3.bf16.msra.mxu0 %v1792_v1  ;;  %v1797_v6 = vld [vmem:[%s1962_s22 + $0xf0] sm:$0xff]   ;;  %v1801_v10 = vld [vmem:[%s1962_s22 + $0xe8] sm:$0xff]  }
  0x13   : > { %v1794_v3 = vld [vmem:[%s1962_s22 + $0xb8] sm:$0xff]   ;;  %1651 = vmatprep.subr.bf16.mxu1 %v1793_v2  ;;  %1625 = vmatprep.subr.bf16.mxu0 %v1795_v4  ;;  %v1798_v7 = vld [vmem:[%s1962_s22 + $0xb0] sm:$0xff]   ;;  %v1802_v11 = vld [vmem:[%s1962_s22 + $0xa8] sm:$0xff]  }
  0x14   : > { %1652 = vmatpush3.bf16.msra.mxu1 %v1794_v3  ;;  %v1803_v12 = vld [vmem:[%s1962_s22 + $0x60] sm:$0xff]   ;;  %v1807_v16 = vld [vmem:[%s1962_s22 + $0x58] sm:$0xff]   ;;  %v1811_v20 = vld [vmem:[%s1962_s22 + $0x50] sm:$0xff]  }
  0x15   : > { %1653 = vmatprep.subr.bf16.mxu1 %v1797_v6  ;;  %v1804_v13 = vld [vmem:[%s1962_s22 + $0x20] sm:$0xff]   ;;  %v1808_v17 = vld [vmem:[%s1962_s22 + $0x18] sm:$0xff]   ;;  %v1812_v21 = vld [vmem:[%s1962_s22 + $0x10] sm:$0xff]  }
  0x16   : > { %1626 = vmatpush3.bf16.msra.mxu0 %v1796_v5  ;;  %v1805_v14 = vld [vmem:[%s1962_s22 + $0xe0] sm:$0xff]   ;;  %v1809_v18 = vld [vmem:[%s1962_s22 + $0xd8] sm:$0xff]   ;;  %v1813_v22 = vld [vmem:[%s1962_s22 + $0xd0] sm:$0xff]  }
  0x17   : > { %1627 = vmatprep.subr.bf16.mxu0 %v1799_v8  ;;  %v1806_v15 = vld [vmem:[%s1962_s22 + $0xa0] sm:$0xff]   ;;  %v1810_v19 = vld [vmem:[%s1962_s22 + $0x98] sm:$0xff]   ;;  %v1814_v23 = vld [vmem:[%s1962_s22 + $0x90] sm:$0xff]  }
  0x18   : > { %1654 = vmatpush3.bf16.msra.mxu1 %v1798_v7  ;;  %v1815_v24 = vld [vmem:[%s1962_s22 + $0x48] sm:$0xff]   ;;  %v1819_v28 = vld [vmem:[%s1962_s22 + $0x40] sm:$0xff]   ;;  %v1826_v34 = vld [vmem:[%s1962_s22 + $0x178] sm:$0xff]  }
  0x19   : > { %1655 = vmatprep.subr.bf16.mxu1 %v1801_v10  ;;  %v1816_v25 = vld [vmem:[%s1962_s22 + $0x8] sm:$0xff]   ;;  %v1820_v29 = vld [vmem:[%s1962_s22] sm:$0xff]   ;;  %v1830_v37 = vld [vmem:[%s1962_s22 + $0x138] sm:$0xff]  }
  0x1a   : > { %1628 = vmatpush3.bf16.msra.mxu0 %v1800_v9  ;;  %v1817_v26 = vld [vmem:[%s1962_s22 + $0xc8] sm:$0xff]   ;;  %v1821_v30 = vld [vmem:[%s1962_s22 + $0xc0] sm:$0xff]   ;;  %v1831_v38 = vld [vmem:[%s1962_s22 + $0x1f8] sm:$0xff]  }
  0x1b   : > { %1629 = vmatprep.subr.bf16.mxu0 %v1803_v12  ;;  %v1818_v27 = vld [vmem:[%s1962_s22 + $0x88] sm:$0xff]   ;;  %v1822_v31 = vld [vmem:[%s1997_s26] ss:$36 sps:$4 sm:$0xff]   ;;  %v1832_v39 = vld [vmem:[%s1962_s22 + $0x1b8] sm:$0xff]  }
  0x1c   : > { %1656 = vmatpush3.bf16.msra.mxu1 %v1802_v11  ;;  %v1824_v32 = vld [vmem:[%s1997_s26 + $0x4] ss:$36 sps:$4 sm:$0xff]   ;;  %v1829_v36 = vld [vmem:[%s1997_s26 + $0xc] ss:$36 sps:$4 sm:$0xff]   ;;  %v1845_v52 = vld [vmem:[%s1962_s22 + $0x158] sm:$0xff]  }
  0x1d   : > { %1657 = vmatprep.subr.bf16.mxu1 %v1805_v14  ;;  %v1825_v33 = vld [vmem:[%s1962_s22 + $0x80] sm:$0xff]   ;;  %1086 = vmatprep.mubr.bf16.mxu0 %v1824_v32  ;;  %v1827_v35 = vld [vmem:[%s1997_s26 + $0x8] ss:$36 sps:$4 sm:$0xff]   ;;  %v1833_v40 = vld [vmem:[%s1962_s22 + $0x170] sm:$0xff]  }
  0x1e   : > { %1630 = vmatpush3.bf16.msra.mxu0 %v1804_v13  ;;  %1135 = vmatprep.mubr.bf16.mxu1 %v1829_v36  ;;  %v1834_v41 = vld [vmem:[%s1962_s22 + $0x130] sm:$0xff]   ;;  %v1837_v44 = vld [vmem:[%s1962_s22 + $0x168] sm:$0xff]   ;;  %v1841_v48 = vld [vmem:[%s1962_s22 + $0x160] sm:$0xff]  }
  0x1f   : > { %1631 = vmatprep.subr.bf16.mxu0 %v1807_v16  ;;  %v1835_v42 = vld [vmem:[%s1962_s22 + $0x1f0] sm:$0xff]   ;;  %v1838_v45 = vld [vmem:[%s1962_s22 + $0x128] sm:$0xff]   ;;  %v1842_v49 = vld [vmem:[%s1962_s22 + $0x120] sm:$0xff]  }
  0x20   : > { %1658 = vmatpush3.bf16.msra.mxu1 %v1806_v15  ;;  %v1836_v43 = vld [vmem:[%s1962_s22 + $0x1b0] sm:$0xff]   ;;  %v1839_v46 = vld [vmem:[%s1962_s22 + $0x1e8] sm:$0xff]   ;;  %v1843_v50 = vld [vmem:[%s1962_s22 + $0x1e0] sm:$0xff]  }
  0x21   : > { %1659 = vmatprep.subr.bf16.mxu1 %v1809_v18  ;;  %v1840_v47 = vld [vmem:[%s1962_s22 + $0x1a8] sm:$0xff]   ;;  %v1844_v51 = vld [vmem:[%s1962_s22 + $0x1a0] sm:$0xff]   ;;  %v1846_v53 = vld [vmem:[%s1962_s22 + $0x118] sm:$0xff]  }
  0x22   : > { %1632 = vmatpush3.bf16.msra.mxu0 %v1808_v17  ;;  %v1847_v54 = vld [vmem:[%s1997_s26 + $0x4c] ss:$36 sps:$4 sm:$0xff]   ;;  %v1849_v55 = vld [vmem:[%s1962_s22 + $0x1d8] sm:$0xff]   ;;  %v1863_v4 = vld [vmem:[%s1962_s22 + $0x140] sm:$0xff]  }
  0x23   : > { %1633 = vmatprep.subr.bf16.mxu0 %v1811_v20  ;;  %v1850_v56 = vld [vmem:[%s1997_s26 + $0x48] ss:$36 sps:$4 sm:$0xff]   ;;  %v1851_v57 = vld [vmem:[%s1962_s22 + $0x198] sm:$0xff]   ;;  %v1854_v59 = vld [vmem:[%s1962_s22 + $0x150] sm:$0xff]  }
  0x24   : > { %1660 = vmatpush3.bf16.msra.mxu1 %v1810_v19  ;;  %v1852_v58 = vld [vmem:[%s1997_s26 + $0x54] ss:$36 sps:$4 sm:$0xff]   ;;  %v1859_v0 = vld [vmem:[%s1962_s22 + $0x148] sm:$0xff]   ;;  %v1864_v5 = vld [vmem:[%s1962_s22 + $0x100] sm:$0xff]  }
  0x25   : > { %1661 = vmatprep.subr.bf16.mxu1 %v1813_v22  ;;  %v1855_v60 = vld [vmem:[%s1997_s26 + $0x50] ss:$36 sps:$4 sm:$0xff]   ;;  %v1860_v1 = vld [vmem:[%s1962_s22 + $0x108] sm:$0xff]   ;;  %v1865_v6 = vld [vmem:[%s1962_s22 + $0x1c0] sm:$0xff]  }
  0x26   : > { %1634 = vmatpush3.bf16.msra.mxu0 %v1812_v21  ;;  %v1856_v61 = vld [vmem:[%s1962_s22 + $0x110] sm:$0xff]   ;;  %v1861_v2 = vld [vmem:[%s1962_s22 + $0x1c8] sm:$0xff]   ;;  %v1869_v9 = vld [vmem:[%s1962_s22 + $0x180] sm:$0xff]  }
  0x27   : > { %1635 = vmatprep.subr.bf16.mxu0 %v1815_v24  ;;  %v1857_v62 = vld [vmem:[%s1962_s22 + $0x1d0] sm:$0xff]   ;;  %v1862_v3 = vld [vmem:[%s1962_s22 + $0x188] sm:$0xff]   ;;  %v1870_v10 = vld [vmem:[%s1962_s22 + $0x238] sm:$0xff]  }
  0x28   : > { %1662 = vmatpush3.bf16.msra.mxu1 %v1814_v23  ;;  %v1858_v63 = vld [vmem:[%s1962_s22 + $0x190] sm:$0xff]   ;;  %v1871_v11 = vld [vmem:[%s1997_s26 + $0x18] ss:$36 sps:$4 sm:$0xff]   ;;  %v1878_v16 = vld [vmem:[%s1962_s22 + $0x228] sm:$0xff]  }
  0x29   : > { %1663 = vmatprep.subr.bf16.mxu1 %v1817_v26  ;;  %v1866_v7 = vld [vmem:[%s1997_s26 + $0x10] ss:$36 sps:$4 sm:$0xff]   ;;  %v1873_v12 = vld [vmem:[%s1997_s26 + $0x1c] ss:$36 sps:$4 sm:$0xff]   ;;  %v1879_v17 = vld [vmem:[%s1997_s26 + $0x64] ss:$36 sps:$4 sm:$0xff]  }
  0x2a   : > { %1636 = vmatpush3.bf16.msra.mxu0 %v1816_v25  ;;  %v1868_v8 = vld [vmem:[%s1997_s26 + $0x14] ss:$36 sps:$4 sm:$0xff]   ;;  %v1875_v14 = vld [vmem:[%s1997_s26 + $0x5c] ss:$36 sps:$4 sm:$0xff]   ;;  %v1885_v23 = vld [vmem:[%s1962_s22 + $0x208] sm:$0xff]  }
  0x2b   : > { %1637 = vmatprep.subr.bf16.mxu0 %v1819_v28  ;;  %v1874_v13 = vld [vmem:[%s1962_s22 + $0x230] sm:$0xff]   ;;  %v1877_v15 = vld [vmem:[%s1997_s26 + $0x58] ss:$36 sps:$4 sm:$0xff]   ;;  %v1881_v18 = vld [vmem:[%s1997_s26 + $0x60] ss:$36 sps:$4 sm:$0xff]  }
  0x2c   : > { %1664 = vmatpush3.bf16.msra.mxu1 %v1818_v27  ;;  %v1882_v19 = vld [vmem:[%s1962_s22 + $0x220] sm:$0xff]   ;;  %v1883_v20 = vld [vmem:[%s1962_s22 + $0x218] sm:$0xff]   ;;  %v1884_v22 = vld [vmem:[%s1962_s22 + $0x210] sm:$0xff]  }
  0x2d   : > { %1665 = vmatprep.subr.bf16.mxu1 %v1821_v30  ;;  %v1887_v21 = vld [vmem:[%s1997_s26 + $0x20] ss:$36 sps:$4 sm:$0xff]   ;;  %v1888_v25 = vld [vmem:[%s1997_s26 + $0x68] ss:$36 sps:$4 sm:$0xff]  }
  0x2e   : > { %1638 = vmatpush3.bf16.msra.mxu0 %v1820_v29  ;;  %v1886_v24 = vld [vmem:[%s1962_s22 + $0x200] sm:$0xff]  }
  0x2f   : > { %1679 = vmatprep.subr.bf16.mxu0 %v1826_v34 }
  0x30   : > { %1666 = vmatpush3.bf16.msra.mxu1 %v1825_v33 }
  0x31   : > { %1087 = vmatmul.mubr.bf16.vlgmr.msra.gmra.mxu0 %v1822_v31  ;;  %1707 = vmatprep.subr.bf16.mxu1 %v1831_v38 }
  0x32   : > { %1680 = vmatpush3.bf16.msra.mxu0 %v1830_v37  ;;  %1094 = vmatprep.mubr.bf16.mxu0 %v1847_v54 }
  0x33   : > { %1136 = vmatmul.mubr.bf16.vlgmr.msra.gmra.mxu1 %v1827_v35  ;;  %1681 = vmatprep.subr.bf16.mxu0 %v1833_v40 }
  0x34   : > { %1708 = vmatpush3.bf16.msra.mxu1 %v1832_v39  ;;  %1143 = vmatprep.mubr.bf16.mxu1 %v1852_v58 }
  0x35   : > { %1709 = vmatprep.subr.bf16.mxu1 %v1835_v42 }
  0x36   : > { %1682 = vmatpush3.bf16.msra.mxu0 %v1834_v41 }
  0x37   : > { %1683 = vmatprep.subr.bf16.mxu0 %v1837_v44 }
  0x38   : > { %1710 = vmatpush3.bf16.msra.mxu1 %v1836_v43 }
  0x39   : > { %1711 = vmatprep.subr.bf16.mxu1 %v1839_v46  ;;  %1095 = vmatmul.mubr.bf16.gmra.mxu0 %v1850_v56 }
  0x3a   : > { %1684 = vmatpush3.bf16.msra.mxu0 %v1838_v45  ;;  %1184 = vmatprep.mubr.bf16.mxu0 %v1868_v8 }
  0x3b   : > { %1685 = vmatprep.subr.bf16.mxu0 %v1841_v48  ;;  %1144 = vmatmul.mubr.bf16.gmra.mxu1 %v1855_v60 }
  0x3c   : > { %1712 = vmatpush3.bf16.msra.mxu1 %v1840_v47  ;;  %1233 = vmatprep.mubr.bf16.mxu1 %v1873_v12 }
  0x3d   : > { %1713 = vmatprep.subr.bf16.mxu1 %v1843_v50 }
  0x3e   : > { %1686 = vmatpush3.bf16.msra.mxu0 %v1842_v49 }
  0x3f   : > { %1687 = vmatprep.subr.bf16.mxu0 %v1845_v52 }
  0x40   : > { %1714 = vmatpush3.bf16.msra.mxu1 %v1844_v51 }
  0x41   : > { %1715 = vmatprep.subr.bf16.mxu1 %v1849_v55  ;;  %v1500_v55 = vld [vmem:[%s331_s29] ss:$0 sm:$0xff] }
  0x42   : > { %1688 = vmatpush3.bf16.msra.mxu0 %v1846_v53 }
  0x43   : > { %1689 = vmatprep.subr.bf16.mxu0 %v1854_v59 }
  0x44   : > { %1716 = vmatpush3.bf16.msra.mxu1 %v1851_v57 }
  0x45   : > { %1717 = vmatprep.subr.bf16.mxu1 %v1857_v62 }
  0x46   : > { %1690 = vmatpush3.bf16.msra.mxu0 %v1856_v61 }
  0x47   : > { %1691 = vmatprep.subr.bf16.mxu0 %v1859_v0 }
  0x48   : > { %1718 = vmatpush3.bf16.msra.mxu1 %v1858_v63 }
  0x49   : > { %1719 = vmatprep.subr.bf16.mxu1 %v1861_v2 }
  0x4a   : > { %1692 = vmatpush3.bf16.msra.mxu0 %v1860_v1 }
  0x4b   : > { %1693 = vmatprep.subr.bf16.mxu0 %v1863_v4 }
  0x4c   : > { %1720 = vmatpush3.bf16.msra.mxu1 %v1862_v3 }
  0x4d   : > { %1721 = vmatprep.subr.bf16.mxu1 %v1865_v6 }
  0x4e   : > { %1694 = vmatpush3.bf16.msra.mxu0 %v1864_v5 }
  0x4f   : > { %1745 = vmatprep.subr.bf16.mxu0 %v1870_v10 }
  0x50   : > { %1722 = vmatpush3.bf16.msra.mxu1 %v1869_v9 }
  0x51   : > { %1185 = vmatmul.mubr.bf16.vlgmr.msra.gmra.mxu0 %v1866_v7 }
  0x52   : > { %1746 = vmatpush3.bf16.msra.mxu0 %v1870_v10  ;;  %1192 = vmatprep.mubr.bf16.mxu0 %v1875_v14 }
  0x53   : > { %1234 = vmatmul.mubr.bf16.vlgmr.msra.gmra.mxu1 %v1871_v11  ;;  %1747 = vmatprep.subr.bf16.mxu0 %v1874_v13 }
  0x54   : > { %1241 = vmatprep.mubr.bf16.mxu1 %v1879_v17 }
  0x56   : > { %1748 = vmatpush3.bf16.msra.mxu0 %v1874_v13 }
  0x57   : > { %1749 = vmatprep.subr.bf16.mxu0 %v1878_v16 }
  0x59   : > { %1193 = vmatmul.mubr.bf16.gmra.mxu0 %v1877_v15 }
  0x5a   : > { %1750 = vmatpush3.bf16.msra.mxu0 %v1878_v16  ;;  %1761 = vmatprep.mubr.bf16.mxu0 %v1887_v21 }
  0x5b   : > { %1242 = vmatmul.mubr.bf16.gmra.mxu1 %v1881_v18  ;;  %1751 = vmatprep.subr.bf16.mxu0 %v1882_v19  ;;  %v1621_v18 = vld [vmem:[%s343_s7 + $0x8] sm:$0xff]  }
  0x5e   : > { %1752 = vmatpush3.bf16.msra.mxu0 %v1882_v19 }
  0x5f   : > { %1753 = vmatprep.subr.bf16.mxu0 %v1883_v20 }
  0x62   : > { %1754 = vmatpush3.bf16.msra.mxu0 %v1883_v20 }
  0x63   : > { %1755 = vmatprep.subr.bf16.mxu0 %v1884_v22 }
  0x66   : > { %1756 = vmatpush3.bf16.msra.mxu0 %v1884_v22 }
  0x67   : > { %1757 = vmatprep.subr.bf16.mxu0 %v1885_v23 }
  0x6a   : > { %1758 = vmatpush3.bf16.msra.mxu0 %v1885_v23 }
  0x6b   : > { %1759 = vmatprep.subr.bf16.mxu0 %v1886_v24 }
  0x6e   : > { %1760 = vmatpush3.bf16.msra.mxu0 %v1886_v24  ;;  %v1609_v24 = vunpack.c.l.bf16 %v1621_v18 }
  0x71   : > { %1762 = vmatmul.mubr.bf16.vlgmr.msra.gmra.mxu0 %v1888_v25  ;;  %v1604_v25 = vld [vmem:[%s343_s7] sm:$0xff]  }
  0xf1   : > { %v1639_v26 = vpop.f32.mrf.mxu0 }
  0xf3   : > { %v1667_v27 = vpop.f32.mrf.mxu1  ;;  %v1640_v28 = vpop.f32.mrf.mxu0 }
  0xf4   : > { %v1641_v54 = vadd.f32 %v1640_v28, %v1639_v26 }
  0xf5   : > { %v1668_v29 = vpop.f32.mrf.mxu1  ;;  %v1642_v30 = vpop.f32.mrf.mxu0 }
  0xf6   : > { %v1089_v61 = vadd.f32 %v1641_v54, %v1500_v55  ;;  %v1669_v62 = vadd.f32 %v1668_v29, %v1667_v27 }
  0xf7   : > { %v1670_v31 = vpop.f32.mrf.mxu1  ;;  %v1643_v32 = vpop.f32.mrf.mxu0 }
  0xf8   : > { %v1644_v63 = vadd.f32 %v1643_v32, %v1642_v30  ;;  %v1138_v7 = vadd.f32 %v1669_v62, %v1089_v61  ;;  %v1605_v32 = vunpack.c.l.bf16 %v1604_v25 }
  0xf9   : > { %v1645_v33 = vpop.f32.mrf.mxu0  ;;  %v1671_v34 = vpop.f32.mrf.mxu1 }
  0xfa   : > { %v1092_v8 = vadd.f32 %v1644_v63, %v1500_v55  ;;  %v1672_v9 = vadd.f32 %v1671_v34, %v1670_v31  ;;  %v1610_v34 = vunpack.c.h.bf16 %v1621_v18 }
  0xfb   : > { %v1673_v35 = vpop.f32.mrf.mxu1  ;;  %v1646_v36 = vpop.f32.mrf.mxu0 }
  0xfc   : > { %v1647_v53 = vadd.f32 %v1646_v36, %v1645_v33  ;;  %v1141_v19 = vadd.f32 %v1672_v9, %v1092_v8 }
  0xfd   : > { %v1674_v37 = vpop.f32.mrf.mxu1  ;;  %v1648_v38 = vpop.f32.mrf.mxu0 }
  0xfe   : > { %v1097_v58 = vadd.f32 %v1647_v53, %v1500_v55  ;;  %v1675_v59 = vadd.f32 %v1674_v37, %v1673_v35 }
  0xff   : > { %v1676_v39 = vpop.f32.mrf.mxu1  ;;  %v1649_v40 = vpop.f32.mrf.mxu0 }
 0x100   : > { %v1650_v60 = vadd.f32 %v1649_v40, %v1648_v38  ;;  %v1146_v3 = vadd.f32 %v1675_v59, %v1097_v58 }
 0x101   : > { %v1677_v42 = vpop.f32.mrf.mxu1 }
 0x102   : > { %v1100_v4 = vadd.f32 %v1650_v60, %v1500_v55  ;;  %v1678_v5 = vadd.f32 %v1677_v42, %v1676_v39  ;;  %v1606_v39 = vunpack.c.h.bf16 %v1604_v25 }
 0x104   : > { %v1149_v14 = vadd.f32 %v1678_v5, %v1100_v4 }
 0x111   : > { %v1695_v41 = vpop.f32.mrf.mxu0 }
 0x113   : > { %v1696_v43 = vpop.f32.mrf.mxu0  ;;  %v1723_v44 = vpop.f32.mrf.mxu1 }
 0x114   : > { %v1697_v6 = vadd.f32 %v1696_v43, %v1695_v41 }
 0x115   : > { %v1698_v45 = vpop.f32.mrf.mxu0  ;;  %v1724_v46 = vpop.f32.mrf.mxu1 }
 0x116   : > { %v1187_v15 = vadd.f32 %v1697_v6, %v1138_v7  ;;  %v1725_v16 = vadd.f32 %v1724_v46, %v1723_v44 }
 0x117   : > { %v1699_v47 = vpop.f32.mrf.mxu0  ;;  %v1726_v48 = vpop.f32.mrf.mxu1 }
 0x118   : > { %v1700_v17 = vadd.f32 %v1699_v47, %v1698_v45  ;;  %v1236_v29 = vadd.f32 %v1725_v16, %v1187_v15 }
 0x119   : > { %v1701_v49 = vpop.f32.mrf.mxu0  ;;  %v1727_v50 = vpop.f32.mrf.mxu1 }
 0x11a   : > { %v1190_v26 = vadd.f32 %v1700_v17, %v1141_v19  ;;  %v1728_v27 = vadd.f32 %v1727_v50, %v1726_v48 }
 0x11b   : > { %v1702_v51 = vpop.f32.mrf.mxu0  ;;  %v1729_v52 = vpop.f32.mrf.mxu1 }
 0x11c   : > { %v1703_v0 = vadd.f32 %v1702_v51, %v1701_v49  ;;  %v1239_v38 = vadd.f32 %v1728_v27, %v1190_v26 }
 0x11d   : > { %v1704_v56 = vpop.f32.mrf.mxu0  ;;  %v1730_v57 = vpop.f32.mrf.mxu1 }
 0x11e   : > { %v1195_v10 = vadd.f32 %v1703_v0, %v1146_v3  ;;  %v1731_v11 = vadd.f32 %v1730_v57, %v1729_v52 }
 0x11f   : > { %v1705_v1 = vpop.f32.mrf.mxu0  ;;  %v1732_v2 = vpop.f32.mrf.mxu1 }
 0x120   : > { %v1706_v12 = vadd.f32 %v1705_v1, %v1704_v56  ;;  %v1244_v22 = vadd.f32 %v1731_v11, %v1195_v10 }
 0x121   : > { %v1733_v13 = vpop.f32.mrf.mxu1 }
 0x122   : > { %v1198_v20 = vadd.f32 %v1706_v12, %v1149_v14  ;;  %v1734_v21 = vadd.f32 %v1733_v13, %v1732_v2 }
 0x124   : > { %v1247_v33 = vadd.f32 %v1734_v21, %v1198_v20 }
 0x131   : > { %v1763_v23 = vpop.f32.mrf.mxu0 }
 0x132   : > { %v1293_v28 = vadd.f32 %v1763_v23, %v1244_v22 }
 0x133   : > { %v1284_v30 = vpop.f32.mrf.mxu0 }
 0x134   : > { %v1285_v31 = vadd.f32 %v1284_v30, %v1236_v29  ;;  %v1309_v36 = vadd.f32 %v1609_v24, %v1293_v28 }
 0x135   : > { %v1764_v35 = vpop.f32.mrf.mxu0 }
 0x136   : > { %v1296_v37 = vadd.f32 %v1764_v35, %v1247_v33  ;;  %v1307_v41 = vadd.f32 %v1605_v32, %v1285_v31  ;;  %v1313_v44 = vmax.f32 %v1309_v36, 0.0 }
 0x137   : > { %v1287_v40 = vpop.f32.mrf.mxu0 }
 0x138   : > { %v1310_v42 = vadd.f32 %v1610_v34, %v1296_v37  ;;  %v1288_v43 = vadd.f32 %v1287_v40, %v1239_v38  ;;  %v1311_v47 = vmax.f32 %v1307_v41, 0.0 }
 0x13a   : > { %v1314_v45 = vmax.f32 %v1310_v42, 0.0  ;;  %v1308_v46 = vadd.f32 %v1606_v39, %v1288_v43 }
 0x13c   : > { %v1619_v48 = vpack.c.bf16 %v1314_v45, %v1313_v44  ;;  %v1312_v49 = vmax.f32 %v1308_v46, 0.0 }
 0x13e   : > { %1622 = vst [vmem:[%s356_s10 + $0x8] sm:$0xff] %v1619_v48   ;;  %v1614_v50 = vpack.c.bf16 %v1312_v49, %v1311_v47 }
 0x140   : > { %1615 = vst [vmem:[%s356_s10] sm:$0xff] %v1614_v50  }
 0x141 PF: > { %s14_s17 = sadd.s32 1, %s1911_s17   ;;  %s2089_s15 = smov %s1907_s16 }
 0x142   : > { %p11_p5 = scmp.ge.s32.totalorder %s14_s17, 4   ;;  %s2090_s16 = smov %s2092_s18 }
 0x144   :  { %13 = sbr.rel (!%p11_p5) target bundleno = 2 (0x2), region = 75 }

// kernel: backbone_forward.14
= control target key start
LH: loop header
LB: loop body
LE: loop exit
PB: predicated region body
PF: predicated region fallthrough
CT: control target
= control target key end

     0   :  { %s2110_s15 = smov 0   ;;  %s2112_s16 = smov 0   ;;  %s2323_s0 = inlined_call_operand.vmem [shape: bf16[2,8,1152], index: 0, kind: input, shape index: {}]   ;;  %s2324_s1 = inlined_call_operand.vmem [shape: bf16[2,1152,256], index: 1, kind: input, shape index: {}]   ;;  %s2325_s2 = inlined_call_operand.vmem [shape: f32[2,1,256], index: 2, kind: input, shape index: {}]   ;;  %s2326_s3 = inlined_call_operand.vmem [shape: f32[1,256], index: 3, kind: input, shape index: {}]   ;;  %s2327_s4 = inlined_call_operand.vmem [shape: bf16[2,8,256], index: 4, kind: output, shape index: {}]  }
   0x1   :  { %s2114_s17 = smov 0  }
   0x2 LB: > { %s33_s18 = sadd.s32 1, %s2078_s16  ;;  %p1644_p0 = scmp.ge.s32.totalorder %s2082_s17, 1  ;;  %s2082_s17 = sphi %s2114_s17, %s14_s17   ;;  %s2078_s16 = sphi %s2112_s16, %s2329_s16   ;;  %s2074_s15 = sphi %s2110_s15, %s2328_s15  }
   0x3   : > { %p35_p1 = scmp.ge.s32.totalorder %s33_s18, 2  ;;  %p234_p2 = scmp.lt.s32.totalorder %s2082_s17, 3 }
   0x5   : > { %s2331_s18 = smov (%p35_p1, %s33_s18), 0  ;;  %p235_p3 = pnand %p1644_p0, %p234_p2 }
   0x6   : > { %p293_p4 = scmp.lt.s32.totalorder (!%p235_p3), %s2074_s15, 1 }
   0x7   : > { %238 = sbr.rel (%p235_p3) target bundleno = 380 (0x17c), region = 36 }
   0xc   : > { %s2333_s15 = smov (!%p293_p4, %s2074_s15), 1 }
   0xd   : > { %s1809_s19 = smul.u32 1152, %s2333_s15  ;;  %s1647_s27 = sshll.u32 %s2333_s15, 1 }
   0xe   : > { %s1808_s23 = smul.u32 36, %s2333_s15  ;;  %s319_s30 = scalar_lea.vmem %s2325_s2, %s1647_s27 }
   0xf   : > { %s2134_s22 = scalar_lea.vmem %s2324_s1, %s1809_s19  ;;  %s1806_s7 = sshll.u32 %s2333_s15, 3 }
  0x10   : > { %v1835_v0 = vld [vmem:[%s2134_s22 + $0x74] ss:$8 sps:$4 sm:$0xff]   ;;  %v1837_v1 = vld [vmem:[%s2134_s22 + $0x70] ss:$8 sps:$4 sm:$0xff]   ;;  %v1841_v4 = vld [vmem:[%s2134_s22 + $0x64] ss:$8 sps:$4 sm:$0xff]   ;;  %s2183_s26 = scalar_lea.vmem %s2323_s0, %s1808_s23  ;;  %s338_s10 = scalar_lea.vmem %s2327_s4, %s1806_s7 }
  0x11   : > { %1254 = vmatprep.subr.bf16.mxu0 %v1835_v0  ;;  %v1838_v2 = vld [vmem:[%s2134_s22 + $0x174] ss:$8 sps:$4 sm:$0xff]   ;;  %v1840_v3 = vld [vmem:[%s2134_s22 + $0x170] ss:$8 sps:$4 sm:$0xff]   ;;  %v1843_v5 = vld [vmem:[%s2134_s22 + $0x60] ss:$8 sps:$4 sm:$0xff]  }
  0x12   : > { %1255 = vmatpush1.bf16.msra.mxu0 %v1837_v1  ;;  %1295 = vmatprep.subr.bf16.mxu1 %v1838_v2  ;;  %v1844_v6 = vld [vmem:[%s2134_s22 + $0x164] ss:$8 sps:$4 sm:$0xff]   ;;  %v1846_v7 = vld [vmem:[%s2134_s22 + $0x160] ss:$8 sps:$4 sm:$0xff]   ;;  %v1847_v8 = vld [vmem:[%s2134_s22 + $0x54] ss:$8 sps:$4 sm:$0xff]  }
  0x13   : > { %1296 = vmatpush1.bf16.msra.mxu1 %v1840_v3  ;;  %1256 = vmatprep.subr.bf16.mxu0 %v1841_v4  ;;  %v1849_v9 = vld [vmem:[%s2134_s22 + $0x50] ss:$8 sps:$4 sm:$0xff]   ;;  %v1850_v10 = vld [vmem:[%s2134_s22 + $0x154] ss:$8 sps:$4 sm:$0xff]   ;;  %v1853_v11 = vld [vmem:[%s2134_s22 + $0x44] ss:$8 sps:$4 sm:$0xff]  }
  0x14   : > { %1297 = vmatprep.subr.bf16.mxu1 %v1844_v6  ;;  %v1852_v12 = vld [vmem:[%s2134_s22 + $0x150] ss:$8 sps:$4 sm:$0xff]   ;;  %v1856_v13 = vld [vmem:[%s2134_s22 + $0x144] ss:$8 sps:$4 sm:$0xff]   ;;  %v1855_v14 = vld [vmem:[%s2134_s22 + $0x40] ss:$8 sps:$4 sm:$0xff]  }
  0x15   : > { %v1859_v15 = vld [vmem:[%s2134_s22 + $0x34] ss:$8 sps:$4 sm:$0xff]   ;;  %v1858_v16 = vld [vmem:[%s2134_s22 + $0x140] ss:$8 sps:$4 sm:$0xff]   ;;  %v1861_v18 = vld [vmem:[%s2134_s22 + $0x30] ss:$8 sps:$4 sm:$0xff]  }
  0x16   : > { %1257 = vmatpush1.bf16.msra.mxu0 %v1843_v5  ;;  %v1862_v17 = vld [vmem:[%s2134_s22 + $0x134] ss:$8 sps:$4 sm:$0xff]   ;;  %v1865_v19 = vld [vmem:[%s2134_s22 + $0x24] ss:$8 sps:$4 sm:$0xff]   ;;  %v1864_v20 = vld [vmem:[%s2134_s22 + $0x130] ss:$8 sps:$4 sm:$0xff]  }
  0x17   : > { %1258 = vmatprep.subr.bf16.mxu0 %v1847_v8  ;;  %1298 = vmatpush1.bf16.msra.mxu1 %v1846_v7  ;;  %v1868_v21 = vld [vmem:[%s2134_s22 + $0x124] ss:$8 sps:$4 sm:$0xff]   ;;  %v1867_v22 = vld [vmem:[%s2134_s22 + $0x20] ss:$8 sps:$4 sm:$0xff]   ;;  %v1871_v23 = vld [vmem:[%s2134_s22 + $0x14] ss:$8 sps:$4 sm:$0xff]  }
  0x18   : > { %1299 = vmatprep.subr.bf16.mxu1 %v1850_v10  ;;  %v1870_v24 = vld [vmem:[%s2134_s22 + $0x120] ss:$8 sps:$4 sm:$0xff]   ;;  %v1874_v25 = vld [vmem:[%s2134_s22 + $0x114] ss:$8 sps:$4 sm:$0xff]   ;;  %v1873_v26 = vld [vmem:[%s2134_s22 + $0x10] ss:$8 sps:$4 sm:$0xff]  }
  0x19   : > { %v1877_v27 = vld [vmem:[%s2134_s22 + $0x4] ss:$8 sps:$4 sm:$0xff]   ;;  %v1876_v28 = vld [vmem:[%s2134_s22 + $0x110] ss:$8 sps:$4 sm:$0xff]   ;;  %v1879_v30 = vld [vmem:[%s2134_s22] ss:$8 sps:$4 sm:$0xff]  }
  0x1a   : > { %1259 = vmatpush1.bf16.msra.mxu0 %v1849_v9  ;;  %v1880_v29 = vld [vmem:[%s2134_s22 + $0x104] ss:$8 sps:$4 sm:$0xff]   ;;  %v1883_v31 = vld [vmem:[%s2134_s22 + $0xf4] ss:$8 sps:$4 sm:$0xff]   ;;  %v1882_v32 = vld [vmem:[%s2134_s22 + $0x100] ss:$8 sps:$4 sm:$0xff]  }
  0x1b   : > { %1260 = vmatprep.subr.bf16.mxu0 %v1853_v11  ;;  %1300 = vmatpush1.bf16.msra.mxu1 %v1852_v12  ;;  %v1886_v33 = vld [vmem:[%s2134_s22 + $0x1f4] ss:$8 sps:$4 sm:$0xff]   ;;  %v1885_v34 = vld [vmem:[%s2134_s22 + $0xf0] ss:$8 sps:$4 sm:$0xff]   ;;  %v1889_v35 = vld [vmem:[%s2134_s22 + $0xe4] ss:$8 sps:$4 sm:$0xff]  }
  0x1c   : > { %1301 = vmatprep.subr.bf16.mxu1 %v1856_v13  ;;  %v1888_v36 = vld [vmem:[%s2134_s22 + $0x1f0] ss:$8 sps:$4 sm:$0xff]   ;;  %v1892_v37 = vld [vmem:[%s2134_s22 + $0x1e4] ss:$8 sps:$4 sm:$0xff]   ;;  %v1891_v38 = vld [vmem:[%s2134_s22 + $0xe0] ss:$8 sps:$4 sm:$0xff]  }
  0x1d   : > { %v1895_v39 = vld [vmem:[%s2134_s22 + $0xd4] ss:$8 sps:$4 sm:$0xff]   ;;  %v1894_v40 = vld [vmem:[%s2134_s22 + $0x1e0] ss:$8 sps:$4 sm:$0xff]   ;;  %v1897_v42 = vld [vmem:[%s2134_s22 + $0xd0] ss:$8 sps:$4 sm:$0xff]  }
  0x1e   : > { %1261 = vmatpush1.bf16.msra.mxu0 %v1855_v14  ;;  %v1898_v41 = vld [vmem:[%s2134_s22 + $0x1d4] ss:$8 sps:$4 sm:$0xff]   ;;  %v1901_v43 = vld [vmem:[%s2134_s22 + $0xc4] ss:$8 sps:$4 sm:$0xff]   ;;  %v1900_v44 = vld [vmem:[%s2134_s22 + $0x1d0] ss:$8 sps:$4 sm:$0xff]  }
  0x1f   : > { %1262 = vmatprep.subr.bf16.mxu0 %v1859_v15  ;;  %1302 = vmatpush1.bf16.msra.mxu1 %v1858_v16  ;;  %v1904_v45 = vld [vmem:[%s2134_s22 + $0x1c4] ss:$8 sps:$4 sm:$0xff]   ;;  %v1903_v47 = vld [vmem:[%s2134_s22 + $0xc0] ss:$8 sps:$4 sm:$0xff]   ;;  %v1907_v49 = vld [vmem:[%s2134_s22 + $0xb4] ss:$8 sps:$4 sm:$0xff]  }
  0x20   : > { %1303 = vmatprep.subr.bf16.mxu1 %v1862_v17  ;;  %v341_v46 = vld [vmem:[%s2183_s26] sm:$0xff]  ;;  %v342_v50 = vld [vmem:[%s2183_s26 + $0x8] sm:$0xff]  ;;  %v1910_v53 = vld [vmem:[%s2134_s22 + $0x1b4] ss:$8 sps:$4 sm:$0xff]  }
  0x21   : > { %v1651_v48 = vcombine.high %v341_v46, %v341_v46  ;;  %v1906_v51 = vld [vmem:[%s2134_s22 + $0x1c0] ss:$8 sps:$4 sm:$0xff]   ;;  %v1653_v52 = vcombine.high %v342_v50, %v342_v50  ;;  %v1909_v54 = vld [vmem:[%s2134_s22 + $0xb0] ss:$8 sps:$4 sm:$0xff]   ;;  %v1913_v55 = vld [vmem:[%s2134_s22 + $0xa4] ss:$8 sps:$4 sm:$0xff]   ;;  %v1650_v5 = vcombine.low %v341_v46, %v341_v46  ;;  %v1652_v8 = vcombine.low %v342_v50, %v342_v50 }
  0x22   : > { %1263 = vmatpush1.bf16.msra.mxu0 %v1861_v18  ;;  %v1912_v56 = vld [vmem:[%s2134_s22 + $0x1b0] ss:$8 sps:$4 sm:$0xff]   ;;  %v1916_v57 = vld [vmem:[%s2134_s22 + $0x1a4] ss:$8 sps:$4 sm:$0xff]   ;;  %v1915_v58 = vld [vmem:[%s2134_s22 + $0xa0] ss:$8 sps:$4 sm:$0xff]  }
  0x23   : > { %1264 = vmatprep.subr.bf16.mxu0 %v1865_v19  ;;  %1304 = vmatpush1.bf16.msra.mxu1 %v1864_v20  ;;  %v1919_v59 = vld [vmem:[%s2134_s22 + $0x94] ss:$8 sps:$4 sm:$0xff]   ;;  %v1918_v60 = vld [vmem:[%s2134_s22 + $0x1a0] ss:$8 sps:$4 sm:$0xff]   ;;  %v1921_v62 = vld [vmem:[%s2134_s22 + $0x90] ss:$8 sps:$4 sm:$0xff]  }
  0x24   : > { %1305 = vmatprep.subr.bf16.mxu1 %v1868_v21  ;;  %1286 = vmatprep.mubr.bf16.mxu0 %v1651_v48  ;;  %v1922_v61 = vld [vmem:[%s2134_s22 + $0x194] ss:$8 sps:$4 sm:$0xff]   ;;  %v1925_v63 = vld [vmem:[%s2134_s22 + $0x84] ss:$8 sps:$4 sm:$0xff]   ;;  %v1924_v0 = vld [vmem:[%s2134_s22 + $0x190] ss:$8 sps:$4 sm:$0xff]  }
  0x25   : > { %1327 = vmatprep.mubr.bf16.mxu1 %v1653_v52  ;;  %v1928_v1 = vld [vmem:[%s2134_s22 + $0x184] ss:$8 sps:$4 sm:$0xff]   ;;  %v1927_v2 = vld [vmem:[%s2134_s22 + $0x80] ss:$8 sps:$4 sm:$0xff]   ;;  %v1935_v3 = vld [vmem:[%s2134_s22 + $0x274] ss:$8 sps:$4 sm:$0xff]  }
  0x26   : > { %1265 = vmatpush1.bf16.msra.mxu0 %v1867_v22  ;;  %v1932_v4 = vld [vmem:[%s2134_s22 + $0x180] ss:$8 sps:$4 sm:$0xff]   ;;  %v1940_v6 = vld [vmem:[%s2134_s22 + $0x374] ss:$8 sps:$4 sm:$0xff]   ;;  %v1933_v7 = vld [vmem:[%s2134_s22 + $0x270] ss:$8 sps:$4 sm:$0xff]  }
  0x27   : > { %1266 = vmatprep.subr.bf16.mxu0 %v1871_v23  ;;  %1306 = vmatpush1.bf16.msra.mxu1 %v1870_v24  ;;  %v1943_v9 = vld [vmem:[%s2134_s22 + $0x264] ss:$8 sps:$4 sm:$0xff]   ;;  %v1938_v10 = vld [vmem:[%s2134_s22 + $0x370] ss:$8 sps:$4 sm:$0xff]   ;;  %v1941_v12 = vld [vmem:[%s2134_s22 + $0x260] ss:$8 sps:$4 sm:$0xff]  }
  0x28   : > { %1307 = vmatprep.subr.bf16.mxu1 %v1874_v25  ;;  %v1946_v11 = vld [vmem:[%s2134_s22 + $0x364] ss:$8 sps:$4 sm:$0xff]   ;;  %v1949_v13 = vld [vmem:[%s2134_s22 + $0x254] ss:$8 sps:$4 sm:$0xff]   ;;  %v1944_v14 = vld [vmem:[%s2134_s22 + $0x360] ss:$8 sps:$4 sm:$0xff]  }
  0x29   : > { %v1952_v15 = vld [vmem:[%s2134_s22 + $0x354] ss:$8 sps:$4 sm:$0xff]   ;;  %v1947_v16 = vld [vmem:[%s2134_s22 + $0x250] ss:$8 sps:$4 sm:$0xff]   ;;  %v1955_v17 = vld [vmem:[%s2134_s22 + $0x244] ss:$8 sps:$4 sm:$0xff]  }
  0x2a   : > { %1267 = vmatpush1.bf16.msra.mxu0 %v1873_v26  ;;  %v1950_v18 = vld [vmem:[%s2134_s22 + $0x350] ss:$8 sps:$4 sm:$0xff]   ;;  %v1958_v19 = vld [vmem:[%s2134_s22 + $0x344] ss:$8 sps:$4 sm:$0xff]   ;;  %v1953_v20 = vld [vmem:[%s2134_s22 + $0x240] ss:$8 sps:$4 sm:$0xff]  }
  0x2b   : > { %1268 = vmatprep.subr.bf16.mxu0 %v1877_v27  ;;  %1308 = vmatpush1.bf16.msra.mxu1 %v1876_v28  ;;  %v1961_v21 = vld [vmem:[%s2134_s22 + $0x234] ss:$8 sps:$4 sm:$0xff]   ;;  %v1956_v22 = vld [vmem:[%s2134_s22 + $0x340] ss:$8 sps:$4 sm:$0xff]   ;;  %v1959_v24 = vld [vmem:[%s2134_s22 + $0x230] ss:$8 sps:$4 sm:$0xff]  }
  0x2c   : > { %1309 = vmatprep.subr.bf16.mxu1 %v1880_v29  ;;  %v1964_v23 = vld [vmem:[%s2134_s22 + $0x334] ss:$8 sps:$4 sm:$0xff]   ;;  %v1967_v25 = vld [vmem:[%s2134_s22 + $0x224] ss:$8 sps:$4 sm:$0xff]   ;;  %v1962_v26 = vld [vmem:[%s2134_s22 + $0x330] ss:$8 sps:$4 sm:$0xff]  }
  0x2d   : > { %v1970_v27 = vld [vmem:[%s2134_s22 + $0x324] ss:$8 sps:$4 sm:$0xff]   ;;  %v1965_v28 = vld [vmem:[%s2134_s22 + $0x220] ss:$8 sps:$4 sm:$0xff]   ;;  %v1973_v29 = vld [vmem:[%s2134_s22 + $0x214] ss:$8 sps:$4 sm:$0xff]  }
  0x2e   : > { %1269 = vmatpush1.bf16.msra.mxu0 %v1879_v30  ;;  %v1968_v30 = vld [vmem:[%s2134_s22 + $0x320] ss:$8 sps:$4 sm:$0xff]   ;;  %v1986_v46 = vld [vmem:[%s2134_s22 + $0x3f0] ss:$8 sps:$4 sm:$0xff]  }
  0x2f   : > { %1270 = vmatprep.subr.bf16.mxu0 %v1883_v31  ;;  %1310 = vmatpush1.bf16.msra.mxu1 %v1882_v32  ;;  %v1976_v31 = vld [vmem:[%s2134_s22 + $0x314] ss:$8 sps:$4 sm:$0xff]   ;;  %v1989_v48 = vld [vmem:[%s2134_s22 + $0x2e0] ss:$8 sps:$4 sm:$0xff]   ;;  %v1995_v52 = vld [vmem:[%s2134_s22 + $0x2d0] ss:$8 sps:$4 sm:$0xff]  }
  0x30   : > { %1311 = vmatprep.subr.bf16.mxu1 %v1886_v33  ;;  %v2235_v32 = vld [vmem:[%s2183_s26 + $0x10] sm:$0xff]  ;;  %v1992_v50 = vld [vmem:[%s2134_s22 + $0x3e0] ss:$8 sps:$4 sm:$0xff]  }
  0x31   : > { %v1971_v33 = vld [vmem:[%s2134_s22 + $0x210] ss:$8 sps:$4 sm:$0xff]  }
  0x32   : > { %1271 = vmatpush2.bf16.msra.mxu0 %v1885_v34  ;;  %v1655_v34 = vcombine.high %v2235_v32, %v2235_v32 }
  0x33   : > { %1272 = vmatprep.subr.bf16.mxu0 %v1889_v35  ;;  %1312 = vmatpush2.bf16.msra.mxu1 %v1888_v36  ;;  %v2241_v35 = vld [vmem:[%s2183_s26 + $0x18] sm:$0xff]  ;;  %v1979_v36 = vld [vmem:[%s2134_s22 + $0x204] ss:$8 sps:$4 sm:$0xff]  }
  0x34   : > { %1313 = vmatprep.subr.bf16.mxu1 %v1892_v37  ;;  %v1657_v37 = vcombine.high %v2241_v35, %v2241_v35 }
  0x36   : > { %1273 = vmatpush2.bf16.msra.mxu0 %v1891_v38  ;;  %v1974_v38 = vld [vmem:[%s2134_s22 + $0x310] ss:$8 sps:$4 sm:$0xff]  }
  0x37   : > { %1274 = vmatprep.subr.bf16.mxu0 %v1895_v39  ;;  %1314 = vmatpush2.bf16.msra.mxu1 %v1894_v40  ;;  %v1982_v39 = vld [vmem:[%s2134_s22 + $0x304] ss:$8 sps:$4 sm:$0xff]   ;;  %v1977_v40 = vld [vmem:[%s2134_s22 + $0x200] ss:$8 sps:$4 sm:$0xff]  }
  0x38   : > { %1315 = vmatprep.subr.bf16.mxu1 %v1898_v41  ;;  %v1985_v41 = vld [vmem:[%s2134_s22 + $0x2f4] ss:$8 sps:$4 sm:$0xff]  }
  0x3a   : > { %1275 = vmatpush2.bf16.msra.mxu0 %v1897_v42  ;;  %v1980_v42 = vld [vmem:[%s2134_s22 + $0x300] ss:$8 sps:$4 sm:$0xff]  }
  0x3b   : > { %1276 = vmatprep.subr.bf16.mxu0 %v1901_v43  ;;  %1316 = vmatpush2.bf16.msra.mxu1 %v1900_v44  ;;  %v1988_v43 = vld [vmem:[%s2134_s22 + $0x3f4] ss:$8 sps:$4 sm:$0xff]   ;;  %v1983_v44 = vld [vmem:[%s2134_s22 + $0x2f0] ss:$8 sps:$4 sm:$0xff]  }
  0x3c   : > { %1317 = vmatprep.subr.bf16.mxu1 %v1904_v45  ;;  %v1991_v45 = vld [vmem:[%s2134_s22 + $0x2e4] ss:$8 sps:$4 sm:$0xff]  }
  0x3e   : > { %1277 = vmatpush2.bf16.msra.mxu0 %v1903_v47  ;;  %v1994_v47 = vld [vmem:[%s2134_s22 + $0x3e4] ss:$8 sps:$4 sm:$0xff]  }
  0x3f   : > { %1278 = vmatprep.subr.bf16.mxu0 %v1907_v49  ;;  %1318 = vmatpush2.bf16.msra.mxu1 %v1906_v51  ;;  %v1997_v49 = vld [vmem:[%s2134_s22 + $0x2d4] ss:$8 sps:$4 sm:$0xff]  }
  0x40   : > { %1319 = vmatprep.subr.bf16.mxu1 %v1910_v53  ;;  %v2000_v51 = vld [vmem:[%s2134_s22 + $0x3d4] ss:$8 sps:$4 sm:$0xff]   ;;  %v2003_v53 = vld [vmem:[%s2134_s22 + $0x2c4] ss:$8 sps:$4 sm:$0xff]  }
  0x42   : > { %1279 = vmatpush2.bf16.msra.mxu0 %v1909_v54  ;;  %v1998_v54 = vld [vmem:[%s2134_s22 + $0x3d0] ss:$8 sps:$4 sm:$0xff]  }
  0x43   : > { %1280 = vmatprep.subr.bf16.mxu0 %v1913_v55  ;;  %1320 = vmatpush2.bf16.msra.mxu1 %v1912_v56  ;;  %v2006_v55 = vld [vmem:[%s2134_s22 + $0x3c4] ss:$8 sps:$4 sm:$0xff]   ;;  %v2001_v56 = vld [vmem:[%s2134_s22 + $0x2c0] ss:$8 sps:$4 sm:$0xff]  }
  0x44   : > { %1321 = vmatprep.subr.bf16.mxu1 %v1916_v57  ;;  %v2009_v57 = vld [vmem:[%s2134_s22 + $0x2b4] ss:$8 sps:$4 sm:$0xff]  }
  0x46   : > { %1281 = vmatpush2.bf16.msra.mxu0 %v1915_v58  ;;  %v2004_v58 = vld [vmem:[%s2134_s22 + $0x3c0] ss:$8 sps:$4 sm:$0xff]  }
  0x47   : > { %1282 = vmatprep.subr.bf16.mxu0 %v1919_v59  ;;  %1322 = vmatpush2.bf16.msra.mxu1 %v1918_v60  ;;  %v2012_v59 = vld [vmem:[%s2134_s22 + $0x3b4] ss:$8 sps:$4 sm:$0xff]   ;;  %v2007_v60 = vld [vmem:[%s2134_s22 + $0x2b0] ss:$8 sps:$4 sm:$0xff]  }
  0x48   : > { %1323 = vmatprep.subr.bf16.mxu1 %v1922_v61  ;;  %v2015_v61 = vld [vmem:[%s2134_s22 + $0x2a4] ss:$8 sps:$4 sm:$0xff]  }
  0x4a   : > { %1283 = vmatpush2.bf16.msra.mxu0 %v1921_v62  ;;  %v2010_v62 = vld [vmem:[%s2134_s22 + $0x3b0] ss:$8 sps:$4 sm:$0xff]  }
  0x4b   : > { %1284 = vmatprep.subr.bf16.mxu0 %v1925_v63  ;;  %1324 = vmatpush2.bf16.msra.mxu1 %v1924_v0  ;;  %v2018_v63 = vld [vmem:[%s2134_s22 + $0x3a4] ss:$8 sps:$4 sm:$0xff]   ;;  %v2013_v0 = vld [vmem:[%s2134_s22 + $0x2a0] ss:$8 sps:$4 sm:$0xff]  }
  0x4c   : > { %1325 = vmatprep.subr.bf16.mxu1 %v1928_v1  ;;  %v2021_v1 = vld [vmem:[%s2134_s22 + $0x294] ss:$8 sps:$4 sm:$0xff]  }
  0x4e   : > { %1285 = vmatpush2.bf16.msra.mxu0 %v1927_v2  ;;  %v2016_v2 = vld [vmem:[%s2134_s22 + $0x3a0] ss:$8 sps:$4 sm:$0xff]  }
  0x4f   : > { %1336 = vmatprep.subr.bf16.mxu0 %v1935_v3  ;;  %1326 = vmatpush2.bf16.msra.mxu1 %v1932_v4  ;;  %v2024_v3 = vld [vmem:[%s2134_s22 + $0x394] ss:$8 sps:$4 sm:$0xff]   ;;  %v2019_v4 = vld [vmem:[%s2134_s22 + $0x290] ss:$8 sps:$4 sm:$0xff]  }
  0x50   : > { %1377 = vmatprep.subr.bf16.mxu1 %v1940_v6  ;;  %v2022_v6 = vld [vmem:[%s2134_s22 + $0x390] ss:$8 sps:$4 sm:$0xff]  }
  0x51   : > { %1287 = vmatmul.mubr.bf16.vlgmr.msra.gmra.mxu0 %v1650_v5  ;;  %v2027_v5 = vld [vmem:[%s2134_s22 + $0x284] ss:$8 sps:$4 sm:$0xff]  }
  0x52   : > { %1337 = vmatpush1.bf16.msra.mxu0 %v1933_v7  ;;  %1328 = vmatmul.mubr.bf16.vlgmr.msra.gmra.mxu1 %v1652_v8  ;;  %v2030_v7 = vld [vmem:[%s2134_s22 + $0x384] ss:$8 sps:$4 sm:$0xff]   ;;  %v2025_v8 = vld [vmem:[%s2134_s22 + $0x280] ss:$8 sps:$4 sm:$0xff]  }
  0x53   : > { %1338 = vmatprep.subr.bf16.mxu0 %v1943_v9  ;;  %1378 = vmatpush1.bf16.msra.mxu1 %v1938_v10  ;;  %v2035_v9 = vld [vmem:[%s2134_s22 + $0x474] ss:$8 sps:$4 sm:$0xff]   ;;  %v2028_v10 = vld [vmem:[%s2134_s22 + $0x380] ss:$8 sps:$4 sm:$0xff]  }
  0x54   : > { %1379 = vmatprep.subr.bf16.mxu1 %v1946_v11  ;;  %1368 = vmatprep.mubr.bf16.mxu0 %v1655_v34  ;;  %v1654_v11 = vcombine.low %v2235_v32, %v2235_v32 }
  0x55   : > { %1409 = vmatprep.mubr.bf16.mxu1 %v1657_v37 }
  0x56   : > { %1339 = vmatpush1.bf16.msra.mxu0 %v1941_v12  ;;  %v2033_v12 = vld [vmem:[%s2134_s22 + $0x470] ss:$8 sps:$4 sm:$0xff]  }
  0x57   : > { %1340 = vmatprep.subr.bf16.mxu0 %v1949_v13  ;;  %1380 = vmatpush1.bf16.msra.mxu1 %v1944_v14  ;;  %v1656_v13 = vcombine.low %v2241_v35, %v2241_v35  ;;  %v2040_v14 = vld [vmem:[%s2134_s22 + $0x464] ss:$8 sps:$4 sm:$0xff]  }
  0x58   : > { %1381 = vmatprep.subr.bf16.mxu1 %v1952_v15  ;;  %v2038_v15 = vld [vmem:[%s2134_s22 + $0x460] ss:$8 sps:$4 sm:$0xff]  }
  0x5a   : > { %1341 = vmatpush1.bf16.msra.mxu0 %v1947_v16  ;;  %v2084_v16 = vmov 0  }
  0x5b   : > { %1342 = vmatprep.subr.bf16.mxu0 %v1955_v17  ;;  %1382 = vmatpush1.bf16.msra.mxu1 %v1950_v18  ;;  %v2043_v17 = vld [vmem:[%s2134_s22 + $0x454] ss:$8 sps:$4 sm:$0xff]   ;;  %v2041_v18 = vld [vmem:[%s2134_s22 + $0x450] ss:$8 sps:$4 sm:$0xff]  }
  0x5c   : > { %1383 = vmatprep.subr.bf16.mxu1 %v1958_v19  ;;  %v2046_v19 = vld [vmem:[%s2134_s22 + $0x444] ss:$8 sps:$4 sm:$0xff]  }
  0x5e   : > { %1343 = vmatpush1.bf16.msra.mxu0 %v1953_v20  ;;  %v2044_v20 = vld [vmem:[%s2134_s22 + $0x440] ss:$8 sps:$4 sm:$0xff]  }
  0x5f   : > { %1344 = vmatprep.subr.bf16.mxu0 %v1961_v21  ;;  %1384 = vmatpush1.bf16.msra.mxu1 %v1956_v22  ;;  %v2049_v21 = vld [vmem:[%s2134_s22 + $0x434] ss:$8 sps:$4 sm:$0xff]   ;;  %v2047_v22 = vld [vmem:[%s2134_s22 + $0x430] ss:$8 sps:$4 sm:$0xff]  }
  0x60   : > { %1385 = vmatprep.subr.bf16.mxu1 %v1964_v23  ;;  %v2052_v23 = vld [vmem:[%s2134_s22 + $0x424] ss:$8 sps:$4 sm:$0xff]  }
  0x62   : > { %1345 = vmatpush1.bf16.msra.mxu0 %v1959_v24  ;;  %v2050_v24 = vld [vmem:[%s2134_s22 + $0x420] ss:$8 sps:$4 sm:$0xff]  }
  0x63   : > { %1346 = vmatprep.subr.bf16.mxu0 %v1967_v25  ;;  %1386 = vmatpush1.bf16.msra.mxu1 %v1962_v26  ;;  %v2055_v25 = vld [vmem:[%s2134_s22 + $0x414] ss:$8 sps:$4 sm:$0xff]   ;;  %v2053_v26 = vld [vmem:[%s2134_s22 + $0x410] ss:$8 sps:$4 sm:$0xff]  }
  0x64   : > { %1387 = vmatprep.subr.bf16.mxu1 %v1970_v27  ;;  %v2058_v27 = vld [vmem:[%s2134_s22 + $0x404] ss:$8 sps:$4 sm:$0xff]  }
  0x66   : > { %1347 = vmatpush1.bf16.msra.mxu0 %v1965_v28  ;;  %v2056_v28 = vld [vmem:[%s2134_s22 + $0x400] ss:$8 sps:$4 sm:$0xff]  }
  0x67   : > { %1348 = vmatprep.subr.bf16.mxu0 %v1973_v29  ;;  %1388 = vmatpush1.bf16.msra.mxu1 %v1968_v30  ;;  %v2059_v29 = vld [vmem:[%s2183_s26 + $0x20] ss:$0 sps:$4 sm:$0xff]   ;;  %v492_v30 = vlaneseq }
  0x68   : > { %1389 = vmatprep.subr.bf16.mxu1 %v1976_v31 }
  0x69   : > { %v493_v31 = vshrl.u32 %v492_v30, 7 }
  0x6a   : > { %1349 = vmatpush1.bf16.msra.mxu0 %v1971_v33  ;;  %v490_v33 = vld [vmem:[%s319_s30] sm:$0x3] }
  0x6b   : > { %1350 = vmatprep.subr.bf16.mxu0 %v1979_v36  ;;  %1390 = vmatpush1.bf16.msra.mxu1 %v1974_v38  ;;  %v494_v32 = vsub.s32 0, %v493_v31  ;;  %v498_v34 = vsub.s32 1, %v493_v31 }
  0x6c   : > { %1391 = vmatprep.subr.bf16.mxu1 %v1982_v39 }
  0x6d   : > { %v495_v35 = vrot.slane %v490_v33, %v494_v32  ;;  %v499_v36 = vrot.slane %v490_v33, %v498_v34 }
  0x6e   : > { %1351 = vmatpush1.bf16.msra.mxu0 %v1977_v40 }
  0x6f   : > { %1352 = vmatprep.subr.bf16.mxu0 %v1985_v41  ;;  %1392 = vmatpush1.bf16.msra.mxu1 %v1980_v42 }
  0x70   : > { %1393 = vmatprep.subr.bf16.mxu1 %v1988_v43 }
  0x72   : > { %1353 = vmatpush2.bf16.msra.mxu0 %v1983_v44 }
  0x73   : > { %1354 = vmatprep.subr.bf16.mxu0 %v1991_v45  ;;  %1394 = vmatpush2.bf16.msra.mxu1 %v1986_v46 }
  0x74   : > { %1395 = vmatprep.subr.bf16.mxu1 %v1994_v47 }
  0x76   : > { %1355 = vmatpush2.bf16.msra.mxu0 %v1989_v48 }
  0x77   : > { %1356 = vmatprep.subr.bf16.mxu0 %v1997_v49  ;;  %1396 = vmatpush2.bf16.msra.mxu1 %v1992_v50 }
  0x78   : > { %1397 = vmatprep.subr.bf16.mxu1 %v2000_v51 }
  0x7a   : > { %1357 = vmatpush2.bf16.msra.mxu0 %v1995_v52 }
  0x7b   : > { %1358 = vmatprep.subr.bf16.mxu0 %v2003_v53  ;;  %1398 = vmatpush2.bf16.msra.mxu1 %v1998_v54 }
  0x7c   : > { %1399 = vmatprep.subr.bf16.mxu1 %v2006_v55 }
  0x7e   : > { %1359 = vmatpush2.bf16.msra.mxu0 %v2001_v56 }
  0x7f   : > { %1360 = vmatprep.subr.bf16.mxu0 %v2009_v57  ;;  %1400 = vmatpush2.bf16.msra.mxu1 %v2004_v58  ;;  %v1459_v57 = vld [vmem:[%s2326_s3] sm:$0x3] }
  0x80   : > { %1401 = vmatprep.subr.bf16.mxu1 %v2012_v59  ;;  %vm1460_vm0 = vcmp.ne.f32.partialorder %v1459_v57, 0.0 }
  0x81   : > { %v1463_v58 = vsel %vm1460_vm0, 1, %v2084_v16 }
  0x82   : > { %1361 = vmatpush2.bf16.msra.mxu0 %v2007_v60 }
  0x83   : > { %1362 = vmatprep.subr.bf16.mxu0 %v2015_v61  ;;  %1402 = vmatpush2.bf16.msra.mxu1 %v2010_v62  ;;  %v1467_v61 = vrot.slane %v1463_v58, %v494_v32 }
  0x84   : > { %1403 = vmatprep.subr.bf16.mxu1 %v2018_v63  ;;  %v1471_v63 = vrot.slane %v1463_v58, %v498_v34 }
  0x85   : > { %vm1472_vm1 = vcmp.eq.s32.totalorder %v1467_v61, 1 }
  0x86   : > { %1363 = vmatpush2.bf16.msra.mxu0 %v2013_v0  ;;  %vm1473_vm2 = vcmp.eq.s32.totalorder %v1471_v63, 1 }
  0x87   : > { %1364 = vmatprep.subr.bf16.mxu0 %v2021_v1  ;;  %1404 = vmatpush2.bf16.msra.mxu1 %v2016_v2 }
  0x88   : > { %1405 = vmatprep.subr.bf16.mxu1 %v2024_v3 }
  0x8a   : > { %1365 = vmatpush2.bf16.msra.mxu0 %v2019_v4 }
  0x8b   : > { %1366 = vmatprep.subr.bf16.mxu0 %v2027_v5  ;;  %1406 = vmatpush2.bf16.msra.mxu1 %v2022_v6 }
  0x8c   : > { %1407 = vmatprep.subr.bf16.mxu1 %v2030_v7 }
  0x8e   : > { %1367 = vmatpush2.bf16.msra.mxu0 %v2025_v8 }
  0x8f   : > { %1418 = vmatprep.subr.bf16.mxu0 %v2035_v9  ;;  %1408 = vmatpush2.bf16.msra.mxu1 %v2028_v10 }
  0x91   : > { %1369 = vmatmul.mubr.bf16.vlgmr.msra.gmra.mxu0 %v1654_v11 }
  0x92   : > { %1419 = vmatpush1.bf16.msra.mxu0 %v2033_v12  ;;  %1450 = vmatprep.mubr.bf16.mxu0 %v2084_v16 }
  0x93   : > { %1410 = vmatmul.mubr.bf16.vlgmr.msra.gmra.mxu1 %v1656_v13  ;;  %1420 = vmatprep.subr.bf16.mxu0 %v2040_v14 }
  0x96   : > { %1421 = vmatpush1.bf16.msra.mxu0 %v2038_v15 }
  0x97   : > { %1422 = vmatprep.subr.bf16.mxu0 %v2043_v17 }
  0x9a   : > { %1423 = vmatpush1.bf16.msra.mxu0 %v2041_v18 }
  0x9b   : > { %1424 = vmatprep.subr.bf16.mxu0 %v2046_v19 }
  0x9e   : > { %1425 = vmatpush1.bf16.msra.mxu0 %v2044_v20 }
  0x9f   : > { %1426 = vmatprep.subr.bf16.mxu0 %v2049_v21 }
  0xa2   : > { %1427 = vmatpush1.bf16.msra.mxu0 %v2047_v22 }
  0xa3   : > { %1428 = vmatprep.subr.bf16.mxu0 %v2052_v23 }
  0xa6   : > { %1429 = vmatpush1.bf16.msra.mxu0 %v2050_v24 }
  0xa7   : > { %1430 = vmatprep.subr.bf16.mxu0 %v2055_v25 }
  0xaa   : > { %1431 = vmatpush1.bf16.msra.mxu0 %v2053_v26 }
  0xab   : > { %1432 = vmatprep.subr.bf16.mxu0 %v2058_v27 }
  0xae   : > { %1433 = vmatpush1.bf16.msra.mxu0 %v2056_v28 }
  0xb1   : > { %1451 = vmatmul.mubr.bf16.vlgmr.msra.gmra.mxu0 %v2059_v29 }
 0x111   : > { %v1288_v37 = vpop.f32.mrf.mxu0 }
 0x112   : > { %v1289_v38 = vadd.f32 %v1288_v37, %v495_v35  ;;  %v1329_v40 = vpop.f32.mrf.mxu1 }
 0x113   : > { %v1290_v39 = vpop.f32.mrf.mxu0 }
 0x114   : > { %v1291_v41 = vadd.f32 %v1290_v39, %v499_v36  ;;  %v1330_v42 = vadd.f32 %v1329_v40, %v1289_v38  ;;  %v1331_v44 = vpop.f32.mrf.mxu1 }
 0x115   : > { %v1292_v43 = vpop.f32.mrf.mxu0 }
 0x116   : > { %v1332_v45 = vadd.f32 %v1331_v44, %v1291_v41  ;;  %v1333_v47 = vpop.f32.mrf.mxu1 }
 0x117   : > { %v1293_v46 = vpop.f32.mrf.mxu0 }
 0x118   : > { %v1334_v48 = vpop.f32.mrf.mxu1 }
 0x151   : > { %v1370_v49 = vpop.f32.mrf.mxu0 }
 0x152   : > { %v1371_v59 = vadd.f32 %v1370_v49, %v1330_v42 }
 0x153   : > { %v1372_v50 = vpop.f32.mrf.mxu0  ;;  %v1411_v51 = vpop.f32.mrf.mxu1 }
 0x154   : > { %v1373_v60 = vadd.f32 %v1372_v50, %v1332_v45  ;;  %v1412_v62 = vadd.f32 %v1411_v51, %v1371_v59 }
 0x155   : > { %v1374_v52 = vpop.f32.mrf.mxu0  ;;  %v1413_v53 = vpop.f32.mrf.mxu1 }
 0x156   : > { %v1414_v1 = vadd.f32 %v1413_v53, %v1373_v60 }
 0x157   : > { %v1375_v54 = vpop.f32.mrf.mxu0  ;;  %v1415_v55 = vpop.f32.mrf.mxu1 }
 0x159   : > { %v1416_v56 = vpop.f32.mrf.mxu1 }
 0x171   : > { %v1452_v0 = vpop.f32.mrf.mxu0 }
 0x172   : > { %v1453_v2 = vadd.f32 %v1452_v0, %v1412_v62 }
 0x173   : > { %v1454_v3 = vpop.f32.mrf.mxu0 }
 0x174   : > { %v1461_v4 = vmax.f32 %v1453_v2, 0.0  ;;  %v1455_v5 = vadd.f32 %v1454_v3, %v1414_v1 }
 0x175   : > { %v1456_v6 = vpop.f32.mrf.mxu0 }
 0x176   : > { %v1474_v7 = vsel %vm1472_vm1, %v1461_v4, %v1453_v2  ;;  %v1462_v8 = vmax.f32 %v1455_v5, 0.0 }
 0x177   : > { %v1457_v9 = vpop.f32.mrf.mxu0 }
 0x178   : > { %v1475_v10 = vsel %vm1473_vm2, %v1462_v8, %v1455_v5 }
 0x179   : > { %v1807_v11 = vpack.c.bf16 %v1475_v10, %v1474_v7 }
 0x17b   : > { %1484 = vst [vmem:[%s338_s10] sm:$0xff] %v1807_v11 }
 0x17c PF: > { %s14_s17 = sadd.s32 1, %s2082_s17   ;;  %s2328_s15 = smov %s2078_s16 }
 0x17d   : > { %p11_p5 = scmp.ge.s32.totalorder %s14_s17, 4   ;;  %s2329_s16 = smov %s2331_s18 }
 0x17f   :  { %13 = sbr.rel (!%p11_p5) target bundleno = 2 (0x2), region = 75 }

// kernel: backbone_forward.15
= control target key start
LH: loop header
LB: loop body
LE: loop exit
PB: predicated region body
PF: predicated region fallthrough
CT: control target
= control target key end

     0   :  { %s1678_s15 = smov 0   ;;  %s1680_s16 = smov 0   ;;  %s1807_s0 = inlined_call_operand.vmem [shape: bf16[2,8,1152], index: 0, kind: input, shape index: {}]   ;;  %s1808_s1 = inlined_call_operand.vmem [shape: bf16[2,1152,128], index: 1, kind: input, shape index: {}]   ;;  %s1809_s2 = inlined_call_operand.vmem [shape: f32[2,1,128], index: 2, kind: input, shape index: {}]   ;;  %s1810_s3 = inlined_call_operand.vmem [shape: bf16[2,8,128], index: 3, kind: input, shape index: {}]   ;;  %s1811_s4 = inlined_call_operand.vmem [shape: bf16[2,8,128], index: 4, kind: output, shape index: {}]  }
   0x1   :  { %s1682_s17 = smov 0  }
   0x2 LB: > { %s33_s18 = sadd.s32 1, %s1645_s16  ;;  %p1312_p0 = scmp.ge.s32.totalorder %s1649_s17, 1  ;;  %s1649_s17 = sphi %s1682_s17, %s14_s17   ;;  %s1645_s16 = sphi %s1680_s16, %s1813_s16   ;;  %s1641_s15 = sphi %s1678_s15, %s1812_s15  }
   0x3   : > { %p35_p1 = scmp.ge.s32.totalorder %s33_s18, 2  ;;  %p238_p2 = scmp.lt.s32.totalorder %s1649_s17, 3 }
   0x5   : > { %s1815_s18 = smov (%p35_p1, %s33_s18), 0  ;;  %p239_p3 = pnand %p1312_p0, %p238_p2 }
   0x6   : > { %p297_p4 = scmp.lt.s32.totalorder (!%p239_p3), %s1641_s15, 1 }
   0x7   : > { %242 = sbr.rel (%p239_p3) target bundleno = 315 (0x13b), region = 36 }
   0xc   : > { %s1817_s15 = smov (!%p297_p4, %s1641_s15), 1  ;;  %vm1652_vm0 = vmmov 0  }
   0xd   : > { %s1519_s19 = smul.u32 576, %s1817_s15  ;;  %s319_s29 = scalar_lea.vmem %s1809_s2, %s1817_s15 }
   0xe   : > { %s1518_s23 = smul.u32 36, %s1817_s15  ;;  %s1315_s30 = sshll.u32 %s1817_s15, 2 }
   0xf   : > { %s1702_s22 = scalar_lea.vmem %s1808_s1, %s1519_s19  ;;  %s329_s7 = scalar_lea.vmem %s1810_s3, %s1315_s30 }
  0x10   : > { %v1546_v0 = vld [vmem:[%s1702_s22 + $0x78] sm:$0xff]   ;;  %v1550_v4 = vld [vmem:[%s1702_s22 + $0x70] sm:$0xff]   ;;  %v1554_v8 = vld [vmem:[%s1702_s22 + $0x68] sm:$0xff]   ;;  %s1737_s26 = scalar_lea.vmem %s1807_s0, %s1518_s23  ;;  %s339_s10 = scalar_lea.vmem %s1811_s4, %s1315_s30 }
  0x11   : > { %v1547_v1 = vld [vmem:[%s1702_s22 + $0x38] sm:$0xff]   ;;  %1401 = vmatprep.subr.bf16.mxu0 %v1546_v0  ;;  %v1551_v5 = vld [vmem:[%s1702_s22 + $0x30] sm:$0xff]   ;;  %v1555_v9 = vld [vmem:[%s1702_s22 + $0x28] sm:$0xff]  }
  0x12   : > { %v1548_v2 = vld [vmem:[%s1702_s22 + $0xf8] sm:$0xff]   ;;  %1402 = vmatpush3.bf16.msra.mxu0 %v1547_v1  ;;  %v1552_v6 = vld [vmem:[%s1702_s22 + $0xf0] sm:$0xff]   ;;  %v1556_v10 = vld [vmem:[%s1702_s22 + $0xe8] sm:$0xff]  }
  0x13   : > { %v1549_v3 = vld [vmem:[%s1702_s22 + $0xb8] sm:$0xff]   ;;  %1423 = vmatprep.subr.bf16.mxu1 %v1548_v2  ;;  %1403 = vmatprep.subr.bf16.mxu0 %v1550_v4  ;;  %v1553_v7 = vld [vmem:[%s1702_s22 + $0xb0] sm:$0xff]   ;;  %v1557_v11 = vld [vmem:[%s1702_s22 + $0xa8] sm:$0xff]  }
  0x14   : > { %1424 = vmatpush3.bf16.msra.mxu1 %v1549_v3  ;;  %v1558_v12 = vld [vmem:[%s1702_s22 + $0x60] sm:$0xff]   ;;  %v1562_v16 = vld [vmem:[%s1702_s22 + $0x58] sm:$0xff]   ;;  %v1566_v20 = vld [vmem:[%s1702_s22 + $0x50] sm:$0xff]  }
  0x15   : > { %1425 = vmatprep.subr.bf16.mxu1 %v1552_v6  ;;  %v1559_v13 = vld [vmem:[%s1702_s22 + $0x20] sm:$0xff]   ;;  %v1563_v17 = vld [vmem:[%s1702_s22 + $0x18] sm:$0xff]   ;;  %v1567_v21 = vld [vmem:[%s1702_s22 + $0x10] sm:$0xff]  }
  0x16   : > { %1404 = vmatpush3.bf16.msra.mxu0 %v1551_v5  ;;  %v1560_v14 = vld [vmem:[%s1702_s22 + $0xe0] sm:$0xff]   ;;  %v1564_v18 = vld [vmem:[%s1702_s22 + $0xd8] sm:$0xff]   ;;  %v1568_v22 = vld [vmem:[%s1702_s22 + $0xd0] sm:$0xff]  }
  0x17   : > { %1405 = vmatprep.subr.bf16.mxu0 %v1554_v8  ;;  %v1561_v15 = vld [vmem:[%s1702_s22 + $0xa0] sm:$0xff]   ;;  %v1565_v19 = vld [vmem:[%s1702_s22 + $0x98] sm:$0xff]   ;;  %v1569_v23 = vld [vmem:[%s1702_s22 + $0x90] sm:$0xff]  }
  0x18   : > { %1426 = vmatpush3.bf16.msra.mxu1 %v1553_v7  ;;  %v1570_v24 = vld [vmem:[%s1702_s22 + $0x48] sm:$0xff]   ;;  %v1574_v28 = vld [vmem:[%s1702_s22 + $0x40] sm:$0xff]   ;;  %v1580_v35 = vld [vmem:[%s1702_s22 + $0x178] sm:$0xff]  }
  0x19   : > { %1427 = vmatprep.subr.bf16.mxu1 %v1556_v10  ;;  %v1571_v25 = vld [vmem:[%s1702_s22 + $0x8] sm:$0xff]   ;;  %v1575_v29 = vld [vmem:[%s1702_s22] sm:$0xff]   ;;  %v1583_v39 = vld [vmem:[%s1702_s22 + $0x138] sm:$0xff]  }
  0x1a   : > { %1406 = vmatpush3.bf16.msra.mxu0 %v1555_v9  ;;  %v1572_v26 = vld [vmem:[%s1702_s22 + $0xc8] sm:$0xff]   ;;  %v1576_v30 = vld [vmem:[%s1702_s22 + $0xc0] sm:$0xff]   ;;  %v1584_v40 = vld [vmem:[%s1702_s22 + $0x1f8] sm:$0xff]   ;;  %v1651_v9 = vmov 0.0  }
  0x1b   : > { %1407 = vmatprep.subr.bf16.mxu0 %v1558_v12  ;;  %v1573_v27 = vld [vmem:[%s1702_s22 + $0x88] sm:$0xff]   ;;  %v341_v31 = vld [vmem:[%s1737_s26] sm:$0xff]  ;;  %v1585_v41 = vld [vmem:[%s1702_s22 + $0x1b8] sm:$0xff]  }
  0x1c   : > { %1428 = vmatpush3.bf16.msra.mxu1 %v1557_v11  ;;  %v1318_v32 = vcombine.low %v341_v31, %v341_v31  ;;  %v1319_v33 = vcombine.high %v341_v31, %v341_v31  ;;  %v1579_v34 = vld [vmem:[%s1702_s22 + $0x80] sm:$0xff]   ;;  %v342_v36 = vld [vmem:[%s1737_s26 + $0x8] sm:$0xff]  ;;  %v1586_v42 = vld [vmem:[%s1702_s22 + $0x170] sm:$0xff]  }
  0x1d   : > { %1429 = vmatprep.subr.bf16.mxu1 %v1560_v14  ;;  %v1320_v37 = vcombine.low %v342_v36, %v342_v36  ;;  %v1321_v38 = vcombine.high %v342_v36, %v342_v36  ;;  %v1587_v43 = vld [vmem:[%s1702_s22 + $0x130] sm:$0xff]   ;;  %v1590_v46 = vld [vmem:[%s1702_s22 + $0x168] sm:$0xff]   ;;  %v1594_v50 = vld [vmem:[%s1702_s22 + $0x160] sm:$0xff]  }
  0x1e   : > { %1408 = vmatpush3.bf16.msra.mxu0 %v1559_v13  ;;  %993 = vmatprep.mubr.bf16.mxu0 %v1319_v33  ;;  %v1588_v44 = vld [vmem:[%s1702_s22 + $0x1f0] sm:$0xff]   ;;  %v1591_v47 = vld [vmem:[%s1702_s22 + $0x128] sm:$0xff]   ;;  %v1595_v51 = vld [vmem:[%s1702_s22 + $0x120] sm:$0xff]  }
  0x1f   : > { %1409 = vmatprep.subr.bf16.mxu0 %v1562_v16  ;;  %1033 = vmatprep.mubr.bf16.mxu1 %v1321_v38  ;;  %v1589_v45 = vld [vmem:[%s1702_s22 + $0x1b0] sm:$0xff]   ;;  %v1592_v48 = vld [vmem:[%s1702_s22 + $0x1e8] sm:$0xff]   ;;  %v1596_v52 = vld [vmem:[%s1702_s22 + $0x1e0] sm:$0xff]  }
  0x20   : > { %1430 = vmatpush3.bf16.msra.mxu1 %v1561_v15  ;;  %v1593_v49 = vld [vmem:[%s1702_s22 + $0x1a8] sm:$0xff]   ;;  %v1597_v53 = vld [vmem:[%s1702_s22 + $0x1a0] sm:$0xff]   ;;  %v1598_v54 = vld [vmem:[%s1702_s22 + $0x158] sm:$0xff]  }
  0x21   : > { %1431 = vmatprep.subr.bf16.mxu1 %v1564_v18  ;;  %v1599_v55 = vld [vmem:[%s1702_s22 + $0x118] sm:$0xff]   ;;  %v1602_v58 = vld [vmem:[%s1702_s22 + $0x150] sm:$0xff]   ;;  %v1606_v62 = vld [vmem:[%s1702_s22 + $0x148] sm:$0xff]  }
  0x22   : > { %1410 = vmatpush3.bf16.msra.mxu0 %v1563_v17  ;;  %v1600_v56 = vld [vmem:[%s1702_s22 + $0x1d8] sm:$0xff]   ;;  %v1603_v59 = vld [vmem:[%s1702_s22 + $0x110] sm:$0xff]   ;;  %v1607_v63 = vld [vmem:[%s1702_s22 + $0x108] sm:$0xff]  }
  0x23   : > { %1411 = vmatprep.subr.bf16.mxu0 %v1566_v20  ;;  %v1601_v57 = vld [vmem:[%s1702_s22 + $0x198] sm:$0xff]   ;;  %v1604_v60 = vld [vmem:[%s1702_s22 + $0x1d0] sm:$0xff]   ;;  %v1608_v0 = vld [vmem:[%s1702_s22 + $0x1c8] sm:$0xff]  }
  0x24   : > { %1432 = vmatpush3.bf16.msra.mxu1 %v1565_v19  ;;  %v1605_v61 = vld [vmem:[%s1702_s22 + $0x190] sm:$0xff]   ;;  %v1609_v1 = vld [vmem:[%s1702_s22 + $0x188] sm:$0xff]   ;;  %v1610_v2 = vld [vmem:[%s1702_s22 + $0x140] sm:$0xff]  }
  0x25   : > { %1433 = vmatprep.subr.bf16.mxu1 %v1568_v22  ;;  %v1611_v3 = vld [vmem:[%s1702_s22 + $0x100] sm:$0xff]   ;;  %v343_v5 = vld [vmem:[%s1737_s26 + $0x10] sm:$0xff]  ;;  %v344_v10 = vld [vmem:[%s1737_s26 + $0x18] sm:$0xff] }
  0x26   : > { %1412 = vmatpush3.bf16.msra.mxu0 %v1567_v21  ;;  %v1612_v4 = vld [vmem:[%s1702_s22 + $0x1c0] sm:$0xff]   ;;  %v1322_v6 = vcombine.low %v343_v5, %v343_v5  ;;  %v1323_v7 = vcombine.high %v343_v5, %v343_v5  ;;  %v1324_v11 = vcombine.low %v344_v10, %v344_v10  ;;  %v1325_v12 = vcombine.high %v344_v10, %v344_v10  ;;  %v1618_v13 = vld [vmem:[%s1702_s22 + $0x238] sm:$0xff]   ;;  %v1619_v14 = vld [vmem:[%s1702_s22 + $0x230] sm:$0xff]  }
  0x27   : > { %1413 = vmatprep.subr.bf16.mxu0 %v1570_v24  ;;  %v1615_v8 = vld [vmem:[%s1702_s22 + $0x180] sm:$0xff]   ;;  %v1620_v15 = vld [vmem:[%s1702_s22 + $0x228] sm:$0xff]   ;;  %v1622_v17 = vld [vmem:[%s1702_s22 + $0x218] sm:$0xff]  }
  0x28   : > { %1434 = vmatpush3.bf16.msra.mxu1 %v1569_v23  ;;  %v1621_v16 = vld [vmem:[%s1702_s22 + $0x220] sm:$0xff]   ;;  %v1623_v18 = vld [vmem:[%s1702_s22 + $0x210] sm:$0xff]   ;;  %v1624_v19 = vld [vmem:[%s1702_s22 + $0x208] sm:$0xff]  }
  0x29   : > { %1435 = vmatprep.subr.bf16.mxu1 %v1572_v26  ;;  %v1625_v20 = vld [vmem:[%s1702_s22 + $0x200] sm:$0xff]  }
  0x2a   : > { %1414 = vmatpush3.bf16.msra.mxu0 %v1571_v25  ;;  %v1626_v21 = vld [vmem:[%s1737_s26 + $0x20] ss:$0 sps:$4 sm:$0xff]  }
  0x2b   : > { %1415 = vmatprep.subr.bf16.mxu0 %v1574_v28 }
  0x2c   : > { %1436 = vmatpush3.bf16.msra.mxu1 %v1573_v27 }
  0x2d   : > { %1437 = vmatprep.subr.bf16.mxu1 %v1576_v30 }
  0x2e   : > { %1416 = vmatpush3.bf16.msra.mxu0 %v1575_v29 }
  0x2f   : > { %1445 = vmatprep.subr.bf16.mxu0 %v1580_v35 }
  0x30   : > { %1438 = vmatpush3.bf16.msra.mxu1 %v1579_v34 }
  0x31   : > { %994 = vmatmul.mubr.bf16.vlgmr.msra.gmra.mxu0 %v1318_v32  ;;  %1467 = vmatprep.subr.bf16.mxu1 %v1584_v40 }
  0x32   : > { %1446 = vmatpush3.bf16.msra.mxu0 %v1583_v39  ;;  %1073 = vmatprep.mubr.bf16.mxu0 %v1323_v7  ;;  %v1317_v39 = vld [vmem:[%s319_s29] ss:$0 sm:$0xff] }
  0x33   : > { %1034 = vmatmul.mubr.bf16.vlgmr.msra.gmra.mxu1 %v1320_v37  ;;  %1447 = vmatprep.subr.bf16.mxu0 %v1586_v42 }
  0x34   : > { %1468 = vmatpush3.bf16.msra.mxu1 %v1585_v41  ;;  %1113 = vmatprep.mubr.bf16.mxu1 %v1325_v12 }
  0x35   : > { %1469 = vmatprep.subr.bf16.mxu1 %v1588_v44 }
  0x36   : > { %1448 = vmatpush3.bf16.msra.mxu0 %v1587_v43 }
  0x37   : > { %1449 = vmatprep.subr.bf16.mxu0 %v1590_v46  ;;  %v1161_v46 = vld [vmem:[%s329_s7] sm:$0xf] }
  0x38   : > { %1470 = vmatpush3.bf16.msra.mxu1 %v1589_v45 }
  0x39   : > { %1471 = vmatprep.subr.bf16.mxu1 %v1592_v48  ;;  %v1162_v48 = vunpack.c.l.bf16 %v1161_v46 }
  0x3a   : > { %1450 = vmatpush3.bf16.msra.mxu0 %v1591_v47 }
  0x3b   : > { %1451 = vmatprep.subr.bf16.mxu0 %v1594_v50 }
  0x3c   : > { %1472 = vmatpush3.bf16.msra.mxu1 %v1593_v49 }
  0x3d   : > { %1473 = vmatprep.subr.bf16.mxu1 %v1596_v52 }
  0x3e   : > { %1452 = vmatpush3.bf16.msra.mxu0 %v1595_v51 }
  0x3f   : > { %1453 = vmatprep.subr.bf16.mxu0 %v1598_v54 }
  0x40   : > { %1474 = vmatpush3.bf16.msra.mxu1 %v1597_v53 }
  0x41   : > { %1475 = vmatprep.subr.bf16.mxu1 %v1600_v56 }
  0x42   : > { %1454 = vmatpush3.bf16.msra.mxu0 %v1599_v55 }
  0x43   : > { %1455 = vmatprep.subr.bf16.mxu0 %v1602_v58 }
  0x44   : > { %1476 = vmatpush3.bf16.msra.mxu1 %v1601_v57 }
  0x45   : > { %1477 = vmatprep.subr.bf16.mxu1 %v1604_v60 }
  0x46   : > { %1456 = vmatpush3.bf16.msra.mxu0 %v1603_v59 }
  0x47   : > { %1457 = vmatprep.subr.bf16.mxu0 %v1606_v62 }
  0x48   : > { %1478 = vmatpush3.bf16.msra.mxu1 %v1605_v61 }
  0x49   : > { %1479 = vmatprep.subr.bf16.mxu1 %v1608_v0 }
  0x4a   : > { %1458 = vmatpush3.bf16.msra.mxu0 %v1607_v63 }
  0x4b   : > { %1459 = vmatprep.subr.bf16.mxu0 %v1610_v2 }
  0x4c   : > { %1480 = vmatpush3.bf16.msra.mxu1 %v1609_v1 }
  0x4d   : > { %1481 = vmatprep.subr.bf16.mxu1 %v1612_v4 }
  0x4e   : > { %1460 = vmatpush3.bf16.msra.mxu0 %v1611_v3 }
  0x4f   : > { %1498 = vmatprep.subr.bf16.mxu0 %v1651_v9 }
  0x50   : > { %1482 = vmatpush3.bf16.msra.mxu1 %v1615_v8 }
  0x51   : > { %1074 = vmatmul.mubr.bf16.vlgmr.msra.gmra.mxu0 %v1322_v6 }
  0x52   : > { %1499 = vmatpush3.bf16.msra.mxu0 %v1618_v13  ;;  %1514 = vmatprep.mubr.msk.bf16.mxu0 %vm1652_vm0, %v1651_v9 }
  0x53   : > { %1114 = vmatmul.mubr.bf16.vlgmr.msra.gmra.mxu1 %v1324_v11  ;;  %1500 = vmatprep.subr.bf16.mxu0 %v1651_v9 }
  0x56   : > { %1501 = vmatpush3.bf16.msra.mxu0 %v1619_v14 }
  0x57   : > { %1502 = vmatprep.subr.bf16.mxu0 %v1651_v9 }
  0x5a   : > { %1503 = vmatpush3.bf16.msra.mxu0 %v1620_v15 }
  0x5b   : > { %1504 = vmatprep.subr.bf16.mxu0 %v1651_v9 }
  0x5e   : > { %1505 = vmatpush3.bf16.msra.mxu0 %v1621_v16 }
  0x5f   : > { %1506 = vmatprep.subr.bf16.mxu0 %v1651_v9 }
  0x62   : > { %1507 = vmatpush3.bf16.msra.mxu0 %v1622_v17 }
  0x63   : > { %1508 = vmatprep.subr.bf16.mxu0 %v1651_v9 }
  0x66   : > { %1509 = vmatpush3.bf16.msra.mxu0 %v1623_v18 }
  0x67   : > { %1510 = vmatprep.subr.bf16.mxu0 %v1651_v9 }
  0x6a   : > { %1511 = vmatpush3.bf16.msra.mxu0 %v1624_v19 }
  0x6b   : > { %1512 = vmatprep.subr.bf16.mxu0 %v1651_v9 }
  0x6e   : > { %1513 = vmatpush3.bf16.msra.mxu0 %v1625_v20 }
  0x71   : > { %1515 = vmatmul.mubr.bf16.vlgmr.msra.gmra.mxu0 %v1626_v21 }
  0xf1   : > { %v1417_v22 = vpop.f32.mrf.mxu0 }
  0xf3   : > { %v1418_v23 = vpop.f32.mrf.mxu0  ;;  %v1439_v24 = vpop.f32.mrf.mxu1 }
  0xf4   : > { %v1419_v38 = vadd.f32 %v1418_v23, %v1417_v22 }
  0xf5   : > { %v1420_v25 = vpop.f32.mrf.mxu0  ;;  %v1440_v26 = vpop.f32.mrf.mxu1 }
  0xf6   : > { %v996_v40 = vadd.f32 %v1419_v38, %v1317_v39  ;;  %v1441_v41 = vadd.f32 %v1440_v26, %v1439_v24 }
  0xf7   : > { %v1421_v27 = vpop.f32.mrf.mxu0  ;;  %v1442_v28 = vpop.f32.mrf.mxu1 }
  0xf8   : > { %v1036_v43 = vadd.f32 %v1441_v41, %v996_v40 }
  0xf9   : > { %v1443_v29 = vpop.f32.mrf.mxu1 }
 0x111   : > { %v1461_v30 = vpop.f32.mrf.mxu0 }
 0x113   : > { %v1462_v31 = vpop.f32.mrf.mxu0  ;;  %v1483_v32 = vpop.f32.mrf.mxu1 }
 0x114   : > { %v1463_v42 = vadd.f32 %v1462_v31, %v1461_v30 }
 0x115   : > { %v1464_v33 = vpop.f32.mrf.mxu0  ;;  %v1484_v34 = vpop.f32.mrf.mxu1 }
 0x116   : > { %v1076_v44 = vadd.f32 %v1463_v42, %v1036_v43  ;;  %v1485_v45 = vadd.f32 %v1484_v34, %v1483_v32 }
 0x117   : > { %v1465_v35 = vpop.f32.mrf.mxu0  ;;  %v1486_v36 = vpop.f32.mrf.mxu1 }
 0x118   : > { %v1116_v47 = vadd.f32 %v1485_v45, %v1076_v44 }
 0x119   : > { %v1487_v37 = vpop.f32.mrf.mxu1 }
 0x131   : > { %v1155_v49 = vpop.f32.mrf.mxu0 }
 0x132   : > { %v1156_v50 = vadd.f32 %v1155_v49, %v1116_v47 }
 0x133   : > { %v1516_v51 = vpop.f32.mrf.mxu0 }
 0x134   : > { %v1163_v52 = vadd.f32 %v1162_v48, %v1156_v50 }
 0x135   : > { %v1158_v53 = vpop.f32.mrf.mxu0 }
 0x136   : > { %v1164_v54 = vmax.f32 %v1163_v52, 0.0 }
 0x137   : > { %v1517_v55 = vpop.f32.mrf.mxu0 }
 0x138   : > { %v1165_v56 = vpack.c.bf16 %v1164_v54, %v1164_v54 }
 0x13a   : > { %1166 = vst [vmem:[%s339_s10] sm:$0xf] %v1165_v56 }
 0x13b PF: > { %s14_s17 = sadd.s32 1, %s1649_s17   ;;  %s1812_s15 = smov %s1645_s16 }
 0x13c   : > { %p11_p5 = scmp.ge.s32.totalorder %s14_s17, 4   ;;  %s1813_s16 = smov %s1815_s18 }
 0x13e   :  { %13 = sbr.rel (!%p11_p5) target bundleno = 2 (0x2), region = 75 }

</bundles_post_ra>
